<compile_context>
chip_gen: v6e
topology: v6e:2x2x1
jax: 0.10.0
libtpu: 0.0.40
codegen_flags: <defaults>
</compile_context>

<pallas_src>
import functools

import numpy as np
import jax
import jax.numpy as jnp
from jax.experimental import pallas as pl
from jax.experimental.pallas import tpu as pltpu


def _round_up(a, b):
    return (a + b - 1) // b * b


# ----------------------------------------------------------------------------
# Kernel 1: row-tiled QKV projection  (M, C) @ (C, 3C) -> (M, 3C)
# ----------------------------------------------------------------------------
def _qkv_kernel(x_ref, w_ref, o_ref):
    o_ref[...] = jnp.dot(x_ref[...], w_ref[...],
                         preferred_element_type=jnp.float32).astype(o_ref.dtype)


def qkv_linear(x, w_t, *, tm):
    M, C = x.shape
    C3 = w_t.shape[1]
    return pl.pallas_call(
        _qkv_kernel,
        out_shape=jax.ShapeDtypeStruct((M, C3), jnp.float32),
        grid_spec=pltpu.PrefetchScalarGridSpec(
            num_scalar_prefetch=0,
            grid=(M // tm,),
            in_specs=[
                pl.BlockSpec((tm, C), lambda i: (i, 0)),
                pl.BlockSpec((C, C3), lambda i: (0, 0)),   # weight resident
            ],
            out_specs=pl.BlockSpec((tm, C3), lambda i: (i, 0)),
        ),
        compiler_params=pltpu.CompilerParams(
            dimension_semantics=("parallel",)),
    )(x, w_t)


# ----------------------------------------------------------------------------
# Kernel 2: fused cross-attention + projection + residual + stream sum
# ----------------------------------------------------------------------------
def _cross_attn_kernel(q_img_ref, k_img_ref, v_img_ref,
                       q_rep_ref, k_rep_ref, v_rep_ref,
                       img_ref, rep_ref, wp_ref, bp_ref, o_ref,
                       *, num_heads, scale):
    img = img_ref[0]                                   # (TQ, C) f32
    rep = rep_ref[0]
    tq, c = img.shape
    dh = c // num_heads

    def head_attend(q, k, v, wp_h):
        # q: (TQ, Dh)   k, v: (N_kv, Dh)   wp_h: (Dh, C)
        s = jax.lax.dot_general(q, k, (((1,), (1,)), ((), ())),
                                preferred_element_type=jnp.float32) * scale
        m = jnp.max(s, axis=-1, keepdims=True)
        p = jnp.exp(s - m)
        p = p / jnp.sum(p, axis=-1, keepdims=True)
        o = jnp.dot(p, v, preferred_element_type=jnp.float32)        # (TQ, Dh)
        # fold the head-merge + output projection into the accumulation:
        return jnp.dot(o, wp_h, preferred_element_type=jnp.float32)  # (TQ, C)

    acc_i = jnp.zeros((tq, c), jnp.float32)
    acc_r = jnp.zeros((tq, c), jnp.float32)
    for h in range(num_heads):                         # small static unroll
        wp_h = wp_ref[h * dh:(h + 1) * dh, :]          # rows of W_proj^T
        acc_i = acc_i + head_attend(q_img_ref[0, h], k_rep_ref[0, h],
                                    v_rep_ref[0, h], wp_h)
        acc_r = acc_r + head_attend(q_rep_ref[0, h], k_img_ref[0, h],
                                    v_img_ref[0, h], wp_h)

    bp = bp_ref[...]                                   # (1, C) broadcast
    proj_i = acc_i + bp
    proj_r = acc_r + bp
    # (image + image*proj_i) + (report + report*proj_r)
    out = img * (1.0 + proj_i) + rep * (1.0 + proj_r)
    o_ref[0] = out.astype(o_ref.dtype)


def cross_attention_fused(q_img, k_img, v_img, q_rep, k_rep, v_rep,
                          image_p, report_p, wp_t, bp,
                          *, num_heads, scale, tq):
    B, H, Nq, Dh = q_img.shape
    N_kv_img = k_img.shape[2]
    N_kv_rep = k_rep.shape[2]
    C = image_p.shape[-1]
    kern = functools.partial(_cross_attn_kernel,
                             num_heads=num_heads, scale=scale)
    return pl.pallas_call(
        kern,
        out_shape=jax.ShapeDtypeStruct((B, Nq, C), jnp.float32),
        grid_spec=pltpu.PrefetchScalarGridSpec(
            num_scalar_prefetch=0,
            grid=(B, Nq // tq),
            in_specs=[
                pl.BlockSpec((1, H, tq, Dh), lambda b, qi: (b, 0, qi, 0)),
                pl.BlockSpec((1, H, N_kv_img, Dh), lambda b, qi: (b, 0, 0, 0)),
                pl.BlockSpec((1, H, N_kv_img, Dh), lambda b, qi: (b, 0, 0, 0)),
                pl.BlockSpec((1, H, tq, Dh), lambda b, qi: (b, 0, qi, 0)),
                pl.BlockSpec((1, H, N_kv_rep, Dh), lambda b, qi: (b, 0, 0, 0)),
                pl.BlockSpec((1, H, N_kv_rep, Dh), lambda b, qi: (b, 0, 0, 0)),
                pl.BlockSpec((1, tq, C), lambda b, qi: (b, qi, 0)),
                pl.BlockSpec((1, tq, C), lambda b, qi: (b, qi, 0)),
                pl.BlockSpec((C, C), lambda b, qi: (0, 0)),    # W_proj^T resident
                pl.BlockSpec((1, C), lambda b, qi: (0, 0)),
            ],
            out_specs=pl.BlockSpec((1, tq, C), lambda b, qi: (b, qi, 0)),
        ),
        compiler_params=pltpu.CompilerParams(
            dimension_semantics=("parallel", "parallel")),
    )(q_img, k_img, v_img, q_rep, k_rep, v_rep, image_p, report_p, wp_t, bp)


# ----------------------------------------------------------------------------
# Python wrapper (layout plumbing only; hot path is inside the two kernels)
# ----------------------------------------------------------------------------
@functools.partial(jax.jit, static_argnames=("num_heads",))
def mi_attention(image, report, w_qkv, w_proj, b_proj, *, num_heads):
    B, N_img, C = image.shape
    _, N_rep, _ = report.shape
    H = num_heads
    Dh = C // H
    scale = float(Dh) ** -0.5

    # ---- QKV projection for both streams (kernel 1), rows tiled by TM ----
    x = jnp.concatenate([image.reshape(B * N_img, C),
                         report.reshape(B * N_rep, C)], axis=0)
    TM = 256
    M = x.shape[0]
    M_pad = _round_up(M, TM)
    x_p = jnp.pad(x, ((0, M_pad - M), (0, 0)))
    qkv = qkv_linear(x_p, jnp.transpose(w_qkv), tm=TM)[:M]      # (M, 3C)

    def split_heads(qkv_x, n):
        t = qkv_x.reshape(B, n, 3, H, Dh)
        t = jnp.transpose(t, (2, 0, 3, 1, 4))                   # (3, B, H, n, Dh)
        return t[0], t[1], t[2]

    q_i, k_i, v_i = split_heads(qkv[:B * N_img], N_img)
    q_r, k_r, v_r = split_heads(qkv[B * N_img:], N_rep)

    # Final `image + report` add in the module requires equal sequence lengths.
    assert N_img == N_rep
    # Tile only query / residual rows; KV stays un-padded so the softmax is exact.
    TQ = min(128, _round_up(N_img, 8))
    N_pad = _round_up(N_img, TQ)
    pad_n = N_pad - N_img
    q_i = jnp.pad(q_i, ((0, 0), (0, 0), (0, pad_n), (0, 0)))
    q_r = jnp.pad(q_r, ((0, 0), (0, 0), (0, pad_n), (0, 0)))
    image_p = jnp.pad(image, ((0, 0), (0, pad_n), (0, 0)))
    report_p = jnp.pad(report, ((0, 0), (0, pad_n), (0, 0)))

    out = cross_attention_fused(
        q_i, k_i, v_i, q_r, k_r, v_r, image_p, report_p,
        jnp.transpose(w_proj), b_proj.reshape(1, C),
        num_heads=H, scale=scale, tq=TQ)
    return out[:, :N_img, :]


# ----------------------------------------------------------------------------
# Pure-JAX reference (mirrors the PyTorch forward) for verification.
# ----------------------------------------------------------------------------
def _ref_forward(image, report, w_qkv, w_proj, b_proj, num_heads):
    B, N_i, C = image.shape
    N_r = report.shape[1]
    H = num_heads
    Dh = C // H
    scale = Dh ** -0.5

    def qkv_split(x, n):
        y = x @ w_qkv.T
        y = y.reshape(B, n, 3, H, Dh).transpose(2, 0, 3, 1, 4)
        return y[0], y[1], y[2]

    q_i, k_i, v_i = qkv_split(image, N_i)
    q_r, k_r, v_r = qkv_split(report, N_r)

    a_i = jax.nn.softmax(jnp.einsum('bhqd,bhkd->bhqk', q_i, k_r) * scale, -1)
    a_r = jax.nn.softmax(jnp.einsum('bhqd,bhkd->bhqk', q_r, k_i) * scale, -1)
    x_i = jnp.einsum('bhqk,bhkd->bhqd', a_i, v_r).transpose(0, 2, 1, 3)
    x_r = jnp.einsum('bhqk,bhkd->bhqd', a_r, v_i).transpose(0, 2, 1, 3)
    x_i = x_i.reshape(B, N_i, C) @ w_proj.T + b_proj
    x_r = x_r.reshape(B, N_r, C) @ w_proj.T + b_proj
    return (image + image * x_i) + (report + report * x_r)


# ----------------------------------------------------------------------------
if __name__ == "__main__":
    key = jax.random.PRNGKey(0)
    ks = jax.random.split(key, 5)

    # dim = 128 (consistent with the module's LayerNorm(128) / Mlp(128)),
    # num_heads = 8 -> head_dim = 16; small sequences for the self-test.
    B, N, C, H = 2, 64, 128, 8
    image = jax.random.normal(ks[0], (B, N, C), jnp.float32)
    report = jax.random.normal(ks[1], (B, N, C), jnp.float32)

    w_qkv = jax.random.normal(ks[2], (3 * C, C), jnp.float32) / np.sqrt(C)
    w_proj = jax.random.normal(ks[3], (C, C), jnp.float32) / np.sqrt(C)
    b_proj = jax.random.normal(ks[4], (C,), jnp.float32) * 0.1

    out = mi_attention(image, report, w_qkv, w_proj, b_proj, num_heads=H)
    out = jax.block_until_ready(out)

    ref = _ref_forward(image, report, w_qkv, w_proj, b_proj, H)
    np.testing.assert_allclose(np.asarray(out), np.asarray(ref),
                               rtol=2e-2, atol=2e-2)
    print("KERNEL_OK")
</pallas_src>

<mosaic_0001>
module attributes {stable_mosaic.version = 11 : i64} {
  func.func @_qkv_kernel(%arg0: i32, %arg1: memref<256x128xf32, #tpu.memory_space<vmem>>, %arg2: memref<128x384xf32, #tpu.memory_space<vmem>>, %arg3: memref<256x384xf32, #tpu.memory_space<vmem>>) attributes {dimension_semantics = [#tpu.dimension_semantics<parallel>], iteration_bounds = array<i64: 1>, scalar_prefetch = 0 : i64, scratch_operands = 0 : i64, tpu.core_type = #tpu.core_type<tc>, window_params = [{transform_indices = @transform_0, window_bounds = array<i64: 256, 128>}, {pipeline_mode = #tpu.pipeline_mode<synchronous>, transform_indices = @transform_1, window_bounds = array<i64: 128, 384>}, {transform_indices = @transform_2, window_bounds = array<i64: 256, 384>}]} {
    %c0 = arith.constant 0 : index
    %c0_0 = arith.constant 0 : index
    %0 = vector.load %arg1[%c0, %c0_0] : memref<256x128xf32, #tpu.memory_space<vmem>>, vector<256x128xf32>
    %c0_1 = arith.constant 0 : index
    %c0_2 = arith.constant 0 : index
    %1 = vector.load %arg2[%c0_1, %c0_2] : memref<128x384xf32, #tpu.memory_space<vmem>>, vector<128x384xf32>
    %cst = arith.constant dense<0.000000e+00> : vector<256x384xf32>
    %2 = tpu.matmul %0, %1, %cst {dimension_numbers = #tpu.dot_dimension_numbers<[1], [0], [0], [1], [0, 0, 1, 1], [], []>} : vector<256x128xf32>, vector<128x384xf32>, vector<256x384xf32> -> vector<256x384xf32>
    %c0_3 = arith.constant 0 : index
    %c0_4 = arith.constant 0 : index
    %3 = vector.load %arg3[%c0_3, %c0_4] : memref<256x384xf32, #tpu.memory_space<vmem>>, vector<256x384xf32>
    tpu.vector_store %arg3[%c0_3, %c0_4], %2 {strides = array<i32>} : memref<256x384xf32, #tpu.memory_space<vmem>>, vector<256x384xf32>,
    return
  }
  func.func @transform_0(%arg0: i32) -> (i32, i32) {
    %c0_i32 = arith.constant 0 : i32
    %c0_i32_0 = arith.constant 0 : i32
    return %arg0, %c0_i32 : i32, i32
  }
  func.func @transform_1(%arg0: i32) -> (i32, i32) {
    %c0_i32 = arith.constant 0 : i32
    %c0_i32_0 = arith.constant 0 : i32
    %c0_i32_1 = arith.constant 0 : i32
    return %c0_i32, %c0_i32_0 : i32, i32
  }
  func.func @transform_2(%arg0: i32) -> (i32, i32) {
    %c0_i32 = arith.constant 0 : i32
    %c0_i32_0 = arith.constant 0 : i32
    return %arg0, %c0_i32 : i32, i32
  }
}

module attributes {stable_mosaic.version = 11 : i64} {
  func.func @_cross_attn_kernel(%arg0: i32, %arg1: i32, %arg2: memref<1x8x64x16xf32, #tpu.memory_space<vmem>>, %arg3: memref<1x8x64x16xf32, #tpu.memory_space<vmem>>, %arg4: memref<1x8x64x16xf32, #tpu.memory_space<vmem>>, %arg5: memref<1x8x64x16xf32, #tpu.memory_space<vmem>>, %arg6: memref<1x8x64x16xf32, #tpu.memory_space<vmem>>, %arg7: memref<1x8x64x16xf32, #tpu.memory_space<vmem>>, %arg8: memref<1x64x128xf32, #tpu.memory_space<vmem>>, %arg9: memref<1x64x128xf32, #tpu.memory_space<vmem>>, %arg10: memref<128x128xf32, #tpu.memory_space<vmem>>, %arg11: memref<1x128xf32, #tpu.memory_space<vmem>>, %arg12: memref<1x64x128xf32, #tpu.memory_space<vmem>>) attributes {dimension_semantics = [#tpu.dimension_semantics<parallel>, #tpu.dimension_semantics<parallel>], iteration_bounds = array<i64: 2, 1>, scalar_prefetch = 0 : i64, scratch_operands = 0 : i64, tpu.core_type = #tpu.core_type<tc>, window_params = [{transform_indices = @transform_0, window_bounds = array<i64: 1, 8, 64, 16>}, {transform_indices = @transform_1, window_bounds = array<i64: 1, 8, 64, 16>}, {transform_indices = @transform_2, window_bounds = array<i64: 1, 8, 64, 16>}, {transform_indices = @transform_3, window_bounds = array<i64: 1, 8, 64, 16>}, {transform_indices = @transform_4, window_bounds = array<i64: 1, 8, 64, 16>}, {transform_indices = @transform_5, window_bounds = array<i64: 1, 8, 64, 16>}, {transform_indices = @transform_6, window_bounds = array<i64: 1, 64, 128>}, {transform_indices = @transform_7, window_bounds = array<i64: 1, 64, 128>}, {pipeline_mode = #tpu.pipeline_mode<synchronous>, transform_indices = @transform_8, window_bounds = array<i64: 128, 128>}, {pipeline_mode = #tpu.pipeline_mode<synchronous>, transform_indices = @transform_9, window_bounds = array<i64: 1, 128>}, {transform_indices = @transform_10, window_bounds = array<i64: 1, 64, 128>}]} {
    %c0 = arith.constant 0 : index
    %c0_0 = arith.constant 0 : index
    %c0_1 = arith.constant 0 : index
    %0 = vector.load %arg8[%c0, %c0_0, %c0_1] : memref<1x64x128xf32, #tpu.memory_space<vmem>>, vector<1x64x128xf32>
    %1 = vector.shape_cast %0 : vector<1x64x128xf32> to vector<64x128xf32>
    %c0_2 = arith.constant 0 : index
    %c0_3 = arith.constant 0 : index
    %c0_4 = arith.constant 0 : index
    %2 = vector.load %arg9[%c0_2, %c0_3, %c0_4] : memref<1x64x128xf32, #tpu.memory_space<vmem>>, vector<1x64x128xf32>
    %3 = vector.shape_cast %2 : vector<1x64x128xf32> to vector<64x128xf32>
    %cst = arith.constant 0.000000e+00 : f32
    %4 = vector.broadcast %cst : f32 to vector<64x128xf32>
    %cst_5 = arith.constant 0.000000e+00 : f32
    %5 = vector.broadcast %cst_5 : f32 to vector<64x128xf32>
    %c0_6 = arith.constant 0 : index
    %c0_7 = arith.constant 0 : index
    %6 = vector.load %arg10[%c0_6, %c0_7] : memref<128x128xf32, #tpu.memory_space<vmem>>, vector<16x128xf32>
    %c0_8 = arith.constant 0 : index
    %c0_9 = arith.constant 0 : index
    %c0_10 = arith.constant 0 : index
    %c0_11 = arith.constant 0 : index
    %7 = vector.load %arg2[%c0_8, %c0_9, %c0_10, %c0_11] : memref<1x8x64x16xf32, #tpu.memory_space<vmem>>, vector<1x1x64x16xf32>
    %8 = vector.shape_cast %7 : vector<1x1x64x16xf32> to vector<64x16xf32>
    %c0_12 = arith.constant 0 : index
    %c0_13 = arith.constant 0 : index
    %c0_14 = arith.constant 0 : index
    %c0_15 = arith.constant 0 : index
    %9 = vector.load %arg6[%c0_12, %c0_13, %c0_14, %c0_15] : memref<1x8x64x16xf32, #tpu.memory_space<vmem>>, vector<1x1x64x16xf32>
    %10 = vector.shape_cast %9 : vector<1x1x64x16xf32> to vector<64x16xf32>
    %c0_16 = arith.constant 0 : index
    %c0_17 = arith.constant 0 : index
    %c0_18 = arith.constant 0 : index
    %c0_19 = arith.constant 0 : index
    %11 = vector.load %arg7[%c0_16, %c0_17, %c0_18, %c0_19] : memref<1x8x64x16xf32, #tpu.memory_space<vmem>>, vector<1x1x64x16xf32>
    %12 = vector.shape_cast %11 : vector<1x1x64x16xf32> to vector<64x16xf32>
    %cst_20 = arith.constant dense<0.000000e+00> : vector<64x64xf32>
    %13 = tpu.matmul %8, %10, %cst_20 {dimension_numbers = #tpu.dot_dimension_numbers<[1], [1], [0], [0], [0, 0, 1, 0], [], []>} : vector<64x16xf32>, vector<64x16xf32>, vector<64x64xf32> -> vector<64x64xf32>
    %cst_21 = arith.constant 2.500000e-01 : f32
    %14 = vector.broadcast %cst_21 : f32 to vector<64x64xf32>
    %15 = arith.mulf %13, %14 : vector<64x64xf32>
    %cst_22 = arith.constant dense<0xFF800000> : vector<64xf32>
    %16 = vector.multi_reduction <maximumf>, %15, %cst_22 [1] : vector<64x64xf32> to vector<64xf32>
    %17 = vector.shape_cast %16 : vector<64xf32> to vector<64x1xf32>
    %18 = vector.broadcast %17 : vector<64x1xf32> to vector<64x64xf32>
    %19 = arith.subf %15, %18 : vector<64x64xf32>
    %20 = math.exp %19 : vector<64x64xf32>
    %cst_23 = arith.constant dense<0.000000e+00> : vector<64xf32>
    %21 = vector.multi_reduction <add>, %20, %cst_23 [1] : vector<64x64xf32> to vector<64xf32>
    %22 = vector.shape_cast %21 : vector<64xf32> to vector<64x1xf32>
    %23 = vector.broadcast %22 : vector<64x1xf32> to vector<64x64xf32>
    %24 = arith.divf %20, %23 : vector<64x64xf32>
    %cst_24 = arith.constant dense<0.000000e+00> : vector<64x16xf32>
    %25 = tpu.matmul %24, %12, %cst_24 {dimension_numbers = #tpu.dot_dimension_numbers<[1], [0], [0], [1], [0, 0, 1, 1], [], []>} : vector<64x64xf32>, vector<64x16xf32>, vector<64x16xf32> -> vector<64x16xf32>
    %cst_25 = arith.constant dense<0.000000e+00> : vector<64x128xf32>
    %26 = tpu.matmul %25, %6, %cst_25 {dimension_numbers = #tpu.dot_dimension_numbers<[1], [0], [0], [1], [0, 0, 1, 1], [], []>} : vector<64x16xf32>, vector<16x128xf32>, vector<64x128xf32> -> vector<64x128xf32>
    %27 = arith.addf %4, %26 : vector<64x128xf32>
    %c0_26 = arith.constant 0 : index
    %c0_27 = arith.constant 0 : index
    %c0_28 = arith.constant 0 : index
    %c0_29 = arith.constant 0 : index
    %28 = vector.load %arg5[%c0_26, %c0_27, %c0_28, %c0_29] : memref<1x8x64x16xf32, #tpu.memory_space<vmem>>, vector<1x1x64x16xf32>
    %29 = vector.shape_cast %28 : vector<1x1x64x16xf32> to vector<64x16xf32>
    %c0_30 = arith.constant 0 : index
    %c0_31 = arith.constant 0 : index
    %c0_32 = arith.constant 0 : index
    %c0_33 = arith.constant 0 : index
    %30 = vector.load %arg3[%c0_30, %c0_31, %c0_32, %c0_33] : memref<1x8x64x16xf32, #tpu.memory_space<vmem>>, vector<1x1x64x16xf32>
    %31 = vector.shape_cast %30 : vector<1x1x64x16xf32> to vector<64x16xf32>
    %c0_34 = arith.constant 0 : index
    %c0_35 = arith.constant 0 : index
    %c0_36 = arith.constant 0 : index
    %c0_37 = arith.constant 0 : index
    %32 = vector.load %arg4[%c0_34, %c0_35, %c0_36, %c0_37] : memref<1x8x64x16xf32, #tpu.memory_space<vmem>>, vector<1x1x64x16xf32>
    %33 = vector.shape_cast %32 : vector<1x1x64x16xf32> to vector<64x16xf32>
    %cst_38 = arith.constant dense<0.000000e+00> : vector<64x64xf32>
    %34 = tpu.matmul %29, %31, %cst_38 {dimension_numbers = #tpu.dot_dimension_numbers<[1], [1], [0], [0], [0, 0, 1, 0], [], []>} : vector<64x16xf32>, vector<64x16xf32>, vector<64x64xf32> -> vector<64x64xf32>
    %cst_39 = arith.constant 2.500000e-01 : f32
    %35 = vector.broadcast %cst_39 : f32 to vector<64x64xf32>
    %36 = arith.mulf %34, %35 : vector<64x64xf32>
    %cst_40 = arith.constant dense<0xFF800000> : vector<64xf32>
    %37 = vector.multi_reduction <maximumf>, %36, %cst_40 [1] : vector<64x64xf32> to vector<64xf32>
    %38 = vector.shape_cast %37 : vector<64xf32> to vector<64x1xf32>
    %39 = vector.broadcast %38 : vector<64x1xf32> to vector<64x64xf32>
    %40 = arith.subf %36, %39 : vector<64x64xf32>
    %41 = math.exp %40 : vector<64x64xf32>
    %cst_41 = arith.constant dense<0.000000e+00> : vector<64xf32>
    %42 = vector.multi_reduction <add>, %41, %cst_41 [1] : vector<64x64xf32> to vector<64xf32>
    %43 = vector.shape_cast %42 : vector<64xf32> to vector<64x1xf32>
    %44 = vector.broadcast %43 : vector<64x1xf32> to vector<64x64xf32>
    %45 = arith.divf %41, %44 : vector<64x64xf32>
    %cst_42 = arith.constant dense<0.000000e+00> : vector<64x16xf32>
    %46 = tpu.matmul %45, %33, %cst_42 {dimension_numbers = #tpu.dot_dimension_numbers<[1], [0], [0], [1], [0, 0, 1, 1], [], []>} : vector<64x64xf32>, vector<64x16xf32>, vector<64x16xf32> -> vector<64x16xf32>
    %cst_43 = arith.constant dense<0.000000e+00> : vector<64x128xf32>
    %47 = tpu.matmul %46, %6, %cst_43 {dimension_numbers = #tpu.dot_dimension_numbers<[1], [0], [0], [1], [0, 0, 1, 1], [], []>} : vector<64x16xf32>, vector<16x128xf32>, vector<64x128xf32> -> vector<64x128xf32>
    %48 = arith.addf %5, %47 : vector<64x128xf32>
    %c16 = arith.constant 16 : index
    %c0_44 = arith.constant 0 : index
    %49 = vector.load %arg10[%c16, %c0_44] : memref<128x128xf32, #tpu.memory_space<vmem>>, vector<16x128xf32>
    %c0_45 = arith.constant 0 : index
    %c1 = arith.constant 1 : index
    %c0_46 = arith.constant 0 : index
    %c0_47 = arith.constant 0 : index
    %50 = vector.load %arg2[%c0_45, %c1, %c0_46, %c0_47] : memref<1x8x64x16xf32, #tpu.memory_space<vmem>>, vector<1x1x64x16xf32>
    %51 = vector.shape_cast %50 : vector<1x1x64x16xf32> to vector<64x16xf32>
    %c0_48 = arith.constant 0 : index
    %c1_49 = arith.constant 1 : index
    %c0_50 = arith.constant 0 : index
    %c0_51 = arith.constant 0 : index
    %52 = vector.load %arg6[%c0_48, %c1_49, %c0_50, %c0_51] : memref<1x8x64x16xf32, #tpu.memory_space<vmem>>, vector<1x1x64x16xf32>
    %53 = vector.shape_cast %52 : vector<1x1x64x16xf32> to vector<64x16xf32>
    %c0_52 = arith.constant 0 : index
    %c1_53 = arith.constant 1 : index
    %c0_54 = arith.constant 0 : index
    %c0_55 = arith.constant 0 : index
    %54 = vector.load %arg7[%c0_52, %c1_53, %c0_54, %c0_55] : memref<1x8x64x16xf32, #tpu.memory_space<vmem>>, vector<1x1x64x16xf32>
    %55 = vector.shape_cast %54 : vector<1x1x64x16xf32> to vector<64x16xf32>
    %cst_56 = arith.constant dense<0.000000e+00> : vector<64x64xf32>
    %56 = tpu.matmul %51, %53, %cst_56 {dimension_numbers = #tpu.dot_dimension_numbers<[1], [1], [0], [0], [0, 0, 1, 0], [], []>} : vector<64x16xf32>, vector<64x16xf32>, vector<64x64xf32> -> vector<64x64xf32>
    %cst_57 = arith.constant 2.500000e-01 : f32
    %57 = vector.broadcast %cst_57 : f32 to vector<64x64xf32>
    %58 = arith.mulf %56, %57 : vector<64x64xf32>
    %cst_58 = arith.constant dense<0xFF800000> : vector<64xf32>
    %59 = vector.multi_reduction <maximumf>, %58, %cst_58 [1] : vector<64x64xf32> to vector<64xf32>
    %60 = vector.shape_cast %59 : vector<64xf32> to vector<64x1xf32>
    %61 = vector.broadcast %60 : vector<64x1xf32> to vector<64x64xf32>
    %62 = arith.subf %58, %61 : vector<64x64xf32>
    %63 = math.exp %62 : vector<64x64xf32>
    %cst_59 = arith.constant dense<0.000000e+00> : vector<64xf32>
    %64 = vector.multi_reduction <add>, %63, %cst_59 [1] : vector<64x64xf32> to vector<64xf32>
    %65 = vector.shape_cast %64 : vector<64xf32> to vector<64x1xf32>
    %66 = vector.broadcast %65 : vector<64x1xf32> to vector<64x64xf32>
    %67 = arith.divf %63, %66 : vector<64x64xf32>
    %cst_60 = arith.constant dense<0.000000e+00> : vector<64x16xf32>
    %68 = tpu.matmul %67, %55, %cst_60 {dimension_numbers = #tpu.dot_dimension_numbers<[1], [0], [0], [1], [0, 0, 1, 1], [], []>} : vector<64x64xf32>, vector<64x16xf32>, vector<64x16xf32> -> vector<64x16xf32>
    %cst_61 = arith.constant dense<0.000000e+00> : vector<64x128xf32>
    %69 = tpu.matmul %68, %49, %cst_61 {dimension_numbers = #tpu.dot_dimension_numbers<[1], [0], [0], [1], [0, 0, 1, 1], [], []>} : vector<64x16xf32>, vector<16x128xf32>, vector<64x128xf32> -> vector<64x128xf32>
    %70 = arith.addf %27, %69 : vector<64x128xf32>
    %c0_62 = arith.constant 0 : index
    %c1_63 = arith.constant 1 : index
    %c0_64 = arith.constant 0 : index
    %c0_65 = arith.constant 0 : index
    %71 = vector.load %arg5[%c0_62, %c1_63, %c0_64, %c0_65] : memref<1x8x64x16xf32, #tpu.memory_space<vmem>>, vector<1x1x64x16xf32>
    %72 = vector.shape_cast %71 : vector<1x1x64x16xf32> to vector<64x16xf32>
    %c0_66 = arith.constant 0 : index
    %c1_67 = arith.constant 1 : index
    %c0_68 = arith.constant 0 : index
    %c0_69 = arith.constant 0 : index
    %73 = vector.load %arg3[%c0_66, %c1_67, %c0_68, %c0_69] : memref<1x8x64x16xf32, #tpu.memory_space<vmem>>, vector<1x1x64x16xf32>
    %74 = vector.shape_cast %73 : vector<1x1x64x16xf32> to vector<64x16xf32>
    %c0_70 = arith.constant 0 : index
    %c1_71 = arith.constant 1 : index
    %c0_72 = arith.constant 0 : index
    %c0_73 = arith.constant 0 : index
    %75 = vector.load %arg4[%c0_70, %c1_71, %c0_72, %c0_73] : memref<1x8x64x16xf32, #tpu.memory_space<vmem>>, vector<1x1x64x16xf32>
    %76 = vector.shape_cast %75 : vector<1x1x64x16xf32> to vector<64x16xf32>
    %cst_74 = arith.constant dense<0.000000e+00> : vector<64x64xf32>
    %77 = tpu.matmul %72, %74, %cst_74 {dimension_numbers = #tpu.dot_dimension_numbers<[1], [1], [0], [0], [0, 0, 1, 0], [], []>} : vector<64x16xf32>, vector<64x16xf32>, vector<64x64xf32> -> vector<64x64xf32>
    %cst_75 = arith.constant 2.500000e-01 : f32
    %78 = vector.broadcast %cst_75 : f32 to vector<64x64xf32>
    %79 = arith.mulf %77, %78 : vector<64x64xf32>
    %cst_76 = arith.constant dense<0xFF800000> : vector<64xf32>
    %80 = vector.multi_reduction <maximumf>, %79, %cst_76 [1] : vector<64x64xf32> to vector<64xf32>
    %81 = vector.shape_cast %80 : vector<64xf32> to vector<64x1xf32>
    %82 = vector.broadcast %81 : vector<64x1xf32> to vector<64x64xf32>
    %83 = arith.subf %79, %82 : vector<64x64xf32>
    %84 = math.exp %83 : vector<64x64xf32>
    %cst_77 = arith.constant dense<0.000000e+00> : vector<64xf32>
    %85 = vector.multi_reduction <add>, %84, %cst_77 [1] : vector<64x64xf32> to vector<64xf32>
    %86 = vector.shape_cast %85 : vector<64xf32> to vector<64x1xf32>
    %87 = vector.broadcast %86 : vector<64x1xf32> to vector<64x64xf32>
    %88 = arith.divf %84, %87 : vector<64x64xf32>
    %cst_78 = arith.constant dense<0.000000e+00> : vector<64x16xf32>
    %89 = tpu.matmul %88, %76, %cst_78 {dimension_numbers = #tpu.dot_dimension_numbers<[1], [0], [0], [1], [0, 0, 1, 1], [], []>} : vector<64x64xf32>, vector<64x16xf32>, vector<64x16xf32> -> vector<64x16xf32>
    %cst_79 = arith.constant dense<0.000000e+00> : vector<64x128xf32>
    %90 = tpu.matmul %89, %49, %cst_79 {dimension_numbers = #tpu.dot_dimension_numbers<[1], [0], [0], [1], [0, 0, 1, 1], [], []>} : vector<64x16xf32>, vector<16x128xf32>, vector<64x128xf32> -> vector<64x128xf32>
    %91 = arith.addf %48, %90 : vector<64x128xf32>
    %c32 = arith.constant 32 : index
    %c0_80 = arith.constant 0 : index
    %92 = vector.load %arg10[%c32, %c0_80] : memref<128x128xf32, #tpu.memory_space<vmem>>, vector<16x128xf32>
    %c0_81 = arith.constant 0 : index
    %c2 = arith.constant 2 : index
    %c0_82 = arith.constant 0 : index
    %c0_83 = arith.constant 0 : index
    %93 = vector.load %arg2[%c0_81, %c2, %c0_82, %c0_83] : memref<1x8x64x16xf32, #tpu.memory_space<vmem>>, vector<1x1x64x16xf32>
    %94 = vector.shape_cast %93 : vector<1x1x64x16xf32> to vector<64x16xf32>
    %c0_84 = arith.constant 0 : index
    %c2_85 = arith.constant 2 : index
    %c0_86 = arith.constant 0 : index
    %c0_87 = arith.constant 0 : index
    %95 = vector.load %arg6[%c0_84, %c2_85, %c0_86, %c0_87] : memref<1x8x64x16xf32, #tpu.memory_space<vmem>>, vector<1x1x64x16xf32>
    %96 = vector.shape_cast %95 : vector<1x1x64x16xf32> to vector<64x16xf32>
    %c0_88 = arith.constant 0 : index
    %c2_89 = arith.constant 2 : index
    %c0_90 = arith.constant 0 : index
    %c0_91 = arith.constant 0 : index
    %97 = vector.load %arg7[%c0_88, %c2_89, %c0_90, %c0_91] : memref<1x8x64x16xf32, #tpu.memory_space<vmem>>, vector<1x1x64x16xf32>
    %98 = vector.shape_cast %97 : vector<1x1x64x16xf32> to vector<64x16xf32>
    %cst_92 = arith.constant dense<0.000000e+00> : vector<64x64xf32>
    %99 = tpu.matmul %94, %96, %cst_92 {dimension_numbers = #tpu.dot_dimension_numbers<[1], [1], [0], [0], [0, 0, 1, 0], [], []>} : vector<64x16xf32>, vector<64x16xf32>, vector<64x64xf32> -> vector<64x64xf32>
    %cst_93 = arith.constant 2.500000e-01 : f32
    %100 = vector.broadcast %cst_93 : f32 to vector<64x64xf32>
    %101 = arith.mulf %99, %100 : vector<64x64xf32>
    %cst_94 = arith.constant dense<0xFF800000> : vector<64xf32>
    %102 = vector.multi_reduction <maximumf>, %101, %cst_94 [1] : vector<64x64xf32> to vector<64xf32>
    %103 = vector.shape_cast %102 : vector<64xf32> to vector<64x1xf32>
    %104 = vector.broadcast %103 : vector<64x1xf32> to vector<64x64xf32>
    %105 = arith.subf %101, %104 : vector<64x64xf32>
    %106 = math.exp %105 : vector<64x64xf32>
    %cst_95 = arith.constant dense<0.000000e+00> : vector<64xf32>
    %107 = vector.multi_reduction <add>, %106, %cst_95 [1] : vector<64x64xf32> to vector<64xf32>
    %108 = vector.shape_cast %107 : vector<64xf32> to vector<64x1xf32>
    %109 = vector.broadcast %108 : vector<64x1xf32> to vector<64x64xf32>
    %110 = arith.divf %106, %109 : vector<64x64xf32>
    %cst_96 = arith.constant dense<0.000000e+00> : vector<64x16xf32>
    %111 = tpu.matmul %110, %98, %cst_96 {dimension_numbers = #tpu.dot_dimension_numbers<[1], [0], [0], [1], [0, 0, 1, 1], [], []>} : vector<64x64xf32>, vector<64x16xf32>, vector<64x16xf32> -> vector<64x16xf32>
    %cst_97 = arith.constant dense<0.000000e+00> : vector<64x128xf32>
    %112 = tpu.matmul %111, %92, %cst_97 {dimension_numbers = #tpu.dot_dimension_numbers<[1], [0], [0], [1], [0, 0, 1, 1], [], []>} : vector<64x16xf32>, vector<16x128xf32>, vector<64x128xf32> -> vector<64x128xf32>
    %113 = arith.addf %70, %112 : vector<64x128xf32>
    %c0_98 = arith.constant 0 : index
    %c2_99 = arith.constant 2 : index
    %c0_100 = arith.constant 0 : index
    %c0_101 = arith.constant 0 : index
    %114 = vector.load %arg5[%c0_98, %c2_99, %c0_100, %c0_101] : memref<1x8x64x16xf32, #tpu.memory_space<vmem>>, vector<1x1x64x16xf32>
    %115 = vector.shape_cast %114 : vector<1x1x64x16xf32> to vector<64x16xf32>
    %c0_102 = arith.constant 0 : index
    %c2_103 = arith.constant 2 : index
    %c0_104 = arith.constant 0 : index
    %c0_105 = arith.constant 0 : index
    %116 = vector.load %arg3[%c0_102, %c2_103, %c0_104, %c0_105] : memref<1x8x64x16xf32, #tpu.memory_space<vmem>>, vector<1x1x64x16xf32>
    %117 = vector.shape_cast %116 : vector<1x1x64x16xf32> to vector<64x16xf32>
    %c0_106 = arith.constant 0 : index
    %c2_107 = arith.constant 2 : index
    %c0_108 = arith.constant 0 : index
    %c0_109 = arith.constant 0 : index
    %118 = vector.load %arg4[%c0_106, %c2_107, %c0_108, %c0_109] : memref<1x8x64x16xf32, #tpu.memory_space<vmem>>, vector<1x1x64x16xf32>
    %119 = vector.shape_cast %118 : vector<1x1x64x16xf32> to vector<64x16xf32>
    %cst_110 = arith.constant dense<0.000000e+00> : vector<64x64xf32>
    %120 = tpu.matmul %115, %117, %cst_110 {dimension_numbers = #tpu.dot_dimension_numbers<[1], [1], [0], [0], [0, 0, 1, 0], [], []>} : vector<64x16xf32>, vector<64x16xf32>, vector<64x64xf32> -> vector<64x64xf32>
    %cst_111 = arith.constant 2.500000e-01 : f32
    %121 = vector.broadcast %cst_111 : f32 to vector<64x64xf32>
    %122 = arith.mulf %120, %121 : vector<64x64xf32>
    %cst_112 = arith.constant dense<0xFF800000> : vector<64xf32>
    %123 = vector.multi_reduction <maximumf>, %122, %cst_112 [1] : vector<64x64xf32> to vector<64xf32>
    %124 = vector.shape_cast %123 : vector<64xf32> to vector<64x1xf32>
    %125 = vector.broadcast %124 : vector<64x1xf32> to vector<64x64xf32>
    %126 = arith.subf %122, %125 : vector<64x64xf32>
    %127 = math.exp %126 : vector<64x64xf32>
    %cst_113 = arith.constant dense<0.000000e+00> : vector<64xf32>
    %128 = vector.multi_reduction <add>, %127, %cst_113 [1] : vector<64x64xf32> to vector<64xf32>
    %129 = vector.shape_cast %128 : vector<64xf32> to vector<64x1xf32>
    %130 = vector.broadcast %129 : vector<64x1xf32> to vector<64x64xf32>
    %131 = arith.divf %127, %130 : vector<64x64xf32>
    %cst_114 = arith.constant dense<0.000000e+00> : vector<64x16xf32>
    %132 = tpu.matmul %131, %119, %cst_114 {dimension_numbers = #tpu.dot_dimension_numbers<[1], [0], [0], [1], [0, 0, 1, 1], [], []>} : vector<64x64xf32>, vector<64x16xf32>, vector<64x16xf32> -> vector<64x16xf32>
    %cst_115 = arith.constant dense<0.000000e+00> : vector<64x128xf32>
    %133 = tpu.matmul %132, %92, %cst_115 {dimension_numbers = #tpu.dot_dimension_numbers<[1], [0], [0], [1], [0, 0, 1, 1], [], []>} : vector<64x16xf32>, vector<16x128xf32>, vector<64x128xf32> -> vector<64x128xf32>
    %134 = arith.addf %91, %133 : vector<64x128xf32>
    %c48 = arith.constant 48 : index
    %c0_116 = arith.constant 0 : index
    %135 = vector.load %arg10[%c48, %c0_116] : memref<128x128xf32, #tpu.memory_space<vmem>>, vector<16x128xf32>
    %c0_117 = arith.constant 0 : index
    %c3 = arith.constant 3 : index
    %c0_118 = arith.constant 0 : index
    %c0_119 = arith.constant 0 : index
    %136 = vector.load %arg2[%c0_117, %c3, %c0_118, %c0_119] : memref<1x8x64x16xf32, #tpu.memory_space<vmem>>, vector<1x1x64x16xf32>
    %137 = vector.shape_cast %136 : vector<1x1x64x16xf32> to vector<64x16xf32>
    %c0_120 = arith.constant 0 : index
    %c3_121 = arith.constant 3 : index
    %c0_122 = arith.constant 0 : index
    %c0_123 = arith.constant 0 : index
    %138 = vector.load %arg6[%c0_120, %c3_121, %c0_122, %c0_123] : memref<1x8x64x16xf32, #tpu.memory_space<vmem>>, vector<1x1x64x16xf32>
    %139 = vector.shape_cast %138 : vector<1x1x64x16xf32> to vector<64x16xf32>
    %c0_124 = arith.constant 0 : index
    %c3_125 = arith.constant 3 : index
    %c0_126 = arith.constant 0 : index
    %c0_127 = arith.constant 0 : index
    %140 = vector.load %arg7[%c0_124, %c3_125, %c0_126, %c0_127] : memref<1x8x64x16xf32, #tpu.memory_space<vmem>>, vector<1x1x64x16xf32>
    %141 = vector.shape_cast %140 : vector<1x1x64x16xf32> to vector<64x16xf32>
    %cst_128 = arith.constant dense<0.000000e+00> : vector<64x64xf32>
    %142 = tpu.matmul %137, %139, %cst_128 {dimension_numbers = #tpu.dot_dimension_numbers<[1], [1], [0], [0], [0, 0, 1, 0], [], []>} : vector<64x16xf32>, vector<64x16xf32>, vector<64x64xf32> -> vector<64x64xf32>
    %cst_129 = arith.constant 2.500000e-01 : f32
    %143 = vector.broadcast %cst_129 : f32 to vector<64x64xf32>
    %144 = arith.mulf %142, %143 : vector<64x64xf32>
    %cst_130 = arith.constant dense<0xFF800000> : vector<64xf32>
    %145 = vector.multi_reduction <maximumf>, %144, %cst_130 [1] : vector<64x64xf32> to vector<64xf32>
    %146 = vector.shape_cast %145 : vector<64xf32> to vector<64x1xf32>
    %147 = vector.broadcast %146 : vector<64x1xf32> to vector<64x64xf32>
    %148 = arith.subf %144, %147 : vector<64x64xf32>
    %149 = math.exp %148 : vector<64x64xf32>
    %cst_131 = arith.constant dense<0.000000e+00> : vector<64xf32>
    %150 = vector.multi_reduction <add>, %149, %cst_131 [1] : vector<64x64xf32> to vector<64xf32>
    %151 = vector.shape_cast %150 : vector<64xf32> to vector<64x1xf32>
    %152 = vector.broadcast %151 : vector<64x1xf32> to vector<64x64xf32>
    %153 = arith.divf %149, %152 : vector<64x64xf32>
    %cst_132 = arith.constant dense<0.000000e+00> : vector<64x16xf32>
    %154 = tpu.matmul %153, %141, %cst_132 {dimension_numbers = #tpu.dot_dimension_numbers<[1], [0], [0], [1], [0, 0, 1, 1], [], []>} : vector<64x64xf32>, vector<64x16xf32>, vector<64x16xf32> -> vector<64x16xf32>
    %cst_133 = arith.constant dense<0.000000e+00> : vector<64x128xf32>
    %155 = tpu.matmul %154, %135, %cst_133 {dimension_numbers = #tpu.dot_dimension_numbers<[1], [0], [0], [1], [0, 0, 1, 1], [], []>} : vector<64x16xf32>, vector<16x128xf32>, vector<64x128xf32> -> vector<64x128xf32>
    %156 = arith.addf %113, %155 : vector<64x128xf32>
    %c0_134 = arith.constant 0 : index
    %c3_135 = arith.constant 3 : index
    %c0_136 = arith.constant 0 : index
    %c0_137 = arith.constant 0 : index
    %157 = vector.load %arg5[%c0_134, %c3_135, %c0_136, %c0_137] : memref<1x8x64x16xf32, #tpu.memory_space<vmem>>, vector<1x1x64x16xf32>
    %158 = vector.shape_cast %157 : vector<1x1x64x16xf32> to vector<64x16xf32>
    %c0_138 = arith.constant 0 : index
    %c3_139 = arith.constant 3 : index
    %c0_140 = arith.constant 0 : index
    %c0_141 = arith.constant 0 : index
    %159 = vector.load %arg3[%c0_138, %c3_139, %c0_140, %c0_141] : memref<1x8x64x16xf32, #tpu.memory_space<vmem>>, vector<1x1x64x16xf32>
    %160 = vector.shape_cast %159 : vector<1x1x64x16xf32> to vector<64x16xf32>
    %c0_142 = arith.constant 0 : index
    %c3_143 = arith.constant 3 : index
    %c0_144 = arith.constant 0 : index
    %c0_145 = arith.constant 0 : index
    %161 = vector.load %arg4[%c0_142, %c3_143, %c0_144, %c0_145] : memref<1x8x64x16xf32, #tpu.memory_space<vmem>>, vector<1x1x64x16xf32>
    %162 = vector.shape_cast %161 : vector<1x1x64x16xf32> to vector<64x16xf32>
    %cst_146 = arith.constant dense<0.000000e+00> : vector<64x64xf32>
    %163 = tpu.matmul %158, %160, %cst_146 {dimension_numbers = #tpu.dot_dimension_numbers<[1], [1], [0], [0], [0, 0, 1, 0], [], []>} : vector<64x16xf32>, vector<64x16xf32>, vector<64x64xf32> -> vector<64x64xf32>
    %cst_147 = arith.constant 2.500000e-01 : f32
    %164 = vector.broadcast %cst_147 : f32 to vector<64x64xf32>
    %165 = arith.mulf %163, %164 : vector<64x64xf32>
    %cst_148 = arith.constant dense<0xFF800000> : vector<64xf32>
    %166 = vector.multi_reduction <maximumf>, %165, %cst_148 [1] : vector<64x64xf32> to vector<64xf32>
    %167 = vector.shape_cast %166 : vector<64xf32> to vector<64x1xf32>
    %168 = vector.broadcast %167 : vector<64x1xf32> to vector<64x64xf32>
    %169 = arith.subf %165, %168 : vector<64x64xf32>
    %170 = math.exp %169 : vector<64x64xf32>
    %cst_149 = arith.constant dense<0.000000e+00> : vector<64xf32>
    %171 = vector.multi_reduction <add>, %170, %cst_149 [1] : vector<64x64xf32> to vector<64xf32>
    %172 = vector.shape_cast %171 : vector<64xf32> to vector<64x1xf32>
    %173 = vector.broadcast %172 : vector<64x1xf32> to vector<64x64xf32>
    %174 = arith.divf %170, %173 : vector<64x64xf32>
    %cst_150 = arith.constant dense<0.000000e+00> : vector<64x16xf32>
    %175 = tpu.matmul %174, %162, %cst_150 {dimension_numbers = #tpu.dot_dimension_numbers<[1], [0], [0], [1], [0, 0, 1, 1], [], []>} : vector<64x64xf32>, vector<64x16xf32>, vector<64x16xf32> -> vector<64x16xf32>
    %cst_151 = arith.constant dense<0.000000e+00> : vector<64x128xf32>
    %176 = tpu.matmul %175, %135, %cst_151 {dimension_numbers = #tpu.dot_dimension_numbers<[1], [0], [0], [1], [0, 0, 1, 1], [], []>} : vector<64x16xf32>, vector<16x128xf32>, vector<64x128xf32> -> vector<64x128xf32>
    %177 = arith.addf %134, %176 : vector<64x128xf32>
    %c64 = arith.constant 64 : index
    %c0_152 = arith.constant 0 : index
    %178 = vector.load %arg10[%c64, %c0_152] : memref<128x128xf32, #tpu.memory_space<vmem>>, vector<16x128xf32>
    %c0_153 = arith.constant 0 : index
    %c4 = arith.constant 4 : index
    %c0_154 = arith.constant 0 : index
    %c0_155 = arith.constant 0 : index
    %179 = vector.load %arg2[%c0_153, %c4, %c0_154, %c0_155] : memref<1x8x64x16xf32, #tpu.memory_space<vmem>>, vector<1x1x64x16xf32>
    %180 = vector.shape_cast %179 : vector<1x1x64x16xf32> to vector<64x16xf32>
    %c0_156 = arith.constant 0 : index
    %c4_157 = arith.constant 4 : index
    %c0_158 = arith.constant 0 : index
    %c0_159 = arith.constant 0 : index
    %181 = vector.load %arg6[%c0_156, %c4_157, %c0_158, %c0_159] : memref<1x8x64x16xf32, #tpu.memory_space<vmem>>, vector<1x1x64x16xf32>
    %182 = vector.shape_cast %181 : vector<1x1x64x16xf32> to vector<64x16xf32>
    %c0_160 = arith.constant 0 : index
    %c4_161 = arith.constant 4 : index
    %c0_162 = arith.constant 0 : index
    %c0_163 = arith.constant 0 : index
    %183 = vector.load %arg7[%c0_160, %c4_161, %c0_162, %c0_163] : memref<1x8x64x16xf32, #tpu.memory_space<vmem>>, vector<1x1x64x16xf32>
    %184 = vector.shape_cast %183 : vector<1x1x64x16xf32> to vector<64x16xf32>
    %cst_164 = arith.constant dense<0.000000e+00> : vector<64x64xf32>
    %185 = tpu.matmul %180, %182, %cst_164 {dimension_numbers = #tpu.dot_dimension_numbers<[1], [1], [0], [0], [0, 0, 1, 0], [], []>} : vector<64x16xf32>, vector<64x16xf32>, vector<64x64xf32> -> vector<64x64xf32>
    %cst_165 = arith.constant 2.500000e-01 : f32
    %186 = vector.broadcast %cst_165 : f32 to vector<64x64xf32>
    %187 = arith.mulf %185, %186 : vector<64x64xf32>
    %cst_166 = arith.constant dense<0xFF800000> : vector<64xf32>
    %188 = vector.multi_reduction <maximumf>, %187, %cst_166 [1] : vector<64x64xf32> to vector<64xf32>
    %189 = vector.shape_cast %188 : vector<64xf32> to vector<64x1xf32>
    %190 = vector.broadcast %189 : vector<64x1xf32> to vector<64x64xf32>
    %191 = arith.subf %187, %190 : vector<64x64xf32>
    %192 = math.exp %191 : vector<64x64xf32>
    %cst_167 = arith.constant dense<0.000000e+00> : vector<64xf32>
    %193 = vector.multi_reduction <add>, %192, %cst_167 [1] : vector<64x64xf32> to vector<64xf32>
    %194 = vector.shape_cast %193 : vector<64xf32> to vector<64x1xf32>
    %195 = vector.broadcast %194 : vector<64x1xf32> to vector<64x64xf32>
    %196 = arith.divf %192, %195 : vector<64x64xf32>
    %cst_168 = arith.constant dense<0.000000e+00> : vector<64x16xf32>
    %197 = tpu.matmul %196, %184, %cst_168 {dimension_numbers = #tpu.dot_dimension_numbers<[1], [0], [0], [1], [0, 0, 1, 1], [], []>} : vector<64x64xf32>, vector<64x16xf32>, vector<64x16xf32> -> vector<64x16xf32>
    %cst_169 = arith.constant dense<0.000000e+00> : vector<64x128xf32>
    %198 = tpu.matmul %197, %178, %cst_169 {dimension_numbers = #tpu.dot_dimension_numbers<[1], [0], [0], [1], [0, 0, 1, 1], [], []>} : vector<64x16xf32>, vector<16x128xf32>, vector<64x128xf32> -> vector<64x128xf32>
    %199 = arith.addf %156, %198 : vector<64x128xf32>
    %c0_170 = arith.constant 0 : index
    %c4_171 = arith.constant 4 : index
    %c0_172 = arith.constant 0 : index
    %c0_173 = arith.constant 0 : index
    %200 = vector.load %arg5[%c0_170, %c4_171, %c0_172, %c0_173] : memref<1x8x64x16xf32, #tpu.memory_space<vmem>>, vector<1x1x64x16xf32>
    %201 = vector.shape_cast %200 : vector<1x1x64x16xf32> to vector<64x16xf32>
    %c0_174 = arith.constant 0 : index
    %c4_175 = arith.constant 4 : index
    %c0_176 = arith.constant 0 : index
    %c0_177 = arith.constant 0 : index
    %202 = vector.load %arg3[%c0_174, %c4_175, %c0_176, %c0_177] : memref<1x8x64x16xf32, #tpu.memory_space<vmem>>, vector<1x1x64x16xf32>
    %203 = vector.shape_cast %202 : vector<1x1x64x16xf32> to vector<64x16xf32>
    %c0_178 = arith.constant 0 : index
    %c4_179 = arith.constant 4 : index
    %c0_180 = arith.constant 0 : index
    %c0_181 = arith.constant 0 : index
    %204 = vector.load %arg4[%c0_178, %c4_179, %c0_180, %c0_181] : memref<1x8x64x16xf32, #tpu.memory_space<vmem>>, vector<1x1x64x16xf32>
    %205 = vector.shape_cast %204 : vector<1x1x64x16xf32> to vector<64x16xf32>
    %cst_182 = arith.constant dense<0.000000e+00> : vector<64x64xf32>
    %206 = tpu.matmul %201, %203, %cst_182 {dimension_numbers = #tpu.dot_dimension_numbers<[1], [1], [0], [0], [0, 0, 1, 0], [], []>} : vector<64x16xf32>, vector<64x16xf32>, vector<64x64xf32> -> vector<64x64xf32>
    %cst_183 = arith.constant 2.500000e-01 : f32
    %207 = vector.broadcast %cst_183 : f32 to vector<64x64xf32>
    %208 = arith.mulf %206, %207 : vector<64x64xf32>
    %cst_184 = arith.constant dense<0xFF800000> : vector<64xf32>
    %209 = vector.multi_reduction <maximumf>, %208, %cst_184 [1] : vector<64x64xf32> to vector<64xf32>
    %210 = vector.shape_cast %209 : vector<64xf32> to vector<64x1xf32>
    %211 = vector.broadcast %210 : vector<64x1xf32> to vector<64x64xf32>
    %212 = arith.subf %208, %211 : vector<64x64xf32>
    %213 = math.exp %212 : vector<64x64xf32>
    %cst_185 = arith.constant dense<0.000000e+00> : vector<64xf32>
    %214 = vector.multi_reduction <add>, %213, %cst_185 [1] : vector<64x64xf32> to vector<64xf32>
    %215 = vector.shape_cast %214 : vector<64xf32> to vector<64x1xf32>
    %216 = vector.broadcast %215 : vector<64x1xf32> to vector<64x64xf32>
    %217 = arith.divf %213, %216 : vector<64x64xf32>
    %cst_186 = arith.constant dense<0.000000e+00> : vector<64x16xf32>
    %218 = tpu.matmul %217, %205, %cst_186 {dimension_numbers = #tpu.dot_dimension_numbers<[1], [0], [0], [1], [0, 0, 1, 1], [], []>} : vector<64x64xf32>, vector<64x16xf32>, vector<64x16xf32> -> vector<64x16xf32>
    %cst_187 = arith.constant dense<0.000000e+00> : vector<64x128xf32>
    %219 = tpu.matmul %218, %178, %cst_187 {dimension_numbers = #tpu.dot_dimension_numbers<[1], [0], [0], [1], [0, 0, 1, 1], [], []>} : vector<64x16xf32>, vector<16x128xf32>, vector<64x128xf32> -> vector<64x128xf32>
    %220 = arith.addf %177, %219 : vector<64x128xf32>
    %c80 = arith.constant 80 : index
    %c0_188 = arith.constant 0 : index
    %221 = vector.load %arg10[%c80, %c0_188] : memref<128x128xf32, #tpu.memory_space<vmem>>, vector<16x128xf32>
    %c0_189 = arith.constant 0 : index
    %c5 = arith.constant 5 : index
    %c0_190 = arith.constant 0 : index
    %c0_191 = arith.constant 0 : index
    %222 = vector.load %arg2[%c0_189, %c5, %c0_190, %c0_191] : memref<1x8x64x16xf32, #tpu.memory_space<vmem>>, vector<1x1x64x16xf32>
    %223 = vector.shape_cast %222 : vector<1x1x64x16xf32> to vector<64x16xf32>
    %c0_192 = arith.constant 0 : index
    %c5_193 = arith.constant 5 : index
    %c0_194 = arith.constant 0 : index
    %c0_195 = arith.constant 0 : index
    %224 = vector.load %arg6[%c0_192, %c5_193, %c0_194, %c0_195] : memref<1x8x64x16xf32, #tpu.memory_space<vmem>>, vector<1x1x64x16xf32>
    %225 = vector.shape_cast %224 : vector<1x1x64x16xf32> to vector<64x16xf32>
    %c0_196 = arith.constant 0 : index
    %c5_197 = arith.constant 5 : index
    %c0_198 = arith.constant 0 : index
    %c0_199 = arith.constant 0 : index
    %226 = vector.load %arg7[%c0_196, %c5_197, %c0_198, %c0_199] : memref<1x8x64x16xf32, #tpu.memory_space<vmem>>, vector<1x1x64x16xf32>
    %227 = vector.shape_cast %226 : vector<1x1x64x16xf32> to vector<64x16xf32>
    %cst_200 = arith.constant dense<0.000000e+00> : vector<64x64xf32>
    %228 = tpu.matmul %223, %225, %cst_200 {dimension_numbers = #tpu.dot_dimension_numbers<[1], [1], [0], [0], [0, 0, 1, 0], [], []>} : vector<64x16xf32>, vector<64x16xf32>, vector<64x64xf32> -> vector<64x64xf32>
    %cst_201 = arith.constant 2.500000e-01 : f32
    %229 = vector.broadcast %cst_201 : f32 to vector<64x64xf32>
    %230 = arith.mulf %228, %229 : vector<64x64xf32>
    %cst_202 = arith.constant dense<0xFF800000> : vector<64xf32>
    %231 = vector.multi_reduction <maximumf>, %230, %cst_202 [1] : vector<64x64xf32> to vector<64xf32>
    %232 = vector.shape_cast %231 : vector<64xf32> to vector<64x1xf32>
    %233 = vector.broadcast %232 : vector<64x1xf32> to vector<64x64xf32>
    %234 = arith.subf %230, %233 : vector<64x64xf32>
    %235 = math.exp %234 : vector<64x64xf32>
    %cst_203 = arith.constant dense<0.000000e+00> : vector<64xf32>
    %236 = vector.multi_reduction <add>, %235, %cst_203 [1] : vector<64x64xf32> to vector<64xf32>
    %237 = vector.shape_cast %236 : vector<64xf32> to vector<64x1xf32>
    %238 = vector.broadcast %237 : vector<64x1xf32> to vector<64x64xf32>
    %239 = arith.divf %235, %238 : vector<64x64xf32>
    %cst_204 = arith.constant dense<0.000000e+00> : vector<64x16xf32>
    %240 = tpu.matmul %239, %227, %cst_204 {dimension_numbers = #tpu.dot_dimension_numbers<[1], [0], [0], [1], [0, 0, 1, 1], [], []>} : vector<64x64xf32>, vector<64x16xf32>, vector<64x16xf32> -> vector<64x16xf32>
    %cst_205 = arith.constant dense<0.000000e+00> : vector<64x128xf32>
    %241 = tpu.matmul %240, %221, %cst_205 {dimension_numbers = #tpu.dot_dimension_numbers<[1], [0], [0], [1], [0, 0, 1, 1], [], []>} : vector<64x16xf32>, vector<16x128xf32>, vector<64x128xf32> -> vector<64x128xf32>
    %242 = arith.addf %199, %241 : vector<64x128xf32>
    %c0_206 = arith.constant 0 : index
    %c5_207 = arith.constant 5 : index
    %c0_208 = arith.constant 0 : index
    %c0_209 = arith.constant 0 : index
    %243 = vector.load %arg5[%c0_206, %c5_207, %c0_208, %c0_209] : memref<1x8x64x16xf32, #tpu.memory_space<vmem>>, vector<1x1x64x16xf32>
    %244 = vector.shape_cast %243 : vector<1x1x64x16xf32> to vector<64x16xf32>
    %c0_210 = arith.constant 0 : index
    %c5_211 = arith.constant 5 : index
    %c0_212 = arith.constant 0 : index
    %c0_213 = arith.constant 0 : index
    %245 = vector.load %arg3[%c0_210, %c5_211, %c0_212, %c0_213] : memref<1x8x64x16xf32, #tpu.memory_space<vmem>>, vector<1x1x64x16xf32>
    %246 = vector.shape_cast %245 : vector<1x1x64x16xf32> to vector<64x16xf32>
    %c0_214 = arith.constant 0 : index
    %c5_215 = arith.constant 5 : index
    %c0_216 = arith.constant 0 : index
    %c0_217 = arith.constant 0 : index
    %247 = vector.load %arg4[%c0_214, %c5_215, %c0_216, %c0_217] : memref<1x8x64x16xf32, #tpu.memory_space<vmem>>, vector<1x1x64x16xf32>
    %248 = vector.shape_cast %247 : vector<1x1x64x16xf32> to vector<64x16xf32>
    %cst_218 = arith.constant dense<0.000000e+00> : vector<64x64xf32>
    %249 = tpu.matmul %244, %246, %cst_218 {dimension_numbers = #tpu.dot_dimension_numbers<[1], [1], [0], [0], [0, 0, 1, 0], [], []>} : vector<64x16xf32>, vector<64x16xf32>, vector<64x64xf32> -> vector<64x64xf32>
    %cst_219 = arith.constant 2.500000e-01 : f32
    %250 = vector.broadcast %cst_219 : f32 to vector<64x64xf32>
    %251 = arith.mulf %249, %250 : vector<64x64xf32>
    %cst_220 = arith.constant dense<0xFF800000> : vector<64xf32>
    %252 = vector.multi_reduction <maximumf>, %251, %cst_220 [1] : vector<64x64xf32> to vector<64xf32>
    %253 = vector.shape_cast %252 : vector<64xf32> to vector<64x1xf32>
    %254 = vector.broadcast %253 : vector<64x1xf32> to vector<64x64xf32>
    %255 = arith.subf %251, %254 : vector<64x64xf32>
    %256 = math.exp %255 : vector<64x64xf32>
    %cst_221 = arith.constant dense<0.000000e+00> : vector<64xf32>
    %257 = vector.multi_reduction <add>, %256, %cst_221 [1] : vector<64x64xf32> to vector<64xf32>
    %258 = vector.shape_cast %257 : vector<64xf32> to vector<64x1xf32>
    %259 = vector.broadcast %258 : vector<64x1xf32> to vector<64x64xf32>
    %260 = arith.divf %256, %259 : vector<64x64xf32>
    %cst_222 = arith.constant dense<0.000000e+00> : vector<64x16xf32>
    %261 = tpu.matmul %260, %248, %cst_222 {dimension_numbers = #tpu.dot_dimension_numbers<[1], [0], [0], [1], [0, 0, 1, 1], [], []>} : vector<64x64xf32>, vector<64x16xf32>, vector<64x16xf32> -> vector<64x16xf32>
    %cst_223 = arith.constant dense<0.000000e+00> : vector<64x128xf32>
    %262 = tpu.matmul %261, %221, %cst_223 {dimension_numbers = #tpu.dot_dimension_numbers<[1], [0], [0], [1], [0, 0, 1, 1], [], []>} : vector<64x16xf32>, vector<16x128xf32>, vector<64x128xf32> -> vector<64x128xf32>
    %263 = arith.addf %220, %262 : vector<64x128xf32>
    %c96 = arith.constant 96 : index
    %c0_224 = arith.constant 0 : index
    %264 = vector.load %arg10[%c96, %c0_224] : memref<128x128xf32, #tpu.memory_space<vmem>>, vector<16x128xf32>
    %c0_225 = arith.constant 0 : index
    %c6 = arith.constant 6 : index
    %c0_226 = arith.constant 0 : index
    %c0_227 = arith.constant 0 : index
    %265 = vector.load %arg2[%c0_225, %c6, %c0_226, %c0_227] : memref<1x8x64x16xf32, #tpu.memory_space<vmem>>, vector<1x1x64x16xf32>
    %266 = vector.shape_cast %265 : vector<1x1x64x16xf32> to vector<64x16xf32>
    %c0_228 = arith.constant 0 : index
    %c6_229 = arith.constant 6 : index
    %c0_230 = arith.constant 0 : index
    %c0_231 = arith.constant 0 : index
    %267 = vector.load %arg6[%c0_228, %c6_229, %c0_230, %c0_231] : memref<1x8x64x16xf32, #tpu.memory_space<vmem>>, vector<1x1x64x16xf32>
    %268 = vector.shape_cast %267 : vector<1x1x64x16xf32> to vector<64x16xf32>
    %c0_232 = arith.constant 0 : index
    %c6_233 = arith.constant 6 : index
    %c0_234 = arith.constant 0 : index
    %c0_235 = arith.constant 0 : index
    %269 = vector.load %arg7[%c0_232, %c6_233, %c0_234, %c0_235] : memref<1x8x64x16xf32, #tpu.memory_space<vmem>>, vector<1x1x64x16xf32>
    %270 = vector.shape_cast %269 : vector<1x1x64x16xf32> to vector<64x16xf32>
    %cst_236 = arith.constant dense<0.000000e+00> : vector<64x64xf32>
    %271 = tpu.matmul %266, %268, %cst_236 {dimension_numbers = #tpu.dot_dimension_numbers<[1], [1], [0], [0], [0, 0, 1, 0], [], []>} : vector<64x16xf32>, vector<64x16xf32>, vector<64x64xf32> -> vector<64x64xf32>
    %cst_237 = arith.constant 2.500000e-01 : f32
    %272 = vector.broadcast %cst_237 : f32 to vector<64x64xf32>
    %273 = arith.mulf %271, %272 : vector<64x64xf32>
    %cst_238 = arith.constant dense<0xFF800000> : vector<64xf32>
    %274 = vector.multi_reduction <maximumf>, %273, %cst_238 [1] : vector<64x64xf32> to vector<64xf32>
    %275 = vector.shape_cast %274 : vector<64xf32> to vector<64x1xf32>
    %276 = vector.broadcast %275 : vector<64x1xf32> to vector<64x64xf32>
    %277 = arith.subf %273, %276 : vector<64x64xf32>
    %278 = math.exp %277 : vector<64x64xf32>
    %cst_239 = arith.constant dense<0.000000e+00> : vector<64xf32>
    %279 = vector.multi_reduction <add>, %278, %cst_239 [1] : vector<64x64xf32> to vector<64xf32>
    %280 = vector.shape_cast %279 : vector<64xf32> to vector<64x1xf32>
    %281 = vector.broadcast %280 : vector<64x1xf32> to vector<64x64xf32>
    %282 = arith.divf %278, %281 : vector<64x64xf32>
    %cst_240 = arith.constant dense<0.000000e+00> : vector<64x16xf32>
    %283 = tpu.matmul %282, %270, %cst_240 {dimension_numbers = #tpu.dot_dimension_numbers<[1], [0], [0], [1], [0, 0, 1, 1], [], []>} : vector<64x64xf32>, vector<64x16xf32>, vector<64x16xf32> -> vector<64x16xf32>
    %cst_241 = arith.constant dense<0.000000e+00> : vector<64x128xf32>
    %284 = tpu.matmul %283, %264, %cst_241 {dimension_numbers = #tpu.dot_dimension_numbers<[1], [0], [0], [1], [0, 0, 1, 1], [], []>} : vector<64x16xf32>, vector<16x128xf32>, vector<64x128xf32> -> vector<64x128xf32>
    %285 = arith.addf %242, %284 : vector<64x128xf32>
    %c0_242 = arith.constant 0 : index
    %c6_243 = arith.constant 6 : index
    %c0_244 = arith.constant 0 : index
    %c0_245 = arith.constant 0 : index
    %286 = vector.load %arg5[%c0_242, %c6_243, %c0_244, %c0_245] : memref<1x8x64x16xf32, #tpu.memory_space<vmem>>, vector<1x1x64x16xf32>
    %287 = vector.shape_cast %286 : vector<1x1x64x16xf32> to vector<64x16xf32>
    %c0_246 = arith.constant 0 : index
    %c6_247 = arith.constant 6 : index
    %c0_248 = arith.constant 0 : index
    %c0_249 = arith.constant 0 : index
    %288 = vector.load %arg3[%c0_246, %c6_247, %c0_248, %c0_249] : memref<1x8x64x16xf32, #tpu.memory_space<vmem>>, vector<1x1x64x16xf32>
    %289 = vector.shape_cast %288 : vector<1x1x64x16xf32> to vector<64x16xf32>
    %c0_250 = arith.constant 0 : index
    %c6_251 = arith.constant 6 : index
    %c0_252 = arith.constant 0 : index
    %c0_253 = arith.constant 0 : index
    %290 = vector.load %arg4[%c0_250, %c6_251, %c0_252, %c0_253] : memref<1x8x64x16xf32, #tpu.memory_space<vmem>>, vector<1x1x64x16xf32>
    %291 = vector.shape_cast %290 : vector<1x1x64x16xf32> to vector<64x16xf32>
    %cst_254 = arith.constant dense<0.000000e+00> : vector<64x64xf32>
    %292 = tpu.matmul %287, %289, %cst_254 {dimension_numbers = #tpu.dot_dimension_numbers<[1], [1], [0], [0], [0, 0, 1, 0], [], []>} : vector<64x16xf32>, vector<64x16xf32>, vector<64x64xf32> -> vector<64x64xf32>
    %cst_255 = arith.constant 2.500000e-01 : f32
    %293 = vector.broadcast %cst_255 : f32 to vector<64x64xf32>
    %294 = arith.mulf %292, %293 : vector<64x64xf32>
    %cst_256 = arith.constant dense<0xFF800000> : vector<64xf32>
    %295 = vector.multi_reduction <maximumf>, %294, %cst_256 [1] : vector<64x64xf32> to vector<64xf32>
    %296 = vector.shape_cast %295 : vector<64xf32> to vector<64x1xf32>
    %297 = vector.broadcast %296 : vector<64x1xf32> to vector<64x64xf32>
    %298 = arith.subf %294, %297 : vector<64x64xf32>
    %299 = math.exp %298 : vector<64x64xf32>
    %cst_257 = arith.constant dense<0.000000e+00> : vector<64xf32>
    %300 = vector.multi_reduction <add>, %299, %cst_257 [1] : vector<64x64xf32> to vector<64xf32>
    %301 = vector.shape_cast %300 : vector<64xf32> to vector<64x1xf32>
    %302 = vector.broadcast %301 : vector<64x1xf32> to vector<64x64xf32>
    %303 = arith.divf %299, %302 : vector<64x64xf32>
    %cst_258 = arith.constant dense<0.000000e+00> : vector<64x16xf32>
    %304 = tpu.matmul %303, %291, %cst_258 {dimension_numbers = #tpu.dot_dimension_numbers<[1], [0], [0], [1], [0, 0, 1, 1], [], []>} : vector<64x64xf32>, vector<64x16xf32>, vector<64x16xf32> -> vector<64x16xf32>
    %cst_259 = arith.constant dense<0.000000e+00> : vector<64x128xf32>
    %305 = tpu.matmul %304, %264, %cst_259 {dimension_numbers = #tpu.dot_dimension_numbers<[1], [0], [0], [1], [0, 0, 1, 1], [], []>} : vector<64x16xf32>, vector<16x128xf32>, vector<64x128xf32> -> vector<64x128xf32>
    %306 = arith.addf %263, %305 : vector<64x128xf32>
    %c112 = arith.constant 112 : index
    %c0_260 = arith.constant 0 : index
    %307 = vector.load %arg10[%c112, %c0_260] : memref<128x128xf32, #tpu.memory_space<vmem>>, vector<16x128xf32>
    %c0_261 = arith.constant 0 : index
    %c7 = arith.constant 7 : index
    %c0_262 = arith.constant 0 : index
    %c0_263 = arith.constant 0 : index
    %308 = vector.load %arg2[%c0_261, %c7, %c0_262, %c0_263] : memref<1x8x64x16xf32, #tpu.memory_space<vmem>>, vector<1x1x64x16xf32>
    %309 = vector.shape_cast %308 : vector<1x1x64x16xf32> to vector<64x16xf32>
    %c0_264 = arith.constant 0 : index
    %c7_265 = arith.constant 7 : index
    %c0_266 = arith.constant 0 : index
    %c0_267 = arith.constant 0 : index
    %310 = vector.load %arg6[%c0_264, %c7_265, %c0_266, %c0_267] : memref<1x8x64x16xf32, #tpu.memory_space<vmem>>, vector<1x1x64x16xf32>
    %311 = vector.shape_cast %310 : vector<1x1x64x16xf32> to vector<64x16xf32>
    %c0_268 = arith.constant 0 : index
    %c7_269 = arith.constant 7 : index
    %c0_270 = arith.constant 0 : index
    %c0_271 = arith.constant 0 : index
    %312 = vector.load %arg7[%c0_268, %c7_269, %c0_270, %c0_271] : memref<1x8x64x16xf32, #tpu.memory_space<vmem>>, vector<1x1x64x16xf32>
    %313 = vector.shape_cast %312 : vector<1x1x64x16xf32> to vector<64x16xf32>
    %cst_272 = arith.constant dense<0.000000e+00> : vector<64x64xf32>
    %314 = tpu.matmul %309, %311, %cst_272 {dimension_numbers = #tpu.dot_dimension_numbers<[1], [1], [0], [0], [0, 0, 1, 0], [], []>} : vector<64x16xf32>, vector<64x16xf32>, vector<64x64xf32> -> vector<64x64xf32>
    %cst_273 = arith.constant 2.500000e-01 : f32
    %315 = vector.broadcast %cst_273 : f32 to vector<64x64xf32>
    %316 = arith.mulf %314, %315 : vector<64x64xf32>
    %cst_274 = arith.constant dense<0xFF800000> : vector<64xf32>
    %317 = vector.multi_reduction <maximumf>, %316, %cst_274 [1] : vector<64x64xf32> to vector<64xf32>
    %318 = vector.shape_cast %317 : vector<64xf32> to vector<64x1xf32>
    %319 = vector.broadcast %318 : vector<64x1xf32> to vector<64x64xf32>
    %320 = arith.subf %316, %319 : vector<64x64xf32>
    %321 = math.exp %320 : vector<64x64xf32>
    %cst_275 = arith.constant dense<0.000000e+00> : vector<64xf32>
    %322 = vector.multi_reduction <add>, %321, %cst_275 [1] : vector<64x64xf32> to vector<64xf32>
    %323 = vector.shape_cast %322 : vector<64xf32> to vector<64x1xf32>
    %324 = vector.broadcast %323 : vector<64x1xf32> to vector<64x64xf32>
    %325 = arith.divf %321, %324 : vector<64x64xf32>
    %cst_276 = arith.constant dense<0.000000e+00> : vector<64x16xf32>
    %326 = tpu.matmul %325, %313, %cst_276 {dimension_numbers = #tpu.dot_dimension_numbers<[1], [0], [0], [1], [0, 0, 1, 1], [], []>} : vector<64x64xf32>, vector<64x16xf32>, vector<64x16xf32> -> vector<64x16xf32>
    %cst_277 = arith.constant dense<0.000000e+00> : vector<64x128xf32>
    %327 = tpu.matmul %326, %307, %cst_277 {dimension_numbers = #tpu.dot_dimension_numbers<[1], [0], [0], [1], [0, 0, 1, 1], [], []>} : vector<64x16xf32>, vector<16x128xf32>, vector<64x128xf32> -> vector<64x128xf32>
    %328 = arith.addf %285, %327 : vector<64x128xf32>
    %c0_278 = arith.constant 0 : index
    %c7_279 = arith.constant 7 : index
    %c0_280 = arith.constant 0 : index
    %c0_281 = arith.constant 0 : index
    %329 = vector.load %arg5[%c0_278, %c7_279, %c0_280, %c0_281] : memref<1x8x64x16xf32, #tpu.memory_space<vmem>>, vector<1x1x64x16xf32>
    %330 = vector.shape_cast %329 : vector<1x1x64x16xf32> to vector<64x16xf32>
    %c0_282 = arith.constant 0 : index
    %c7_283 = arith.constant 7 : index
    %c0_284 = arith.constant 0 : index
    %c0_285 = arith.constant 0 : index
    %331 = vector.load %arg3[%c0_282, %c7_283, %c0_284, %c0_285] : memref<1x8x64x16xf32, #tpu.memory_space<vmem>>, vector<1x1x64x16xf32>
    %332 = vector.shape_cast %331 : vector<1x1x64x16xf32> to vector<64x16xf32>
    %c0_286 = arith.constant 0 : index
    %c7_287 = arith.constant 7 : index
    %c0_288 = arith.constant 0 : index
    %c0_289 = arith.constant 0 : index
    %333 = vector.load %arg4[%c0_286, %c7_287, %c0_288, %c0_289] : memref<1x8x64x16xf32, #tpu.memory_space<vmem>>, vector<1x1x64x16xf32>
    %334 = vector.shape_cast %333 : vector<1x1x64x16xf32> to vector<64x16xf32>
    %cst_290 = arith.constant dense<0.000000e+00> : vector<64x64xf32>
    %335 = tpu.matmul %330, %332, %cst_290 {dimension_numbers = #tpu.dot_dimension_numbers<[1], [1], [0], [0], [0, 0, 1, 0], [], []>} : vector<64x16xf32>, vector<64x16xf32>, vector<64x64xf32> -> vector<64x64xf32>
    %cst_291 = arith.constant 2.500000e-01 : f32
    %336 = vector.broadcast %cst_291 : f32 to vector<64x64xf32>
    %337 = arith.mulf %335, %336 : vector<64x64xf32>
    %cst_292 = arith.constant dense<0xFF800000> : vector<64xf32>
    %338 = vector.multi_reduction <maximumf>, %337, %cst_292 [1] : vector<64x64xf32> to vector<64xf32>
    %339 = vector.shape_cast %338 : vector<64xf32> to vector<64x1xf32>
    %340 = vector.broadcast %339 : vector<64x1xf32> to vector<64x64xf32>
    %341 = arith.subf %337, %340 : vector<64x64xf32>
    %342 = math.exp %341 : vector<64x64xf32>
    %cst_293 = arith.constant dense<0.000000e+00> : vector<64xf32>
    %343 = vector.multi_reduction <add>, %342, %cst_293 [1] : vector<64x64xf32> to vector<64xf32>
    %344 = vector.shape_cast %343 : vector<64xf32> to vector<64x1xf32>
    %345 = vector.broadcast %344 : vector<64x1xf32> to vector<64x64xf32>
    %346 = arith.divf %342, %345 : vector<64x64xf32>
    %cst_294 = arith.constant dense<0.000000e+00> : vector<64x16xf32>
    %347 = tpu.matmul %346, %334, %cst_294 {dimension_numbers = #tpu.dot_dimension_numbers<[1], [0], [0], [1], [0, 0, 1, 1], [], []>} : vector<64x64xf32>, vector<64x16xf32>, vector<64x16xf32> -> vector<64x16xf32>
    %cst_295 = arith.constant dense<0.000000e+00> : vector<64x128xf32>
    %348 = tpu.matmul %347, %307, %cst_295 {dimension_numbers = #tpu.dot_dimension_numbers<[1], [0], [0], [1], [0, 0, 1, 1], [], []>} : vector<64x16xf32>, vector<16x128xf32>, vector<64x128xf32> -> vector<64x128xf32>
    %349 = arith.addf %306, %348 : vector<64x128xf32>
    %c0_296 = arith.constant 0 : index
    %c0_297 = arith.constant 0 : index
    %350 = vector.load %arg11[%c0_296, %c0_297] : memref<1x128xf32, #tpu.memory_space<vmem>>, vector<1x128xf32>
    %351 = vector.broadcast %350 : vector<1x128xf32> to vector<64x128xf32>
    %352 = arith.addf %328, %351 : vector<64x128xf32>
    %353 = vector.broadcast %350 : vector<1x128xf32> to vector<64x128xf32>
    %354 = arith.addf %349, %353 : vector<64x128xf32>
    %cst_298 = arith.constant 1.000000e+00 : f32
    %355 = vector.broadcast %cst_298 : f32 to vector<64x128xf32>
    %356 = arith.addf %355, %352 : vector<64x128xf32>
    %357 = arith.mulf %1, %356 : vector<64x128xf32>
    %cst_299 = arith.constant 1.000000e+00 : f32
    %358 = vector.broadcast %cst_299 : f32 to vector<64x128xf32>
    %359 = arith.addf %358, %354 : vector<64x128xf32>
    %360 = arith.mulf %3, %359 : vector<64x128xf32>
    %361 = arith.addf %357, %360 : vector<64x128xf32>
    %c0_300 = arith.constant 0 : index
    %c0_301 = arith.constant 0 : index
    %c0_302 = arith.constant 0 : index
    %362 = vector.load %arg12[%c0_300, %c0_301, %c0_302] : memref<1x64x128xf32, #tpu.memory_space<vmem>>, vector<1x64x128xf32>
    %363 = vector.shape_cast %362 : vector<1x64x128xf32> to vector<64x128xf32>
    %364 = vector.shape_cast %361 : vector<64x128xf32> to vector<1x64x128xf32>
    tpu.vector_store %arg12[%c0_300, %c0_301, %c0_302], %364 {strides = array<i32>} : memref<1x64x128xf32, #tpu.memory_space<vmem>>, vector<1x64x128xf32>,
    return
  }
  func.func @transform_0(%arg0: i32, %arg1: i32) -> (i32, i32, i32, i32) {
    %c0_i32 = arith.constant 0 : i32
    %c0_i32_0 = arith.constant 0 : i32
    %c0_i32_1 = arith.constant 0 : i32
    return %arg0, %c0_i32, %arg1, %c0_i32_0 : i32, i32, i32, i32
  }
  func.func @transform_1(%arg0: i32, %arg1: i32) -> (i32, i32, i32, i32) {
    %c0_i32 = arith.constant 0 : i32
    %c0_i32_0 = arith.constant 0 : i32
    %c0_i32_1 = arith.constant 0 : i32
    %c0_i32_2 = arith.constant 0 : i32
    return %arg0, %c0_i32, %c0_i32_0, %c0_i32_1 : i32, i32, i32, i32
  }
  func.func @transform_2(%arg0: i32, %arg1: i32) -> (i32, i32, i32, i32) {
    %c0_i32 = arith.constant 0 : i32
    %c0_i32_0 = arith.constant 0 : i32
    %c0_i32_1 = arith.constant 0 : i32
    %c0_i32_2 = arith.constant 0 : i32
    return %arg0, %c0_i32, %c0_i32_0, %c0_i32_1 : i32, i32, i32, i32
  }
  func.func @transform_3(%arg0: i32, %arg1: i32) -> (i32, i32, i32, i32) {
    %c0_i32 = arith.constant 0 : i32
    %c0_i32_0 = arith.constant 0 : i32
    %c0_i32_1 = arith.constant 0 : i32
    return %arg0, %c0_i32, %arg1, %c0_i32_0 : i32, i32, i32, i32
  }
  func.func @transform_4(%arg0: i32, %arg1: i32) -> (i32, i32, i32, i32) {
    %c0_i32 = arith.constant 0 : i32
    %c0_i32_0 = arith.constant 0 : i32
    %c0_i32_1 = arith.constant 0 : i32
    %c0_i32_2 = arith.constant 0 : i32
    return %arg0, %c0_i32, %c0_i32_0, %c0_i32_1 : i32, i32, i32, i32
  }
  func.func @transform_5(%arg0: i32, %arg1: i32) -> (i32, i32, i32, i32) {
    %c0_i32 = arith.constant 0 : i32
    %c0_i32_0 = arith.constant 0 : i32
    %c0_i32_1 = arith.constant 0 : i32
    %c0_i32_2 = arith.constant 0 : i32
    return %arg0, %c0_i32, %c0_i32_0, %c0_i32_1 : i32, i32, i32, i32
  }
  func.func @transform_6(%arg0: i32, %arg1: i32) -> (i32, i32, i32) {
    %c0_i32 = arith.constant 0 : i32
    %c0_i32_0 = arith.constant 0 : i32
    return %arg0, %arg1, %c0_i32 : i32, i32, i32
  }
  func.func @transform_7(%arg0: i32, %arg1: i32) -> (i32, i32, i32) {
    %c0_i32 = arith.constant 0 : i32
    %c0_i32_0 = arith.constant 0 : i32
    return %arg0, %arg1, %c0_i32 : i32, i32, i32
  }
  func.func @transform_8(%arg0: i32, %arg1: i32) -> (i32, i32) {
    %c0_i32 = arith.constant 0 : i32
    %c0_i32_0 = arith.constant 0 : i32
    %c0_i32_1 = arith.constant 0 : i32
    return %c0_i32, %c0_i32_0 : i32, i32
  }
  func.func @transform_9(%arg0: i32, %arg1: i32) -> (i32, i32) {
    %c0_i32 = arith.constant 0 : i32
    %c0_i32_0 = arith.constant 0 : i32
    %c0_i32_1 = arith.constant 0 : i32
    return %c0_i32, %c0_i32_0 : i32, i32
  }
  func.func @transform_10(%arg0: i32, %arg1: i32) -> (i32, i32, i32) {
    %c0_i32 = arith.constant 0 : i32
    %c0_i32_0 = arith.constant 0 : i32
    return %arg0, %arg1, %c0_i32 : i32, i32, i32
  }
}

</mosaic_0001>

<bundles_post_ra>
// kernel: mi_attention.2
= control target key start
LH: loop header
LB: loop body
LE: loop exit
PB: predicated region body
PF: predicated region fallthrough
CT: control target
= control target key end

     0   :  { %v834_v3 = vmov 0.0   ;;  %s1458_s1 = inlined_call_operand.vmem [shape: f32[128,384], index: 1, kind: input, shape index: {}]   ;;  %s1459_s0 = inlined_call_operand.vmem [shape: f32[256,128], index: 0, kind: input, shape index: {}]   ;;  %s1460_s2 = inlined_call_operand.vmem [shape: f32[256,384], index: 2, kind: output, shape index: {}]  }
   0x1   :  { %v89_v0 = vld [vmem:[%s1458_s1 + $0x170] sm:$0xff]  ;;  %v88_v1 = vld [vmem:[%s1458_s1 + $0x168] sm:$0xff]  ;;  %v86_v2 = vld [vmem:[%s1458_s1 + $0x158] sm:$0xff]  ;;  %155 = vmatprep.mubr.f32.mxu0 %v834_v3  ;;  %299 = vmatprep.mubr.f32.mxu1 %v834_v3 }
   0x2   :  { %91 = vmatprep.subr.mxu0 %v89_v0  ;;  %801 = vmatprep.subr.mxu1 %v89_v0  ;;  %v85_v4 = vld [vmem:[%s1458_s1 + $0x150] sm:$0xff]  ;;  %v83_v5 = vld [vmem:[%s1458_s1 + $0x140] sm:$0xff]  ;;  %v82_v6 = vld [vmem:[%s1458_s1 + $0x138] sm:$0xff] }
   0x3   :  { %92 = vmatpush1.msra.mxu0 %v88_v1  ;;  %817 = vmatpush1.msra.mxu1 %v88_v1  ;;  %v80_v7 = vld [vmem:[%s1458_s1 + $0x128] sm:$0xff]  ;;  %v79_v8 = vld [vmem:[%s1458_s1 + $0x120] sm:$0xff]  ;;  %v77_v9 = vld [vmem:[%s1458_s1 + $0x110] sm:$0xff] }
   0x4   :  { %93 = vmatprep.subr.mxu0 %v86_v2  ;;  %802 = vmatprep.subr.mxu1 %v86_v2  ;;  %v76_v10 = vld [vmem:[%s1458_s1 + $0x108] sm:$0xff]  ;;  %v74_v11 = vld [vmem:[%s1458_s1 + $0xf8] sm:$0xff]  ;;  %v73_v12 = vld [vmem:[%s1458_s1 + $0xf0] sm:$0xff] }
   0x5   :  { %94 = vmatpush1.msra.mxu0 %v85_v4  ;;  %818 = vmatpush1.msra.mxu1 %v85_v4  ;;  %v71_v13 = vld [vmem:[%s1458_s1 + $0xe0] sm:$0xff]  ;;  %v70_v14 = vld [vmem:[%s1458_s1 + $0xd8] sm:$0xff]  ;;  %v68_v15 = vld [vmem:[%s1458_s1 + $0xc8] sm:$0xff] }
   0x6   :  { %95 = vmatprep.subr.mxu0 %v83_v5  ;;  %803 = vmatprep.subr.mxu1 %v83_v5  ;;  %v67_v16 = vld [vmem:[%s1458_s1 + $0xc0] sm:$0xff]  ;;  %v65_v17 = vld [vmem:[%s1458_s1 + $0xb0] sm:$0xff]  ;;  %v64_v18 = vld [vmem:[%s1458_s1 + $0xa8] sm:$0xff] }
   0x7   :  { %96 = vmatpush1.msra.mxu0 %v82_v6  ;;  %819 = vmatpush1.msra.mxu1 %v82_v6  ;;  %v62_v19 = vld [vmem:[%s1458_s1 + $0x98] sm:$0xff]  ;;  %v61_v20 = vld [vmem:[%s1458_s1 + $0x90] sm:$0xff]  ;;  %v59_v21 = vld [vmem:[%s1458_s1 + $0x80] sm:$0xff] }
   0x8   :  { %97 = vmatprep.subr.mxu0 %v80_v7  ;;  %804 = vmatprep.subr.mxu1 %v80_v7  ;;  %v58_v22 = vld [vmem:[%s1458_s1 + $0x78] sm:$0xff]  ;;  %v56_v23 = vld [vmem:[%s1458_s1 + $0x68] sm:$0xff]  ;;  %v55_v24 = vld [vmem:[%s1458_s1 + $0x60] sm:$0xff] }
   0x9   :  { %98 = vmatpush1.msra.mxu0 %v79_v8  ;;  %820 = vmatpush1.msra.mxu1 %v79_v8  ;;  %v53_v25 = vld [vmem:[%s1458_s1 + $0x50] sm:$0xff]  ;;  %v52_v26 = vld [vmem:[%s1458_s1 + $0x48] sm:$0xff]  ;;  %v50_v27 = vld [vmem:[%s1458_s1 + $0x38] sm:$0xff] }
   0xa   :  { %99 = vmatprep.subr.mxu0 %v77_v9  ;;  %805 = vmatprep.subr.mxu1 %v77_v9  ;;  %v49_v28 = vld [vmem:[%s1458_s1 + $0x30] sm:$0xff]  ;;  %v47_v29 = vld [vmem:[%s1458_s1 + $0x20] sm:$0xff]  ;;  %v46_v30 = vld [vmem:[%s1458_s1 + $0x18] sm:$0xff] }
   0xb   :  { %100 = vmatpush1.msra.mxu0 %v76_v10  ;;  %821 = vmatpush1.msra.mxu1 %v76_v10  ;;  %v44_v31 = vld [vmem:[%s1458_s1 + $0x8] sm:$0xff]  ;;  %v43_v32 = vld [vmem:[%s1458_s1] sm:$0xff]  ;;  %v90_v35 = vld [vmem:[%s1458_s1 + $0x178] sm:$0xff] }
   0xc   :  { %101 = vmatprep.subr.mxu0 %v74_v11  ;;  %806 = vmatprep.subr.mxu1 %v74_v11  ;;  %v951_v33 = vld [vmem:[%s1459_s0] sm:$0xff]  ;;  %v970_v37 = vld [vmem:[%s1459_s0 + $0x8] sm:$0xff]  ;;  %v81_v40 = vld [vmem:[%s1458_s1 + $0x130] sm:$0xff] }
   0xd   :  { %102 = vmatpush1.msra.mxu0 %v73_v12  ;;  %822 = vmatpush1.msra.mxu1 %v73_v12  ;;  %v956_v34 = vld [vmem:[%s1459_s0 + $0xc0] sm:$0xff]  ;;  %v976_v38 = vld [vmem:[%s1459_s0 + $0xc8] sm:$0xff]  ;;  %v989_v41 = vld [vmem:[%s1459_s0 + $0x10] sm:$0xff] }
   0xe   :  { %103 = vmatprep.subr.mxu0 %v71_v13  ;;  %807 = vmatprep.subr.mxu1 %v71_v13  ;;  %v87_v36 = vld [vmem:[%s1458_s1 + $0x160] sm:$0xff]  ;;  %v84_v39 = vld [vmem:[%s1458_s1 + $0x148] sm:$0xff]  ;;  %v995_v42 = vld [vmem:[%s1459_s0 + $0xd0] sm:$0xff] }
   0xf   :  { %104 = vmatpush1.msra.mxu0 %v70_v14  ;;  %823 = vmatpush1.msra.mxu1 %v70_v14  ;;  %v78_v43 = vld [vmem:[%s1458_s1 + $0x118] sm:$0xff]  ;;  %v75_v44 = vld [vmem:[%s1458_s1 + $0x100] sm:$0xff]  ;;  %v72_v47 = vld [vmem:[%s1458_s1 + $0xe8] sm:$0xff] }
  0x10   :  { %105 = vmatprep.subr.mxu0 %v68_v15  ;;  %808 = vmatprep.subr.mxu1 %v68_v15  ;;  %v1009_v45 = vld [vmem:[%s1459_s0 + $0x18] sm:$0xff]  ;;  %v69_v48 = vld [vmem:[%s1458_s1 + $0xd0] sm:$0xff]  ;;  %v15_v49 = vld [vmem:[%s1459_s0 + $0x20] sm:$0xff] }
  0x11   :  { %106 = vmatpush1.msra.mxu0 %v67_v16  ;;  %824 = vmatpush1.msra.mxu1 %v67_v16  ;;  %v1015_v46 = vld [vmem:[%s1459_s0 + $0xd8] sm:$0xff]  ;;  %v1033_v50 = vld [vmem:[%s1459_s0 + $0xe0] sm:$0xff]  ;;  %v16_v53 = vld [vmem:[%s1459_s0 + $0x28] sm:$0xff] }
  0x12   :  { %107 = vmatprep.subr.mxu0 %v65_v17  ;;  %809 = vmatprep.subr.mxu1 %v65_v17  ;;  %v66_v51 = vld [vmem:[%s1458_s1 + $0xb8] sm:$0xff]  ;;  %v63_v52 = vld [vmem:[%s1458_s1 + $0xa0] sm:$0xff]  ;;  %v1050_v54 = vld [vmem:[%s1459_s0 + $0xe8] sm:$0xff] }
  0x13   :  { %108 = vmatpush1.msra.mxu0 %v64_v18  ;;  %825 = vmatpush1.msra.mxu1 %v64_v18  ;;  %v60_v55 = vld [vmem:[%s1458_s1 + $0x88] sm:$0xff]  ;;  %v57_v56 = vld [vmem:[%s1458_s1 + $0x70] sm:$0xff]  ;;  %v54_v59 = vld [vmem:[%s1458_s1 + $0x58] sm:$0xff] }
  0x14   :  { %109 = vmatprep.subr.mxu0 %v62_v19  ;;  %810 = vmatprep.subr.mxu1 %v62_v19  ;;  %v17_v57 = vld [vmem:[%s1459_s0 + $0x30] sm:$0xff]  ;;  %v51_v60 = vld [vmem:[%s1458_s1 + $0x40] sm:$0xff]  ;;  %v18_v61 = vld [vmem:[%s1459_s0 + $0x38] sm:$0xff] }
  0x15   :  { %110 = vmatpush1.msra.mxu0 %v61_v20  ;;  %826 = vmatpush1.msra.mxu1 %v61_v20  ;;  %v1067_v58 = vld [vmem:[%s1459_s0 + $0xf0] sm:$0xff]  ;;  %v1084_v62 = vld [vmem:[%s1459_s0 + $0xf8] sm:$0xff]  ;;  %v48_v63 = vld [vmem:[%s1458_s1 + $0x28] sm:$0xff] }
  0x16   :  { %111 = vmatprep.subr.mxu0 %v59_v21  ;;  %811 = vmatprep.subr.mxu1 %v59_v21  ;;  %v45_v0 = vld [vmem:[%s1458_s1 + $0x10] sm:$0xff]  ;;  %v19_v1 = vld [vmem:[%s1459_s0 + $0x40] sm:$0xff]  ;;  %v20_v2 = vld [vmem:[%s1459_s0 + $0x48] sm:$0xff] }
  0x17   :  { %112 = vmatpush1.msra.mxu0 %v58_v22  ;;  %827 = vmatpush1.msra.mxu1 %v58_v22  ;;  %v21_v4 = vld [vmem:[%s1459_s0 + $0x50] sm:$0xff]  ;;  %v22_v5 = vld [vmem:[%s1459_s0 + $0x58] sm:$0xff]  ;;  %v23_v6 = vld [vmem:[%s1459_s0 + $0x60] sm:$0xff] }
  0x18   :  { %113 = vmatprep.subr.mxu0 %v56_v23  ;;  %812 = vmatprep.subr.mxu1 %v56_v23  ;;  %v24_v7 = vld [vmem:[%s1459_s0 + $0x68] sm:$0xff]  ;;  %v25_v8 = vld [vmem:[%s1459_s0 + $0x70] sm:$0xff]  ;;  %v26_v9 = vld [vmem:[%s1459_s0 + $0x78] sm:$0xff] }
  0x19   :  { %114 = vmatpush1.msra.mxu0 %v55_v24  ;;  %828 = vmatpush1.msra.mxu1 %v55_v24  ;;  %v27_v10 = vld [vmem:[%s1459_s0 + $0x80] sm:$0xff]  ;;  %v28_v11 = vld [vmem:[%s1459_s0 + $0x88] sm:$0xff]  ;;  %v29_v12 = vld [vmem:[%s1459_s0 + $0x90] sm:$0xff] }
  0x1a   :  { %115 = vmatprep.subr.mxu0 %v53_v25  ;;  %813 = vmatprep.subr.mxu1 %v53_v25  ;;  %v30_v13 = vld [vmem:[%s1459_s0 + $0x98] sm:$0xff]  ;;  %v31_v14 = vld [vmem:[%s1459_s0 + $0xa0] sm:$0xff]  ;;  %v32_v15 = vld [vmem:[%s1459_s0 + $0xa8] sm:$0xff] }
  0x1b   :  { %116 = vmatpush1.msra.mxu0 %v52_v26  ;;  %829 = vmatpush1.msra.mxu1 %v52_v26  ;;  %v33_v16 = vld [vmem:[%s1459_s0 + $0xb0] sm:$0xff]  ;;  %v34_v17 = vld [vmem:[%s1459_s0 + $0xb8] sm:$0xff] }
  0x1c   :  { %117 = vmatprep.subr.mxu0 %v50_v27  ;;  %814 = vmatprep.subr.mxu1 %v50_v27 }
  0x1d   :  { %118 = vmatpush1.msra.mxu0 %v49_v28  ;;  %830 = vmatpush1.msra.mxu1 %v49_v28 }
  0x1e   :  { %119 = vmatprep.subr.mxu0 %v47_v29  ;;  %815 = vmatprep.subr.mxu1 %v47_v29 }
  0x1f   :  { %120 = vmatpush1.msra.mxu0 %v46_v30  ;;  %831 = vmatpush1.msra.mxu1 %v46_v30 }
  0x20   :  { %121 = vmatprep.subr.mxu0 %v44_v31  ;;  %816 = vmatprep.subr.mxu1 %v44_v31 }
  0x21   :  { %122 = vmatpush1.msra.mxu0 %v43_v32  ;;  %832 = vmatpush1.msra.mxu1 %v43_v32 }
  0x22   :  { %156 = vmatmul.mubr.f32.vlgmr.msra.gmra.mxu0 %v951_v33  ;;  %300 = vmatmul.mubr.f32.vlgmr.msra.gmra.mxu1 %v956_v34 }
  0x23   :  { %721 = vmatprep.subr.mxu1 %v90_v35  ;;  %161 = vmatprep.mubr.f32.mxu0 %v834_v3 }
  0x24   :  { %722 = vmatpush3.msra.mxu1 %v90_v35  ;;  %305 = vmatprep.mubr.f32.mxu1 %v834_v3 }
  0x25   :  { %723 = vmatprep.subr.mxu1 %v87_v36 }
  0x26   :  { %724 = vmatpush3.msra.mxu1 %v87_v36  ;;  %162 = vmatmul.mubr.f32.gmra.mxu0 %v970_v37 }
  0x27   :  { %306 = vmatmul.mubr.f32.gmra.mxu1 %v976_v38  ;;  %725 = vmatprep.subr.mxu1 %v84_v39 }
  0x28   :  { %726 = vmatpush3.msra.mxu1 %v84_v39  ;;  %167 = vmatprep.mubr.f32.mxu0 %v834_v3 }
  0x29   :  { %727 = vmatprep.subr.mxu1 %v81_v40  ;;  %311 = vmatprep.mubr.f32.mxu1 %v834_v3 }
  0x2a   :  { %728 = vmatpush3.msra.mxu1 %v81_v40  ;;  %168 = vmatmul.mubr.f32.gmra.mxu0 %v989_v41 }
  0x2b   :  { %312 = vmatmul.mubr.f32.gmra.mxu1 %v995_v42  ;;  %729 = vmatprep.subr.mxu1 %v78_v43 }
  0x2c   :  { %730 = vmatpush3.msra.mxu1 %v78_v43  ;;  %173 = vmatprep.mubr.f32.mxu0 %v834_v3 }
  0x2d   :  { %731 = vmatprep.subr.mxu1 %v75_v44  ;;  %317 = vmatprep.mubr.f32.mxu1 %v834_v3 }
  0x2e   :  { %732 = vmatpush3.msra.mxu1 %v75_v44  ;;  %174 = vmatmul.mubr.f32.gmra.mxu0 %v1009_v45 }
  0x2f   :  { %318 = vmatmul.mubr.f32.gmra.mxu1 %v1015_v46  ;;  %733 = vmatprep.subr.mxu1 %v72_v47 }
  0x30   :  { %734 = vmatpush3.msra.mxu1 %v72_v47  ;;  %179 = vmatprep.mubr.f32.mxu0 %v834_v3 }
  0x31   :  { %735 = vmatprep.subr.mxu1 %v69_v48  ;;  %323 = vmatprep.mubr.f32.mxu1 %v834_v3 }
  0x32   :  { %736 = vmatpush3.msra.mxu1 %v69_v48  ;;  %180 = vmatmul.mubr.f32.gmra.mxu0 %v15_v49 }
  0x33   :  { %324 = vmatmul.mubr.f32.gmra.mxu1 %v1033_v50  ;;  %737 = vmatprep.subr.mxu1 %v66_v51 }
  0x34   :  { %738 = vmatpush3.msra.mxu1 %v66_v51  ;;  %185 = vmatprep.mubr.f32.mxu0 %v834_v3 }
  0x35   :  { %739 = vmatprep.subr.mxu1 %v63_v52  ;;  %329 = vmatprep.mubr.f32.mxu1 %v834_v3 }
  0x36   :  { %740 = vmatpush3.msra.mxu1 %v63_v52  ;;  %186 = vmatmul.mubr.f32.gmra.mxu0 %v16_v53 }
  0x37   :  { %330 = vmatmul.mubr.f32.gmra.mxu1 %v1050_v54  ;;  %741 = vmatprep.subr.mxu1 %v60_v55 }
  0x38   :  { %742 = vmatpush3.msra.mxu1 %v60_v55  ;;  %191 = vmatprep.mubr.f32.mxu0 %v834_v3 }
  0x39   :  { %743 = vmatprep.subr.mxu1 %v57_v56  ;;  %335 = vmatprep.mubr.f32.mxu1 %v834_v3 }
  0x3a   :  { %744 = vmatpush3.msra.mxu1 %v57_v56  ;;  %192 = vmatmul.mubr.f32.gmra.mxu0 %v17_v57 }
  0x3b   :  { %336 = vmatmul.mubr.f32.gmra.mxu1 %v1067_v58  ;;  %745 = vmatprep.subr.mxu1 %v54_v59 }
  0x3c   :  { %746 = vmatpush3.msra.mxu1 %v54_v59  ;;  %197 = vmatprep.mubr.f32.mxu0 %v834_v3 }
  0x3d   :  { %747 = vmatprep.subr.mxu1 %v51_v60  ;;  %341 = vmatprep.mubr.f32.mxu1 %v834_v3 }
  0x3e   :  { %748 = vmatpush3.msra.mxu1 %v51_v60  ;;  %198 = vmatmul.mubr.f32.gmra.mxu0 %v18_v61 }
  0x3f   :  { %342 = vmatmul.mubr.f32.gmra.mxu1 %v1084_v62  ;;  %749 = vmatprep.subr.mxu1 %v48_v63 }
  0x40   :  { %750 = vmatpush3.msra.mxu1 %v48_v63  ;;  %203 = vmatprep.mubr.f32.mxu0 %v834_v3 }
  0x41   :  { %751 = vmatprep.subr.mxu1 %v45_v0  ;;  %753 = vmatprep.mubr.f32.mxu1 %v951_v33 }
  0x42   :  { %752 = vmatpush3.msra.mxu1 %v45_v0  ;;  %204 = vmatmul.mubr.f32.gmra.mxu0 %v19_v1 }
  0x43   :  { %754 = vmatmul.mubr.f32.vlgmr.msra.gmra.mxu1 %v970_v37  ;;  %209 = vmatprep.mubr.f32.mxu0 %v834_v3 }
  0x44   :  { %756 = vmatprep.mubr.f32.mxu1 %v989_v41 }
  0x46   :  { %210 = vmatmul.mubr.f32.gmra.mxu0 %v20_v2 }
  0x47   :  { %757 = vmatmul.mubr.f32.gmra.mxu1 %v1009_v45  ;;  %215 = vmatprep.mubr.f32.mxu0 %v834_v3 }
  0x48   :  { %759 = vmatprep.mubr.f32.mxu1 %v15_v49 }
  0x4a   :  { %216 = vmatmul.mubr.f32.gmra.mxu0 %v21_v4 }
  0x4b   :  { %760 = vmatmul.mubr.f32.gmra.mxu1 %v16_v53  ;;  %221 = vmatprep.mubr.f32.mxu0 %v834_v3 }
  0x4c   :  { %762 = vmatprep.mubr.f32.mxu1 %v17_v57 }
  0x4e   :  { %222 = vmatmul.mubr.f32.gmra.mxu0 %v22_v5 }
  0x4f   :  { %763 = vmatmul.mubr.f32.gmra.mxu1 %v18_v61  ;;  %227 = vmatprep.mubr.f32.mxu0 %v834_v3 }
  0x50   :  { %765 = vmatprep.mubr.f32.mxu1 %v19_v1 }
  0x52   :  { %228 = vmatmul.mubr.f32.gmra.mxu0 %v23_v6 }
  0x53   :  { %766 = vmatmul.mubr.f32.gmra.mxu1 %v20_v2  ;;  %233 = vmatprep.mubr.f32.mxu0 %v834_v3 }
  0x54   :  { %768 = vmatprep.mubr.f32.mxu1 %v21_v4 }
  0x56   :  { %234 = vmatmul.mubr.f32.gmra.mxu0 %v24_v7 }
  0x57   :  { %769 = vmatmul.mubr.f32.gmra.mxu1 %v22_v5  ;;  %239 = vmatprep.mubr.f32.mxu0 %v834_v3 }
  0x58   :  { %771 = vmatprep.mubr.f32.mxu1 %v23_v6 }
  0x5a   :  { %240 = vmatmul.mubr.f32.gmra.mxu0 %v25_v8 }
  0x5b   :  { %772 = vmatmul.mubr.f32.gmra.mxu1 %v24_v7  ;;  %245 = vmatprep.mubr.f32.mxu0 %v834_v3 }
  0x5c   :  { %774 = vmatprep.mubr.f32.mxu1 %v25_v8 }
  0x5e   :  { %246 = vmatmul.mubr.f32.gmra.mxu0 %v26_v9 }
  0x5f   :  { %775 = vmatmul.mubr.f32.gmra.mxu1 %v26_v9  ;;  %251 = vmatprep.mubr.f32.mxu0 %v834_v3 }
  0x60   :  { %777 = vmatprep.mubr.f32.mxu1 %v27_v10 }
  0x62   :  { %252 = vmatmul.mubr.f32.gmra.mxu0 %v27_v10 }
  0x63   :  { %778 = vmatmul.mubr.f32.gmra.mxu1 %v28_v11  ;;  %257 = vmatprep.mubr.f32.mxu0 %v834_v3 }
  0x64   :  { %780 = vmatprep.mubr.f32.mxu1 %v29_v12 }
  0x66   :  { %258 = vmatmul.mubr.f32.gmra.mxu0 %v28_v11 }
  0x67   :  { %781 = vmatmul.mubr.f32.gmra.mxu1 %v30_v13  ;;  %263 = vmatprep.mubr.f32.mxu0 %v834_v3 }
  0x68   :  { %783 = vmatprep.mubr.f32.mxu1 %v31_v14 }
  0x6a   :  { %264 = vmatmul.mubr.f32.gmra.mxu0 %v29_v12 }
  0x6b   :  { %784 = vmatmul.mubr.f32.gmra.mxu1 %v32_v15  ;;  %269 = vmatprep.mubr.f32.mxu0 %v834_v3 }
  0x6c   :  { %786 = vmatprep.mubr.f32.mxu1 %v33_v16 }
  0x6e   :  { %270 = vmatmul.mubr.f32.gmra.mxu0 %v30_v13 }
  0x6f   :  { %787 = vmatmul.mubr.f32.gmra.mxu1 %v34_v17  ;;  %275 = vmatprep.mubr.f32.mxu0 %v834_v3 }
  0x70   :  { %789 = vmatprep.mubr.f32.mxu1 %v956_v34 }
  0x72   :  { %276 = vmatmul.mubr.f32.gmra.mxu0 %v31_v14 }
  0x73   :  { %790 = vmatmul.mubr.f32.gmra.mxu1 %v976_v38  ;;  %281 = vmatprep.mubr.f32.mxu0 %v834_v3 }
  0x74   :  { %792 = vmatprep.mubr.f32.mxu1 %v995_v42 }
  0x76   :  { %282 = vmatmul.mubr.f32.gmra.mxu0 %v32_v15 }
  0x77   :  { %793 = vmatmul.mubr.f32.gmra.mxu1 %v1015_v46  ;;  %287 = vmatprep.mubr.f32.mxu0 %v834_v3 }
  0x78   :  { %795 = vmatprep.mubr.f32.mxu1 %v1033_v50 }
  0x7a   :  { %288 = vmatmul.mubr.f32.gmra.mxu0 %v33_v16 }
  0x7b   :  { %796 = vmatmul.mubr.f32.gmra.mxu1 %v1050_v54  ;;  %293 = vmatprep.mubr.f32.mxu0 %v834_v3 }
  0x7c   :  { %798 = vmatprep.mubr.f32.mxu1 %v1067_v58 }
  0x7e   :  { %294 = vmatmul.mubr.f32.gmra.mxu0 %v34_v17 }
  0x7f   :  { %799 = vmatmul.mubr.f32.gmra.mxu1 %v1084_v62 }
  0xe2   :  { %v157_v18 = vpop.f32.mrf.mxu0  ;;  %v301_v19 = vpop.f32.mrf.mxu1 }
  0xe3   :  { %573 = vst [vmem:[%s1460_s2] sm:$0xff] %v157_v18  ;;  %645 = vst [vmem:[%s1460_s2 + $0x240] sm:$0xff] %v301_v19 }
  0xe4   :  { %v159_v20 = vpop.f32.mrf.mxu0  ;;  %v303_v21 = vpop.f32.mrf.mxu1 }
  0xe5   :  { %574 = vst [vmem:[%s1460_s2 + $0x8] sm:$0xff] %v159_v20  ;;  %646 = vst [vmem:[%s1460_s2 + $0x248] sm:$0xff] %v303_v21 }
  0xe6   :  { %v163_v3 = vpop.f32.mrf.mxu0 }
  0xe7   :  { %576 = vst [vmem:[%s1460_s2 + $0x18] sm:$0xff] %v163_v3  ;;  %v307_v22 = vpop.f32.mrf.mxu1 }
  0xe8   :  { %648 = vst [vmem:[%s1460_s2 + $0x258] sm:$0xff] %v307_v22  ;;  %v165_v23 = vpop.f32.mrf.mxu0 }
  0xe9   :  { %577 = vst [vmem:[%s1460_s2 + $0x20] sm:$0xff] %v165_v23  ;;  %v309_v24 = vpop.f32.mrf.mxu1 }
  0xea   :  { %649 = vst [vmem:[%s1460_s2 + $0x260] sm:$0xff] %v309_v24  ;;  %v169_v25 = vpop.f32.mrf.mxu0 }
  0xeb   :  { %579 = vst [vmem:[%s1460_s2 + $0x30] sm:$0xff] %v169_v25  ;;  %v313_v26 = vpop.f32.mrf.mxu1 }
  0xec   :  { %651 = vst [vmem:[%s1460_s2 + $0x270] sm:$0xff] %v313_v26  ;;  %v171_v27 = vpop.f32.mrf.mxu0 }
  0xed   :  { %580 = vst [vmem:[%s1460_s2 + $0x38] sm:$0xff] %v171_v27  ;;  %v315_v28 = vpop.f32.mrf.mxu1 }
  0xee   :  { %652 = vst [vmem:[%s1460_s2 + $0x278] sm:$0xff] %v315_v28  ;;  %v175_v29 = vpop.f32.mrf.mxu0 }
  0xef   :  { %582 = vst [vmem:[%s1460_s2 + $0x48] sm:$0xff] %v175_v29  ;;  %v319_v30 = vpop.f32.mrf.mxu1 }
  0xf0   :  { %654 = vst [vmem:[%s1460_s2 + $0x288] sm:$0xff] %v319_v30  ;;  %v177_v31 = vpop.f32.mrf.mxu0 }
  0xf1   :  { %583 = vst [vmem:[%s1460_s2 + $0x50] sm:$0xff] %v177_v31  ;;  %v321_v32 = vpop.f32.mrf.mxu1 }
  0xf2   :  { %655 = vst [vmem:[%s1460_s2 + $0x290] sm:$0xff] %v321_v32  ;;  %v181_v33 = vpop.f32.mrf.mxu0 }
  0xf3   :  { %585 = vst [vmem:[%s1460_s2 + $0x60] sm:$0xff] %v181_v33  ;;  %v325_v34 = vpop.f32.mrf.mxu1 }
  0xf4   :  { %657 = vst [vmem:[%s1460_s2 + $0x2a0] sm:$0xff] %v325_v34  ;;  %v183_v35 = vpop.f32.mrf.mxu0 }
  0xf5   :  { %586 = vst [vmem:[%s1460_s2 + $0x68] sm:$0xff] %v183_v35  ;;  %v327_v36 = vpop.f32.mrf.mxu1 }
  0xf6   :  { %658 = vst [vmem:[%s1460_s2 + $0x2a8] sm:$0xff] %v327_v36  ;;  %v187_v37 = vpop.f32.mrf.mxu0 }
  0xf7   :  { %588 = vst [vmem:[%s1460_s2 + $0x78] sm:$0xff] %v187_v37  ;;  %v331_v38 = vpop.f32.mrf.mxu1 }
  0xf8   :  { %660 = vst [vmem:[%s1460_s2 + $0x2b8] sm:$0xff] %v331_v38  ;;  %v189_v39 = vpop.f32.mrf.mxu0 }
  0xf9   :  { %589 = vst [vmem:[%s1460_s2 + $0x80] sm:$0xff] %v189_v39  ;;  %v333_v40 = vpop.f32.mrf.mxu1 }
  0xfa   :  { %661 = vst [vmem:[%s1460_s2 + $0x2c0] sm:$0xff] %v333_v40  ;;  %v193_v41 = vpop.f32.mrf.mxu0 }
  0xfb   :  { %591 = vst [vmem:[%s1460_s2 + $0x90] sm:$0xff] %v193_v41  ;;  %v337_v42 = vpop.f32.mrf.mxu1 }
  0xfc   :  { %663 = vst [vmem:[%s1460_s2 + $0x2d0] sm:$0xff] %v337_v42  ;;  %v195_v43 = vpop.f32.mrf.mxu0 }
  0xfd   :  { %592 = vst [vmem:[%s1460_s2 + $0x98] sm:$0xff] %v195_v43  ;;  %v339_v44 = vpop.f32.mrf.mxu1 }
  0xfe   :  { %664 = vst [vmem:[%s1460_s2 + $0x2d8] sm:$0xff] %v339_v44  ;;  %v199_v45 = vpop.f32.mrf.mxu0 }
  0xff   :  { %594 = vst [vmem:[%s1460_s2 + $0xa8] sm:$0xff] %v199_v45  ;;  %v343_v46 = vpop.f32.mrf.mxu1 }
 0x100   :  { %666 = vst [vmem:[%s1460_s2 + $0x2e8] sm:$0xff] %v343_v46  ;;  %v201_v47 = vpop.f32.mrf.mxu0 }
 0x101   :  { %595 = vst [vmem:[%s1460_s2 + $0xb0] sm:$0xff] %v201_v47  ;;  %v345_v48 = vpop.f32.mrf.mxu1 }
 0x102   :  { %667 = vst [vmem:[%s1460_s2 + $0x2f0] sm:$0xff] %v345_v48  ;;  %v205_v49 = vpop.f32.mrf.mxu0 }
 0x103   :  { %597 = vst [vmem:[%s1460_s2 + $0xc0] sm:$0xff] %v205_v49  ;;  %v755_v50 = vpop.f32.mrf.mxu1 }
 0x104   :  { %578 = vst [vmem:[%s1460_s2 + $0x28] sm:$0xff] %v755_v50  ;;  %v207_v51 = vpop.f32.mrf.mxu0 }
 0x105   :  { %598 = vst [vmem:[%s1460_s2 + $0xc8] sm:$0xff] %v207_v51  ;;  %v414_v52 = vpop.f32.mrf.mxu1 }
 0x106   :  { %575 = vst [vmem:[%s1460_s2 + $0x10] sm:$0xff] %v414_v52  ;;  %v211_v53 = vpop.f32.mrf.mxu0 }
 0x107   :  { %600 = vst [vmem:[%s1460_s2 + $0xd8] sm:$0xff] %v211_v53  ;;  %v758_v54 = vpop.f32.mrf.mxu1 }
 0x108   :  { %584 = vst [vmem:[%s1460_s2 + $0x58] sm:$0xff] %v758_v54  ;;  %v213_v55 = vpop.f32.mrf.mxu0 }
 0x109   :  { %601 = vst [vmem:[%s1460_s2 + $0xe0] sm:$0xff] %v213_v55  ;;  %v424_v56 = vpop.f32.mrf.mxu1 }
 0x10a   :  { %581 = vst [vmem:[%s1460_s2 + $0x40] sm:$0xff] %v424_v56  ;;  %v217_v57 = vpop.f32.mrf.mxu0 }
 0x10b   :  { %603 = vst [vmem:[%s1460_s2 + $0xf0] sm:$0xff] %v217_v57  ;;  %v761_v58 = vpop.f32.mrf.mxu1 }
 0x10c   :  { %590 = vst [vmem:[%s1460_s2 + $0x88] sm:$0xff] %v761_v58  ;;  %v219_v59 = vpop.f32.mrf.mxu0 }
 0x10d   :  { %604 = vst [vmem:[%s1460_s2 + $0xf8] sm:$0xff] %v219_v59  ;;  %v434_v60 = vpop.f32.mrf.mxu1 }
 0x10e   :  { %587 = vst [vmem:[%s1460_s2 + $0x70] sm:$0xff] %v434_v60  ;;  %v223_v61 = vpop.f32.mrf.mxu0 }
 0x10f   :  { %606 = vst [vmem:[%s1460_s2 + $0x108] sm:$0xff] %v223_v61  ;;  %v764_v62 = vpop.f32.mrf.mxu1 }
 0x110   :  { %596 = vst [vmem:[%s1460_s2 + $0xb8] sm:$0xff] %v764_v62  ;;  %v225_v63 = vpop.f32.mrf.mxu0 }
 0x111   :  { %607 = vst [vmem:[%s1460_s2 + $0x110] sm:$0xff] %v225_v63  ;;  %v444_v0 = vpop.f32.mrf.mxu1 }
 0x112   :  { %593 = vst [vmem:[%s1460_s2 + $0xa0] sm:$0xff] %v444_v0  ;;  %v229_v1 = vpop.f32.mrf.mxu0 }
 0x113   :  { %609 = vst [vmem:[%s1460_s2 + $0x120] sm:$0xff] %v229_v1  ;;  %v767_v2 = vpop.f32.mrf.mxu1 }
 0x114   :  { %602 = vst [vmem:[%s1460_s2 + $0xe8] sm:$0xff] %v767_v2  ;;  %v231_v4 = vpop.f32.mrf.mxu0 }
 0x115   :  { %610 = vst [vmem:[%s1460_s2 + $0x128] sm:$0xff] %v231_v4  ;;  %v454_v5 = vpop.f32.mrf.mxu1 }
 0x116   :  { %599 = vst [vmem:[%s1460_s2 + $0xd0] sm:$0xff] %v454_v5  ;;  %v235_v6 = vpop.f32.mrf.mxu0 }
 0x117   :  { %612 = vst [vmem:[%s1460_s2 + $0x138] sm:$0xff] %v235_v6  ;;  %v770_v7 = vpop.f32.mrf.mxu1 }
 0x118   :  { %608 = vst [vmem:[%s1460_s2 + $0x118] sm:$0xff] %v770_v7  ;;  %v237_v8 = vpop.f32.mrf.mxu0 }
 0x119   :  { %613 = vst [vmem:[%s1460_s2 + $0x140] sm:$0xff] %v237_v8  ;;  %v464_v9 = vpop.f32.mrf.mxu1 }
 0x11a   :  { %605 = vst [vmem:[%s1460_s2 + $0x100] sm:$0xff] %v464_v9  ;;  %v241_v10 = vpop.f32.mrf.mxu0 }
 0x11b   :  { %615 = vst [vmem:[%s1460_s2 + $0x150] sm:$0xff] %v241_v10  ;;  %v773_v11 = vpop.f32.mrf.mxu1 }
 0x11c   :  { %614 = vst [vmem:[%s1460_s2 + $0x148] sm:$0xff] %v773_v11  ;;  %v243_v12 = vpop.f32.mrf.mxu0 }
 0x11d   :  { %616 = vst [vmem:[%s1460_s2 + $0x158] sm:$0xff] %v243_v12  ;;  %v474_v13 = vpop.f32.mrf.mxu1 }
 0x11e   :  { %611 = vst [vmem:[%s1460_s2 + $0x130] sm:$0xff] %v474_v13  ;;  %v247_v14 = vpop.f32.mrf.mxu0 }
 0x11f   :  { %618 = vst [vmem:[%s1460_s2 + $0x168] sm:$0xff] %v247_v14  ;;  %v776_v15 = vpop.f32.mrf.mxu1 }
 0x120   :  { %620 = vst [vmem:[%s1460_s2 + $0x178] sm:$0xff] %v776_v15  ;;  %v249_v16 = vpop.f32.mrf.mxu0 }
 0x121   :  { %619 = vst [vmem:[%s1460_s2 + $0x170] sm:$0xff] %v249_v16  ;;  %v484_v17 = vpop.f32.mrf.mxu1 }
 0x122   :  { %617 = vst [vmem:[%s1460_s2 + $0x160] sm:$0xff] %v484_v17  ;;  %v253_v18 = vpop.f32.mrf.mxu0 }
 0x123   :  { %621 = vst [vmem:[%s1460_s2 + $0x180] sm:$0xff] %v253_v18  ;;  %v779_v19 = vpop.f32.mrf.mxu1 }
 0x124   :  { %626 = vst [vmem:[%s1460_s2 + $0x1a8] sm:$0xff] %v779_v19  ;;  %v255_v20 = vpop.f32.mrf.mxu0 }
 0x125   :  { %622 = vst [vmem:[%s1460_s2 + $0x188] sm:$0xff] %v255_v20  ;;  %v494_v21 = vpop.f32.mrf.mxu1 }
 0x126   :  { %623 = vst [vmem:[%s1460_s2 + $0x190] sm:$0xff] %v494_v21  ;;  %v259_v3 = vpop.f32.mrf.mxu0 }
 0x127   :  { %624 = vst [vmem:[%s1460_s2 + $0x198] sm:$0xff] %v259_v3  ;;  %v782_v22 = vpop.f32.mrf.mxu1 }
 0x128   :  { %632 = vst [vmem:[%s1460_s2 + $0x1d8] sm:$0xff] %v782_v22  ;;  %v261_v23 = vpop.f32.mrf.mxu0 }
 0x129   :  { %625 = vst [vmem:[%s1460_s2 + $0x1a0] sm:$0xff] %v261_v23  ;;  %v504_v24 = vpop.f32.mrf.mxu1 }
 0x12a   :  { %629 = vst [vmem:[%s1460_s2 + $0x1c0] sm:$0xff] %v504_v24  ;;  %v265_v25 = vpop.f32.mrf.mxu0 }
 0x12b   :  { %627 = vst [vmem:[%s1460_s2 + $0x1b0] sm:$0xff] %v265_v25  ;;  %v785_v26 = vpop.f32.mrf.mxu1 }
 0x12c   :  { %638 = vst [vmem:[%s1460_s2 + $0x208] sm:$0xff] %v785_v26  ;;  %v267_v27 = vpop.f32.mrf.mxu0 }
 0x12d   :  { %628 = vst [vmem:[%s1460_s2 + $0x1b8] sm:$0xff] %v267_v27  ;;  %v514_v28 = vpop.f32.mrf.mxu1 }
 0x12e   :  { %635 = vst [vmem:[%s1460_s2 + $0x1f0] sm:$0xff] %v514_v28  ;;  %v271_v29 = vpop.f32.mrf.mxu0 }
 0x12f   :  { %630 = vst [vmem:[%s1460_s2 + $0x1c8] sm:$0xff] %v271_v29  ;;  %v788_v30 = vpop.f32.mrf.mxu1 }
 0x130   :  { %644 = vst [vmem:[%s1460_s2 + $0x238] sm:$0xff] %v788_v30  ;;  %v273_v31 = vpop.f32.mrf.mxu0 }
 0x131   :  { %631 = vst [vmem:[%s1460_s2 + $0x1d0] sm:$0xff] %v273_v31  ;;  %v524_v32 = vpop.f32.mrf.mxu1 }
 0x132   :  { %641 = vst [vmem:[%s1460_s2 + $0x220] sm:$0xff] %v524_v32  ;;  %v277_v33 = vpop.f32.mrf.mxu0 }
 0x133   :  { %633 = vst [vmem:[%s1460_s2 + $0x1e0] sm:$0xff] %v277_v33  ;;  %v791_v34 = vpop.f32.mrf.mxu1 }
 0x134   :  { %650 = vst [vmem:[%s1460_s2 + $0x268] sm:$0xff] %v791_v34  ;;  %v279_v35 = vpop.f32.mrf.mxu0 }
 0x135   :  { %634 = vst [vmem:[%s1460_s2 + $0x1e8] sm:$0xff] %v279_v35  ;;  %v534_v36 = vpop.f32.mrf.mxu1 }
 0x136   :  { %647 = vst [vmem:[%s1460_s2 + $0x250] sm:$0xff] %v534_v36  ;;  %v283_v37 = vpop.f32.mrf.mxu0 }
 0x137   :  { %636 = vst [vmem:[%s1460_s2 + $0x1f8] sm:$0xff] %v283_v37  ;;  %v794_v38 = vpop.f32.mrf.mxu1 }
 0x138   :  { %656 = vst [vmem:[%s1460_s2 + $0x298] sm:$0xff] %v794_v38  ;;  %v285_v39 = vpop.f32.mrf.mxu0 }
 0x139   :  { %637 = vst [vmem:[%s1460_s2 + $0x200] sm:$0xff] %v285_v39  ;;  %v544_v40 = vpop.f32.mrf.mxu1 }
 0x13a   :  { %653 = vst [vmem:[%s1460_s2 + $0x280] sm:$0xff] %v544_v40  ;;  %v289_v41 = vpop.f32.mrf.mxu0 }
 0x13b   :  { %639 = vst [vmem:[%s1460_s2 + $0x210] sm:$0xff] %v289_v41  ;;  %v797_v42 = vpop.f32.mrf.mxu1 }
 0x13c   :  { %662 = vst [vmem:[%s1460_s2 + $0x2c8] sm:$0xff] %v797_v42  ;;  %v291_v43 = vpop.f32.mrf.mxu0 }
 0x13d   :  { %640 = vst [vmem:[%s1460_s2 + $0x218] sm:$0xff] %v291_v43  ;;  %v554_v44 = vpop.f32.mrf.mxu1 }
 0x13e   :  { %659 = vst [vmem:[%s1460_s2 + $0x2b0] sm:$0xff] %v554_v44  ;;  %v295_v45 = vpop.f32.mrf.mxu0 }
 0x13f   :  { %642 = vst [vmem:[%s1460_s2 + $0x228] sm:$0xff] %v295_v45  ;;  %v800_v46 = vpop.f32.mrf.mxu1 }
 0x140   :  { %668 = vst [vmem:[%s1460_s2 + $0x2f8] sm:$0xff] %v800_v46  ;;  %v297_v47 = vpop.f32.mrf.mxu0 }
 0x141   :  { %643 = vst [vmem:[%s1460_s2 + $0x230] sm:$0xff] %v297_v47  ;;  %v564_v48 = vpop.f32.mrf.mxu1 }
 0x142   :  { %665 = vst [vmem:[%s1460_s2 + $0x2e0] sm:$0xff] %v564_v48 }

// kernel: mi_attention.3
= control target key start
LH: loop header
LB: loop body
LE: loop exit
PB: predicated region body
PF: predicated region fallthrough
CT: control target
= control target key end

     0   :  { %s16127_s0 = inlined_call_operand.vmem [shape: f32[2,8,64,16], index: 0, kind: input, shape index: {}]   ;;  %s16128_s1 = inlined_call_operand.vmem [shape: f32[2,8,64,16], index: 1, kind: input, shape index: {}]   ;;  %s16129_s2 = inlined_call_operand.vmem [shape: f32[2,8,64,16], index: 2, kind: input, shape index: {}]   ;;  %s16130_s3 = inlined_call_operand.vmem [shape: f32[2,8,64,16], index: 3, kind: input, shape index: {}]   ;;  %s16131_s4 = inlined_call_operand.vmem [shape: f32[2,8,64,16], index: 4, kind: input, shape index: {}]   ;;  %s16132_s5 = inlined_call_operand.vmem [shape: f32[2,8,64,16], index: 5, kind: input, shape index: {}]   ;;  %s16133_s6 = inlined_call_operand.vmem [shape: f32[2,64,128], index: 6, kind: input, shape index: {}]   ;;  %s16134_s7 = inlined_call_operand.vmem [shape: f32[2,64,128], index: 7, kind: input, shape index: {}]   ;;  %s16135_s8 = inlined_call_operand.vmem [shape: f32[128,128], index: 8, kind: input, shape index: {}]   ;;  %s16136_s9 = inlined_call_operand.vmem [shape: f32[1,128], index: 9, kind: input, shape index: {}]   ;;  %s16137_s10 = inlined_call_operand.hbm [shape: f32[2,64,128], index: 10, kind: output, shape index: {}]  }
   0x1   :  { %16154 = sst [smem:[#allocation54_spill]] %s16127_s0 }
   0x2   :  { %15 = vsyncpa [#allocation3], 0 }
   0x3   :  { %17 = vsyncpa [#allocation3 + $0x1], 0  ;;  %s12927_s13 = smov 0   ;;  %s12929_s14 = smov 0  }
   0x4   :  { %s12931_s15 = smov 0   ;;  %s12933_s16 = smov 0  }
   0x5   :  { %s12935_s17 = smov 0   ;;  %s12937_s18 = smov 0  }
   0x6 LB: > { %s9513_s19 = sadd.s32 4294967295, %s12867_s18   ;;  %s9514_s20 = sadd.s32 4294967294, %s12867_s18   ;;  %s12867_s18 = sphi %s12937_s18, %s23_s18   ;;  %s12863_s17 = sphi %s12935_s17, %s16262_s17   ;;  %s12859_s16 = sphi %s12933_s16, %s16261_s16   ;;  %s12855_s15 = sphi %s12931_s15, %s16260_s15   ;;  %s12851_s14 = sphi %s12929_s14, %s16259_s14   ;;  %s12847_s13 = sphi %s12927_s13, %s16258_s13  }
   0x7   : > { %s35_s21 = sadd.s32 1, %s12863_s17  ;;  %s302_s22 = sadd.s32 1, %s12855_s15 }
   0x8   : > { %p37_p0 = scmp.ge.s32.totalorder %s35_s21, 2  ;;  %p312_p1 = scmp.ne.s32.totalorder %s12855_s15, %s12851_s14 }
   0x9   : > { %p313_p2 = scmp.eq.s32.totalorder %s9513_s19, 1  ;;  %p318_p3 = scmp.ne.s32.totalorder %s12851_s14, %s12847_s13 }
   0xa   : > { %s16264_s21 = smov (%p37_p0, %s35_s21), 0  ;;  %p319_p5 = scmp.eq.s32.totalorder %s9514_s20, 1 }
   0xb   : > { %p12967_p4 = por %p313_p2, %p312_p1  ;;  %s297_s24 = ssub.s32 %s12863_s17, %s16264_s21 }
   0xc   : > { %p9517_p6 = scmp.ge.s32.totalorder %s12867_s18, 1  ;;  %p300_p7 = scmp.eq.s32.totalorder %s297_s24, 0 }
   0xd   : > { %p12974_p8 = por %p319_p5, %p318_p3  ;;  %p427_p9 = scmp.lt.s32.totalorder %s12867_s18, 3 }
   0xe   : > { %s12980_s26 = scalar_select %p300_p7, %s12855_s15, %s302_s22  }
   0xf   : > { %p428_p10 = pnand %p9517_p6, %p427_p9 }
  0x11   : > { %431 = sbr.rel (%p428_p10) target bundleno = 5894 (0x1706), region = 60 }
  0x16   : > { %p517_p11 = scmp.lt.s32.totalorder %s12859_s16, 1  ;;  %vm619_vm0 = vcmask 130048   ;;  %s16157_s0 = sld [smem:[#allocation54_spill]]  ;;  %vm781_vm1 = vcmask 523264  }
  0x18   : > { %s12984_s27 = scalar_select %p517_p11, %s12859_s16, 1 }
  0x1a   : > { %s12987_s28 = sshll.u32 %s12984_s27, 9 }
  0x1b   : > { %s12993_s11 = scalar_lea.vmem %s16131_s4, %s12987_s28  ;;  %s13075_s29 = scalar_lea.vmem %s16132_s5, %s12987_s28 }
  0x1c   : > { %s12999_s20 = scalar_lea.vmem %s16157_s0, %s12987_s28  ;;  %v610_v0 = vld [vmem:[%s12993_s11 + $0x38] sm:$0xff]  ;;  %v609_v1 = vld [vmem:[%s12993_s11 + $0x30] sm:$0xff]  ;;  %v608_v3 = vld [vmem:[%s12993_s11 + $0x28] sm:$0xff]  ;;  %s13099_s19 = scalar_lea.vmem %s16128_s1, %s12987_s28 }
  0x1d   : > { %11070 = vmatprep.subr.msk.mxu0 %vm619_vm0, %v610_v0  ;;  %v595_v2 = vld [vmem:[%s12999_s20] sm:$0xff]  ;;  %v606_v5 = vld [vmem:[%s12993_s11 + $0x18] sm:$0xff]  ;;  %v605_v6 = vld [vmem:[%s12993_s11 + $0x10] sm:$0xff]  ;;  %s13126_s30 = scalar_lea.vmem %s16130_s3, %s12987_s28  ;;  %s13217_s24 = scalar_lea.vmem %s16129_s2, %s12987_s28 }
  0x1e   : > { %11071 = vmatpush3.xpose.msk.msra.mxu0 %vm619_vm0, %v610_v0  ;;  %11086 = vmatprep.mubr.msk.f32.mxu0 %vm619_vm0, %v595_v2  ;;  %v607_v4 = vld [vmem:[%s12993_s11 + $0x20] sm:$0xff]  ;;  %v604_v7 = vld [vmem:[%s12993_s11 + $0x8] sm:$0xff]  ;;  %v597_v10 = vld [vmem:[%s12999_s20 + $0x10] sm:$0xff]  ;;  %s10397_s28 = sshll.u32 %s12859_s16, 10 }
  0x1f   : > { %11072 = vmatprep.subr.msk.mxu0 %vm619_vm0, %v609_v1  ;;  %v603_v8 = vld [vmem:[%s12993_s11] sm:$0xff]  ;;  %v596_v9 = vld [vmem:[%s12999_s20 + $0x8] sm:$0xff]  ;;  %v598_v11 = vld [vmem:[%s12999_s20 + $0x18] sm:$0xff] }
  0x20   : > { %v599_v12 = vld [vmem:[%s12999_s20 + $0x20] sm:$0xff]  ;;  %v600_v13 = vld [vmem:[%s12999_s20 + $0x28] sm:$0xff]  ;;  %v601_v14 = vld [vmem:[%s12999_s20 + $0x30] sm:$0xff] }
  0x21   : > { %v602_v15 = vld [vmem:[%s12999_s20 + $0x38] sm:$0xff] }
  0x22   : > { %11073 = vmatpush3.xpose.msk.msra.mxu0 %vm619_vm0, %v609_v1 }
  0x23   : > { %11074 = vmatprep.subr.msk.mxu0 %vm619_vm0, %v608_v3 }
  0x26   : > { %11075 = vmatpush3.xpose.msk.msra.mxu0 %vm619_vm0, %v608_v3 }
  0x27   : > { %11076 = vmatprep.subr.msk.mxu0 %vm619_vm0, %v607_v4 }
  0x2a   : > { %11077 = vmatpush3.xpose.msk.msra.mxu0 %vm619_vm0, %v607_v4 }
  0x2b   : > { %11078 = vmatprep.subr.msk.mxu0 %vm619_vm0, %v606_v5 }
  0x2e   : > { %11079 = vmatpush3.xpose.msk.msra.mxu0 %vm619_vm0, %v606_v5 }
  0x2f   : > { %11080 = vmatprep.subr.msk.mxu0 %vm619_vm0, %v605_v6 }
  0x32   : > { %11081 = vmatpush3.xpose.msk.msra.mxu0 %vm619_vm0, %v605_v6 }
  0x33   : > { %11082 = vmatprep.subr.msk.mxu0 %vm619_vm0, %v604_v7 }
  0x36   : > { %11083 = vmatpush3.xpose.msk.msra.mxu0 %vm619_vm0, %v604_v7 }
  0x37   : > { %11084 = vmatprep.subr.msk.mxu0 %vm619_vm0, %v603_v8 }
  0x3a   : > { %11085 = vmatpush3.xpose.msk.msra.mxu0 %vm619_vm0, %v603_v8 }
  0x3d   : > { %11087 = vmatmul.mubr.msk.f32.vlgmr.msra.gmra.mxu0 %vm619_vm0, %v596_v9 }
  0x3e   : > { %11089 = vmatprep.mubr.msk.f32.mxu0 %vm619_vm0, %v597_v10 }
  0x41   : > { %11090 = vmatmul.mubr.msk.f32.gmra.mxu0 %vm619_vm0, %v598_v11 }
  0x42   : > { %11092 = vmatprep.mubr.msk.f32.mxu0 %vm619_vm0, %v599_v12 }
  0x45   : > { %11093 = vmatmul.mubr.msk.f32.gmra.mxu0 %vm619_vm0, %v600_v13  ;;  %v618_v13 = vld [vmem:[%s13075_s29 + $0x38] sm:$0xff] }
  0x46   : > { %11095 = vmatprep.mubr.msk.f32.mxu0 %vm619_vm0, %v601_v14  ;;  %11098 = vmatprep.subr.mxu1 %v618_v13 }
  0x47   : > { %11099 = vmatpush3.msra.mxu1 %v618_v13 }
  0x49   : > { %11096 = vmatmul.mubr.msk.f32.gmra.mxu0 %vm619_vm0, %v602_v15 }
  0xfd   : > { %v11088_v16 = vpop.f32.mrf.mxu0 }
  0xfe   : > { %v774_v20 = vmul.f32 0.25, %v11088_v16 }
  0xff   : > { %v734_v17 = vpop.f32.mrf.mxu0 }
 0x100   : > { %v773_v18 = vmul.f32 0.25, %v734_v17  ;;  %v785_v26 = vsel %vm781_vm1, %v774_v20, -inf  ;;  %v617_v17 = vld [vmem:[%s13075_s29 + $0x30] sm:$0xff] }
 0x101   : > { %v11091_v19 = vpop.f32.mrf.mxu0  ;;  %11100 = vmatprep.subr.mxu1 %v617_v17 }
 0x102   : > { %v782_v21 = vsel %vm781_vm1, %v773_v18, -inf  ;;  %v776_v23 = vmul.f32 0.25, %v11091_v19  ;;  %11101 = vmatpush3.msra.mxu1 %v617_v17  ;;  %v615_v19 = vld [vmem:[%s13075_s29 + $0x20] sm:$0xff] }
 0x103   : > { %783 = vmax.xlane.f32.xlu0 %v782_v21  ;;  %v744_v22 = vpop.f32.mrf.mxu0  ;;  %v613_v21 = vld [vmem:[%s13075_s29 + $0x10] sm:$0xff] }
 0x104   : > { %v775_v24 = vmul.f32 0.25, %v744_v22  ;;  %v791_v31 = vsel %vm781_vm1, %v776_v23, -inf  ;;  %v612_v22 = vld [vmem:[%s13075_s29 + $0x8] sm:$0xff] }
 0x105   : > { %v11094_v25 = vpop.f32.mrf.mxu0 }
 0x106   : > { %v788_v27 = vsel %vm781_vm1, %v775_v24, -inf  ;;  %v778_v29 = vmul.f32 0.25, %v11094_v25 }
 0x107   : > { %786 = vmax.xlane.f32.xlu0 %v785_v26  ;;  %789 = vmax.xlane.f32.xlu1 %v788_v27  ;;  %v754_v28 = vpop.f32.mrf.mxu0 }
 0x108   : > { %v777_v30 = vmul.f32 0.25, %v754_v28  ;;  %v797_v37 = vsel %vm781_vm1, %v778_v29, -inf }
 0x109   : > { %v11097_v32 = vpop.f32.mrf.mxu0 }
 0x10a   : > { %v794_v33 = vsel %vm781_vm1, %v777_v30, -inf  ;;  %v780_v35 = vmul.f32 0.25, %v11097_v32 }
 0x10b   : > { %792 = vmax.xlane.f32.xlu1 %v791_v31  ;;  %795 = vmax.xlane.f32.xlu0 %v794_v33  ;;  %v764_v34 = vpop.f32.mrf.mxu0 }
 0x10c   : > { %v779_v36 = vmul.f32 0.25, %v764_v34  ;;  %v803_v39 = vsel %vm781_vm1, %v780_v35, -inf }
 0x10e   : > { %v800_v38 = vsel %vm781_vm1, %v779_v36, -inf }
 0x10f   : > { %798 = vmax.xlane.f32.xlu1 %v797_v37  ;;  %801 = vmax.xlane.f32.xlu0 %v800_v38 }
 0x113   : > { %804 = vmax.xlane.f32.xlu1 %v803_v39  ;;  %v1013_v39 = vld [vmem:[%s13099_s19 + $0x30] sm:$0xff] }
 0x18c   : > { %v784_v40 = vpop.xlane.xlu0 %783 }
 0x18d   : > { %v806_v41 = vsub.f32 %v773_v18, %v784_v40  ;;  %v616_v18 = vld [vmem:[%s13075_s29 + $0x28] sm:$0xff] }
 0x18e   : > { %11102 = vmatprep.subr.mxu1 %v616_v18 }
 0x18f   : > { %v814_v42 = vmul.f32 1.442695, %v806_v41  ;;  %11103 = vmatpush3.msra.mxu1 %v616_v18 }
 0x190   : > { %v787_v43 = vpop.xlane.xlu0 %786  ;;  %v790_v44 = vpop.xlane.xlu1 %789  ;;  %11104 = vmatprep.subr.mxu1 %v615_v19 }
 0x191   : > { %12279 = vpow2.f32 %v814_v42  ;;  %v807_v45 = vsub.f32 %v774_v20, %v787_v43  ;;  %v808_v46 = vsub.f32 %v775_v24, %v790_v44  ;;  %v614_v20 = vld [vmem:[%s13075_s29 + $0x18] sm:$0xff]  ;;  %11105 = vmatpush3.msra.mxu1 %v615_v19  ;;  %v1012_v44 = vld [vmem:[%s13099_s19 + $0x28] sm:$0xff] }
 0x192   : > { %11106 = vmatprep.subr.mxu1 %v614_v20  ;;  %v1014_v24 = vld [vmem:[%s13099_s19 + $0x38] sm:$0xff] }
 0x193   : > { %v816_v47 = vmul.f32 1.442695, %v807_v45  ;;  %v818_v48 = vmul.f32 1.442695, %v808_v46  ;;  %11107 = vmatpush3.msra.mxu1 %v614_v20 }
 0x194   : > { %v793_v49 = vpop.xlane.xlu1 %792  ;;  %v796_v50 = vpop.xlane.xlu0 %795  ;;  %11108 = vmatprep.subr.mxu1 %v613_v21 }
 0x195   : > { %12281 = vpow2.f32 %v816_v47  ;;  %v809_v51 = vsub.f32 %v776_v23, %v793_v49  ;;  %v810_v52 = vsub.f32 %v777_v30, %v796_v50  ;;  %11109 = vmatpush3.msra.mxu1 %v613_v21  ;;  %v611_v23 = vld [vmem:[%s13075_s29] sm:$0xff] }
 0x196   : > { %12283 = vpow2.f32 %v818_v48  ;;  %11110 = vmatprep.subr.mxu1 %v612_v22  ;;  %v1011_v49 = vld [vmem:[%s13099_s19 + $0x20] sm:$0xff] }
 0x197   : > { %v820_v53 = vmul.f32 1.442695, %v809_v51  ;;  %v822_v54 = vmul.f32 1.442695, %v810_v52  ;;  %11111 = vmatpush3.msra.mxu1 %v612_v22  ;;  %v999_v52 = vld [vmem:[%s13126_s30] sm:$0xff] }
 0x198   : > { %v799_v55 = vpop.xlane.xlu1 %798  ;;  %v802_v56 = vpop.xlane.xlu0 %801  ;;  %11112 = vmatprep.subr.mxu1 %v611_v23 }
 0x199   : > { %12285 = vpow2.f32 %v820_v53  ;;  %v811_v57 = vsub.f32 %v778_v29, %v799_v55  ;;  %v812_v58 = vsub.f32 %v779_v36, %v802_v56  ;;  %11113 = vmatpush3.msra.mxu1 %v611_v23  ;;  %v1010_v53 = vld [vmem:[%s13099_s19 + $0x18] sm:$0xff]  ;;  %v1008_v55 = vld [vmem:[%s13099_s19 + $0x8] sm:$0xff]  ;;  %v1007_v56 = vld [vmem:[%s13099_s19] sm:$0xff] }
 0x19a   : > { %12287 = vpow2.f32 %v822_v54  ;;  %11126 = vmatprep.subr.msk.mxu1 %vm619_vm0, %v1014_v24  ;;  %v1009_v54 = vld [vmem:[%s13099_s19 + $0x10] sm:$0xff] }
 0x19b   : > { %v824_v59 = vmul.f32 1.442695, %v811_v57  ;;  %v826_v60 = vmul.f32 1.442695, %v812_v58  ;;  %v1000_v57 = vld [vmem:[%s13126_s30 + $0x8] sm:$0xff]  ;;  %v1001_v58 = vld [vmem:[%s13126_s30 + $0x10] sm:$0xff] }
 0x19c   : > { %v805_v61 = vpop.xlane.xlu1 %804 }
 0x19d   : > { %12289 = vpow2.f32 %v824_v59  ;;  %v813_v62 = vsub.f32 %v780_v35, %v805_v61  ;;  %v1002_v59 = vld [vmem:[%s13126_s30 + $0x18] sm:$0xff]  ;;  %v1004_v61 = vld [vmem:[%s13126_s30 + $0x28] sm:$0xff] }
 0x19e   : > { %v13049_v63 = vpop.eup %12279  ;;  %12291 = vpow2.f32 %v826_v60  ;;  %v1003_v60 = vld [vmem:[%s13126_s30 + $0x20] sm:$0xff] }
 0x19f   : > { %v828_v0 = vmul.f32 1.442695, %v813_v62  ;;  %v830_v1 = vsel %vm781_vm1, %v13049_v63, 0.0  ;;  %v1005_v62 = vld [vmem:[%s13126_s30 + $0x30] sm:$0xff] }
 0x1a0   : > { %831 = vadd.xlane.f32.xlu0 %v830_v1 }
 0x1a1   : > { %12293 = vpow2.f32 %v828_v0 }
 0x1a2   : > { %v13053_v2 = vpop.eup %12281 }
 0x1a3   : > { %v13055_v3 = vpop.eup %12283  ;;  %v833_v4 = vsel %vm781_vm1, %v13053_v2, 0.0 }
 0x1a4   : > { %834 = vadd.xlane.f32.xlu1 %v833_v4  ;;  %v836_v5 = vsel %vm781_vm1, %v13055_v3, 0.0 }
 0x1a5   : > { %837 = vadd.xlane.f32.xlu0 %v836_v5 }
 0x1a6   : > { %v13061_v6 = vpop.eup %12285 }
 0x1a7   : > { %v13063_v7 = vpop.eup %12287  ;;  %v839_v8 = vsel %vm781_vm1, %v13061_v6, 0.0 }
 0x1a8   : > { %840 = vadd.xlane.f32.xlu1 %v839_v8  ;;  %v842_v9 = vsel %vm781_vm1, %v13063_v7, 0.0 }
 0x1a9   : > { %843 = vadd.xlane.f32.xlu0 %v842_v9 }
 0x1aa   : > { %v13069_v10 = vpop.eup %12289 }
 0x1ab   : > { %v13077_v11 = vpop.eup %12291  ;;  %v845_v12 = vsel %vm781_vm1, %v13069_v10, 0.0 }
 0x1ac   : > { %846 = vadd.xlane.f32.xlu1 %v845_v12  ;;  %v848_v14 = vsel %vm781_vm1, %v13077_v11, 0.0 }
 0x1ad   : > { %849 = vadd.xlane.f32.xlu0 %v848_v14 }
 0x1ae   : > { %v13084_v15 = vpop.eup %12293 }
 0x1af   : > { %v851_v16 = vsel %vm781_vm1, %v13084_v15, 0.0 }
 0x1b0   : > { %852 = vadd.xlane.f32.xlu1 %v851_v16 }
 0x229   : > { %v832_v25 = vpop.xlane.xlu0 %831 }
 0x22a   : > { %12295 = vrcp.f32 %v832_v25 }
 0x22d   : > { %v835_v26 = vpop.xlane.xlu1 %834 }
 0x22e   : > { %12297 = vrcp.f32 %v835_v26  ;;  %v838_v27 = vpop.xlane.xlu0 %837 }
 0x22f   : > { %12299 = vrcp.f32 %v838_v27 }
 0x231   : > { %v841_v28 = vpop.xlane.xlu1 %840 }
 0x232   : > { %12301 = vrcp.f32 %v841_v28  ;;  %v844_v29 = vpop.xlane.xlu0 %843 }
 0x233   : > { %12303 = vrcp.f32 %v844_v29 }
 0x235   : > { %v847_v30 = vpop.xlane.xlu1 %846 }
 0x236   : > { %12305 = vrcp.f32 %v847_v30  ;;  %v850_v31 = vpop.xlane.xlu0 %849 }
 0x237   : > { %v12296_v32 = vpop.eup %12295  ;;  %12307 = vrcp.f32 %v850_v31 }
 0x238   : > { %v855_v33 = vmul.f32 %v12296_v32, %v13049_v63  ;;  %v1006_v63 = vld [vmem:[%s13126_s30 + $0x38] sm:$0xff] }
 0x239   : > { %v853_v34 = vpop.xlane.xlu1 %852 }
 0x23a   : > { %12309 = vrcp.f32 %v853_v34  ;;  %11114 = vmatprep.mubr.msk.f32.mxu1 %vm781_vm1, %v855_v33 }
 0x23b   : > { %v12298_v35 = vpop.eup %12297 }
 0x23c   : > { %v12300_v36 = vpop.eup %12299  ;;  %v857_v37 = vmul.f32 %v12298_v35, %v13053_v2 }
 0x23d   : > { %v859_v38 = vmul.f32 %v12300_v36, %v13055_v3 }
 0x23e   : > { %11115 = vmatmul.mubr.msk.f32.vlgmr.msra.gmra.mxu1 %vm781_vm1, %v857_v37 }
 0x23f   : > { %v12302_v40 = vpop.eup %12301  ;;  %11127 = vmatpush3.xpose.msk.msra.mxu1 %vm619_vm0, %v1014_v24  ;;  %11117 = vmatprep.mubr.msk.f32.mxu1 %vm781_vm1, %v859_v38 }
 0x240   : > { %v12304_v41 = vpop.eup %12303  ;;  %11128 = vmatprep.subr.msk.mxu1 %vm619_vm0, %v1013_v39  ;;  %v861_v42 = vmul.f32 %v12302_v40, %v13061_v6 }
 0x241   : > { %v863_v43 = vmul.f32 %v12304_v41, %v13063_v7 }
 0x242   : > { %11118 = vmatmul.mubr.msk.f32.gmra.mxu1 %vm781_vm1, %v861_v42 }
 0x243   : > { %v12306_v45 = vpop.eup %12305  ;;  %11129 = vmatpush3.xpose.msk.msra.mxu1 %vm619_vm0, %v1013_v39  ;;  %11120 = vmatprep.mubr.msk.f32.mxu1 %vm781_vm1, %v863_v43 }
 0x244   : > { %v12308_v46 = vpop.eup %12307  ;;  %11130 = vmatprep.subr.msk.mxu1 %vm619_vm0, %v1012_v44  ;;  %v865_v47 = vmul.f32 %v12306_v45, %v13069_v10 }
 0x245   : > { %v867_v48 = vmul.f32 %v12308_v46, %v13077_v11 }
 0x246   : > { %11121 = vmatmul.mubr.msk.f32.gmra.mxu1 %vm781_vm1, %v865_v47 }
 0x247   : > { %v12310_v50 = vpop.eup %12309  ;;  %11131 = vmatpush3.xpose.msk.msra.mxu1 %vm619_vm0, %v1012_v44  ;;  %11123 = vmatprep.mubr.msk.f32.mxu1 %vm781_vm1, %v867_v48 }
 0x248   : > { %11132 = vmatprep.subr.msk.mxu1 %vm619_vm0, %v1011_v49  ;;  %v869_v51 = vmul.f32 %v12310_v50, %v13084_v15 }
 0x24a   : > { %11124 = vmatmul.mubr.msk.f32.gmra.mxu1 %vm781_vm1, %v869_v51 }
 0x24b   : > { %11133 = vmatpush3.xpose.msk.msra.mxu1 %vm619_vm0, %v1011_v49  ;;  %11142 = vmatprep.mubr.msk.f32.mxu1 %vm619_vm0, %v999_v52 }
 0x24c   : > { %11134 = vmatprep.subr.msk.mxu1 %vm619_vm0, %v1010_v53 }
 0x24f   : > { %11135 = vmatpush3.xpose.msk.msra.mxu1 %vm619_vm0, %v1010_v53 }
 0x250   : > { %11136 = vmatprep.subr.msk.mxu1 %vm619_vm0, %v1009_v54 }
 0x253   : > { %11137 = vmatpush3.xpose.msk.msra.mxu1 %vm619_vm0, %v1009_v54 }
 0x254   : > { %11138 = vmatprep.subr.msk.mxu1 %vm619_vm0, %v1008_v55 }
 0x257   : > { %11139 = vmatpush3.xpose.msk.msra.mxu1 %vm619_vm0, %v1008_v55 }
 0x258   : > { %11140 = vmatprep.subr.msk.mxu1 %vm619_vm0, %v1007_v56 }
 0x25b   : > { %11141 = vmatpush3.xpose.msk.msra.mxu1 %vm619_vm0, %v1007_v56 }
 0x25e   : > { %11143 = vmatmul.mubr.msk.f32.vlgmr.msra.gmra.mxu1 %vm619_vm0, %v1000_v57 }
 0x25f   : > { %11145 = vmatprep.mubr.msk.f32.mxu1 %vm619_vm0, %v1001_v58 }
 0x262   : > { %11146 = vmatmul.mubr.msk.f32.gmra.mxu1 %vm619_vm0, %v1002_v59 }
 0x263   : > { %11148 = vmatprep.mubr.msk.f32.mxu1 %vm619_vm0, %v1003_v60 }
 0x266   : > { %11149 = vmatmul.mubr.msk.f32.gmra.mxu1 %vm619_vm0, %v1004_v61 }
 0x267   : > { %11151 = vmatprep.mubr.msk.f32.mxu1 %vm619_vm0, %v1005_v62 }
 0x26a   : > { %11152 = vmatmul.mubr.msk.f32.gmra.mxu1 %vm619_vm0, %v1006_v63 }
 0x2fe   : > { %v13163_v0 = vpop.f32.mrf.mxu1 }
 0x300   : > { %v13165_v1 = vpop.f32.mrf.mxu1 }
 0x302   : > { %v13167_v2 = vpop.f32.mrf.mxu1 }
 0x304   : > { %v13169_v3 = vpop.f32.mrf.mxu1 }
 0x306   : > { %v13171_v4 = vpop.f32.mrf.mxu1 }
 0x308   : > { %v13173_v5 = vpop.f32.mrf.mxu1 }
 0x30a   : > { %v13175_v6 = vpop.f32.mrf.mxu1 }
 0x30c   : > { %v13177_v7 = vpop.f32.mrf.mxu1 }
 0x31e   : > { %v11144_v8 = vpop.f32.mrf.mxu1 }
 0x31f   : > { %v1177_v9 = vmul.f32 0.25, %v11144_v8 }
 0x320   : > { %v1137_v10 = vpop.f32.mrf.mxu1 }
 0x321   : > { %v1176_v11 = vmul.f32 0.25, %v1137_v10  ;;  %v1187_v12 = vsel %vm781_vm1, %v1177_v9, -inf }
 0x322   : > { %1188 = vmax.xlane.f32.xlu1 %v1187_v12  ;;  %v11147_v13 = vpop.f32.mrf.mxu1 }
 0x323   : > { %v1179_v14 = vmul.f32 0.25, %v11147_v13  ;;  %v1184_v15 = vsel %vm781_vm1, %v1176_v11, -inf }
 0x324   : > { %1185 = vmax.xlane.f32.xlu0 %v1184_v15  ;;  %v1147_v16 = vpop.f32.mrf.mxu1 }
 0x325   : > { %v1178_v17 = vmul.f32 0.25, %v1147_v16  ;;  %v1193_v18 = vsel %vm781_vm1, %v1179_v14, -inf }
 0x326   : > { %1194 = vmax.xlane.f32.xlu1 %v1193_v18  ;;  %v11150_v19 = vpop.f32.mrf.mxu1  ;;  %v1020_v18 = vld [vmem:[%s13217_s24 + $0x28] sm:$0xff] }
 0x327   : > { %v1181_v20 = vmul.f32 0.25, %v11150_v19  ;;  %v1190_v21 = vsel %vm781_vm1, %v1178_v17, -inf  ;;  %v1019_v19 = vld [vmem:[%s13217_s24 + $0x20] sm:$0xff] }
 0x328   : > { %1191 = vmax.xlane.f32.xlu0 %v1190_v21  ;;  %v1157_v22 = vpop.f32.mrf.mxu1  ;;  %v1017_v21 = vld [vmem:[%s13217_s24 + $0x10] sm:$0xff] }
 0x329   : > { %v1180_v23 = vmul.f32 0.25, %v1157_v22  ;;  %v1199_v24 = vsel %vm781_vm1, %v1181_v20, -inf  ;;  %v1016_v22 = vld [vmem:[%s13217_s24 + $0x8] sm:$0xff] }
 0x32a   : > { %1200 = vmax.xlane.f32.xlu1 %v1199_v24  ;;  %v11153_v25 = vpop.f32.mrf.mxu1  ;;  %v9598_v24 = vld [vmem:[%s12993_s11 + $0x78] sm:$0xff] }
 0x32b   : > { %v1183_v26 = vmul.f32 0.25, %v11153_v25  ;;  %v1196_v27 = vsel %vm781_vm1, %v1180_v23, -inf }
 0x32c   : > { %1197 = vmax.xlane.f32.xlu0 %v1196_v27  ;;  %v1167_v28 = vpop.f32.mrf.mxu1 }
 0x32d   : > { %v1182_v29 = vmul.f32 0.25, %v1167_v28  ;;  %v1205_v30 = vsel %vm781_vm1, %v1183_v26, -inf }
 0x32e   : > { %1206 = vmax.xlane.f32.xlu1 %v1205_v30 }
 0x32f   : > { %v1202_v31 = vsel %vm781_vm1, %v1182_v29, -inf }
 0x330   : > { %1203 = vmax.xlane.f32.xlu0 %v1202_v31 }
 0x3ab   : > { %v1189_v32 = vpop.xlane.xlu1 %1188 }
 0x3ac   : > { %v1209_v33 = vsub.f32 %v1177_v9, %v1189_v32 }
 0x3ad   : > { %v1186_v34 = vpop.xlane.xlu0 %1185 }
 0x3ae   : > { %v1218_v35 = vmul.f32 1.442695, %v1209_v33  ;;  %v1208_v36 = vsub.f32 %v1176_v11, %v1186_v34 }
 0x3af   : > { %v1195_v37 = vpop.xlane.xlu1 %1194 }
 0x3b0   : > { %12311 = vpow2.f32 %v1218_v35  ;;  %v1216_v38 = vmul.f32 1.442695, %v1208_v36  ;;  %v1211_v39 = vsub.f32 %v1179_v14, %v1195_v37  ;;  %v1022_v14 = vld [vmem:[%s13217_s24 + $0x38] sm:$0xff] }
 0x3b1   : > { %v1192_v40 = vpop.xlane.xlu0 %1191  ;;  %11154 = vmatprep.subr.mxu0 %v1022_v14 }
 0x3b2   : > { %12313 = vpow2.f32 %v1216_v38  ;;  %v1222_v41 = vmul.f32 1.442695, %v1211_v39  ;;  %v1210_v42 = vsub.f32 %v1178_v17, %v1192_v40  ;;  %11155 = vmatpush3.msra.mxu0 %v1022_v14  ;;  %v1021_v17 = vld [vmem:[%s13217_s24 + $0x30] sm:$0xff] }
 0x3b3   : > { %v1201_v43 = vpop.xlane.xlu1 %1200  ;;  %11156 = vmatprep.subr.mxu0 %v1021_v17  ;;  %v9597_v38 = vld [vmem:[%s12993_s11 + $0x70] sm:$0xff] }
 0x3b4   : > { %12315 = vpow2.f32 %v1222_v41  ;;  %v1220_v44 = vmul.f32 1.442695, %v1210_v42  ;;  %v1213_v45 = vsub.f32 %v1181_v20, %v1201_v43  ;;  %11157 = vmatpush3.msra.mxu0 %v1021_v17  ;;  %v1018_v20 = vld [vmem:[%s13217_s24 + $0x18] sm:$0xff]  ;;  %v9596_v43 = vld [vmem:[%s12993_s11 + $0x68] sm:$0xff] }
 0x3b5   : > { %v1198_v46 = vpop.xlane.xlu0 %1197  ;;  %11158 = vmatprep.subr.mxu0 %v1020_v18 }
 0x3b6   : > { %12317 = vpow2.f32 %v1220_v44  ;;  %v1226_v47 = vmul.f32 1.442695, %v1213_v45  ;;  %v1212_v48 = vsub.f32 %v1180_v23, %v1198_v46  ;;  %11159 = vmatpush3.msra.mxu0 %v1020_v18  ;;  %v1015_v23 = vld [vmem:[%s13217_s24] sm:$0xff] }
 0x3b7   : > { %v1207_v49 = vpop.xlane.xlu1 %1206  ;;  %11160 = vmatprep.subr.mxu0 %v1019_v19 }
 0x3b8   : > { %12319 = vpow2.f32 %v1226_v47  ;;  %v1224_v50 = vmul.f32 1.442695, %v1212_v48  ;;  %v1215_v51 = vsub.f32 %v1183_v26, %v1207_v49  ;;  %11161 = vmatpush3.msra.mxu0 %v1019_v19  ;;  %v9595_v48 = vld [vmem:[%s12993_s11 + $0x60] sm:$0xff] }
 0x3b9   : > { %v1204_v52 = vpop.xlane.xlu0 %1203  ;;  %11162 = vmatprep.subr.mxu0 %v1018_v20 }
 0x3ba   : > { %12321 = vpow2.f32 %v1224_v50  ;;  %v1230_v53 = vmul.f32 1.442695, %v1215_v51  ;;  %v1214_v54 = vsub.f32 %v1182_v29, %v1204_v52  ;;  %11163 = vmatpush3.msra.mxu0 %v1018_v20  ;;  %v9583_v52 = vld [vmem:[%s12999_s20 + $0x40] sm:$0xff] }
 0x3bb   : > { %11164 = vmatprep.subr.mxu0 %v1017_v21 }
 0x3bc   : > { %12323 = vpow2.f32 %v1230_v53  ;;  %v1228_v55 = vmul.f32 1.442695, %v1214_v54  ;;  %11165 = vmatpush3.msra.mxu0 %v1017_v21  ;;  %v9594_v53 = vld [vmem:[%s12993_s11 + $0x58] sm:$0xff]  ;;  %v9593_v54 = vld [vmem:[%s12993_s11 + $0x50] sm:$0xff] }
 0x3bd   : > { %v13187_v56 = vpop.eup %12311  ;;  %11166 = vmatprep.subr.mxu0 %v1016_v22 }
 0x3be   : > { %12325 = vpow2.f32 %v1228_v55  ;;  %v1235_v57 = vsel %vm781_vm1, %v13187_v56, 0.0  ;;  %11167 = vmatpush3.msra.mxu0 %v1016_v22  ;;  %v9592_v55 = vld [vmem:[%s12993_s11 + $0x48] sm:$0xff] }
 0x3bf   : > { %v13191_v58 = vpop.eup %12313  ;;  %1236 = vadd.xlane.f32.xlu1 %v1235_v57  ;;  %11168 = vmatprep.subr.mxu0 %v1015_v23  ;;  %v13277_v57 = vld [vmem:[%s16135_s8 + $0x8] sm:$0xff] }
 0x3c0   : > { %v1232_v59 = vsel %vm781_vm1, %v13191_v58, 0.0  ;;  %11169 = vmatpush3.msra.mxu0 %v1015_v23 }
 0x3c1   : > { %v13195_v60 = vpop.eup %12315  ;;  %1233 = vadd.xlane.f32.xlu0 %v1232_v59  ;;  %11182 = vmatprep.subr.msk.mxu0 %vm619_vm0, %v9598_v24  ;;  %v9585_v59 = vld [vmem:[%s12999_s20 + $0x50] sm:$0xff] }
 0x3c2   : > { %v1241_v61 = vsel %vm781_vm1, %v13195_v60, 0.0 }
 0x3c3   : > { %v13199_v62 = vpop.eup %12317  ;;  %1242 = vadd.xlane.f32.xlu1 %v1241_v61  ;;  %v9586_v61 = vld [vmem:[%s12999_s20 + $0x58] sm:$0xff] }
 0x3c4   : > { %v1238_v63 = vsel %vm781_vm1, %v13199_v62, 0.0 }
 0x3c5   : > { %v13203_v8 = vpop.eup %12319  ;;  %1239 = vadd.xlane.f32.xlu0 %v1238_v63  ;;  %v9588_v63 = vld [vmem:[%s12999_s20 + $0x68] sm:$0xff] }
 0x3c6   : > { %v1247_v9 = vsel %vm781_vm1, %v13203_v8, 0.0 }
 0x3c7   : > { %v13207_v10 = vpop.eup %12321  ;;  %1248 = vadd.xlane.f32.xlu1 %v1247_v9  ;;  %v9590_v9 = vld [vmem:[%s12999_s20 + $0x78] sm:$0xff] }
 0x3c8   : > { %v1244_v11 = vsel %vm781_vm1, %v13207_v10, 0.0 }
 0x3c9   : > { %v13211_v12 = vpop.eup %12323  ;;  %1245 = vadd.xlane.f32.xlu0 %v1244_v11 }
 0x3ca   : > { %v1253_v13 = vsel %vm781_vm1, %v13211_v12, 0.0 }
 0x3cb   : > { %v13222_v15 = vpop.eup %12325  ;;  %1254 = vadd.xlane.f32.xlu1 %v1253_v13 }
 0x3cc   : > { %v1250_v16 = vsel %vm781_vm1, %v13222_v15, 0.0 }
 0x3cd   : > { %1251 = vadd.xlane.f32.xlu0 %v1250_v16 }
 0x448   : > { %v1237_v25 = vpop.xlane.xlu1 %1236 }
 0x449   : > { %12327 = vrcp.f32 %v1237_v25 }
 0x44a   : > { %v1234_v26 = vpop.xlane.xlu0 %1233 }
 0x44b   : > { %12329 = vrcp.f32 %v1234_v26 }
 0x44c   : > { %v1243_v27 = vpop.xlane.xlu1 %1242 }
 0x44d   : > { %12331 = vrcp.f32 %v1243_v27 }
 0x44e   : > { %v1240_v28 = vpop.xlane.xlu0 %1239 }
 0x44f   : > { %12333 = vrcp.f32 %v1240_v28 }
 0x450   : > { %v1249_v29 = vpop.xlane.xlu1 %1248 }
 0x451   : > { %12335 = vrcp.f32 %v1249_v29 }
 0x452   : > { %v1246_v30 = vpop.xlane.xlu0 %1245 }
 0x453   : > { %12337 = vrcp.f32 %v1246_v30 }
 0x454   : > { %v1255_v31 = vpop.xlane.xlu1 %1254 }
 0x455   : > { %12339 = vrcp.f32 %v1255_v31 }
 0x456   : > { %v1252_v32 = vpop.xlane.xlu0 %1251  ;;  %v12328_v33 = vpop.eup %12327 }
 0x457   : > { %12341 = vrcp.f32 %v1252_v32  ;;  %v1259_v36 = vmul.f32 %v12328_v33, %v13187_v56  ;;  %v9591_v56 = vld [vmem:[%s12993_s11 + $0x40] sm:$0xff] }
 0x458   : > { %v12330_v34 = vpop.eup %12329 }
 0x459   : > { %v1257_v35 = vmul.f32 %v12330_v34, %v13191_v58  ;;  %v9584_v58 = vld [vmem:[%s12999_s20 + $0x48] sm:$0xff] }
 0x45a   : > { %v12332_v37 = vpop.eup %12331 }
 0x45b   : > { %11170 = vmatprep.mubr.msk.f32.mxu0 %vm781_vm1, %v1257_v35  ;;  %v1263_v41 = vmul.f32 %v12332_v37, %v13195_v60  ;;  %v13286_v60 = vld [vmem:[%s16135_s8] sm:$0xff] }
 0x45c   : > { %v12334_v39 = vpop.eup %12333  ;;  %11171 = vmatmul.mubr.msk.f32.vlgmr.msra.gmra.mxu0 %vm781_vm1, %v1259_v36 }
 0x45d   : > { %11183 = vmatpush3.xpose.msk.msra.mxu0 %vm619_vm0, %v9598_v24  ;;  %v1261_v40 = vmul.f32 %v12334_v39, %v13199_v62  ;;  %v9587_v62 = vld [vmem:[%s12999_s20 + $0x60] sm:$0xff] }
 0x45e   : > { %11184 = vmatprep.subr.msk.mxu0 %vm619_vm0, %v9597_v38  ;;  %v12336_v42 = vpop.eup %12335 }
 0x45f   : > { %11173 = vmatprep.mubr.msk.f32.mxu0 %vm781_vm1, %v1261_v40  ;;  %v1267_v46 = vmul.f32 %v12336_v42, %v13203_v8  ;;  %v9589_v8 = vld [vmem:[%s12999_s20 + $0x70] sm:$0xff] }
 0x460   : > { %v12338_v44 = vpop.eup %12337  ;;  %11174 = vmatmul.mubr.msk.f32.gmra.mxu0 %vm781_vm1, %v1263_v41 }
 0x461   : > { %11185 = vmatpush3.xpose.msk.msra.mxu0 %vm619_vm0, %v9597_v38  ;;  %v1265_v45 = vmul.f32 %v12338_v44, %v13207_v10 }
 0x462   : > { %11186 = vmatprep.subr.msk.mxu0 %vm619_vm0, %v9596_v43  ;;  %v12340_v47 = vpop.eup %12339 }
 0x463   : > { %11176 = vmatprep.mubr.msk.f32.mxu0 %vm781_vm1, %v1265_v45  ;;  %v1271_v51 = vmul.f32 %v12340_v47, %v13211_v12 }
 0x464   : > { %v12342_v49 = vpop.eup %12341  ;;  %11177 = vmatmul.mubr.msk.f32.gmra.mxu0 %vm781_vm1, %v1267_v46 }
 0x465   : > { %11187 = vmatpush3.xpose.msk.msra.mxu0 %vm619_vm0, %v9596_v43  ;;  %v1269_v50 = vmul.f32 %v12342_v49, %v13222_v15 }
 0x466   : > { %11188 = vmatprep.subr.msk.mxu0 %vm619_vm0, %v9595_v48 }
 0x467   : > { %11179 = vmatprep.mubr.msk.f32.mxu0 %vm781_vm1, %v1269_v50 }
 0x468   : > { %11180 = vmatmul.mubr.msk.f32.gmra.mxu0 %vm781_vm1, %v1271_v51 }
 0x469   : > { %11189 = vmatpush3.xpose.msk.msra.mxu0 %vm619_vm0, %v9595_v48  ;;  %11198 = vmatprep.mubr.msk.f32.mxu0 %vm619_vm0, %v9583_v52 }
 0x46a   : > { %11190 = vmatprep.subr.msk.mxu0 %vm619_vm0, %v9594_v53 }
 0x46d   : > { %11191 = vmatpush3.xpose.msk.msra.mxu0 %vm619_vm0, %v9594_v53 }
 0x46e   : > { %11192 = vmatprep.subr.msk.mxu0 %vm619_vm0, %v9593_v54 }
 0x471   : > { %11193 = vmatpush3.xpose.msk.msra.mxu0 %vm619_vm0, %v9593_v54 }
 0x472   : > { %11194 = vmatprep.subr.msk.mxu0 %vm619_vm0, %v9592_v55 }
 0x475   : > { %11195 = vmatpush3.xpose.msk.msra.mxu0 %vm619_vm0, %v9592_v55 }
 0x476   : > { %11196 = vmatprep.subr.msk.mxu0 %vm619_vm0, %v9591_v56 }
 0x479   : > { %11197 = vmatpush3.xpose.msk.msra.mxu0 %vm619_vm0, %v9591_v56 }
 0x47a   : > { %11254 = vmatprep.subr.mxu0 %v13277_v57 }
 0x47c   : > { %11199 = vmatmul.mubr.msk.f32.vlgmr.msra.gmra.mxu0 %vm619_vm0, %v9584_v58 }
 0x47d   : > { %11201 = vmatprep.mubr.msk.f32.mxu0 %vm619_vm0, %v9585_v59  ;;  %11255 = vmatpush3.msra.mxu0 %v13277_v57 }
 0x47e   : > { %11256 = vmatprep.subr.mxu0 %v13286_v60 }
 0x47f   : > { %11257 = vmatpush3.msra.mxu0 %v13286_v60 }
 0x480   : > { %11202 = vmatmul.mubr.msk.f32.gmra.mxu0 %vm619_vm0, %v9586_v61 }
 0x481   : > { %11204 = vmatprep.mubr.msk.f32.mxu0 %vm619_vm0, %v9587_v62 }
 0x484   : > { %11205 = vmatmul.mubr.msk.f32.gmra.mxu0 %vm619_vm0, %v9588_v63 }
 0x485   : > { %11207 = vmatprep.mubr.msk.f32.mxu0 %vm619_vm0, %v9589_v8 }
 0x488   : > { %11208 = vmatmul.mubr.msk.f32.gmra.mxu0 %vm619_vm0, %v9590_v9 }
 0x489   : > { %11258 = vmatprep.mubr.msk.f32.mxu0 %vm619_vm0, %v13165_v1 }
 0x48c   : > { %11259 = vmatmul.mubr.msk.f32.vlgmr.msra.gmra.mxu0 %vm619_vm0, %v13163_v0 }
 0x48d   : > { %11261 = vmatprep.mubr.msk.f32.mxu0 %vm619_vm0, %v13169_v3 }
 0x490   : > { %11262 = vmatmul.mubr.msk.f32.gmra.mxu0 %vm619_vm0, %v13167_v2 }
 0x491   : > { %11264 = vmatprep.mubr.msk.f32.mxu0 %vm619_vm0, %v13173_v5 }
 0x494   : > { %11265 = vmatmul.mubr.msk.f32.gmra.mxu0 %vm619_vm0, %v13171_v4 }
 0x495   : > { %11267 = vmatprep.mubr.msk.f32.mxu0 %vm619_vm0, %v13177_v7 }
 0x498   : > { %11268 = vmatmul.mubr.msk.f32.gmra.mxu0 %vm619_vm0, %v13175_v6 }
 0x51c   : > { %v13319_v1 = vpop.f32.mrf.mxu0 }
 0x51e   : > { %v13321_v0 = vpop.f32.mrf.mxu0 }
 0x520   : > { %v13323_v3 = vpop.f32.mrf.mxu0 }
 0x522   : > { %v13325_v10 = vpop.f32.mrf.mxu0 }
 0x524   : > { %v13327_v2 = vpop.f32.mrf.mxu0 }
 0x526   : > { %v13329_v5 = vpop.f32.mrf.mxu0 }
 0x528   : > { %v13331_v11 = vpop.f32.mrf.mxu0 }
 0x52a   : > { %v13333_v4 = vpop.f32.mrf.mxu0 }
 0x53c   : > { %v11200_v7 = vpop.f32.mrf.mxu0 }
 0x53d   : > { %v1584_v12 = vmul.f32 0.25, %v11200_v7 }
 0x53e   : > { %v1544_v13 = vpop.f32.mrf.mxu0 }
 0x53f   : > { %v1583_v6 = vmul.f32 0.25, %v1544_v13  ;;  %v1594_v14 = vsel %vm781_vm1, %v1584_v12, -inf }
 0x540   : > { %1595 = vmax.xlane.f32.xlu1 %v1594_v14  ;;  %v11203_v15 = vpop.f32.mrf.mxu0 }
 0x541   : > { %v1586_v16 = vmul.f32 0.25, %v11203_v15  ;;  %v1591_v17 = vsel %vm781_vm1, %v1583_v6, -inf }
 0x542   : > { %1592 = vmax.xlane.f32.xlu0 %v1591_v17  ;;  %v1554_v18 = vpop.f32.mrf.mxu0 }
 0x543   : > { %v1585_v19 = vmul.f32 0.25, %v1554_v18  ;;  %v1600_v20 = vsel %vm781_vm1, %v1586_v16, -inf }
 0x544   : > { %1601 = vmax.xlane.f32.xlu1 %v1600_v20  ;;  %v11206_v21 = vpop.f32.mrf.mxu0 }
 0x545   : > { %v1588_v22 = vmul.f32 0.25, %v11206_v21  ;;  %v1597_v23 = vsel %vm781_vm1, %v1585_v19, -inf  ;;  %v9605_v21 = vld [vmem:[%s13075_s29 + $0x70] sm:$0xff] }
 0x546   : > { %1598 = vmax.xlane.f32.xlu0 %v1597_v23  ;;  %v1564_v24 = vpop.f32.mrf.mxu0  ;;  %v9603_v23 = vld [vmem:[%s13075_s29 + $0x60] sm:$0xff] }
 0x547   : > { %v1587_v25 = vmul.f32 0.25, %v1564_v24  ;;  %v1606_v26 = vsel %vm781_vm1, %v1588_v22, -inf  ;;  %v9602_v24 = vld [vmem:[%s13075_s29 + $0x58] sm:$0xff] }
 0x548   : > { %1607 = vmax.xlane.f32.xlu1 %v1606_v26  ;;  %v11209_v27 = vpop.f32.mrf.mxu0  ;;  %v9600_v26 = vld [vmem:[%s13075_s29 + $0x48] sm:$0xff] }
 0x549   : > { %v1590_v28 = vmul.f32 0.25, %v11209_v27  ;;  %v1603_v29 = vsel %vm781_vm1, %v1587_v25, -inf  ;;  %v9599_v27 = vld [vmem:[%s13075_s29 + $0x40] sm:$0xff] }
 0x54a   : > { %1604 = vmax.xlane.f32.xlu0 %v1603_v29  ;;  %v1574_v30 = vpop.f32.mrf.mxu0 }
 0x54b   : > { %v1589_v31 = vmul.f32 0.25, %v1574_v30  ;;  %v1612_v32 = vsel %vm781_vm1, %v1590_v28, -inf }
 0x54c   : > { %1613 = vmax.xlane.f32.xlu1 %v1612_v32 }
 0x54d   : > { %v1609_v33 = vsel %vm781_vm1, %v1589_v31, -inf }
 0x54e   : > { %1610 = vmax.xlane.f32.xlu0 %v1609_v33 }
 0x5c9   : > { %v1596_v34 = vpop.xlane.xlu1 %1595 }
 0x5ca   : > { %v1616_v35 = vsub.f32 %v1584_v12, %v1596_v34 }
 0x5cb   : > { %v1593_v36 = vpop.xlane.xlu0 %1592 }
 0x5cc   : > { %v1625_v37 = vmul.f32 1.442695, %v1616_v35  ;;  %v1615_v38 = vsub.f32 %v1583_v6, %v1593_v36 }
 0x5cd   : > { %v1602_v39 = vpop.xlane.xlu1 %1601 }
 0x5ce   : > { %12343 = vpow2.f32 %v1625_v37  ;;  %v1623_v40 = vmul.f32 1.442695, %v1615_v38  ;;  %v1618_v41 = vsub.f32 %v1586_v16, %v1602_v39 }
 0x5cf   : > { %v1599_v42 = vpop.xlane.xlu0 %1598 }
 0x5d0   : > { %12345 = vpow2.f32 %v1623_v40  ;;  %v1629_v43 = vmul.f32 1.442695, %v1618_v41  ;;  %v1617_v44 = vsub.f32 %v1585_v19, %v1599_v42  ;;  %v9606_v19 = vld [vmem:[%s13075_s29 + $0x78] sm:$0xff]  ;;  %v13395_v42 = vld [vmem:[%s16135_s8 + $0x10] sm:$0xff] }
 0x5d1   : > { %v1608_v45 = vpop.xlane.xlu1 %1607  ;;  %11210 = vmatprep.subr.mxu1 %v9606_v19 }
 0x5d2   : > { %12347 = vpow2.f32 %v1629_v43  ;;  %v1627_v46 = vmul.f32 1.442695, %v1617_v44  ;;  %v1620_v47 = vsub.f32 %v1588_v22, %v1608_v45  ;;  %11211 = vmatpush3.msra.mxu1 %v9606_v19  ;;  %v9604_v22 = vld [vmem:[%s13075_s29 + $0x68] sm:$0xff]  ;;  %v9650_v19 = vld [vmem:[%s13126_s30 + $0x58] sm:$0xff] }
 0x5d3   : > { %v1605_v48 = vpop.xlane.xlu0 %1604  ;;  %11212 = vmatprep.subr.mxu1 %v9605_v21 }
 0x5d4   : > { %12349 = vpow2.f32 %v1627_v46  ;;  %v1633_v49 = vmul.f32 1.442695, %v1620_v47  ;;  %v1619_v50 = vsub.f32 %v1587_v25, %v1605_v48  ;;  %11213 = vmatpush3.msra.mxu1 %v9605_v21  ;;  %v9601_v25 = vld [vmem:[%s13075_s29 + $0x50] sm:$0xff]  ;;  %v9652_v21 = vld [vmem:[%s13126_s30 + $0x68] sm:$0xff] }
 0x5d5   : > { %v1614_v51 = vpop.xlane.xlu1 %1613  ;;  %11214 = vmatprep.subr.mxu1 %v9604_v22 }
 0x5d6   : > { %12351 = vpow2.f32 %v1633_v49  ;;  %v1631_v52 = vmul.f32 1.442695, %v1619_v50  ;;  %v1622_v53 = vsub.f32 %v1590_v28, %v1614_v51  ;;  %11215 = vmatpush3.msra.mxu1 %v9604_v22  ;;  %v13386_v28 = vld [vmem:[%s16135_s8 + $0x18] sm:$0xff]  ;;  %v9653_v22 = vld [vmem:[%s13126_s30 + $0x70] sm:$0xff] }
 0x5d7   : > { %v1611_v54 = vpop.xlane.xlu0 %1610  ;;  %11216 = vmatprep.subr.mxu1 %v9603_v23 }
 0x5d8   : > { %12353 = vpow2.f32 %v1631_v52  ;;  %v1637_v55 = vmul.f32 1.442695, %v1622_v53  ;;  %v1621_v56 = vsub.f32 %v1589_v31, %v1611_v54  ;;  %11217 = vmatpush3.msra.mxu1 %v9603_v23  ;;  %v9662_v54 = vld [vmem:[%s13099_s19 + $0x78] sm:$0xff] }
 0x5d9   : > { %11218 = vmatprep.subr.mxu1 %v9602_v24  ;;  %v9654_v23 = vld [vmem:[%s13126_s30 + $0x78] sm:$0xff] }
 0x5da   : > { %12355 = vpow2.f32 %v1637_v55  ;;  %v1635_v58 = vmul.f32 1.442695, %v1621_v56  ;;  %11219 = vmatpush3.msra.mxu1 %v9602_v24 }
 0x5db   : > { %v13343_v59 = vpop.eup %12343  ;;  %11220 = vmatprep.subr.mxu1 %v9601_v25 }
 0x5dc   : > { %12357 = vpow2.f32 %v1635_v58  ;;  %v1642_v61 = vsel %vm781_vm1, %v13343_v59, 0.0  ;;  %11221 = vmatpush3.msra.mxu1 %v9601_v25  ;;  %v9661_v58 = vld [vmem:[%s13099_s19 + $0x70] sm:$0xff] }
 0x5dd   : > { %v13347_v62 = vpop.eup %12345  ;;  %1643 = vadd.xlane.f32.xlu1 %v1642_v61  ;;  %11222 = vmatprep.subr.mxu1 %v9600_v26 }
 0x5de   : > { %v1639_v63 = vsel %vm781_vm1, %v13347_v62, 0.0  ;;  %11223 = vmatpush3.msra.mxu1 %v9600_v26 }
 0x5df   : > { %v13351_v8 = vpop.eup %12347  ;;  %1640 = vadd.xlane.f32.xlu0 %v1639_v63  ;;  %11224 = vmatprep.subr.mxu1 %v9599_v27 }
 0x5e0   : > { %v1648_v9 = vsel %vm781_vm1, %v13351_v8, 0.0  ;;  %11225 = vmatpush3.msra.mxu1 %v9599_v27 }
 0x5e1   : > { %v13355_v7 = vpop.eup %12349  ;;  %1649 = vadd.xlane.f32.xlu1 %v1648_v9  ;;  %11238 = vmatprep.subr.mxu1 %v13386_v28  ;;  %v9659_v9 = vld [vmem:[%s13099_s19 + $0x60] sm:$0xff] }
 0x5e2   : > { %v1645_v12 = vsel %vm781_vm1, %v13355_v7, 0.0 }
 0x5e3   : > { %v13359_v13 = vpop.eup %12351  ;;  %1646 = vadd.xlane.f32.xlu0 %v1645_v12 }
 0x5e4   : > { %v1654_v6 = vsel %vm781_vm1, %v13359_v13, 0.0 }
 0x5e5   : > { %v13363_v14 = vpop.eup %12353  ;;  %1655 = vadd.xlane.f32.xlu1 %v1654_v6  ;;  %v9658_v6 = vld [vmem:[%s13099_s19 + $0x58] sm:$0xff] }
 0x5e6   : > { %v1651_v15 = vsel %vm781_vm1, %v13363_v14, 0.0 }
 0x5e7   : > { %v13367_v16 = vpop.eup %12355  ;;  %1652 = vadd.xlane.f32.xlu0 %v1651_v15  ;;  %v9656_v15 = vld [vmem:[%s13099_s19 + $0x48] sm:$0xff] }
 0x5e8   : > { %v1660_v17 = vsel %vm781_vm1, %v13367_v16, 0.0 }
 0x5e9   : > { %v13371_v18 = vpop.eup %12357  ;;  %1661 = vadd.xlane.f32.xlu1 %v1660_v17  ;;  %v9648_v17 = vld [vmem:[%s13126_s30 + $0x48] sm:$0xff] }
 0x5ea   : > { %v1657_v20 = vsel %vm781_vm1, %v13371_v18, 0.0 }
 0x5eb   : > { %1658 = vadd.xlane.f32.xlu0 %v1657_v20  ;;  %v9651_v20 = vld [vmem:[%s13126_s30 + $0x60] sm:$0xff] }
 0x666   : > { %v1644_v29 = vpop.xlane.xlu1 %1643 }
 0x667   : > { %12359 = vrcp.f32 %v1644_v29 }
 0x668   : > { %v1641_v30 = vpop.xlane.xlu0 %1640 }
 0x669   : > { %12361 = vrcp.f32 %v1641_v30 }
 0x66a   : > { %v1650_v31 = vpop.xlane.xlu1 %1649 }
 0x66b   : > { %12363 = vrcp.f32 %v1650_v31 }
 0x66c   : > { %v1647_v32 = vpop.xlane.xlu0 %1646 }
 0x66d   : > { %12365 = vrcp.f32 %v1647_v32 }
 0x66e   : > { %v1656_v33 = vpop.xlane.xlu1 %1655 }
 0x66f   : > { %12367 = vrcp.f32 %v1656_v33 }
 0x670   : > { %v1653_v34 = vpop.xlane.xlu0 %1652 }
 0x671   : > { %12369 = vrcp.f32 %v1653_v34 }
 0x672   : > { %v1662_v35 = vpop.xlane.xlu1 %1661 }
 0x673   : > { %12371 = vrcp.f32 %v1662_v35 }
 0x674   : > { %v1659_v36 = vpop.xlane.xlu0 %1658  ;;  %v12360_v37 = vpop.eup %12359 }
 0x675   : > { %12373 = vrcp.f32 %v1659_v36  ;;  %v1666_v40 = vmul.f32 %v12360_v37, %v13343_v59 }
 0x676   : > { %v12362_v38 = vpop.eup %12361 }
 0x677   : > { %v1664_v39 = vmul.f32 %v12362_v38, %v13347_v62  ;;  %v9660_v62 = vld [vmem:[%s13099_s19 + $0x68] sm:$0xff] }
 0x678   : > { %v12364_v41 = vpop.eup %12363 }
 0x679   : > { %11226 = vmatprep.mubr.msk.f32.mxu1 %vm781_vm1, %v1664_v39  ;;  %v1670_v45 = vmul.f32 %v12364_v41, %v13351_v8 }
 0x67a   : > { %v12366_v43 = vpop.eup %12365  ;;  %11227 = vmatmul.mubr.msk.f32.vlgmr.msra.gmra.mxu1 %vm781_vm1, %v1666_v40 }
 0x67b   : > { %v1668_v44 = vmul.f32 %v12366_v43, %v13355_v7  ;;  %11239 = vmatpush3.msra.mxu1 %v13386_v28 }
 0x67c   : > { %11240 = vmatprep.subr.mxu1 %v13395_v42  ;;  %v12368_v46 = vpop.eup %12367 }
 0x67d   : > { %11229 = vmatprep.mubr.msk.f32.mxu1 %vm781_vm1, %v1668_v44  ;;  %11241 = vmatpush3.msra.mxu1 %v13395_v42  ;;  %v1674_v49 = vmul.f32 %v12368_v46, %v13359_v13  ;;  %v9647_v13 = vld [vmem:[%s13126_s30 + $0x40] sm:$0xff] }
 0x67e   : > { %v12370_v47 = vpop.eup %12369  ;;  %11230 = vmatmul.mubr.msk.f32.gmra.mxu1 %vm781_vm1, %v1670_v45  ;;  %11270 = vmatprep.subr.msk.mxu1 %vm619_vm0, %v9662_v54 }
 0x67f   : > { %v1672_v48 = vmul.f32 %v12370_v47, %v13363_v14  ;;  %v9657_v14 = vld [vmem:[%s13099_s19 + $0x50] sm:$0xff] }
 0x680   : > { %v12372_v50 = vpop.eup %12371 }
 0x681   : > { %11232 = vmatprep.mubr.msk.f32.mxu1 %vm781_vm1, %v1672_v48  ;;  %v1678_v53 = vmul.f32 %v12372_v50, %v13367_v16  ;;  %v9655_v16 = vld [vmem:[%s13099_s19 + $0x40] sm:$0xff] }
 0x682   : > { %v12374_v51 = vpop.eup %12373  ;;  %11233 = vmatmul.mubr.msk.f32.gmra.mxu1 %vm781_vm1, %v1674_v49 }
 0x683   : > { %v1676_v52 = vmul.f32 %v12374_v51, %v13371_v18  ;;  %v9649_v18 = vld [vmem:[%s13126_s30 + $0x50] sm:$0xff] }
 0x685   : > { %11235 = vmatprep.mubr.msk.f32.mxu1 %vm781_vm1, %v1676_v52 }
 0x686   : > { %11236 = vmatmul.mubr.msk.f32.gmra.mxu1 %vm781_vm1, %v1678_v53 }
 0x73a   : > { %v11228_v55 = vpop.f32.mrf.mxu1 }
 0x73c   : > { %v1769_v56 = vpop.f32.mrf.mxu1 }
 0x73d   : > { %11242 = vmatprep.mubr.msk.f32.mxu1 %vm619_vm0, %v1769_v56 }
 0x73e   : > { %v11231_v59 = vpop.f32.mrf.mxu1  ;;  %11243 = vmatmul.mubr.msk.f32.vlgmr.msra.gmra.mxu1 %vm619_vm0, %v11228_v55 }
 0x73f   : > { %11271 = vmatpush3.xpose.msk.msra.mxu1 %vm619_vm0, %v9662_v54 }
 0x740   : > { %v1779_v61 = vpop.f32.mrf.mxu1  ;;  %11272 = vmatprep.subr.msk.mxu1 %vm619_vm0, %v9661_v58 }
 0x741   : > { %11245 = vmatprep.mubr.msk.f32.mxu1 %vm619_vm0, %v1779_v61 }
 0x742   : > { %v11234_v63 = vpop.f32.mrf.mxu1  ;;  %11246 = vmatmul.mubr.msk.f32.gmra.mxu1 %vm619_vm0, %v11231_v59 }
 0x743   : > { %11273 = vmatpush3.xpose.msk.msra.mxu1 %vm619_vm0, %v9661_v58 }
 0x744   : > { %v1789_v8 = vpop.f32.mrf.mxu1  ;;  %11274 = vmatprep.subr.msk.mxu1 %vm619_vm0, %v9660_v62 }
 0x745   : > { %11248 = vmatprep.mubr.msk.f32.mxu1 %vm619_vm0, %v1789_v8 }
 0x746   : > { %v11237_v7 = vpop.f32.mrf.mxu1  ;;  %11249 = vmatmul.mubr.msk.f32.gmra.mxu1 %vm619_vm0, %v11234_v63 }
 0x747   : > { %11275 = vmatpush3.xpose.msk.msra.mxu1 %vm619_vm0, %v9660_v62 }
 0x748   : > { %v1799_v12 = vpop.f32.mrf.mxu1  ;;  %11276 = vmatprep.subr.msk.mxu1 %vm619_vm0, %v9659_v9 }
 0x749   : > { %11251 = vmatprep.mubr.msk.f32.mxu1 %vm619_vm0, %v1799_v12 }
 0x74a   : > { %11252 = vmatmul.mubr.msk.f32.gmra.mxu1 %vm619_vm0, %v11237_v7 }
 0x74b   : > { %11277 = vmatpush3.xpose.msk.msra.mxu1 %vm619_vm0, %v9659_v9  ;;  %11286 = vmatprep.mubr.msk.f32.mxu1 %vm619_vm0, %v9647_v13 }
 0x74c   : > { %11278 = vmatprep.subr.msk.mxu1 %vm619_vm0, %v9658_v6 }
 0x74f   : > { %11279 = vmatpush3.xpose.msk.msra.mxu1 %vm619_vm0, %v9658_v6 }
 0x750   : > { %11280 = vmatprep.subr.msk.mxu1 %vm619_vm0, %v9657_v14 }
 0x753   : > { %11281 = vmatpush3.xpose.msk.msra.mxu1 %vm619_vm0, %v9657_v14 }
 0x754   : > { %11282 = vmatprep.subr.msk.mxu1 %vm619_vm0, %v9656_v15 }
 0x757   : > { %11283 = vmatpush3.xpose.msk.msra.mxu1 %vm619_vm0, %v9656_v15 }
 0x758   : > { %11284 = vmatprep.subr.msk.mxu1 %vm619_vm0, %v9655_v16 }
 0x75b   : > { %11285 = vmatpush3.xpose.msk.msra.mxu1 %vm619_vm0, %v9655_v16 }
 0x75c   : > { %11342 = vmatprep.subr.mxu1 %v13277_v57 }
 0x75e   : > { %11287 = vmatmul.mubr.msk.f32.vlgmr.msra.gmra.mxu1 %vm619_vm0, %v9648_v17 }
 0x75f   : > { %11289 = vmatprep.mubr.msk.f32.mxu1 %vm619_vm0, %v9649_v18  ;;  %11343 = vmatpush3.msra.mxu1 %v13277_v57 }
 0x760   : > { %11344 = vmatprep.subr.mxu1 %v13286_v60 }
 0x761   : > { %11345 = vmatpush3.msra.mxu1 %v13286_v60 }
 0x762   : > { %11290 = vmatmul.mubr.msk.f32.gmra.mxu1 %vm619_vm0, %v9650_v19 }
 0x763   : > { %11292 = vmatprep.mubr.msk.f32.mxu1 %vm619_vm0, %v9651_v20 }
 0x766   : > { %11293 = vmatmul.mubr.msk.f32.gmra.mxu1 %vm619_vm0, %v9652_v21 }
 0x767   : > { %11295 = vmatprep.mubr.msk.f32.mxu1 %vm619_vm0, %v9653_v22 }
 0x76a   : > { %11296 = vmatmul.mubr.msk.f32.gmra.mxu1 %vm619_vm0, %v9654_v23 }
 0x76b   : > { %11346 = vmatprep.mubr.msk.f32.mxu1 %vm619_vm0, %v13321_v0 }
 0x76e   : > { %11347 = vmatmul.mubr.msk.f32.vlgmr.msra.gmra.mxu1 %vm619_vm0, %v13319_v1 }
 0x76f   : > { %11349 = vmatprep.mubr.msk.f32.mxu1 %vm619_vm0, %v13325_v10 }
 0x772   : > { %11350 = vmatmul.mubr.msk.f32.gmra.mxu1 %vm619_vm0, %v13323_v3 }
 0x773   : > { %11352 = vmatprep.mubr.msk.f32.mxu1 %vm619_vm0, %v13329_v5 }
 0x776   : > { %11353 = vmatmul.mubr.msk.f32.gmra.mxu1 %vm619_vm0, %v13327_v2 }
 0x777   : > { %11355 = vmatprep.mubr.msk.f32.mxu1 %vm619_vm0, %v13333_v4 }
 0x77a   : > { %11356 = vmatmul.mubr.msk.f32.gmra.mxu1 %vm619_vm0, %v13331_v11 }
 0x7fe   : > { %v13481_v57 = vpop.f32.mrf.mxu1 }
 0x800   : > { %v13483_v60 = vpop.f32.mrf.mxu1 }
 0x801   : > { %16158 = vst [vmem:[#allocation5_spill] sm:$0xff] %v13483_v60 }
 0x802   : > { %v13485_v1 = vpop.f32.mrf.mxu1 }
 0x804   : > { %v13487_v0 = vpop.f32.mrf.mxu1 }
 0x805   : > { %16159 = vst [vmem:[#allocation6_spill] sm:$0xff] %v13487_v0 }
 0x806   : > { %v13489_v3 = vpop.f32.mrf.mxu1 }
 0x808   : > { %v13491_v10 = vpop.f32.mrf.mxu1 }
 0x809   : > { %16160 = vst [vmem:[#allocation7_spill] sm:$0xff] %v13491_v10 }
 0x80a   : > { %v13493_v5 = vpop.f32.mrf.mxu1 }
 0x80c   : > { %v13495_v2 = vpop.f32.mrf.mxu1 }
 0x80d   : > { %16161 = vst [vmem:[#allocation8_spill] sm:$0xff] %v13495_v2 }
 0x81e   : > { %v11288_v4 = vpop.f32.mrf.mxu1 }
 0x81f   : > { %v2247_v24 = vmul.f32 0.25, %v11288_v4 }
 0x820   : > { %v2207_v25 = vpop.f32.mrf.mxu1 }
 0x821   : > { %v2246_v11 = vmul.f32 0.25, %v2207_v25  ;;  %v2257_v26 = vsel %vm781_vm1, %v2247_v24, -inf }
 0x822   : > { %2258 = vmax.xlane.f32.xlu1 %v2257_v26  ;;  %v11291_v27 = vpop.f32.mrf.mxu1 }
 0x823   : > { %v2249_v29 = vmul.f32 0.25, %v11291_v27  ;;  %v2254_v30 = vsel %vm781_vm1, %v2246_v11, -inf }
 0x824   : > { %2255 = vmax.xlane.f32.xlu0 %v2254_v30  ;;  %v2217_v31 = vpop.f32.mrf.mxu1 }
 0x825   : > { %v2248_v32 = vmul.f32 0.25, %v2217_v31  ;;  %v2263_v33 = vsel %vm781_vm1, %v2249_v29, -inf }
 0x826   : > { %2264 = vmax.xlane.f32.xlu1 %v2263_v33  ;;  %v11294_v34 = vpop.f32.mrf.mxu1 }
 0x827   : > { %v2251_v35 = vmul.f32 0.25, %v11294_v34  ;;  %v2260_v36 = vsel %vm781_vm1, %v2248_v32, -inf  ;;  %v9669_v34 = vld [vmem:[%s13217_s24 + $0x70] sm:$0xff] }
 0x828   : > { %2261 = vmax.xlane.f32.xlu0 %v2260_v36  ;;  %v2227_v37 = vpop.f32.mrf.mxu1  ;;  %v9667_v36 = vld [vmem:[%s13217_s24 + $0x60] sm:$0xff] }
 0x829   : > { %v2250_v38 = vmul.f32 0.25, %v2227_v37  ;;  %v2269_v39 = vsel %vm781_vm1, %v2251_v35, -inf  ;;  %v9666_v37 = vld [vmem:[%s13217_s24 + $0x58] sm:$0xff] }
 0x82a   : > { %2270 = vmax.xlane.f32.xlu1 %v2269_v39  ;;  %v11297_v40 = vpop.f32.mrf.mxu1  ;;  %v9664_v39 = vld [vmem:[%s13217_s24 + $0x48] sm:$0xff] }
 0x82b   : > { %v2253_v41 = vmul.f32 0.25, %v11297_v40  ;;  %v2266_v43 = vsel %vm781_vm1, %v2250_v38, -inf  ;;  %v9663_v40 = vld [vmem:[%s13217_s24 + $0x40] sm:$0xff] }
 0x82c   : > { %2267 = vmax.xlane.f32.xlu0 %v2266_v43  ;;  %v2237_v44 = vpop.f32.mrf.mxu1 }
 0x82d   : > { %v2252_v45 = vmul.f32 0.25, %v2237_v44  ;;  %v2275_v46 = vsel %vm781_vm1, %v2253_v41, -inf }
 0x82e   : > { %2276 = vmax.xlane.f32.xlu1 %v2275_v46 }
 0x82f   : > { %v2272_v47 = vsel %vm781_vm1, %v2252_v45, -inf }
 0x830   : > { %2273 = vmax.xlane.f32.xlu0 %v2272_v47 }
 0x8ab   : > { %v2259_v48 = vpop.xlane.xlu1 %2258 }
 0x8ac   : > { %v2279_v49 = vsub.f32 %v2247_v24, %v2259_v48 }
 0x8ad   : > { %v2256_v50 = vpop.xlane.xlu0 %2255 }
 0x8ae   : > { %v2288_v51 = vmul.f32 1.442695, %v2279_v49  ;;  %v2278_v52 = vsub.f32 %v2246_v11, %v2256_v50 }
 0x8af   : > { %v2265_v53 = vpop.xlane.xlu1 %2264 }
 0x8b0   : > { %12375 = vpow2.f32 %v2288_v51  ;;  %v2286_v54 = vmul.f32 1.442695, %v2278_v52  ;;  %v2281_v55 = vsub.f32 %v2249_v29, %v2265_v53 }
 0x8b1   : > { %v2262_v56 = vpop.xlane.xlu0 %2261 }
 0x8b2   : > { %12377 = vpow2.f32 %v2286_v54  ;;  %v2292_v58 = vmul.f32 1.442695, %v2281_v55  ;;  %v2280_v59 = vsub.f32 %v2248_v32, %v2262_v56  ;;  %v9670_v32 = vld [vmem:[%s13217_s24 + $0x78] sm:$0xff] }
 0x8b3   : > { %v2271_v61 = vpop.xlane.xlu1 %2270  ;;  %11298 = vmatprep.subr.mxu0 %v9670_v32 }
 0x8b4   : > { %12379 = vpow2.f32 %v2292_v58  ;;  %v2290_v62 = vmul.f32 1.442695, %v2280_v59  ;;  %v2283_v63 = vsub.f32 %v2251_v35, %v2271_v61  ;;  %11299 = vmatpush3.msra.mxu0 %v9670_v32  ;;  %v9668_v35 = vld [vmem:[%s13217_s24 + $0x68] sm:$0xff] }
 0x8b5   : > { %v2268_v8 = vpop.xlane.xlu0 %2267  ;;  %11300 = vmatprep.subr.mxu0 %v9669_v34  ;;  %v9720_v32 = vld [vmem:[%s12993_s11 + $0x88] sm:$0xff] }
 0x8b6   : > { %12381 = vpow2.f32 %v2290_v62  ;;  %v2296_v9 = vmul.f32 1.442695, %v2283_v63  ;;  %v2282_v7 = vsub.f32 %v2250_v38, %v2268_v8  ;;  %11301 = vmatpush3.msra.mxu0 %v9669_v34  ;;  %v9665_v38 = vld [vmem:[%s13217_s24 + $0x50] sm:$0xff]  ;;  %v9782_v34 = vld [vmem:[%s13099_s19 + $0xb8] sm:$0xff] }
 0x8b7   : > { %v2277_v12 = vpop.xlane.xlu1 %2276  ;;  %11302 = vmatprep.subr.mxu0 %v9668_v35 }
 0x8b8   : > { %12383 = vpow2.f32 %v2296_v9  ;;  %v2294_v13 = vmul.f32 1.442695, %v2282_v7  ;;  %v2285_v6 = vsub.f32 %v2253_v41, %v2277_v12  ;;  %11303 = vmatpush3.msra.mxu0 %v9668_v35  ;;  %v13567_v12 = vpop.f32.mrf.mxu0  ;;  %v9712_v35 = vld [vmem:[%s12999_s20 + $0x88] sm:$0xff] }
 0x8b9   : > { %v2274_v14 = vpop.xlane.xlu0 %2273  ;;  %11304 = vmatprep.subr.mxu0 %v9667_v36 }
 0x8ba   : > { %12385 = vpow2.f32 %v2294_v13  ;;  %v2300_v15 = vmul.f32 1.442695, %v2285_v6  ;;  %v2284_v16 = vsub.f32 %v2252_v45, %v2274_v14  ;;  %11305 = vmatpush3.msra.mxu0 %v9667_v36  ;;  %v13569_v13 = vpop.f32.mrf.mxu0  ;;  %v9713_v36 = vld [vmem:[%s12999_s20 + $0x90] sm:$0xff] }
 0x8bb   : > { %11306 = vmatprep.subr.mxu0 %v9666_v37  ;;  %16162 = vst [vmem:[#allocation9_spill] sm:$0xff] %v13569_v13  ;;  %v9784_v13 = vld [vmem:[%s13217_s24 + $0x88] sm:$0xff] }
 0x8bc   : > { %12387 = vpow2.f32 %v2300_v15  ;;  %v2298_v17 = vmul.f32 1.442695, %v2284_v16  ;;  %11307 = vmatpush3.msra.mxu0 %v9666_v37  ;;  %v13571_v6 = vpop.f32.mrf.mxu0  ;;  %v9781_v37 = vld [vmem:[%s13099_s19 + $0xb0] sm:$0xff] }
 0x8bd   : > { %v13505_v18 = vpop.eup %12375  ;;  %11308 = vmatprep.subr.mxu0 %v9665_v38 }
 0x8be   : > { %12389 = vpow2.f32 %v2298_v17  ;;  %v2305_v19 = vsel %vm781_vm1, %v13505_v18, 0.0  ;;  %11309 = vmatpush3.msra.mxu0 %v9665_v38  ;;  %v13573_v14 = vpop.f32.mrf.mxu0  ;;  %v9714_v38 = vld [vmem:[%s12999_s20 + $0x98] sm:$0xff] }
 0x8bf   : > { %v13509_v20 = vpop.eup %12377  ;;  %2306 = vadd.xlane.f32.xlu1 %v2305_v19  ;;  %11310 = vmatprep.subr.mxu0 %v9664_v39  ;;  %16163 = vst [vmem:[#allocation10_spill] sm:$0xff] %v13573_v14  ;;  %v14102_v14 = vld [vmem:[%s13099_s19 + $0x130] sm:$0xff] }
 0x8c0   : > { %v2302_v21 = vsel %vm781_vm1, %v13509_v20, 0.0  ;;  %11311 = vmatpush3.msra.mxu0 %v9664_v39  ;;  %v13575_v15 = vpop.f32.mrf.mxu0  ;;  %v9715_v39 = vld [vmem:[%s12999_s20 + $0xa0] sm:$0xff] }
 0x8c1   : > { %v13513_v22 = vpop.eup %12379  ;;  %2303 = vadd.xlane.f32.xlu0 %v2302_v21  ;;  %11312 = vmatprep.subr.mxu0 %v9663_v40  ;;  %v9725_v21 = vld [vmem:[%s12993_s11 + $0xb0] sm:$0xff] }
 0x8c2   : > { %v2311_v23 = vsel %vm781_vm1, %v13513_v22, 0.0  ;;  %11313 = vmatpush3.msra.mxu0 %v9663_v40  ;;  %v13577_v16 = vpop.f32.mrf.mxu0  ;;  %v9780_v40 = vld [vmem:[%s13099_s19 + $0xa8] sm:$0xff] }
 0x8c3   : > { %v13517_v4 = vpop.eup %12381  ;;  %2312 = vadd.xlane.f32.xlu1 %v2311_v23  ;;  %11326 = vmatprep.subr.mxu0 %v13386_v28  ;;  %16164 = vst [vmem:[#allocation11_spill] sm:$0xff] %v13577_v16 }
 0x8c4   : > { %v2308_v24 = vsel %vm781_vm1, %v13517_v4, 0.0  ;;  %v13579_v17 = vpop.f32.mrf.mxu0 }
 0x8c5   : > { %v13521_v25 = vpop.eup %12383  ;;  %2309 = vadd.xlane.f32.xlu0 %v2308_v24 }
 0x8c6   : > { %v2317_v11 = vsel %vm781_vm1, %v13521_v25, 0.0 }
 0x8c7   : > { %v13525_v26 = vpop.eup %12385  ;;  %2318 = vadd.xlane.f32.xlu1 %v2317_v11  ;;  %v9723_v11 = vld [vmem:[%s12993_s11 + $0xa0] sm:$0xff] }
 0x8c8   : > { %v2314_v27 = vsel %vm781_vm1, %v13525_v26, 0.0 }
 0x8c9   : > { %v13529_v29 = vpop.eup %12387  ;;  %2315 = vadd.xlane.f32.xlu0 %v2314_v27 }
 0x8ca   : > { %v2323_v30 = vsel %vm781_vm1, %v13529_v29, 0.0 }
 0x8cb   : > { %v13533_v31 = vpop.eup %12389  ;;  %2324 = vadd.xlane.f32.xlu1 %v2323_v30  ;;  %v9722_v30 = vld [vmem:[%s12993_s11 + $0x98] sm:$0xff] }
 0x8cc   : > { %v2320_v33 = vsel %vm781_vm1, %v13533_v31, 0.0 }
 0x8cd   : > { %2321 = vadd.xlane.f32.xlu0 %v2320_v33  ;;  %v9719_v33 = vld [vmem:[%s12993_s11 + $0x80] sm:$0xff] }
 0x948   : > { %v2307_v41 = vpop.xlane.xlu1 %2306 }
 0x949   : > { %12391 = vrcp.f32 %v2307_v41  ;;  %v9716_v41 = vld [vmem:[%s12999_s20 + $0xa8] sm:$0xff] }
 0x94a   : > { %v2304_v43 = vpop.xlane.xlu0 %2303 }
 0x94b   : > { %12393 = vrcp.f32 %v2304_v43  ;;  %v9717_v43 = vld [vmem:[%s12999_s20 + $0xb0] sm:$0xff] }
 0x94c   : > { %v2313_v44 = vpop.xlane.xlu1 %2312 }
 0x94d   : > { %12395 = vrcp.f32 %v2313_v44  ;;  %v9779_v44 = vld [vmem:[%s13099_s19 + $0xa0] sm:$0xff] }
 0x94e   : > { %v2310_v45 = vpop.xlane.xlu0 %2309 }
 0x94f   : > { %12397 = vrcp.f32 %v2310_v45  ;;  %v9718_v45 = vld [vmem:[%s12999_s20 + $0xb8] sm:$0xff] }
 0x950   : > { %v2319_v46 = vpop.xlane.xlu1 %2318 }
 0x951   : > { %12399 = vrcp.f32 %v2319_v46  ;;  %v9778_v46 = vld [vmem:[%s13099_s19 + $0x98] sm:$0xff] }
 0x952   : > { %v2316_v47 = vpop.xlane.xlu0 %2315 }
 0x953   : > { %12401 = vrcp.f32 %v2316_v47  ;;  %v9777_v47 = vld [vmem:[%s13099_s19 + $0x90] sm:$0xff] }
 0x954   : > { %v2325_v48 = vpop.xlane.xlu1 %2324 }
 0x955   : > { %12403 = vrcp.f32 %v2325_v48  ;;  %v9776_v48 = vld [vmem:[%s13099_s19 + $0x88] sm:$0xff] }
 0x956   : > { %v2322_v49 = vpop.xlane.xlu0 %2321  ;;  %v12392_v50 = vpop.eup %12391 }
 0x957   : > { %12405 = vrcp.f32 %v2322_v49  ;;  %v2329_v53 = vmul.f32 %v12392_v50, %v13505_v18  ;;  %v13581_v18 = vpop.f32.mrf.mxu0  ;;  %v9775_v49 = vld [vmem:[%s13099_s19 + $0x80] sm:$0xff] }
 0x958   : > { %v12394_v51 = vpop.eup %12393  ;;  %16165 = vst [vmem:[#allocation12_spill] sm:$0xff] %v13581_v18  ;;  %v9767_v50 = vld [vmem:[%s13126_s30 + $0x80] sm:$0xff] }
 0x959   : > { %v2327_v52 = vmul.f32 %v12394_v51, %v13509_v20  ;;  %v9768_v51 = vld [vmem:[%s13126_s30 + $0x88] sm:$0xff] }
 0x95a   : > { %v12396_v54 = vpop.eup %12395 }
 0x95b   : > { %11314 = vmatprep.mubr.msk.f32.mxu0 %vm781_vm1, %v2327_v52  ;;  %v2333_v58 = vmul.f32 %v12396_v54, %v13513_v22  ;;  %v9769_v52 = vld [vmem:[%s13126_s30 + $0x90] sm:$0xff]  ;;  %v9771_v54 = vld [vmem:[%s13126_s30 + $0xa0] sm:$0xff] }
 0x95c   : > { %v12398_v55 = vpop.eup %12397  ;;  %11315 = vmatmul.mubr.msk.f32.vlgmr.msra.gmra.mxu0 %vm781_vm1, %v2329_v53  ;;  %v9770_v53 = vld [vmem:[%s13126_s30 + $0x98] sm:$0xff] }
 0x95d   : > { %v2331_v56 = vmul.f32 %v12398_v55, %v13517_v4  ;;  %11327 = vmatpush3.msra.mxu0 %v13386_v28  ;;  %v9724_v4 = vld [vmem:[%s12993_s11 + $0xa8] sm:$0xff] }
 0x95e   : > { %11328 = vmatprep.subr.mxu0 %v13395_v42  ;;  %v12400_v59 = vpop.eup %12399  ;;  %v9772_v55 = vld [vmem:[%s13126_s30 + $0xa8] sm:$0xff] }
 0x95f   : > { %11317 = vmatprep.mubr.msk.f32.mxu0 %vm781_vm1, %v2331_v56  ;;  %11329 = vmatpush3.msra.mxu0 %v13395_v42  ;;  %v2337_v63 = vmul.f32 %v12400_v59, %v13521_v25  ;;  %v9726_v42 = vld [vmem:[%s12993_s11 + $0xb8] sm:$0xff]  ;;  %v9773_v56 = vld [vmem:[%s13126_s30 + $0xb0] sm:$0xff] }
 0x960   : > { %v12402_v61 = vpop.eup %12401  ;;  %11318 = vmatmul.mubr.msk.f32.gmra.mxu0 %vm781_vm1, %v2333_v58  ;;  %11358 = vmatprep.subr.msk.mxu0 %vm619_vm0, %v9726_v42  ;;  %v9774_v58 = vld [vmem:[%s13126_s30 + $0xb8] sm:$0xff] }
 0x961   : > { %v2335_v62 = vmul.f32 %v12402_v61, %v13525_v26  ;;  %v9838_v59 = vld [vmem:[%s12993_s11 + $0xf8] sm:$0xff]  ;;  %v9837_v61 = vld [vmem:[%s12993_s11 + $0xf0] sm:$0xff] }
 0x962   : > { %v12404_v8 = vpop.eup %12403 }
 0x963   : > { %11320 = vmatprep.mubr.msk.f32.mxu0 %vm781_vm1, %v2335_v62  ;;  %v2341_v7 = vmul.f32 %v12404_v8, %v13529_v29  ;;  %v9711_v29 = vld [vmem:[%s12999_s20 + $0x80] sm:$0xff]  ;;  %v9836_v62 = vld [vmem:[%s12993_s11 + $0xe8] sm:$0xff]  ;;  %v9834_v8 = vld [vmem:[%s12993_s11 + $0xd8] sm:$0xff] }
 0x964   : > { %v12406_v28 = vpop.eup %12405  ;;  %11321 = vmatmul.mubr.msk.f32.gmra.mxu0 %vm781_vm1, %v2337_v63  ;;  %v9835_v63 = vld [vmem:[%s12993_s11 + $0xe0] sm:$0xff] }
 0x965   : > { %v2339_v9 = vmul.f32 %v12406_v28, %v13533_v31  ;;  %v9721_v31 = vld [vmem:[%s12993_s11 + $0x90] sm:$0xff] }
 0x967   : > { %11323 = vmatprep.mubr.msk.f32.mxu0 %vm781_vm1, %v2339_v9 }
 0x968   : > { %11324 = vmatmul.mubr.msk.f32.gmra.mxu0 %vm781_vm1, %v2341_v7 }
 0xa1c   : > { %v11316_v19 = vpop.f32.mrf.mxu0 }
 0xa1e   : > { %v2432_v20 = vpop.f32.mrf.mxu0 }
 0xa1f   : > { %11330 = vmatprep.mubr.msk.f32.mxu0 %vm619_vm0, %v2432_v20 }
 0xa20   : > { %v11319_v22 = vpop.f32.mrf.mxu0  ;;  %11331 = vmatmul.mubr.msk.f32.vlgmr.msra.gmra.mxu0 %vm619_vm0, %v11316_v19 }
 0xa21   : > { %11359 = vmatpush3.xpose.msk.msra.mxu0 %vm619_vm0, %v9726_v42 }
 0xa22   : > { %v2442_v23 = vpop.f32.mrf.mxu0  ;;  %11360 = vmatprep.subr.msk.mxu0 %vm619_vm0, %v9725_v21 }
 0xa23   : > { %11333 = vmatprep.mubr.msk.f32.mxu0 %vm619_vm0, %v2442_v23 }
 0xa24   : > { %v11322_v24 = vpop.f32.mrf.mxu0  ;;  %11334 = vmatmul.mubr.msk.f32.gmra.mxu0 %vm619_vm0, %v11319_v22 }
 0xa25   : > { %11361 = vmatpush3.xpose.msk.msra.mxu0 %vm619_vm0, %v9725_v21 }
 0xa26   : > { %v2452_v25 = vpop.f32.mrf.mxu0  ;;  %11362 = vmatprep.subr.msk.mxu0 %vm619_vm0, %v9724_v4 }
 0xa27   : > { %11336 = vmatprep.mubr.msk.f32.mxu0 %vm619_vm0, %v2452_v25 }
 0xa28   : > { %v11325_v26 = vpop.f32.mrf.mxu0  ;;  %11337 = vmatmul.mubr.msk.f32.gmra.mxu0 %vm619_vm0, %v11322_v24 }
 0xa29   : > { %11363 = vmatpush3.xpose.msk.msra.mxu0 %vm619_vm0, %v9724_v4 }
 0xa2a   : > { %v2462_v27 = vpop.f32.mrf.mxu0  ;;  %11364 = vmatprep.subr.msk.mxu0 %vm619_vm0, %v9723_v11 }
 0xa2b   : > { %11339 = vmatprep.mubr.msk.f32.mxu0 %vm619_vm0, %v2462_v27 }
 0xa2c   : > { %11340 = vmatmul.mubr.msk.f32.gmra.mxu0 %vm619_vm0, %v11325_v26 }
 0xa2d   : > { %11365 = vmatpush3.xpose.msk.msra.mxu0 %vm619_vm0, %v9723_v11  ;;  %11374 = vmatprep.mubr.msk.f32.mxu0 %vm619_vm0, %v9711_v29 }
 0xa2e   : > { %11366 = vmatprep.subr.msk.mxu0 %vm619_vm0, %v9722_v30 }
 0xa31   : > { %11367 = vmatpush3.xpose.msk.msra.mxu0 %vm619_vm0, %v9722_v30 }
 0xa32   : > { %11368 = vmatprep.subr.msk.mxu0 %vm619_vm0, %v9721_v31 }
 0xa35   : > { %11369 = vmatpush3.xpose.msk.msra.mxu0 %vm619_vm0, %v9721_v31 }
 0xa36   : > { %11370 = vmatprep.subr.msk.mxu0 %vm619_vm0, %v9720_v32 }
 0xa39   : > { %11371 = vmatpush3.xpose.msk.msra.mxu0 %vm619_vm0, %v9720_v32 }
 0xa3a   : > { %11372 = vmatprep.subr.msk.mxu0 %vm619_vm0, %v9719_v33 }
 0xa3d   : > { %11373 = vmatpush3.xpose.msk.msra.mxu0 %vm619_vm0, %v9719_v33 }
 0xa3e   : > { %11430 = vmatprep.subr.msk.mxu0 %vm619_vm0, %v9782_v34 }
 0xa40   : > { %11375 = vmatmul.mubr.msk.f32.vlgmr.msra.gmra.mxu0 %vm619_vm0, %v9712_v35 }
 0xa41   : > { %11377 = vmatprep.mubr.msk.f32.mxu0 %vm619_vm0, %v9713_v36  ;;  %11431 = vmatpush3.xpose.msk.msra.mxu0 %vm619_vm0, %v9782_v34 }
 0xa42   : > { %11432 = vmatprep.subr.msk.mxu0 %vm619_vm0, %v9781_v37 }
 0xa44   : > { %11378 = vmatmul.mubr.msk.f32.gmra.mxu0 %vm619_vm0, %v9714_v38 }
 0xa45   : > { %11380 = vmatprep.mubr.msk.f32.mxu0 %vm619_vm0, %v9715_v39  ;;  %11433 = vmatpush3.xpose.msk.msra.mxu0 %vm619_vm0, %v9781_v37 }
 0xa46   : > { %11434 = vmatprep.subr.msk.mxu0 %vm619_vm0, %v9780_v40 }
 0xa48   : > { %11381 = vmatmul.mubr.msk.f32.gmra.mxu0 %vm619_vm0, %v9716_v41 }
 0xa49   : > { %11383 = vmatprep.mubr.msk.f32.mxu0 %vm619_vm0, %v9717_v43  ;;  %11435 = vmatpush3.xpose.msk.msra.mxu0 %vm619_vm0, %v9780_v40  ;;  %v9833_v43 = vld [vmem:[%s12993_s11 + $0xd0] sm:$0xff] }
 0xa4a   : > { %11436 = vmatprep.subr.msk.mxu0 %vm619_vm0, %v9779_v44 }
 0xa4c   : > { %11384 = vmatmul.mubr.msk.f32.gmra.mxu0 %vm619_vm0, %v9718_v45 }
 0xa4d   : > { %11437 = vmatpush3.xpose.msk.msra.mxu0 %vm619_vm0, %v9779_v44  ;;  %11446 = vmatprep.mubr.msk.f32.mxu0 %vm619_vm0, %v9767_v50  ;;  %v9823_v50 = vld [vmem:[%s12999_s20 + $0xc0] sm:$0xff] }
 0xa4e   : > { %11438 = vmatprep.subr.msk.mxu0 %vm619_vm0, %v9778_v46 }
 0xa51   : > { %11439 = vmatpush3.xpose.msk.msra.mxu0 %vm619_vm0, %v9778_v46 }
 0xa52   : > { %11440 = vmatprep.subr.msk.mxu0 %vm619_vm0, %v9777_v47 }
 0xa55   : > { %11441 = vmatpush3.xpose.msk.msra.mxu0 %vm619_vm0, %v9777_v47 }
 0xa56   : > { %11442 = vmatprep.subr.msk.mxu0 %vm619_vm0, %v9776_v48 }
 0xa59   : > { %11443 = vmatpush3.xpose.msk.msra.mxu0 %vm619_vm0, %v9776_v48  ;;  %v9832_v48 = vld [vmem:[%s12993_s11 + $0xc8] sm:$0xff] }
 0xa5a   : > { %11444 = vmatprep.subr.msk.mxu0 %vm619_vm0, %v9775_v49 }
 0xa5d   : > { %11445 = vmatpush3.xpose.msk.msra.mxu0 %vm619_vm0, %v9775_v49  ;;  %v9831_v49 = vld [vmem:[%s12993_s11 + $0xc0] sm:$0xff] }
 0xa5e   : > { %11502 = vmatprep.subr.msk.mxu0 %vm619_vm0, %v9838_v59 }
 0xa60   : > { %11447 = vmatmul.mubr.msk.f32.vlgmr.msra.gmra.mxu0 %vm619_vm0, %v9768_v51  ;;  %v9824_v51 = vld [vmem:[%s12999_s20 + $0xc8] sm:$0xff] }
 0xa61   : > { %11449 = vmatprep.mubr.msk.f32.mxu0 %vm619_vm0, %v9769_v52  ;;  %11503 = vmatpush3.xpose.msk.msra.mxu0 %vm619_vm0, %v9838_v59  ;;  %v9825_v52 = vld [vmem:[%s12999_s20 + $0xd0] sm:$0xff]  ;;  %v9894_v59 = vld [vmem:[%s13099_s19 + $0xf8] sm:$0xff] }
 0xa62   : > { %11504 = vmatprep.subr.msk.mxu0 %vm619_vm0, %v9837_v61 }
 0xa64   : > { %11450 = vmatmul.mubr.msk.f32.gmra.mxu0 %vm619_vm0, %v9770_v53  ;;  %v9826_v53 = vld [vmem:[%s12999_s20 + $0xd8] sm:$0xff] }
 0xa65   : > { %11452 = vmatprep.mubr.msk.f32.mxu0 %vm619_vm0, %v9771_v54  ;;  %11505 = vmatpush3.xpose.msk.msra.mxu0 %vm619_vm0, %v9837_v61  ;;  %v9827_v54 = vld [vmem:[%s12999_s20 + $0xe0] sm:$0xff] }
 0xa66   : > { %11506 = vmatprep.subr.msk.mxu0 %vm619_vm0, %v9836_v62 }
 0xa68   : > { %11453 = vmatmul.mubr.msk.f32.gmra.mxu0 %vm619_vm0, %v9772_v55  ;;  %v9828_v55 = vld [vmem:[%s12999_s20 + $0xe8] sm:$0xff] }
 0xa69   : > { %11455 = vmatprep.mubr.msk.f32.mxu0 %vm619_vm0, %v9773_v56  ;;  %11507 = vmatpush3.xpose.msk.msra.mxu0 %vm619_vm0, %v9836_v62  ;;  %v9829_v56 = vld [vmem:[%s12999_s20 + $0xf0] sm:$0xff] }
 0xa6a   : > { %11508 = vmatprep.subr.msk.mxu0 %vm619_vm0, %v9835_v63 }
 0xa6c   : > { %11456 = vmatmul.mubr.msk.f32.gmra.mxu0 %vm619_vm0, %v9774_v58  ;;  %v9830_v58 = vld [vmem:[%s12999_s20 + $0xf8] sm:$0xff] }
 0xa6d   : > { %11509 = vmatpush3.xpose.msk.msra.mxu0 %vm619_vm0, %v9835_v63  ;;  %11518 = vmatprep.mubr.msk.f32.mxu0 %vm619_vm0, %v9823_v50 }
 0xa6e   : > { %11510 = vmatprep.subr.msk.mxu0 %vm619_vm0, %v9834_v8 }
 0xa71   : > { %11511 = vmatpush3.xpose.msk.msra.mxu0 %vm619_vm0, %v9834_v8 }
 0xa72   : > { %11512 = vmatprep.subr.msk.mxu0 %vm619_vm0, %v9833_v43 }
 0xa75   : > { %11513 = vmatpush3.xpose.msk.msra.mxu0 %vm619_vm0, %v9833_v43 }
 0xa76   : > { %11514 = vmatprep.subr.msk.mxu0 %vm619_vm0, %v9832_v48 }
 0xa79   : > { %11515 = vmatpush3.xpose.msk.msra.mxu0 %vm619_vm0, %v9832_v48 }
 0xa7a   : > { %11516 = vmatprep.subr.msk.mxu0 %vm619_vm0, %v9831_v49 }
 0xa7d   : > { %11517 = vmatpush3.xpose.msk.msra.mxu0 %vm619_vm0, %v9831_v49 }
 0xa7e   : > { %11574 = vmatprep.subr.msk.mxu0 %vm619_vm0, %v9894_v59 }
 0xa80   : > { %11519 = vmatmul.mubr.msk.f32.vlgmr.msra.gmra.mxu0 %vm619_vm0, %v9824_v51 }
 0xa81   : > { %11521 = vmatprep.mubr.msk.f32.mxu0 %vm619_vm0, %v9825_v52  ;;  %11575 = vmatpush3.xpose.msk.msra.mxu0 %vm619_vm0, %v9894_v59 }
 0xa84   : > { %11522 = vmatmul.mubr.msk.f32.gmra.mxu0 %vm619_vm0, %v9826_v53 }
 0xa85   : > { %11524 = vmatprep.mubr.msk.f32.mxu0 %vm619_vm0, %v9827_v54 }
 0xa88   : > { %11525 = vmatmul.mubr.msk.f32.gmra.mxu0 %vm619_vm0, %v9828_v55 }
 0xa89   : > { %11527 = vmatprep.mubr.msk.f32.mxu0 %vm619_vm0, %v9829_v56 }
 0xa8c   : > { %11528 = vmatmul.mubr.msk.f32.gmra.mxu0 %vm619_vm0, %v9830_v58 }
 0xae0   : > { %v13684_v28 = vpop.f32.mrf.mxu0 }
 0xae2   : > { %v13686_v9 = vpop.f32.mrf.mxu0 }
 0xae4   : > { %v13688_v7 = vpop.f32.mrf.mxu0 }
 0xae6   : > { %v13690_v42 = vpop.f32.mrf.mxu0 }
 0xae7   : > { %16166 = vst [vmem:[#allocation13_spill] sm:$0xff] %v13690_v42 }
 0xae8   : > { %v13692_v19 = vpop.f32.mrf.mxu0 }
 0xaea   : > { %v13694_v20 = vpop.f32.mrf.mxu0 }
 0xaeb   : > { %16167 = vst [vmem:[#allocation14_spill] sm:$0xff] %v13694_v20 }
 0xaec   : > { %v13696_v21 = vpop.f32.mrf.mxu0 }
 0xaee   : > { %v13698_v22 = vpop.f32.mrf.mxu0 }
 0xaef   : > { %16168 = vst [vmem:[#allocation15_spill] sm:$0xff] %v13698_v22 }
 0xb00   : > { %v11376_v23 = vpop.f32.mrf.mxu0 }
 0xb01   : > { %v2912_v4 = vmul.f32 0.25, %v11376_v23 }
 0xb02   : > { %v2872_v24 = vpop.f32.mrf.mxu0 }
 0xb03   : > { %v13700_v25 = vmul.f32 0.25, %v2872_v24  ;;  %v2922_v11 = vsel %vm781_vm1, %v2912_v4, -inf }
 0xb04   : > { %2923 = vmax.xlane.f32.xlu1 %v2922_v11  ;;  %v11379_v26 = vpop.f32.mrf.mxu0 }
 0xb05   : > { %v13703_v27 = vmul.f32 0.25, %v11379_v26  ;;  %v2919_v29 = vsel %vm781_vm1, %v13700_v25, -inf }
 0xb06   : > { %2920 = vmax.xlane.f32.xlu0 %v2919_v29  ;;  %v2882_v30 = vpop.f32.mrf.mxu0 }
 0xb07   : > { %v13707_v31 = vmul.f32 0.25, %v2882_v30  ;;  %v2928_v32 = vsel %vm781_vm1, %v13703_v27, -inf }
 0xb08   : > { %2929 = vmax.xlane.f32.xlu1 %v2928_v32  ;;  %v11382_v33 = vpop.f32.mrf.mxu0 }
 0xb09   : > { %v13711_v34 = vmul.f32 0.25, %v11382_v33  ;;  %v2925_v35 = vsel %vm781_vm1, %v13707_v31, -inf }
 0xb0a   : > { %2926 = vmax.xlane.f32.xlu0 %v2925_v35  ;;  %v2892_v36 = vpop.f32.mrf.mxu0 }
 0xb0b   : > { %v13715_v37 = vmul.f32 0.25, %v2892_v36  ;;  %v2934_v38 = vsel %vm781_vm1, %v13711_v34, -inf }
 0xb0c   : > { %2935 = vmax.xlane.f32.xlu1 %v2934_v38  ;;  %v11385_v39 = vpop.f32.mrf.mxu0 }
 0xb0d   : > { %v13719_v40 = vmul.f32 0.25, %v11385_v39  ;;  %v2931_v41 = vsel %vm781_vm1, %v13715_v37, -inf }
 0xb0e   : > { %2932 = vmax.xlane.f32.xlu0 %v2931_v41  ;;  %v2902_v44 = vpop.f32.mrf.mxu0 }
 0xb0f   : > { %v13725_v45 = vmul.f32 0.25, %v2902_v44  ;;  %v2940_v46 = vsel %vm781_vm1, %v13719_v40, -inf }
 0xb10   : > { %2941 = vmax.xlane.f32.xlu1 %v2940_v46 }
 0xb11   : > { %v2937_v47 = vsel %vm781_vm1, %v13725_v45, -inf }
 0xb12   : > { %2938 = vmax.xlane.f32.xlu0 %v2937_v47 }
 0xb20   : > { %v11448_v41 = vpop.f32.mrf.mxu0 }
 0xb22   : > { %v3414_v47 = vpop.f32.mrf.mxu0 }
 0xb24   : > { %v11451_v50 = vpop.f32.mrf.mxu0 }
 0xb26   : > { %v3424_v53 = vpop.f32.mrf.mxu0 }
 0xb28   : > { %v11454_v59 = vpop.f32.mrf.mxu0 }
 0xb8d   : > { %v2924_v61 = vpop.xlane.xlu1 %2923 }
 0xb8e   : > { %v2944_v62 = vsub.f32 %v2912_v4, %v2924_v61 }
 0xb8f   : > { %v2921_v63 = vpop.xlane.xlu0 %2920 }
 0xb90   : > { %v2953_v8 = vmul.f32 1.442695, %v2944_v62  ;;  %v2943_v23 = vsub.f32 %v13700_v25, %v2921_v63  ;;  %v13788_v62 = vmul.f32 0.25, %v11448_v41  ;;  %v9893_v63 = vld [vmem:[%s13099_s19 + $0xf0] sm:$0xff] }
 0xb91   : > { %v2930_v24 = vpop.xlane.xlu1 %2929  ;;  %11576 = vmatprep.subr.msk.mxu0 %vm619_vm0, %v9893_v63 }
 0xb92   : > { %12407 = vpow2.f32 %v2953_v8  ;;  %v2951_v11 = vmul.f32 1.442695, %v2943_v23  ;;  %v2946_v26 = vsub.f32 %v13703_v27, %v2930_v24  ;;  %v13796_v24 = vmul.f32 0.25, %v3414_v47  ;;  %11577 = vmatpush3.xpose.msk.msra.mxu0 %vm619_vm0, %v9893_v63  ;;  %v9727_v63 = vld [vmem:[%s13075_s29 + $0x80] sm:$0xff] }
 0xb93   : > { %v2927_v29 = vpop.xlane.xlu0 %2926 }
 0xb94   : > { %12409 = vpow2.f32 %v2951_v11  ;;  %v2957_v30 = vmul.f32 1.442695, %v2946_v26  ;;  %v2945_v32 = vsub.f32 %v13707_v31, %v2927_v29  ;;  %v3434_v26 = vpop.f32.mrf.mxu0  ;;  %v9734_v29 = vld [vmem:[%s13075_s29 + $0xb8] sm:$0xff] }
 0xb95   : > { %v2936_v33 = vpop.xlane.xlu1 %2935  ;;  %11386 = vmatprep.subr.mxu1 %v9734_v29 }
 0xb96   : > { %12411 = vpow2.f32 %v2957_v30  ;;  %v2955_v35 = vmul.f32 1.442695, %v2945_v32  ;;  %v2948_v36 = vsub.f32 %v13711_v34, %v2936_v33  ;;  %v3464_v32 = vsel %vm781_vm1, %v13788_v62, -inf  ;;  %11387 = vmatpush3.msra.mxu1 %v9734_v29  ;;  %v9887_v29 = vld [vmem:[%s13099_s19 + $0xc0] sm:$0xff] }
 0xb97   : > { %v2933_v4 = vpop.xlane.xlu0 %2932  ;;  %v13806_v33 = vmul.f32 0.25, %v11451_v50 }
 0xb98   : > { %12413 = vpow2.f32 %v2955_v35  ;;  %v2961_v38 = vmul.f32 1.442695, %v2948_v36  ;;  %v2947_v25 = vsub.f32 %v13715_v37, %v2933_v4  ;;  %v9892_v35 = vld [vmem:[%s13099_s19 + $0xe8] sm:$0xff]  ;;  %v9733_v36 = vld [vmem:[%s13075_s29 + $0xb0] sm:$0xff]  ;;  %v13810_v4 = vmul.f32 0.25, %v3424_v53 }
 0xb99   : > { %v2942_v39 = vpop.xlane.xlu1 %2941  ;;  %11388 = vmatprep.subr.mxu1 %v9733_v36  ;;  %11578 = vmatprep.subr.msk.mxu0 %vm619_vm0, %v9892_v35  ;;  %v3470_v41 = vsel %vm781_vm1, %v13806_v33, -inf }
 0xb9a   : > { %12415 = vpow2.f32 %v2961_v38  ;;  %v2959_v43 = vmul.f32 1.442695, %v2947_v25  ;;  %v2950_v27 = vsub.f32 %v13719_v40, %v2942_v39  ;;  %v3461_v38 = vsel %vm781_vm1, %v13796_v24, -inf  ;;  %v11457_v25 = vpop.f32.mrf.mxu0  ;;  %11389 = vmatpush3.msra.mxu1 %v9733_v36  ;;  %v9732_v39 = vld [vmem:[%s13075_s29 + $0xa8] sm:$0xff]  ;;  %11579 = vmatpush3.xpose.msk.msra.mxu0 %vm619_vm0, %v9892_v35  ;;  %v9881_v35 = vld [vmem:[%s13126_s30 + $0xd0] sm:$0xff]  ;;  %v9882_v36 = vld [vmem:[%s13126_s30 + $0xd8] sm:$0xff] }
 0xb9b   : > { %v2939_v44 = vpop.xlane.xlu0 %2938  ;;  %11390 = vmatprep.subr.mxu1 %v9732_v39  ;;  %v13831_v50 = vmul.f32 0.25, %v11457_v25  ;;  %v9884_v25 = vld [vmem:[%s13126_s30 + $0xe8] sm:$0xff] }
 0xb9c   : > { %12417 = vpow2.f32 %v2959_v43  ;;  %v2965_v46 = vmul.f32 1.442695, %v2950_v27  ;;  %v2949_v31 = vsub.f32 %v13725_v45, %v2939_v44  ;;  %v13818_v43 = vmul.f32 0.25, %v11454_v59  ;;  %v9891_v27 = vld [vmem:[%s13099_s19 + $0xe0] sm:$0xff]  ;;  %11391 = vmatpush3.msra.mxu1 %v9732_v39  ;;  %v3444_v47 = vpop.f32.mrf.mxu0  ;;  %v9885_v39 = vld [vmem:[%s13126_s30 + $0xf0] sm:$0xff] }
 0xb9d   : > { %v9731_v44 = vld [vmem:[%s13075_s29 + $0xa0] sm:$0xff]  ;;  %11580 = vmatprep.subr.msk.mxu0 %vm619_vm0, %v9891_v27  ;;  %v13836_v53 = vmul.f32 0.25, %v3444_v47  ;;  %v3482_v59 = vsel %vm781_vm1, %v13831_v50, -inf }
 0xb9e   : > { %12419 = vpow2.f32 %v2965_v46  ;;  %v2963_v48 = vmul.f32 1.442695, %v2949_v31  ;;  %v13823_v46 = vmul.f32 0.25, %v3434_v26  ;;  %v3467_v31 = vsel %vm781_vm1, %v13810_v4, -inf  ;;  %11392 = vmatprep.subr.mxu1 %v9731_v44  ;;  %11581 = vmatpush3.xpose.msk.msra.mxu0 %vm619_vm0, %v9891_v27  ;;  %v9888_v26 = vld [vmem:[%s13099_s19 + $0xc8] sm:$0xff]  ;;  %v9950_v27 = vld [vmem:[%s12993_s11 + $0x138] sm:$0xff] }
 0xb9f   : > { %v13764_v34 = vpop.eup %12407  ;;  %11393 = vmatpush3.msra.mxu1 %v9731_v44 }
 0xba0   : > { %12421 = vpow2.f32 %v2963_v48  ;;  %v2970_v37 = vsel %vm781_vm1, %v13764_v34, 0.0  ;;  %v9730_v48 = vld [vmem:[%s13075_s29 + $0x98] sm:$0xff] }
 0xba1   : > { %v13768_v49 = vpop.eup %12409  ;;  %2971 = vadd.xlane.f32.xlu1 %v2970_v37  ;;  %v3476_v37 = vsel %vm781_vm1, %v13818_v43, -inf  ;;  %11394 = vmatprep.subr.mxu1 %v9730_v48 }
 0xba2   : > { %v2967_v40 = vsel %vm781_vm1, %v13768_v49, 0.0  ;;  %11395 = vmatpush3.msra.mxu1 %v9730_v48 }
 0xba3   : > { %v13772_v51 = vpop.eup %12411  ;;  %2968 = vadd.xlane.f32.xlu0 %v2967_v40  ;;  %v9890_v40 = vld [vmem:[%s13099_s19 + $0xd8] sm:$0xff] }
 0xba4   : > { %v2976_v45 = vsel %vm781_vm1, %v13772_v51, 0.0  ;;  %11582 = vmatprep.subr.msk.mxu0 %vm619_vm0, %v9890_v40 }
 0xba5   : > { %v13776_v52 = vpop.eup %12413  ;;  %2977 = vadd.xlane.f32.xlu1 %v2976_v45  ;;  %v9729_v45 = vld [vmem:[%s13075_s29 + $0x90] sm:$0xff]  ;;  %11583 = vmatpush3.xpose.msk.msra.mxu0 %vm619_vm0, %v9890_v40 }
 0xba6   : > { %v2973_v54 = vsel %vm781_vm1, %v13776_v52, 0.0  ;;  %11396 = vmatprep.subr.mxu1 %v9729_v45 }
 0xba7   : > { %v13780_v55 = vpop.eup %12415  ;;  %2974 = vadd.xlane.f32.xlu0 %v2973_v54  ;;  %v3473_v54 = vsel %vm781_vm1, %v13823_v46, -inf  ;;  %11397 = vmatpush3.msra.mxu1 %v9729_v45 }
 0xba8   : > { %v2982_v56 = vsel %vm781_vm1, %v13780_v55, 0.0 }
 0xba9   : > { %v13784_v58 = vpop.eup %12417  ;;  %2983 = vadd.xlane.f32.xlu1 %v2982_v56  ;;  %v9728_v56 = vld [vmem:[%s13075_s29 + $0x88] sm:$0xff] }
 0xbaa   : > { %v2979_v61 = vsel %vm781_vm1, %v13784_v58, 0.0  ;;  %11398 = vmatprep.subr.mxu1 %v9728_v56 }
 0xbab   : > { %v13791_v8 = vpop.eup %12419  ;;  %2980 = vadd.xlane.f32.xlu0 %v2979_v61  ;;  %v9889_v61 = vld [vmem:[%s13099_s19 + $0xd0] sm:$0xff]  ;;  %11399 = vmatpush3.msra.mxu1 %v9728_v56 }
 0xbac   : > { %v2988_v23 = vsel %vm781_vm1, %v13791_v8, 0.0  ;;  %11400 = vmatprep.subr.mxu1 %v9727_v63  ;;  %11584 = vmatprep.subr.msk.mxu0 %vm619_vm0, %v9889_v61 }
 0xbad   : > { %v13799_v11 = vpop.eup %12421  ;;  %2989 = vadd.xlane.f32.xlu1 %v2988_v23  ;;  %v3479_v23 = vsel %vm781_vm1, %v13836_v53, -inf  ;;  %11401 = vmatpush3.msra.mxu1 %v9727_v63 }
 0xbae   : > { %v2985_v30 = vsel %vm781_vm1, %v13799_v11, 0.0  ;;  %11585 = vmatpush3.xpose.msk.msra.mxu0 %vm619_vm0, %v9889_v61 }
 0xbaf   : > { %2986 = vadd.xlane.f32.xlu0 %v2985_v30  ;;  %11586 = vmatprep.subr.msk.mxu0 %vm619_vm0, %v9888_v26  ;;  %v9879_v30 = vld [vmem:[%s13126_s30 + $0xc0] sm:$0xff] }
 0xbb0   : > { %11590 = vmatprep.mubr.msk.f32.mxu0 %vm619_vm0, %v9879_v30 }
 0xbb1   : > { %3465 = vmax.xlane.f32.xlu1 %v3464_v32  ;;  %v9880_v32 = vld [vmem:[%s13126_s30 + $0xc8] sm:$0xff] }
 0xbb2   : > { %11587 = vmatpush3.xpose.msk.msra.mxu0 %vm619_vm0, %v9888_v26 }
 0xbb3   : > { %3462 = vmax.xlane.f32.xlu0 %v3461_v38  ;;  %11588 = vmatprep.subr.msk.mxu0 %vm619_vm0, %v9887_v29  ;;  %v9883_v38 = vld [vmem:[%s13126_s30 + $0xe0] sm:$0xff] }
 0xbb5   : > { %3471 = vmax.xlane.f32.xlu1 %v3470_v41  ;;  %v9886_v41 = vld [vmem:[%s13126_s30 + $0xf8] sm:$0xff] }
 0xbb6   : > { %11589 = vmatpush3.xpose.msk.msra.mxu0 %vm619_vm0, %v9887_v29 }
 0xbb7   : > { %3468 = vmax.xlane.f32.xlu0 %v3467_v31  ;;  %11646 = vmatprep.subr.msk.mxu0 %vm619_vm0, %v9950_v27 }
 0xbb9   : > { %3477 = vmax.xlane.f32.xlu1 %v3476_v37  ;;  %11591 = vmatmul.mubr.msk.f32.vlgmr.msra.gmra.mxu0 %vm619_vm0, %v9880_v32 }
 0xbba   : > { %11593 = vmatprep.mubr.msk.f32.mxu0 %vm619_vm0, %v9881_v35  ;;  %11647 = vmatpush3.xpose.msk.msra.mxu0 %vm619_vm0, %v9950_v27 }
 0xbbb   : > { %3474 = vmax.xlane.f32.xlu0 %v3473_v54 }
 0xbbd   : > { %3483 = vmax.xlane.f32.xlu1 %v3482_v59  ;;  %11594 = vmatmul.mubr.msk.f32.gmra.mxu0 %vm619_vm0, %v9882_v36 }
 0xbbe   : > { %11596 = vmatprep.mubr.msk.f32.mxu0 %vm619_vm0, %v9883_v38 }
 0xbbf   : > { %3480 = vmax.xlane.f32.xlu0 %v3479_v23 }
 0xbc1   : > { %11597 = vmatmul.mubr.msk.f32.gmra.mxu0 %vm619_vm0, %v9884_v25 }
 0xbc2   : > { %11599 = vmatprep.mubr.msk.f32.mxu0 %vm619_vm0, %v9885_v39 }
 0xbc5   : > { %11600 = vmatmul.mubr.msk.f32.gmra.mxu0 %vm619_vm0, %v9886_v41 }
 0xc2a   : > { %v2972_v44 = vpop.xlane.xlu1 %2971 }
 0xc2b   : > { %12423 = vrcp.f32 %v2972_v44 }
 0xc2c   : > { %v2969_v31 = vpop.xlane.xlu0 %2968 }
 0xc2d   : > { %12425 = vrcp.f32 %v2969_v31 }
 0xc2e   : > { %v2978_v47 = vpop.xlane.xlu1 %2977 }
 0xc2f   : > { %12427 = vrcp.f32 %v2978_v47 }
 0xc30   : > { %v2975_v48 = vpop.xlane.xlu0 %2974 }
 0xc31   : > { %12429 = vrcp.f32 %v2975_v48 }
 0xc32   : > { %v2984_v37 = vpop.xlane.xlu1 %2983 }
 0xc33   : > { %12431 = vrcp.f32 %v2984_v37 }
 0xc34   : > { %v2981_v40 = vpop.xlane.xlu0 %2980 }
 0xc35   : > { %12433 = vrcp.f32 %v2981_v40 }
 0xc36   : > { %v2990_v45 = vpop.xlane.xlu1 %2989 }
 0xc37   : > { %12435 = vrcp.f32 %v2990_v45 }
 0xc38   : > { %v2987_v54 = vpop.xlane.xlu0 %2986  ;;  %v12424_v56 = vpop.eup %12423 }
 0xc39   : > { %12437 = vrcp.f32 %v2987_v54  ;;  %v2994_v26 = vmul.f32 %v12424_v56, %v13764_v34  ;;  %v11520_v56 = vpop.f32.mrf.mxu0 }
 0xc3a   : > { %v12426_v59 = vpop.eup %12425  ;;  %v3466_v61 = vpop.xlane.xlu1 %3465 }
 0xc3b   : > { %v3486_v63 = vsub.f32 %v13788_v62, %v3466_v61  ;;  %v2992_v23 = vmul.f32 %v12426_v59, %v13768_v49 }
 0xc3c   : > { %v3463_v29 = vpop.xlane.xlu0 %3462  ;;  %v12428_v30 = vpop.eup %12427 }
 0xc3d   : > { %v3495_v32 = vmul.f32 1.442695, %v3486_v63  ;;  %v3485_v35 = vsub.f32 %v13796_v24, %v3463_v29  ;;  %11402 = vmatprep.mubr.msk.f32.mxu1 %vm781_vm1, %v2992_v23  ;;  %v2998_v34 = vmul.f32 %v12428_v30, %v13772_v51  ;;  %v3958_v23 = vpop.f32.mrf.mxu0 }
 0xc3e   : > { %v12430_v36 = vpop.eup %12429  ;;  %v3472_v38 = vpop.xlane.xlu1 %3471  ;;  %11403 = vmatmul.mubr.msk.f32.vlgmr.msra.gmra.mxu1 %vm781_vm1, %v2994_v26 }
 0xc3f   : > { %12439 = vpow2.f32 %v3495_v32  ;;  %v3493_v25 = vmul.f32 1.442695, %v3485_v35  ;;  %v3488_v39 = vsub.f32 %v13806_v33, %v3472_v38  ;;  %v2996_v62 = vmul.f32 %v12430_v36, %v13776_v52 }
 0xc40   : > { %v3469_v49 = vpop.xlane.xlu0 %3468  ;;  %v12432_v41 = vpop.eup %12431 }
 0xc41   : > { %12441 = vpow2.f32 %v3493_v25  ;;  %v3499_v27 = vmul.f32 1.442695, %v3488_v39  ;;  %v3487_v24 = vsub.f32 %v13810_v4, %v3469_v49  ;;  %11405 = vmatprep.mubr.msk.f32.mxu1 %vm781_vm1, %v2996_v62  ;;  %v3002_v51 = vmul.f32 %v12432_v41, %v13780_v55 }
 0xc42   : > { %v12434_v44 = vpop.eup %12433  ;;  %v3478_v31 = vpop.xlane.xlu1 %3477  ;;  %11406 = vmatmul.mubr.msk.f32.gmra.mxu1 %vm781_vm1, %v2998_v34  ;;  %v13924_v41 = vmul.f32 0.25, %v11520_v56 }
 0xc43   : > { %12443 = vpow2.f32 %v3499_v27  ;;  %v3497_v47 = vmul.f32 1.442695, %v3487_v24  ;;  %v3490_v33 = vsub.f32 %v13818_v43, %v3478_v31  ;;  %v3000_v52 = vmul.f32 %v12434_v44, %v13784_v58  ;;  %v9949_v27 = vld [vmem:[%s12993_s11 + $0x130] sm:$0xff] }
 0xc44   : > { %v3475_v48 = vpop.xlane.xlu0 %3474  ;;  %v12436_v37 = vpop.eup %12435  ;;  %11648 = vmatprep.subr.msk.mxu0 %vm619_vm0, %v9949_v27  ;;  %v13932_v31 = vmul.f32 0.25, %v3958_v23 }
 0xc45   : > { %12445 = vpow2.f32 %v3497_v47  ;;  %v3503_v40 = vmul.f32 1.442695, %v3490_v33  ;;  %v3489_v4 = vsub.f32 %v13823_v46, %v3475_v48  ;;  %11408 = vmatprep.mubr.msk.f32.mxu1 %vm781_vm1, %v3000_v52  ;;  %v3006_v55 = vmul.f32 %v12436_v37, %v13791_v8  ;;  %v11523_v8 = vpop.f32.mrf.mxu0  ;;  %11649 = vmatpush3.xpose.msk.msra.mxu0 %vm619_vm0, %v9949_v27  ;;  %v9948_v37 = vld [vmem:[%s12993_s11 + $0x128] sm:$0xff]  ;;  %v9938_v27 = vld [vmem:[%s12999_s20 + $0x118] sm:$0xff] }
 0xc46   : > { %v12438_v45 = vpop.eup %12437  ;;  %v3484_v54 = vpop.xlane.xlu1 %3483  ;;  %11409 = vmatmul.mubr.msk.f32.gmra.mxu1 %vm781_vm1, %v3002_v51  ;;  %v4008_v48 = vsel %vm781_vm1, %v13924_v41, -inf  ;;  %v13941_v51 = vmul.f32 0.25, %v11523_v8  ;;  %11650 = vmatprep.subr.msk.mxu0 %vm619_vm0, %v9948_v37  ;;  %v9945_v8 = vld [vmem:[%s12993_s11 + $0x110] sm:$0xff] }
 0xc47   : > { %12447 = vpow2.f32 %v3503_v40  ;;  %v3501_v59 = vmul.f32 1.442695, %v3489_v4  ;;  %v3492_v43 = vsub.f32 %v13831_v50, %v3484_v54  ;;  %v3004_v58 = vmul.f32 %v12438_v45, %v13799_v11  ;;  %v3968_v36 = vpop.f32.mrf.mxu0 }
 0xc48   : > { %v3481_v61 = vpop.xlane.xlu0 %3480  ;;  %v13945_v40 = vmul.f32 0.25, %v3968_v36  ;;  %v4005_v4 = vsel %vm781_vm1, %v13932_v31, -inf  ;;  %v4014_v54 = vsel %vm781_vm1, %v13941_v51, -inf  ;;  %v9943_v36 = vld [vmem:[%s12993_s11 + $0x100] sm:$0xff] }
 0xc49   : > { %12449 = vpow2.f32 %v3501_v59  ;;  %v3507_v63 = vmul.f32 1.442695, %v3492_v43  ;;  %v3491_v46 = vsub.f32 %v13836_v53, %v3481_v61  ;;  %11411 = vmatprep.mubr.msk.f32.mxu1 %vm781_vm1, %v3004_v58  ;;  %v11526_v49 = vpop.f32.mrf.mxu0  ;;  %11651 = vmatpush3.xpose.msk.msra.mxu0 %vm619_vm0, %v9948_v37  ;;  %v9947_v59 = vld [vmem:[%s12993_s11 + $0x120] sm:$0xff]  ;;  %v9942_v37 = vld [vmem:[%s12999_s20 + $0x138] sm:$0xff] }
 0xc4a   : > { %11412 = vmatmul.mubr.msk.f32.gmra.mxu1 %vm781_vm1, %v3006_v55  ;;  %v13952_v56 = vmul.f32 0.25, %v11526_v49  ;;  %11652 = vmatprep.subr.msk.mxu0 %vm619_vm0, %v9947_v59  ;;  %v4011_v58 = vsel %vm781_vm1, %v13945_v40, -inf  ;;  %v13991_v49 = vld [vmem:[%s16135_s8 + $0x28] sm:$0xff] }
 0xc4b   : > { %12451 = vpow2.f32 %v3507_v63  ;;  %v3505_v26 = vmul.f32 1.442695, %v3491_v46  ;;  %v3978_v33 = vpop.f32.mrf.mxu0  ;;  %v9946_v46 = vld [vmem:[%s12993_s11 + $0x118] sm:$0xff]  ;;  %11414 = vmatprep.subr.mxu1 %v13991_v49 }
 0xc4c   : > { %v13900_v29 = vpop.eup %12439  ;;  %v13956_v43 = vmul.f32 0.25, %v3978_v33  ;;  %v4020_v55 = vsel %vm781_vm1, %v13952_v56, -inf  ;;  %11415 = vmatpush3.msra.mxu1 %v13991_v49  ;;  %v9939_v33 = vld [vmem:[%s12999_s20 + $0x120] sm:$0xff] }
 0xc4d   : > { %12453 = vpow2.f32 %v3505_v26  ;;  %v3512_v11 = vsel %vm781_vm1, %v13900_v29, 0.0  ;;  %v11529_v45 = vpop.f32.mrf.mxu0  ;;  %11653 = vmatpush3.xpose.msk.msra.mxu0 %vm619_vm0, %v9947_v59 }
 0xc4e   : > { %v13904_v50 = vpop.eup %12441  ;;  %3513 = vadd.xlane.f32.xlu1 %v3512_v11  ;;  %v13963_v63 = vmul.f32 0.25, %v11529_v45  ;;  %11654 = vmatprep.subr.msk.mxu0 %vm619_vm0, %v9946_v46  ;;  %v4017_v26 = vsel %vm781_vm1, %v13956_v43, -inf  ;;  %v10006_v45 = vld [vmem:[%s13099_s19 + $0x138] sm:$0xff] }
 0xc4f   : > { %v3509_v53 = vsel %vm781_vm1, %v13904_v50, 0.0  ;;  %v3988_v61 = vpop.f32.mrf.mxu0 }
 0xc50   : > { %v13908_v30 = vpop.eup %12443  ;;  %3510 = vadd.xlane.f32.xlu0 %v3509_v53  ;;  %v13967_v23 = vmul.f32 0.25, %v3988_v61  ;;  %v4026_v11 = vsel %vm781_vm1, %v13963_v63, -inf }
 0xc51   : > { %v3518_v32 = vsel %vm781_vm1, %v13908_v30, 0.0  ;;  %11655 = vmatpush3.xpose.msk.msra.mxu0 %vm619_vm0, %v9946_v46  ;;  %v14030_v46 = vpop.f32.mrf.mxu1 }
 0xc52   : > { %v13912_v35 = vpop.eup %12445  ;;  %3519 = vadd.xlane.f32.xlu1 %v3518_v32  ;;  %11656 = vmatprep.subr.msk.mxu0 %vm619_vm0, %v9945_v8  ;;  %v4023_v53 = vsel %vm781_vm1, %v13967_v23, -inf  ;;  %v9944_v32 = vld [vmem:[%s12993_s11 + $0x108] sm:$0xff] }
 0xc53   : > { %v3515_v38 = vsel %vm781_vm1, %v13912_v35, 0.0 }
 0xc54   : > { %v13916_v25 = vpop.eup %12447  ;;  %3516 = vadd.xlane.f32.xlu0 %v3515_v38  ;;  %v9935_v38 = vld [vmem:[%s12999_s20 + $0x100] sm:$0xff] }
 0xc55   : > { %v3524_v39 = vsel %vm781_vm1, %v13916_v25, 0.0  ;;  %11657 = vmatpush3.xpose.msk.msra.mxu0 %vm619_vm0, %v9945_v8  ;;  %11662 = vmatprep.mubr.msk.f32.mxu0 %vm619_vm0, %v9935_v38  ;;  %v14036_v8 = vpop.f32.mrf.mxu1 }
 0xc56   : > { %v13920_v62 = vpop.eup %12449  ;;  %3525 = vadd.xlane.f32.xlu1 %v3524_v39  ;;  %11658 = vmatprep.subr.msk.mxu0 %vm619_vm0, %v9944_v32  ;;  %v9936_v39 = vld [vmem:[%s12999_s20 + $0x108] sm:$0xff] }
 0xc57   : > { %v3521_v34 = vsel %vm781_vm1, %v13920_v62, 0.0 }
 0xc58   : > { %v13927_v24 = vpop.eup %12451  ;;  %3522 = vadd.xlane.f32.xlu0 %v3521_v34  ;;  %v9937_v34 = vld [vmem:[%s12999_s20 + $0x110] sm:$0xff] }
 0xc59   : > { %v3530_v44 = vsel %vm781_vm1, %v13927_v24, 0.0  ;;  %11659 = vmatpush3.xpose.msk.msra.mxu0 %vm619_vm0, %v9944_v32 }
 0xc5a   : > { %v13935_v47 = vpop.eup %12453  ;;  %3531 = vadd.xlane.f32.xlu1 %v3530_v44  ;;  %11660 = vmatprep.subr.msk.mxu0 %vm619_vm0, %v9943_v36  ;;  %v14003_v44 = vld [vmem:[%s16135_s8 + $0x20] sm:$0xff] }
 0xc5b   : > { %v3527_v52 = vsel %vm781_vm1, %v13935_v47, 0.0  ;;  %11416 = vmatprep.subr.mxu1 %v14003_v44 }
 0xc5c   : > { %3528 = vadd.xlane.f32.xlu0 %v3527_v52  ;;  %v9940_v52 = vld [vmem:[%s12999_s20 + $0x128] sm:$0xff]  ;;  %11417 = vmatpush3.msra.mxu1 %v14003_v44 }
 0xc5d   : > { %11661 = vmatpush3.xpose.msk.msra.mxu0 %vm619_vm0, %v9943_v36  ;;  %v14040_v36 = vpop.f32.mrf.mxu1 }
 0xc5e   : > { %4009 = vmax.xlane.f32.xlu1 %v4008_v48  ;;  %v9941_v48 = vld [vmem:[%s12999_s20 + $0x130] sm:$0xff]  ;;  %11718 = vmatprep.subr.msk.mxu0 %vm619_vm0, %v10006_v45 }
 0xc60   : > { %4006 = vmax.xlane.f32.xlu0 %v4005_v4  ;;  %11663 = vmatmul.mubr.msk.f32.vlgmr.msra.gmra.mxu0 %vm619_vm0, %v9936_v39  ;;  %v14016_v4 = vld [vmem:[%s13217_s24 + $0xb8] sm:$0xff] }
 0xc61   : > { %11665 = vmatprep.mubr.msk.f32.mxu0 %vm619_vm0, %v9937_v34  ;;  %11458 = vmatprep.subr.mxu1 %v14016_v4 }
 0xc62   : > { %4015 = vmax.xlane.f32.xlu1 %v4014_v54  ;;  %11719 = vmatpush3.xpose.msk.msra.mxu0 %vm619_vm0, %v10006_v45 }
 0xc63   : > { %11720 = vmatprep.subr.msk.mxu0 %vm619_vm0, %v14102_v14 }
 0xc64   : > { %4012 = vmax.xlane.f32.xlu0 %v4011_v58  ;;  %11666 = vmatmul.mubr.msk.f32.gmra.mxu0 %vm619_vm0, %v9938_v27 }
 0xc65   : > { %11668 = vmatprep.mubr.msk.f32.mxu0 %vm619_vm0, %v9939_v33 }
 0xc66   : > { %4021 = vmax.xlane.f32.xlu1 %v4020_v55  ;;  %11721 = vmatpush3.xpose.msk.msra.mxu0 %vm619_vm0, %v14102_v14 }
 0xc68   : > { %4018 = vmax.xlane.f32.xlu0 %v4017_v26  ;;  %11669 = vmatmul.mubr.msk.f32.gmra.mxu0 %vm619_vm0, %v9940_v52  ;;  %v14044_v52 = vpop.f32.mrf.mxu1 }
 0xc69   : > { %11671 = vmatprep.mubr.msk.f32.mxu0 %vm619_vm0, %v9941_v48  ;;  %16169 = vst [vmem:[#allocation16_spill] sm:$0xff] %v14044_v52 }
 0xc6a   : > { %4027 = vmax.xlane.f32.xlu1 %v4026_v11  ;;  %v14048_v10 = vpop.f32.mrf.mxu1 }
 0xc6c   : > { %4024 = vmax.xlane.f32.xlu0 %v4023_v53  ;;  %11672 = vmatmul.mubr.msk.f32.gmra.mxu0 %vm619_vm0, %v9942_v37 }
 0xcd7   : > { %v14022_v54 = vpop.xlane.xlu1 %3513 }
 0xcd9   : > { %v3511_v59 = vpop.xlane.xlu0 %3510 }
 0xcdb   : > { %v14024_v58 = vpop.xlane.xlu1 %3519 }
 0xcdd   : > { %v14026_v61 = vpop.xlane.xlu0 %3516 }
 0xcdf   : > { %v14028_v55 = vpop.xlane.xlu1 %3525 }
 0xce1   : > { %v14032_v26 = vpop.xlane.xlu0 %3522 }
 0xce3   : > { %v14034_v11 = vpop.xlane.xlu1 %3531 }
 0xce5   : > { %v14038_v53 = vpop.xlane.xlu0 %3528 }
 0xce7   : > { %v4010_v32 = vpop.xlane.xlu1 %4009 }
 0xce8   : > { %v4030_v38 = vsub.f32 %v13924_v41, %v4010_v32 }
 0xce9   : > { %v4007_v39 = vpop.xlane.xlu0 %4006 }
 0xcea   : > { %v4039_v34 = vmul.f32 1.442695, %v4030_v38  ;;  %v4029_v27 = vsub.f32 %v13932_v31, %v4007_v39 }
 0xceb   : > { %v4016_v33 = vpop.xlane.xlu1 %4015 }
 0xcec   : > { %12455 = vpow2.f32 %v4039_v34  ;;  %v4037_v48 = vmul.f32 1.442695, %v4029_v27  ;;  %v4032_v37 = vsub.f32 %v13941_v51, %v4016_v33  ;;  %v14052_v27 = vpop.f32.mrf.mxu1 }
 0xced   : > { %v4013_v45 = vpop.xlane.xlu0 %4012  ;;  %16170 = vst [vmem:[#allocation17_spill] sm:$0xff] %v14052_v27 }
 0xcee   : > { %12457 = vpow2.f32 %v4037_v48  ;;  %v4043_v18 = vmul.f32 1.442695, %v4032_v37  ;;  %v4031_v2 = vsub.f32 %v13945_v40, %v4013_v45  ;;  %v11592_v40 = vpop.f32.mrf.mxu0 }
 0xcef   : > { %v4022_v16 = vpop.xlane.xlu1 %4021 }
 0xcf0   : > { %12459 = vpow2.f32 %v4043_v18  ;;  %v4041_v41 = vmul.f32 1.442695, %v4031_v2  ;;  %v4034_v32 = vsub.f32 %v13952_v56, %v4022_v16  ;;  %v14056_v18 = vpop.f32.mrf.mxu1  ;;  %v4500_v56 = vpop.f32.mrf.mxu0 }
 0xcf1   : > { %v4019_v31 = vpop.xlane.xlu0 %4018 }
 0xcf2   : > { %12461 = vpow2.f32 %v4041_v41  ;;  %v4047_v38 = vmul.f32 1.442695, %v4034_v32  ;;  %v4033_v39 = vsub.f32 %v13956_v43, %v4019_v31 }
 0xcf3   : > { %v4028_v34 = vpop.xlane.xlu1 %4027 }
 0xcf4   : > { %12463 = vpow2.f32 %v4047_v38  ;;  %v4045_v51 = vmul.f32 1.442695, %v4033_v39  ;;  %v4036_v33 = vsub.f32 %v13963_v63, %v4028_v34  ;;  %v14064_v63 = vpop.f32.mrf.mxu1 }
 0xcf5   : > { %v4025_v48 = vpop.xlane.xlu0 %4024  ;;  %16171 = vst [vmem:[#allocation18_spill] sm:$0xff] %v14064_v63 }
 0xcf6   : > { %12465 = vpow2.f32 %v4045_v51  ;;  %v4051_v37 = vmul.f32 1.442695, %v4036_v33  ;;  %v4035_v2 = vsub.f32 %v13967_v23, %v4025_v48  ;;  %v11595_v23 = vpop.f32.mrf.mxu0 }
 0xcf8   : > { %12467 = vpow2.f32 %v4051_v37  ;;  %v4049_v16 = vmul.f32 1.442695, %v4035_v2  ;;  %v4510_v48 = vpop.f32.mrf.mxu0  ;;  %v9789_v2 = vld [vmem:[%s13217_s24 + $0xb0] sm:$0xff] }
 0xcf9   : > { %v14058_v45 = vpop.eup %12455 }
 0xcfa   : > { %12469 = vpow2.f32 %v4049_v16  ;;  %v4056_v43 = vsel %vm781_vm1, %v14058_v45, 0.0 }
 0xcfb   : > { %v14062_v41 = vpop.eup %12457  ;;  %4057 = vadd.xlane.f32.xlu1 %v4056_v43  ;;  %12471 = vrcp.f32 %v3511_v59 }
 0xcfc   : > { %v4053_v32 = vsel %vm781_vm1, %v14062_v41, 0.0  ;;  %12473 = vrcp.f32 %v14022_v54 }
 0xcfd   : > { %v14068_v31 = vpop.eup %12459  ;;  %4054 = vadd.xlane.f32.xlu0 %v4053_v32  ;;  %12475 = vrcp.f32 %v14026_v61  ;;  %v9788_v32 = vld [vmem:[%s13217_s24 + $0xa8] sm:$0xff]  ;;  %v11598_v61 = vpop.f32.mrf.mxu0 }
 0xcfe   : > { %v11404_v38 = vpop.f32.mrf.mxu1  ;;  %v4062_v39 = vsel %vm781_vm1, %v14068_v31, 0.0  ;;  %12477 = vrcp.f32 %v14024_v58  ;;  %v14107_v58 = vmul.f32 0.25, %v4500_v56 }
 0xcff   : > { %v14072_v34 = vpop.eup %12461  ;;  %4063 = vadd.xlane.f32.xlu1 %v4062_v39  ;;  %12479 = vrcp.f32 %v14032_v26  ;;  %v9786_v26 = vld [vmem:[%s13217_s24 + $0x98] sm:$0xff] }
 0xd00   : > { %v3097_v51 = vpop.f32.mrf.mxu1  ;;  %v4059_v33 = vsel %vm781_vm1, %v14072_v34, 0.0  ;;  %12481 = vrcp.f32 %v14028_v55  ;;  %v4547_v55 = vsel %vm781_vm1, %v14107_v58, -inf }
 0xd01   : > { %v14076_v37 = vpop.eup %12463  ;;  %11418 = vmatprep.mubr.msk.f32.mxu1 %vm619_vm0, %v3097_v51  ;;  %4060 = vadd.xlane.f32.xlu0 %v4059_v33  ;;  %12483 = vrcp.f32 %v14038_v53 }
 0xd02   : > { %v11407_v16 = vpop.f32.mrf.mxu1  ;;  %11419 = vmatmul.mubr.msk.f32.vlgmr.msra.gmra.mxu1 %vm619_vm0, %v11404_v38  ;;  %v4068_v59 = vsel %vm781_vm1, %v14076_v37, 0.0  ;;  %v14095_v38 = vmul.f32 0.25, %v11592_v40  ;;  %12485 = vrcp.f32 %v14034_v11 }
 0xd03   : > { %v14085_v43 = vpop.eup %12465  ;;  %11459 = vmatpush3.msra.mxu1 %v14016_v4  ;;  %4069 = vadd.xlane.f32.xlu1 %v4068_v59  ;;  %v9787_v59 = vld [vmem:[%s13217_s24 + $0xa0] sm:$0xff] }
 0xd04   : > { %11460 = vmatprep.subr.mxu1 %v9789_v2  ;;  %v3107_v54 = vpop.f32.mrf.mxu1  ;;  %v4065_v39 = vsel %vm781_vm1, %v14085_v43, 0.0  ;;  %v4550_v56 = vsel %vm781_vm1, %v14095_v38, -inf }
 0xd05   : > { %v14091_v51 = vpop.eup %12467  ;;  %11461 = vmatpush3.msra.mxu1 %v9789_v2  ;;  %11421 = vmatprep.mubr.msk.f32.mxu1 %vm619_vm0, %v3107_v54  ;;  %v4520_v54 = vpop.f32.mrf.mxu0 }
 0xd06   : > { %11462 = vmatprep.subr.mxu1 %v9788_v32  ;;  %4066 = vadd.xlane.f32.xlu0 %v4065_v39  ;;  %v11410_v4 = vpop.f32.mrf.mxu1  ;;  %v4074_v33 = vsel %vm781_vm1, %v14091_v51, 0.0  ;;  %v9785_v39 = vld [vmem:[%s13217_s24 + $0x90] sm:$0xff]  ;;  %v14137_v11 = vmul.f32 0.25, %v4520_v54  ;;  %v10004_v54 = vld [vmem:[%s13099_s19 + $0x128] sm:$0xff] }
 0xd07   : > { %v14104_v0 = vpop.eup %12469  ;;  %11422 = vmatmul.mubr.msk.f32.gmra.mxu1 %vm619_vm0, %v11407_v16  ;;  %4075 = vadd.xlane.f32.xlu1 %v4074_v33  ;;  %v14118_v16 = vmul.f32 0.25, %v11595_v23  ;;  %v14123_v33 = vmul.f32 0.25, %v4510_v48  ;;  %v11601_v60 = vpop.f32.mrf.mxu0  ;;  %v14132_v48 = vmul.f32 0.25, %v11598_v61 }
 0xd08   : > { %11463 = vmatpush3.msra.mxu1 %v9788_v32  ;;  %v3117_v40 = vpop.f32.mrf.mxu1  ;;  %v4071_v2 = vsel %vm781_vm1, %v14104_v0, 0.0  ;;  %11722 = vmatprep.subr.msk.mxu0 %vm619_vm0, %v10004_v54 }
 0xd09   : > { %11464 = vmatprep.subr.mxu1 %v9787_v59  ;;  %11424 = vmatprep.mubr.msk.f32.mxu1 %vm619_vm0, %v3117_v40  ;;  %v12472_v40 = vpop.eup %12471  ;;  %v4556_v53 = vsel %vm781_vm1, %v14118_v16, -inf  ;;  %v4530_v61 = vpop.f32.mrf.mxu0 }
 0xd0a   : > { %11465 = vmatpush3.msra.mxu1 %v9787_v59  ;;  %4072 = vadd.xlane.f32.xlu0 %v4071_v2  ;;  %v11413_v32 = vpop.f32.mrf.mxu1  ;;  %v9783_v59 = vld [vmem:[%s13217_s24 + $0x80] sm:$0xff] }
 0xd0b   : > { %11466 = vmatprep.subr.mxu1 %v9786_v26  ;;  %11425 = vmatmul.mubr.msk.f32.gmra.mxu1 %vm619_vm0, %v11410_v4  ;;  %v12474_v4 = vpop.eup %12473 }
 0xd0c   : > { %11467 = vmatpush3.msra.mxu1 %v9786_v26  ;;  %4551 = vmax.xlane.f32.xlu1 %v4550_v56  ;;  %v3127_v23 = vpop.f32.mrf.mxu1  ;;  %v12476_v2 = vpop.eup %12475  ;;  %v3534_v26 = vmul.f32 %v12472_v40, %v13904_v50  ;;  %v4553_v56 = vsel %vm781_vm1, %v14123_v33, -inf  ;;  %v14150_v40 = vmul.f32 0.25, %v4530_v61  ;;  %v9992_v61 = vld [vmem:[%s13126_s30 + $0x108] sm:$0xff] }
 0xd0d   : > { %11468 = vmatprep.subr.mxu1 %v9785_v39  ;;  %11427 = vmatprep.mubr.msk.f32.mxu1 %vm619_vm0, %v3127_v23  ;;  %v3536_v23 = vmul.f32 %v12474_v4, %v13900_v29  ;;  %v3538_v50 = vmul.f32 %v12476_v2, %v13912_v35  ;;  %v4559_v29 = vsel %vm781_vm1, %v14137_v11, -inf }
 0xd0e   : > { %11469 = vmatpush3.msra.mxu1 %v9785_v39  ;;  %4548 = vmax.xlane.f32.xlu0 %v4547_v55  ;;  %v4562_v39 = vsel %vm781_vm1, %v14132_v48, -inf  ;;  %v12478_v55 = vpop.eup %12477 }
 0xd0f   : > { %11470 = vmatprep.subr.mxu1 %v9784_v13  ;;  %11428 = vmatmul.mubr.msk.f32.gmra.mxu1 %vm619_vm0, %v11413_v32  ;;  %v14145_v32 = vmul.f32 0.25, %v11601_v60  ;;  %v3540_v60 = vmul.f32 %v12478_v55, %v13908_v30  ;;  %v4565_v30 = vsel %vm781_vm1, %v14150_v40, -inf  ;;  %v9995_v55 = vld [vmem:[%s13126_s30 + $0x120] sm:$0xff] }
 0xd10   : > { %11471 = vmatpush3.msra.mxu1 %v9784_v13  ;;  %4557 = vmax.xlane.f32.xlu1 %v4556_v53  ;;  %v12480_v13 = vpop.eup %12479 }
 0xd11   : > { %11472 = vmatprep.subr.mxu1 %v9783_v59  ;;  %11474 = vmatprep.mubr.msk.f32.mxu1 %vm781_vm1, %v3534_v26  ;;  %v4568_v35 = vsel %vm781_vm1, %v14145_v32, -inf  ;;  %v12482_v53 = vpop.eup %12481  ;;  %v3542_v4 = vmul.f32 %v12480_v13, %v13920_v62  ;;  %v10002_v62 = vld [vmem:[%s13099_s19 + $0x118] sm:$0xff] }
 0xd12   : > { %11473 = vmatpush3.msra.mxu1 %v9783_v59  ;;  %4554 = vmax.xlane.f32.xlu0 %v4553_v56  ;;  %v10003_v59 = vld [vmem:[%s13099_s19 + $0x120] sm:$0xff]  ;;  %v12484_v14 = vpop.eup %12483  ;;  %v3544_v2 = vmul.f32 %v12482_v53, %v13916_v25  ;;  %v10001_v56 = vld [vmem:[%s13099_s19 + $0x110] sm:$0xff]  ;;  %v9998_v13 = vld [vmem:[%s13126_s30 + $0x138] sm:$0xff] }
 0xd13   : > { %11475 = vmatmul.mubr.msk.f32.vlgmr.msra.gmra.mxu1 %vm781_vm1, %v3536_v23  ;;  %11486 = vmatprep.subr.mxu1 %v13991_v49  ;;  %v3546_v26 = vmul.f32 %v12484_v14, %v13935_v47  ;;  %v10000_v47 = vld [vmem:[%s13099_s19 + $0x108] sm:$0xff]  ;;  %v9993_v23 = vld [vmem:[%s13126_s30 + $0x110] sm:$0xff] }
 0xd14   : > { %4563 = vmax.xlane.f32.xlu1 %v4562_v39  ;;  %11477 = vmatprep.mubr.msk.f32.mxu1 %vm781_vm1, %v3538_v50  ;;  %v9994_v39 = vld [vmem:[%s13126_s30 + $0x118] sm:$0xff]  ;;  %v9996_v50 = vld [vmem:[%s13126_s30 + $0x128] sm:$0xff] }
 0xd15   : > { %11487 = vmatpush3.msra.mxu1 %v13991_v49  ;;  %11723 = vmatpush3.xpose.msk.msra.mxu0 %vm619_vm0, %v10004_v54  ;;  %v12486_v49 = vpop.eup %12485  ;;  %v9997_v54 = vld [vmem:[%s13126_s30 + $0x130] sm:$0xff] }
 0xd16   : > { %4560 = vmax.xlane.f32.xlu0 %v4559_v29  ;;  %11724 = vmatprep.subr.msk.mxu0 %vm619_vm0, %v10003_v59  ;;  %v3548_v25 = vmul.f32 %v12486_v49, %v13927_v24  ;;  %v9999_v24 = vld [vmem:[%s13099_s19 + $0x100] sm:$0xff]  ;;  %v14209_v29 = vld [vmem:[%s13075_s29 + $0xf8] sm:$0xff] }
 0xd17   : > { %11478 = vmatmul.mubr.msk.f32.gmra.mxu1 %vm781_vm1, %v3540_v60  ;;  %11488 = vmatprep.subr.mxu1 %v14003_v44  ;;  %v10062_v60 = vld [vmem:[%s12993_s11 + $0x178] sm:$0xff] }
 0xd18   : > { %4569 = vmax.xlane.f32.xlu1 %v4568_v35  ;;  %11480 = vmatprep.mubr.msk.f32.mxu1 %vm781_vm1, %v3542_v4 }
 0xd19   : > { %11489 = vmatpush3.msra.mxu1 %v14003_v44  ;;  %11725 = vmatpush3.xpose.msk.msra.mxu0 %vm619_vm0, %v10003_v59  ;;  %v9991_v44 = vld [vmem:[%s13126_s30 + $0x100] sm:$0xff] }
 0xd1a   : > { %4566 = vmax.xlane.f32.xlu0 %v4565_v30  ;;  %11726 = vmatprep.subr.msk.mxu0 %vm619_vm0, %v10002_v62 }
 0xd1b   : > { %11481 = vmatmul.mubr.msk.f32.gmra.mxu1 %vm781_vm1, %v3544_v2  ;;  %11734 = vmatprep.mubr.msk.f32.mxu0 %vm619_vm0, %v9991_v44 }
 0xd1c   : > { %11483 = vmatprep.mubr.msk.f32.mxu1 %vm781_vm1, %v3546_v26  ;;  %11530 = vmatprep.subr.mxu1 %v14209_v29 }
 0xd1d   : > { %11727 = vmatpush3.xpose.msk.msra.mxu0 %vm619_vm0, %v10002_v62 }
 0xd1e   : > { %11728 = vmatprep.subr.msk.mxu0 %vm619_vm0, %v10001_v56 }
 0xd1f   : > { %11484 = vmatmul.mubr.msk.f32.gmra.mxu1 %vm781_vm1, %v3548_v25 }
 0xd21   : > { %11729 = vmatpush3.xpose.msk.msra.mxu0 %vm619_vm0, %v10001_v56 }
 0xd22   : > { %11730 = vmatprep.subr.msk.mxu0 %vm619_vm0, %v10000_v47 }
 0xd25   : > { %11731 = vmatpush3.xpose.msk.msra.mxu0 %vm619_vm0, %v10000_v47 }
 0xd26   : > { %11732 = vmatprep.subr.msk.mxu0 %vm619_vm0, %v9999_v24 }
 0xd29   : > { %11733 = vmatpush3.xpose.msk.msra.mxu0 %vm619_vm0, %v9999_v24 }
 0xd2a   : > { %11790 = vmatprep.subr.msk.mxu0 %vm619_vm0, %v10062_v60 }
 0xd2c   : > { %11735 = vmatmul.mubr.msk.f32.vlgmr.msra.gmra.mxu0 %vm619_vm0, %v9992_v61 }
 0xd2d   : > { %11737 = vmatprep.mubr.msk.f32.mxu0 %vm619_vm0, %v9993_v23  ;;  %11791 = vmatpush3.xpose.msk.msra.mxu0 %vm619_vm0, %v10062_v60 }
 0xd30   : > { %11738 = vmatmul.mubr.msk.f32.gmra.mxu0 %vm619_vm0, %v9994_v39 }
 0xd31   : > { %11740 = vmatprep.mubr.msk.f32.mxu0 %vm619_vm0, %v9995_v55 }
 0xd34   : > { %11741 = vmatmul.mubr.msk.f32.gmra.mxu0 %vm619_vm0, %v9996_v50 }
 0xd35   : > { %11743 = vmatprep.mubr.msk.f32.mxu0 %vm619_vm0, %v9997_v54 }
 0xd38   : > { %11744 = vmatmul.mubr.msk.f32.gmra.mxu0 %vm619_vm0, %v9998_v13 }
 0xd84   : > { %v14215_v35 = vpop.xlane.xlu1 %4057 }
 0xd86   : > { %v14217_v53 = vpop.xlane.xlu0 %4054 }
 0xd88   : > { %v14219_v4 = vpop.xlane.xlu1 %4063 }
 0xd8a   : > { %v14221_v59 = vpop.xlane.xlu0 %4060 }
 0xd8c   : > { %v14223_v14 = vpop.xlane.xlu1 %4069 }
 0xd8f   : > { %v14225_v30 = vpop.xlane.xlu0 %4066 }
 0xd90   : > { %v14227_v2 = vpop.xlane.xlu1 %4075 }
 0xd93   : > { %v14229_v62 = vpop.xlane.xlu0 %4072 }
 0xd95   : > { %v4552_v49 = vpop.xlane.xlu1 %4551 }
 0xd96   : > { %v4572_v26 = vsub.f32 %v14095_v38, %v4552_v49 }
 0xd97   : > { %v4549_v25 = vpop.xlane.xlu0 %4548 }
 0xd98   : > { %v4581_v56 = vmul.f32 1.442695, %v4572_v26  ;;  %v4571_v47 = vsub.f32 %v14107_v58, %v4549_v25  ;;  %v11664_v26 = vpop.f32.mrf.mxu0 }
 0xd99   : > { %v4558_v44 = vpop.xlane.xlu1 %4557 }
 0xd9a   : > { %12487 = vpow2.f32 %v4581_v56  ;;  %v4579_v24 = vmul.f32 1.442695, %v4571_v47  ;;  %v4574_v61 = vsub.f32 %v14118_v16, %v4558_v44  ;;  %v5044_v44 = vpop.f32.mrf.mxu0 }
 0xd9b   : > { %v4555_v23 = vpop.xlane.xlu0 %4554 }
 0xd9c   : > { %12489 = vpow2.f32 %v4579_v24  ;;  %v4585_v39 = vmul.f32 1.442695, %v4574_v61  ;;  %v4573_v55 = vsub.f32 %v14123_v33, %v4555_v23  ;;  %v11667_v23 = vpop.f32.mrf.mxu0 }
 0xd9d   : > { %v4564_v50 = vpop.xlane.xlu1 %4563 }
 0xd9e   : > { %12491 = vpow2.f32 %v4585_v39  ;;  %v4583_v54 = vmul.f32 1.442695, %v4573_v55  ;;  %v4576_v13 = vsub.f32 %v14132_v48, %v4564_v50  ;;  %v5054_v50 = vpop.f32.mrf.mxu0 }
 0xd9f   : > { %v4561_v38 = vpop.xlane.xlu0 %4560 }
 0xda0   : > { %12493 = vpow2.f32 %v4583_v54  ;;  %v4589_v60 = vmul.f32 1.442695, %v4576_v13  ;;  %v4575_v58 = vsub.f32 %v14137_v11, %v4561_v38 }
 0xda1   : > { %v4570_v49 = vpop.xlane.xlu1 %4569 }
 0xda2   : > { %12495 = vpow2.f32 %v4589_v60  ;;  %v4587_v25 = vmul.f32 1.442695, %v4575_v58  ;;  %v4578_v16 = vsub.f32 %v14145_v32, %v4570_v49  ;;  %v11670_v58 = vpop.f32.mrf.mxu0 }
 0xda3   : > { %v4567_v56 = vpop.xlane.xlu0 %4566 }
 0xda4   : > { %12497 = vpow2.f32 %v4587_v25  ;;  %v4593_v47 = vmul.f32 1.442695, %v4578_v16  ;;  %v4577_v33 = vsub.f32 %v14150_v40, %v4567_v56  ;;  %v14263_v25 = vmul.f32 0.25, %v11664_v26  ;;  %v10061_v56 = vld [vmem:[%s12993_s11 + $0x170] sm:$0xff] }
 0xda5   : > { %11792 = vmatprep.subr.msk.mxu0 %vm619_vm0, %v10061_v56 }
 0xda6   : > { %12499 = vpow2.f32 %v4593_v47  ;;  %v4591_v24 = vmul.f32 1.442695, %v4577_v33  ;;  %v14270_v33 = vmul.f32 0.25, %v5044_v44  ;;  %11793 = vmatpush3.xpose.msk.msra.mxu0 %vm619_vm0, %v10061_v56  ;;  %v10060_v44 = vld [vmem:[%s12993_s11 + $0x168] sm:$0xff] }
 0xda7   : > { %v14239_v48 = vpop.eup %12487  ;;  %11794 = vmatprep.subr.msk.mxu0 %vm619_vm0, %v10060_v44 }
 0xda8   : > { %12501 = vpow2.f32 %v4591_v24  ;;  %v4598_v11 = vsel %vm781_vm1, %v14239_v48, 0.0 }
 0xda9   : > { %v14243_v61 = vpop.eup %12489  ;;  %4599 = vadd.xlane.f32.xlu1 %v4598_v11  ;;  %v5064_v11 = vpop.f32.mrf.mxu0  ;;  %12503 = vrcp.f32 %v14217_v53  ;;  %v10052_v53 = vld [vmem:[%s12999_s20 + $0x168] sm:$0xff] }
 0xdaa   : > { %v4595_v32 = vsel %vm781_vm1, %v14243_v61, 0.0  ;;  %11795 = vmatpush3.xpose.msk.msra.mxu0 %vm619_vm0, %v10060_v44  ;;  %12505 = vrcp.f32 %v14215_v35  ;;  %v10053_v35 = vld [vmem:[%s12999_s20 + $0x170] sm:$0xff] }
 0xdab   : > { %v14247_v39 = vpop.eup %12491  ;;  %4596 = vadd.xlane.f32.xlu0 %v4595_v32  ;;  %v5094_v32 = vsel %vm781_vm1, %v14263_v25, -inf  ;;  %12507 = vrcp.f32 %v14221_v59 }
 0xdac   : > { %v4604_v40 = vsel %vm781_vm1, %v14247_v39, 0.0  ;;  %12509 = vrcp.f32 %v14219_v4 }
 0xdad   : > { %v14251_v55 = vpop.eup %12493  ;;  %4605 = vadd.xlane.f32.xlu1 %v4604_v40  ;;  %v14280_v40 = vmul.f32 0.25, %v11667_v23  ;;  %v10059_v23 = vld [vmem:[%s12993_s11 + $0x160] sm:$0xff]  ;;  %12511 = vrcp.f32 %v14225_v30  ;;  %v9841_v30 = vld [vmem:[%s13075_s29 + $0xd0] sm:$0xff] }
 0xdae   : > { %v4601_v54 = vsel %vm781_vm1, %v14251_v55, 0.0  ;;  %11796 = vmatprep.subr.msk.mxu0 %vm619_vm0, %v10059_v23  ;;  %12513 = vrcp.f32 %v14223_v14 }
 0xdaf   : > { %v14255_v13 = vpop.eup %12495  ;;  %4602 = vadd.xlane.f32.xlu0 %v4601_v54  ;;  %v14283_v54 = vmul.f32 0.25, %v5054_v50  ;;  %v5100_v56 = vsel %vm781_vm1, %v14280_v40, -inf  ;;  %11797 = vmatpush3.xpose.msk.msra.mxu0 %vm619_vm0, %v10059_v23  ;;  %12515 = vrcp.f32 %v14229_v62  ;;  %v9839_v62 = vld [vmem:[%s13075_s29 + $0xc0] sm:$0xff] }
 0xdb0   : > { %v4610_v38 = vsel %vm781_vm1, %v14255_v13, 0.0  ;;  %12517 = vrcp.f32 %v14227_v2 }
 0xdb1   : > { %v14259_v60 = vpop.eup %12497  ;;  %4611 = vadd.xlane.f32.xlu1 %v4610_v38  ;;  %v5091_v38 = vsel %vm781_vm1, %v14270_v33, -inf  ;;  %v5097_v50 = vsel %vm781_vm1, %v14283_v54, -inf }
 0xdb2   : > { %v4607_v49 = vsel %vm781_vm1, %v14259_v60, 0.0 }
 0xdb3   : > { %v14265_v16 = vpop.eup %12499  ;;  %4608 = vadd.xlane.f32.xlu0 %v4607_v49  ;;  %v11673_v49 = vpop.f32.mrf.mxu0 }
 0xdb4   : > { %v4616_v47 = vsel %vm781_vm1, %v14265_v16, 0.0  ;;  %v14302_v63 = vmul.f32 0.25, %v11673_v49 }
 0xdb5   : > { %v14273_v24 = vpop.eup %12501  ;;  %4617 = vadd.xlane.f32.xlu1 %v4616_v47  ;;  %v14291_v47 = vmul.f32 0.25, %v11670_v58  ;;  %v10058_v58 = vld [vmem:[%s12993_s11 + $0x158] sm:$0xff] }
 0xdb6   : > { %v4613_v26 = vsel %vm781_vm1, %v14273_v24, 0.0  ;;  %11798 = vmatprep.subr.msk.mxu0 %vm619_vm0, %v10058_v58  ;;  %v5112_v49 = vsel %vm781_vm1, %v14302_v63, -inf }
 0xdb7   : > { %4614 = vadd.xlane.f32.xlu0 %v4613_v26  ;;  %v14294_v26 = vmul.f32 0.25, %v5064_v11  ;;  %v5106_v44 = vsel %vm781_vm1, %v14291_v47, -inf  ;;  %11799 = vmatpush3.xpose.msk.msra.mxu0 %vm619_vm0, %v10058_v58 }
 0xdb9   : > { %5095 = vmax.xlane.f32.xlu1 %v5094_v32  ;;  %v5074_v32 = vpop.f32.mrf.mxu0  ;;  %v5103_v11 = vsel %vm781_vm1, %v14294_v26, -inf }
 0xdbb   : > { %5092 = vmax.xlane.f32.xlu0 %v5091_v38  ;;  %v14305_v38 = vmul.f32 0.25, %v5074_v32  ;;  %v10057_v32 = vld [vmem:[%s12993_s11 + $0x150] sm:$0xff] }
 0xdbc   : > { %11800 = vmatprep.subr.msk.mxu0 %vm619_vm0, %v10057_v32 }
 0xdbd   : > { %5101 = vmax.xlane.f32.xlu1 %v5100_v56  ;;  %v2033_v56 = vadd.f32 %v13567_v12, %v13481_v57  ;;  %v5109_v27 = vsel %vm781_vm1, %v14305_v38, -inf  ;;  %11801 = vmatpush3.xpose.msk.msra.mxu0 %vm619_vm0, %v10057_v32  ;;  %v2043_v57 = vadd.f32 %v13571_v6, %v13485_v1  ;;  %v10047_v32 = vld [vmem:[%s12999_s20 + $0x140] sm:$0xff] }
 0xdbe   : > { %11806 = vmatprep.mubr.msk.f32.mxu0 %vm619_vm0, %v10047_v32  ;;  %v9844_v32 = vld [vmem:[%s13075_s29 + $0xe8] sm:$0xff] }
 0xdbf   : > { %5098 = vmax.xlane.f32.xlu0 %v5097_v50 }
 0xdc1   : > { %5107 = vmax.xlane.f32.xlu1 %v5106_v44  ;;  %v10056_v44 = vld [vmem:[%s12993_s11 + $0x148] sm:$0xff] }
 0xdc2   : > { %v11420_v23 = vpop.f32.mrf.mxu1  ;;  %11802 = vmatprep.subr.msk.mxu0 %vm619_vm0, %v10056_v44 }
 0xdc3   : > { %v14315_v50 = vadd.f32 %v11420_v23, %v2033_v56  ;;  %5104 = vmax.xlane.f32.xlu0 %v5103_v11  ;;  %11803 = vmatpush3.xpose.msk.msra.mxu0 %vm619_vm0, %v10056_v44  ;;  %v2053_v56 = vadd.f32 %v13575_v15, %v13489_v3  ;;  %v10048_v3 = vld [vmem:[%s12999_s20 + $0x148] sm:$0xff]  ;;  %v10049_v44 = vld [vmem:[%s12999_s20 + $0x150] sm:$0xff] }
 0xdc4   : > { %v14318_v22 = vpop.f32.mrf.mxu1 }
 0xdc5   : > { %16172 = vst [vmem:[#allocation19_spill] sm:$0xff] %v14318_v22  ;;  %5113 = vmax.xlane.f32.xlu1 %v5112_v49  ;;  %v10055_v49 = vld [vmem:[%s12993_s11 + $0x140] sm:$0xff] }
 0xdc6   : > { %11804 = vmatprep.subr.msk.mxu0 %vm619_vm0, %v10055_v49 }
 0xdc7   : > { %v11423_v12 = vpop.f32.mrf.mxu1  ;;  %5110 = vmax.xlane.f32.xlu0 %v5109_v27  ;;  %11805 = vmatpush3.xpose.msk.msra.mxu0 %vm619_vm0, %v10055_v49  ;;  %v2063_v27 = vadd.f32 %v13579_v17, %v13493_v5  ;;  %v10050_v5 = vld [vmem:[%s12999_s20 + $0x158] sm:$0xff]  ;;  %v9845_v49 = vld [vmem:[%s13075_s29 + $0xf0] sm:$0xff] }
 0xdc8   : > { %v14327_v58 = vadd.f32 %v11423_v12, %v2043_v57 }
 0xdc9   : > { %v14330_v11 = vpop.f32.mrf.mxu1 }
 0xdca   : > { %16173 = vst [vmem:[#allocation20_spill] sm:$0xff] %v14330_v11  ;;  %11807 = vmatmul.mubr.msk.f32.vlgmr.msra.gmra.mxu0 %vm619_vm0, %v10048_v3  ;;  %v10054_v3 = vld [vmem:[%s12999_s20 + $0x178] sm:$0xff] }
 0xdcb   : > { %v11426_v23 = vpop.f32.mrf.mxu1  ;;  %11809 = vmatprep.mubr.msk.f32.mxu0 %vm619_vm0, %v10049_v44  ;;  %v9842_v44 = vld [vmem:[%s13075_s29 + $0xd8] sm:$0xff] }
 0xdcc   : > { %v14336_v1 = vadd.f32 %v11426_v23, %v2053_v56  ;;  %v10051_v23 = vld [vmem:[%s12999_s20 + $0x160] sm:$0xff] }
 0xdcd   : > { %v14339_v6 = vpop.f32.mrf.mxu1 }
 0xdce   : > { %16174 = vst [vmem:[#allocation21_spill] sm:$0xff] %v14339_v6  ;;  %11810 = vmatmul.mubr.msk.f32.gmra.mxu0 %vm619_vm0, %v10050_v5 }
 0xdcf   : > { %v11429_v57 = vpop.f32.mrf.mxu1  ;;  %11812 = vmatprep.mubr.msk.f32.mxu0 %vm619_vm0, %v10051_v23 }
 0xdd0   : > { %v14347_v15 = vadd.f32 %v11429_v57, %v2063_v27  ;;  %v9843_v57 = vld [vmem:[%s13075_s29 + $0xe0] sm:$0xff] }
 0xdd1   : > { %v14350_v12 = vpop.f32.mrf.mxu1 }
 0xdd2   : > { %16175 = vst [vmem:[#allocation22_spill] sm:$0xff] %v14350_v12  ;;  %11813 = vmatmul.mubr.msk.f32.gmra.mxu0 %vm619_vm0, %v10052_v53 }
 0xdd3   : > { %v11476_v56 = vpop.f32.mrf.mxu1  ;;  %11815 = vmatprep.mubr.msk.f32.mxu0 %vm619_vm0, %v10053_v35 }
 0xdd5   : > { %v3639_v17 = vpop.f32.mrf.mxu1 }
 0xdd6   : > { %11490 = vmatprep.mubr.msk.f32.mxu1 %vm619_vm0, %v3639_v17  ;;  %11816 = vmatmul.mubr.msk.f32.gmra.mxu0 %vm619_vm0, %v10054_v3  ;;  %v9840_v17 = vld [vmem:[%s13075_s29 + $0xc8] sm:$0xff] }
 0xdd7   : > { %v11479_v27 = vpop.f32.mrf.mxu1  ;;  %11491 = vmatmul.mubr.msk.f32.vlgmr.msra.gmra.mxu1 %vm619_vm0, %v11476_v56  ;;  %v12504_v56 = vpop.eup %12503 }
 0xdd8   : > { %11531 = vmatpush3.msra.mxu1 %v14209_v29  ;;  %v12506_v23 = vpop.eup %12505 }
 0xdd9   : > { %11532 = vmatprep.subr.mxu1 %v9845_v49  ;;  %v3649_v59 = vpop.f32.mrf.mxu1  ;;  %v12508_v53 = vpop.eup %12507 }
 0xdda   : > { %11533 = vmatpush3.msra.mxu1 %v9845_v49  ;;  %11493 = vmatprep.mubr.msk.f32.mxu1 %vm619_vm0, %v3649_v59  ;;  %v4078_v49 = vmul.f32 %v12504_v56, %v14062_v41  ;;  %v12510_v2 = vpop.eup %12509 }
 0xddb   : > { %11534 = vmatprep.subr.mxu1 %v9844_v32  ;;  %v11482_v29 = vpop.f32.mrf.mxu1  ;;  %11494 = vmatmul.mubr.msk.f32.gmra.mxu1 %vm619_vm0, %v11479_v27  ;;  %v4080_v27 = vmul.f32 %v12506_v23, %v14058_v45  ;;  %v12512_v35 = vpop.eup %12511  ;;  %v4084_v41 = vmul.f32 %v12510_v2, %v14068_v31 }
 0xddc   : > { %11535 = vmatpush3.msra.mxu1 %v9844_v32  ;;  %v4082_v32 = vmul.f32 %v12508_v53, %v14072_v34  ;;  %v12514_v59 = vpop.eup %12513 }
 0xddd   : > { %11536 = vmatprep.subr.mxu1 %v9843_v57  ;;  %v3659_v4 = vpop.f32.mrf.mxu1  ;;  %v12516_v3 = vpop.eup %12515  ;;  %v4088_v45 = vmul.f32 %v12514_v59, %v14076_v37  ;;  %v14419_v37 = vld [vmem:[%s13217_s24 + $0xf8] sm:$0xff] }
 0xdde   : > { %11537 = vmatpush3.msra.mxu1 %v9843_v57  ;;  %11496 = vmatprep.mubr.msk.f32.mxu1 %vm619_vm0, %v3659_v4  ;;  %v4086_v57 = vmul.f32 %v12512_v35, %v14085_v43  ;;  %v4090_v34 = vmul.f32 %v12516_v3, %v14104_v0  ;;  %v14407_v43 = vld [vmem:[%s16135_s8 + $0x38] sm:$0xff]  ;;  %v14414_v0 = vld [vmem:[%s16135_s8 + $0x30] sm:$0xff] }
 0xddf   : > { %11538 = vmatprep.subr.mxu1 %v9842_v44  ;;  %v11485_v5 = vpop.f32.mrf.mxu1  ;;  %11497 = vmatmul.mubr.msk.f32.gmra.mxu1 %vm619_vm0, %v11482_v29  ;;  %v12518_v29 = vpop.eup %12517 }
 0xde0   : > { %11539 = vmatpush3.msra.mxu1 %v9842_v44  ;;  %v4092_v31 = vmul.f32 %v12518_v29, %v14091_v51 }
 0xde1   : > { %11540 = vmatprep.subr.mxu1 %v9841_v30  ;;  %v3669_v14 = vpop.f32.mrf.mxu1 }
 0xde2   : > { %11541 = vmatpush3.msra.mxu1 %v9841_v30  ;;  %11499 = vmatprep.mubr.msk.f32.mxu1 %vm619_vm0, %v3669_v14 }
 0xde3   : > { %11542 = vmatprep.subr.mxu1 %v9840_v17  ;;  %11500 = vmatmul.mubr.msk.f32.gmra.mxu1 %vm619_vm0, %v11485_v5 }
 0xde4   : > { %11543 = vmatpush3.msra.mxu1 %v9840_v17  ;;  %11546 = vmatprep.mubr.msk.f32.mxu1 %vm781_vm1, %v4078_v49 }
 0xde5   : > { %11544 = vmatprep.subr.mxu1 %v9839_v62 }
 0xde6   : > { %11545 = vmatpush3.msra.mxu1 %v9839_v62 }
 0xde7   : > { %11547 = vmatmul.mubr.msk.f32.vlgmr.msra.gmra.mxu1 %vm781_vm1, %v4080_v27  ;;  %11558 = vmatprep.subr.mxu1 %v14407_v43 }
 0xde8   : > { %11549 = vmatprep.mubr.msk.f32.mxu1 %vm781_vm1, %v4082_v32  ;;  %11559 = vmatpush3.msra.mxu1 %v14407_v43 }
 0xde9   : > { %11560 = vmatprep.subr.mxu1 %v14414_v0 }
 0xdea   : > { %11561 = vmatpush3.msra.mxu1 %v14414_v0 }
 0xdeb   : > { %11550 = vmatmul.mubr.msk.f32.gmra.mxu1 %vm781_vm1, %v4084_v41  ;;  %11602 = vmatprep.subr.mxu1 %v14419_v37  ;;  %v10118_v41 = vld [vmem:[%s13099_s19 + $0x178] sm:$0xff] }
 0xdec   : > { %11552 = vmatprep.mubr.msk.f32.mxu1 %vm781_vm1, %v4086_v57  ;;  %11862 = vmatprep.subr.msk.mxu0 %vm619_vm0, %v10118_v41 }
 0xded   : > { %11863 = vmatpush3.xpose.msk.msra.mxu0 %vm619_vm0, %v10118_v41 }
 0xdef   : > { %11553 = vmatmul.mubr.msk.f32.gmra.mxu1 %vm781_vm1, %v4088_v45 }
 0xdf0   : > { %11555 = vmatprep.mubr.msk.f32.mxu1 %vm781_vm1, %v4090_v34 }
 0xdf3   : > { %11556 = vmatmul.mubr.msk.f32.gmra.mxu1 %vm781_vm1, %v4092_v31 }
 0xe32   : > { %v14422_v51 = vpop.xlane.xlu1 %4599 }
 0xe34   : > { %v14424_v44 = vpop.xlane.xlu0 %4596 }
 0xe36   : > { %v14426_v4 = vpop.xlane.xlu1 %4605 }
 0xe38   : > { %v14428_v30 = vpop.xlane.xlu0 %4602 }
 0xe3a   : > { %v14430_v56 = vpop.xlane.xlu1 %4611 }
 0xe3c   : > { %v14432_v5 = vpop.xlane.xlu0 %4608 }
 0xe3e   : > { %v14434_v17 = vpop.xlane.xlu1 %4617 }
 0xe40   : > { %v14436_v14 = vpop.xlane.xlu0 %4614 }
 0xe42   : > { %v5096_v23 = vpop.xlane.xlu1 %5095 }
 0xe43   : > { %v5116_v62 = vsub.f32 %v14263_v25, %v5096_v23  ;;  %v11736_v23 = vpop.f32.mrf.mxu0 }
 0xe44   : > { %v5093_v49 = vpop.xlane.xlu0 %5092 }
 0xe45   : > { %v5125_v53 = vmul.f32 1.442695, %v5116_v62  ;;  %v5115_v27 = vsub.f32 %v14270_v33, %v5093_v49 }
 0xe46   : > { %v5102_v2 = vpop.xlane.xlu1 %5101 }
 0xe47   : > { %12519 = vpow2.f32 %v5125_v53  ;;  %v5123_v32 = vmul.f32 1.442695, %v5115_v27  ;;  %v5118_v35 = vsub.f32 %v14280_v40, %v5102_v2  ;;  %v5586_v2 = vpop.f32.mrf.mxu0 }
 0xe48   : > { %v5099_v59 = vpop.xlane.xlu0 %5098 }
 0xe49   : > { %12521 = vpow2.f32 %v5123_v32  ;;  %v5129_v57 = vmul.f32 1.442695, %v5118_v35  ;;  %v5117_v3 = vsub.f32 %v14283_v54, %v5099_v59  ;;  %v11739_v41 = vpop.f32.mrf.mxu0 }
 0xe4a   : > { %v5108_v25 = vpop.xlane.xlu1 %5107 }
 0xe4b   : > { %12523 = vpow2.f32 %v5129_v57  ;;  %v5127_v45 = vmul.f32 1.442695, %v5117_v3  ;;  %v5120_v33 = vsub.f32 %v14291_v47, %v5108_v25  ;;  %v5596_v3 = vpop.f32.mrf.mxu0 }
 0xe4c   : > { %v5105_v29 = vpop.xlane.xlu0 %5104 }
 0xe4d   : > { %12525 = vpow2.f32 %v5127_v45  ;;  %v5133_v34 = vmul.f32 1.442695, %v5120_v33  ;;  %v5119_v40 = vsub.f32 %v14294_v26, %v5105_v29 }
 0xe4e   : > { %v5114_v31 = vpop.xlane.xlu1 %5113 }
 0xe4f   : > { %12527 = vpow2.f32 %v5133_v34  ;;  %v5131_v62 = vmul.f32 1.442695, %v5119_v40  ;;  %v5122_v49 = vsub.f32 %v14302_v63, %v5114_v31  ;;  %v11742_v34 = vpop.f32.mrf.mxu0  ;;  %v14473_v31 = vmul.f32 0.25, %v11736_v23 }
 0xe50   : > { %v5111_v53 = vpop.xlane.xlu0 %5110 }
 0xe51   : > { %12529 = vpow2.f32 %v5131_v62  ;;  %v5137_v54 = vmul.f32 1.442695, %v5122_v49  ;;  %v5121_v27 = vsub.f32 %v14305_v38, %v5111_v53  ;;  %v10117_v49 = vld [vmem:[%s13099_s19 + $0x170] sm:$0xff] }
 0xe52   : > { %11864 = vmatprep.subr.msk.mxu0 %vm619_vm0, %v10117_v49 }
 0xe53   : > { %12531 = vpow2.f32 %v5137_v54  ;;  %v5135_v32 = vmul.f32 1.442695, %v5121_v27  ;;  %v14480_v54 = vmul.f32 0.25, %v5586_v2  ;;  %11865 = vmatpush3.xpose.msk.msra.mxu0 %vm619_vm0, %v10117_v49  ;;  %v10116_v2 = vld [vmem:[%s13099_s19 + $0x168] sm:$0xff]  ;;  %v14501_v49 = vmul.f32 0.25, %v11742_v34  ;;  %v10114_v34 = vld [vmem:[%s13099_s19 + $0x158] sm:$0xff] }
 0xe54   : > { %v14449_v47 = vpop.eup %12519  ;;  %11866 = vmatprep.subr.msk.mxu0 %vm619_vm0, %v10116_v2 }
 0xe55   : > { %12533 = vpow2.f32 %v5135_v32  ;;  %v5142_v26 = vsel %vm781_vm1, %v14449_v47, 0.0  ;;  %v5606_v32 = vpop.f32.mrf.mxu0 }
 0xe56   : > { %v14453_v35 = vpop.eup %12521  ;;  %5143 = vadd.xlane.f32.xlu1 %v5142_v26  ;;  %v5636_v26 = vsel %vm781_vm1, %v14473_v31, -inf  ;;  %12535 = vrcp.f32 %v14424_v44 }
 0xe57   : > { %v5139_v63 = vsel %vm781_vm1, %v14453_v35, 0.0  ;;  %11867 = vmatpush3.xpose.msk.msra.mxu0 %vm619_vm0, %v10116_v2  ;;  %12537 = vrcp.f32 %v14422_v51  ;;  %v9899_v51 = vld [vmem:[%s13217_s24 + $0xe0] sm:$0xff] }
 0xe58   : > { %v14457_v59 = vpop.eup %12523  ;;  %5140 = vadd.xlane.f32.xlu0 %v5139_v63  ;;  %v14490_v63 = vmul.f32 0.25, %v11739_v41  ;;  %v10115_v41 = vld [vmem:[%s13099_s19 + $0x160] sm:$0xff]  ;;  %12539 = vrcp.f32 %v14428_v30  ;;  %v9898_v30 = vld [vmem:[%s13217_s24 + $0xd8] sm:$0xff] }
 0xe59   : > { %v5148_v38 = vsel %vm781_vm1, %v14457_v59, 0.0  ;;  %11868 = vmatprep.subr.msk.mxu0 %vm619_vm0, %v10115_v41  ;;  %12541 = vrcp.f32 %v14426_v4  ;;  %v9897_v4 = vld [vmem:[%s13217_s24 + $0xd0] sm:$0xff] }
 0xe5a   : > { %v14461_v57 = vpop.eup %12525  ;;  %5149 = vadd.xlane.f32.xlu1 %v5148_v38  ;;  %v14493_v38 = vmul.f32 0.25, %v5596_v3  ;;  %12543 = vrcp.f32 %v14432_v5 }
 0xe5b   : > { %v5145_v25 = vsel %vm781_vm1, %v14461_v57, 0.0  ;;  %11869 = vmatpush3.xpose.msk.msra.mxu0 %vm619_vm0, %v10115_v41  ;;  %12545 = vrcp.f32 %v14430_v56 }
 0xe5c   : > { %v14465_v45 = vpop.eup %12527  ;;  %5146 = vadd.xlane.f32.xlu0 %v5145_v25  ;;  %v5633_v25 = vsel %vm781_vm1, %v14480_v54, -inf  ;;  %v5639_v3 = vsel %vm781_vm1, %v14493_v38, -inf  ;;  %11870 = vmatprep.subr.msk.mxu0 %vm619_vm0, %v10114_v34  ;;  %12547 = vrcp.f32 %v14436_v14  ;;  %v9895_v14 = vld [vmem:[%s13217_s24 + $0xc0] sm:$0xff] }
 0xe5d   : > { %v5154_v33 = vsel %vm781_vm1, %v14465_v45, 0.0  ;;  %12549 = vrcp.f32 %v14434_v17 }
 0xe5e   : > { %v14469_v29 = vpop.eup %12529  ;;  %5155 = vadd.xlane.f32.xlu1 %v5154_v33  ;;  %v11745_v33 = vpop.f32.mrf.mxu0 }
 0xe5f   : > { %v5151_v40 = vsel %vm781_vm1, %v14469_v29, 0.0  ;;  %v14512_v2 = vmul.f32 0.25, %v11745_v33  ;;  %11871 = vmatpush3.xpose.msk.msra.mxu0 %vm619_vm0, %v10114_v34  ;;  %v10113_v33 = vld [vmem:[%s13099_s19 + $0x150] sm:$0xff]  ;;  %v10104_v34 = vld [vmem:[%s13126_s30 + $0x148] sm:$0xff] }
 0xe60   : > { %v14475_v62 = vpop.eup %12531  ;;  %5152 = vadd.xlane.f32.xlu0 %v5151_v40  ;;  %v5642_v40 = vsel %vm781_vm1, %v14490_v63, -inf  ;;  %11872 = vmatprep.subr.msk.mxu0 %vm619_vm0, %v10113_v33 }
 0xe61   : > { %v5160_v53 = vsel %vm781_vm1, %v14475_v62, 0.0 }
 0xe62   : > { %v14483_v27 = vpop.eup %12533  ;;  %5161 = vadd.xlane.f32.xlu1 %v5160_v53  ;;  %v14504_v53 = vmul.f32 0.25, %v5606_v32 }
 0xe63   : > { %v5157_v23 = vsel %vm781_vm1, %v14483_v27, 0.0  ;;  %11873 = vmatpush3.xpose.msk.msra.mxu0 %vm619_vm0, %v10113_v33  ;;  %v10107_v33 = vld [vmem:[%s13126_s30 + $0x160] sm:$0xff]  ;;  %v12536_v5 = vpop.eup %12535 }
 0xe64   : > { %5158 = vadd.xlane.f32.xlu0 %v5157_v23  ;;  %v5616_v23 = vpop.f32.mrf.mxu0 }
 0xe65   : > { %v14515_v32 = vmul.f32 0.25, %v5616_v23  ;;  %v10111_v23 = vld [vmem:[%s13099_s19 + $0x140] sm:$0xff] }
 0xe66   : > { %5637 = vmax.xlane.f32.xlu1 %v5636_v26  ;;  %v5648_v26 = vsel %vm781_vm1, %v14501_v49, -inf }
 0xe67   : > { %v5651_v41 = vsel %vm781_vm1, %v14515_v32, -inf }
 0xe68   : > { %5634 = vmax.xlane.f32.xlu0 %v5633_v25  ;;  %v5645_v25 = vsel %vm781_vm1, %v14504_v53, -inf }
 0xe6a   : > { %5643 = vmax.xlane.f32.xlu1 %v5642_v40  ;;  %v5654_v40 = vsel %vm781_vm1, %v14512_v2, -inf }
 0xe6c   : > { %5640 = vmax.xlane.f32.xlu0 %v5639_v3  ;;  %v10112_v3 = vld [vmem:[%s13099_s19 + $0x148] sm:$0xff] }
 0xe6d   : > { %11874 = vmatprep.subr.msk.mxu0 %vm619_vm0, %v10112_v3 }
 0xe6e   : > { %5649 = vmax.xlane.f32.xlu1 %v5648_v26  ;;  %11875 = vmatpush3.xpose.msk.msra.mxu0 %vm619_vm0, %v10112_v3  ;;  %v10103_v26 = vld [vmem:[%s13126_s30 + $0x140] sm:$0xff]  ;;  %v10109_v3 = vld [vmem:[%s13126_s30 + $0x170] sm:$0xff] }
 0xe6f   : > { %11876 = vmatprep.subr.msk.mxu0 %vm619_vm0, %v10111_v23  ;;  %11878 = vmatprep.mubr.msk.f32.mxu0 %vm619_vm0, %v10103_v26  ;;  %v2696_v26 = vadd.f32 %v14030_v46, %v13684_v28  ;;  %v2726_v46 = vadd.f32 %v14056_v18, %v13696_v21  ;;  %v9900_v21 = vld [vmem:[%s13217_s24 + $0xe8] sm:$0xff] }
 0xe70   : > { %5646 = vmax.xlane.f32.xlu0 %v5645_v25  ;;  %v10105_v25 = vld [vmem:[%s13126_s30 + $0x150] sm:$0xff] }
 0xe72   : > { %5655 = vmax.xlane.f32.xlu1 %v5654_v40  ;;  %11877 = vmatpush3.xpose.msk.msra.mxu0 %vm619_vm0, %v10111_v23  ;;  %v10106_v40 = vld [vmem:[%s13126_s30 + $0x158] sm:$0xff] }
 0xe73   : > { %v10110_v23 = vld [vmem:[%s13126_s30 + $0x178] sm:$0xff] }
 0xe74   : > { %5652 = vmax.xlane.f32.xlu0 %v5651_v41  ;;  %v10108_v41 = vld [vmem:[%s13126_s30 + $0x168] sm:$0xff] }
 0xe75   : > { %11879 = vmatmul.mubr.msk.f32.vlgmr.msra.gmra.mxu0 %vm619_vm0, %v10104_v34 }
 0xe76   : > { %11881 = vmatprep.mubr.msk.f32.mxu0 %vm619_vm0, %v10105_v25 }
 0xe79   : > { %11882 = vmatmul.mubr.msk.f32.gmra.mxu0 %vm619_vm0, %v10106_v40  ;;  %v2706_v40 = vadd.f32 %v14040_v36, %v13688_v7 }
 0xe7a   : > { %11884 = vmatprep.mubr.msk.f32.mxu0 %vm619_vm0, %v10107_v33 }
 0xe7d   : > { %11885 = vmatmul.mubr.msk.f32.gmra.mxu0 %vm619_vm0, %v10108_v41 }
 0xe7e   : > { %11887 = vmatprep.mubr.msk.f32.mxu0 %vm619_vm0, %v10109_v3  ;;  %v2716_v3 = vadd.f32 %v14048_v10, %v13692_v19  ;;  %v9901_v19 = vld [vmem:[%s13217_s24 + $0xf0] sm:$0xff] }
 0xe81   : > { %11888 = vmatmul.mubr.msk.f32.gmra.mxu0 %vm619_vm0, %v10110_v23 }
 0xe97   : > { %v11492_v34 = vpop.f32.mrf.mxu1 }
 0xe98   : > { %v14552_v25 = vadd.f32 %v11492_v34, %v2696_v26 }
 0xe99   : > { %v14554_v12 = vpop.f32.mrf.mxu1 }
 0xe9b   : > { %v11495_v33 = vpop.f32.mrf.mxu1 }
 0xe9c   : > { %v14558_v6 = vadd.f32 %v11495_v33, %v2706_v40 }
 0xe9d   : > { %v14560_v41 = vpop.f32.mrf.mxu1 }
 0xe9e   : > { %16176 = vst [vmem:[#allocation23_spill] sm:$0xff] %v14560_v41 }
 0xe9f   : > { %v11498_v23 = vpop.f32.mrf.mxu1 }
 0xea0   : > { %v14564_v11 = vadd.f32 %v11498_v23, %v2716_v3  ;;  %v9896_v3 = vld [vmem:[%s13217_s24 + $0xc8] sm:$0xff]  ;;  %v12538_v23 = vpop.eup %12537 }
 0xea1   : > { %v14566_v28 = vpop.f32.mrf.mxu1 }
 0xea2   : > { %16177 = vst [vmem:[#allocation24_spill] sm:$0xff] %v14566_v28 }
 0xea3   : > { %v11501_v26 = vpop.f32.mrf.mxu1 }
 0xea4   : > { %v14570_v7 = vadd.f32 %v11501_v26, %v2726_v46  ;;  %v4620_v46 = vmul.f32 %v12536_v5, %v14243_v61  ;;  %v12540_v26 = vpop.eup %12539 }
 0xea5   : > { %v14572_v36 = vpop.f32.mrf.mxu1  ;;  %v12542_v17 = vpop.eup %12541 }
 0xea6   : > { %16178 = vst [vmem:[#allocation25_spill] sm:$0xff] %v14572_v36  ;;  %v4626_v61 = vmul.f32 %v12542_v17, %v14247_v39 }
 0xea7   : > { %v11548_v34 = vpop.f32.mrf.mxu1 }
 0xea9   : > { %v4183_v10 = vpop.f32.mrf.mxu1 }
 0xeaa   : > { %11562 = vmatprep.mubr.msk.f32.mxu1 %vm619_vm0, %v4183_v10  ;;  %v4624_v10 = vmul.f32 %v12540_v26, %v14251_v55 }
 0xeab   : > { %v11551_v40 = vpop.f32.mrf.mxu1  ;;  %11563 = vmatmul.mubr.msk.f32.vlgmr.msra.gmra.mxu1 %vm619_vm0, %v11548_v34  ;;  %v4622_v34 = vmul.f32 %v12538_v23, %v14239_v48 }
 0xeac   : > { %11603 = vmatpush3.msra.mxu1 %v14419_v37 }
 0xead   : > { %11604 = vmatprep.subr.mxu1 %v9901_v19  ;;  %v4193_v18 = vpop.f32.mrf.mxu1 }
 0xeae   : > { %11605 = vmatpush3.msra.mxu1 %v9901_v19  ;;  %11565 = vmatprep.mubr.msk.f32.mxu1 %vm619_vm0, %v4193_v18  ;;  %v12544_v19 = vpop.eup %12543 }
 0xeaf   : > { %11606 = vmatprep.subr.mxu1 %v9900_v21  ;;  %v11554_v44 = vpop.f32.mrf.mxu1  ;;  %11566 = vmatmul.mubr.msk.f32.gmra.mxu1 %vm619_vm0, %v11551_v40  ;;  %v12546_v40 = vpop.eup %12545  ;;  %v4628_v48 = vmul.f32 %v12544_v19, %v14259_v60 }
 0xeb0   : > { %11607 = vmatpush3.msra.mxu1 %v9900_v21  ;;  %v12548_v21 = vpop.eup %12547  ;;  %v4630_v55 = vmul.f32 %v12546_v40, %v14255_v13 }
 0xeb1   : > { %11608 = vmatprep.subr.mxu1 %v9899_v51  ;;  %v4203_v37 = vpop.f32.mrf.mxu1  ;;  %v12550_v18 = vpop.eup %12549 }
 0xeb2   : > { %11609 = vmatpush3.msra.mxu1 %v9899_v51  ;;  %11568 = vmatprep.mubr.msk.f32.mxu1 %vm619_vm0, %v4203_v37  ;;  %v4632_v51 = vmul.f32 %v12548_v21, %v14273_v24  ;;  %v4634_v39 = vmul.f32 %v12550_v18, %v14265_v16 }
 0xeb3   : > { %11610 = vmatprep.subr.mxu1 %v9898_v30  ;;  %v11557_v33 = vpop.f32.mrf.mxu1  ;;  %11569 = vmatmul.mubr.msk.f32.gmra.mxu1 %vm619_vm0, %v11554_v44 }
 0xeb4   : > { %11611 = vmatpush3.msra.mxu1 %v9898_v30 }
 0xeb5   : > { %11612 = vmatprep.subr.mxu1 %v9897_v4  ;;  %v4213_v56 = vpop.f32.mrf.mxu1 }
 0xeb6   : > { %11613 = vmatpush3.msra.mxu1 %v9897_v4  ;;  %11571 = vmatprep.mubr.msk.f32.mxu1 %vm619_vm0, %v4213_v56 }
 0xeb7   : > { %11614 = vmatprep.subr.mxu1 %v9896_v3  ;;  %11572 = vmatmul.mubr.msk.f32.gmra.mxu1 %vm619_vm0, %v11557_v33 }
 0xeb8   : > { %11615 = vmatpush3.msra.mxu1 %v9896_v3  ;;  %11618 = vmatprep.mubr.msk.f32.mxu1 %vm781_vm1, %v4620_v46 }
 0xeb9   : > { %11616 = vmatprep.subr.mxu1 %v9895_v14 }
 0xeba   : > { %11617 = vmatpush3.msra.mxu1 %v9895_v14 }
 0xebb   : > { %11619 = vmatmul.mubr.msk.f32.vlgmr.msra.gmra.mxu1 %vm781_vm1, %v4622_v34  ;;  %11630 = vmatprep.subr.mxu1 %v14407_v43 }
 0xebc   : > { %11621 = vmatprep.mubr.msk.f32.mxu1 %vm781_vm1, %v4624_v10  ;;  %11631 = vmatpush3.msra.mxu1 %v14407_v43 }
 0xebd   : > { %11632 = vmatprep.subr.mxu1 %v14414_v0 }
 0xebe   : > { %11633 = vmatpush3.msra.mxu1 %v14414_v0 }
 0xebf   : > { %11622 = vmatmul.mubr.msk.f32.gmra.mxu1 %vm781_vm1, %v4626_v61 }
 0xec0   : > { %11624 = vmatprep.mubr.msk.f32.mxu1 %vm781_vm1, %v4628_v48  ;;  %v11808_v48 = vpop.f32.mrf.mxu0 }
 0xec3   : > { %11625 = vmatmul.mubr.msk.f32.gmra.mxu1 %vm781_vm1, %v4630_v55 }
 0xec4   : > { %11627 = vmatprep.mubr.msk.f32.mxu1 %vm781_vm1, %v4632_v51  ;;  %v14643_v51 = vld [vmem:[%s13075_s29 + $0x138] sm:$0xff] }
 0xec5   : > { %11674 = vmatprep.subr.mxu1 %v14643_v51 }
 0xec7   : > { %11628 = vmatmul.mubr.msk.f32.gmra.mxu1 %vm781_vm1, %v4634_v39  ;;  %v6130_v39 = vpop.f32.mrf.mxu0 }
 0xedf   : > { %v14618_v60 = vpop.xlane.xlu1 %5143 }
 0xee1   : > { %v14620_v43 = vpop.xlane.xlu0 %5140 }
 0xee3   : > { %v14622_v0 = vpop.xlane.xlu1 %5149 }
 0xee5   : > { %v14624_v44 = vpop.xlane.xlu0 %5146 }
 0xee7   : > { %v14626_v13 = vpop.xlane.xlu1 %5155 }
 0xee9   : > { %v14628_v30 = vpop.xlane.xlu0 %5152 }
 0xeeb   : > { %v14630_v24 = vpop.xlane.xlu1 %5161 }
 0xeed   : > { %v14632_v37 = vpop.xlane.xlu0 %5158 }
 0xeef   : > { %v5638_v4 = vpop.xlane.xlu1 %5637 }
 0xef0   : > { %v5658_v16 = vsub.f32 %v14473_v31, %v5638_v4 }
 0xef1   : > { %v5635_v5 = vpop.xlane.xlu0 %5634 }
 0xef2   : > { %v5667_v33 = vmul.f32 1.442695, %v5658_v16  ;;  %v5657_v3 = vsub.f32 %v14480_v54, %v5635_v5 }
 0xef3   : > { %v5644_v56 = vpop.xlane.xlu1 %5643 }
 0xef4   : > { %12551 = vpow2.f32 %v5667_v33  ;;  %v5665_v23 = vmul.f32 1.442695, %v5657_v3  ;;  %v5660_v14 = vsub.f32 %v14490_v63, %v5644_v56 }
 0xef5   : > { %v5641_v46 = vpop.xlane.xlu0 %5640 }
 0xef6   : > { %12553 = vpow2.f32 %v5665_v23  ;;  %v5671_v26 = vmul.f32 1.442695, %v5660_v14  ;;  %v5659_v34 = vsub.f32 %v14493_v38, %v5641_v46 }
 0xef7   : > { %v5650_v17 = vpop.xlane.xlu1 %5649 }
 0xef8   : > { %12555 = vpow2.f32 %v5671_v26  ;;  %v5669_v10 = vmul.f32 1.442695, %v5659_v34  ;;  %v5662_v31 = vsub.f32 %v14501_v49, %v5650_v17 }
 0xef9   : > { %v5647_v19 = vpop.xlane.xlu0 %5646 }
 0xefa   : > { %12557 = vpow2.f32 %v5669_v10  ;;  %v5675_v61 = vmul.f32 1.442695, %v5662_v31  ;;  %v5661_v54 = vsub.f32 %v14504_v53, %v5647_v19  ;;  %v14670_v10 = vmul.f32 0.25, %v11808_v48 }
 0xefb   : > { %v5656_v40 = vpop.xlane.xlu1 %5655 }
 0xefc   : > { %12559 = vpow2.f32 %v5675_v61  ;;  %v5673_v63 = vmul.f32 1.442695, %v5661_v54  ;;  %v5664_v21 = vsub.f32 %v14512_v2, %v5656_v40  ;;  %v11811_v2 = vpop.f32.mrf.mxu0  ;;  %v14676_v61 = vmul.f32 0.25, %v6130_v39 }
 0xefd   : > { %v5653_v55 = vpop.xlane.xlu0 %5652  ;;  %v14684_v48 = vmul.f32 0.25, %v11811_v2 }
 0xefe   : > { %12561 = vpow2.f32 %v5673_v63  ;;  %v5679_v38 = vmul.f32 1.442695, %v5664_v21  ;;  %v5663_v18 = vsub.f32 %v14515_v32, %v5653_v55  ;;  %v6140_v56 = vpop.f32.mrf.mxu0  ;;  %v6180_v21 = vsel %vm781_vm1, %v14670_v10, -inf }
 0xeff   : > { %v14686_v55 = vmul.f32 0.25, %v6140_v56  ;;  %v6186_v39 = vsel %vm781_vm1, %v14684_v48, -inf }
 0xf00   : > { %12563 = vpow2.f32 %v5679_v38  ;;  %v5677_v49 = vmul.f32 1.442695, %v5663_v18  ;;  %v11814_v34 = vpop.f32.mrf.mxu0  ;;  %v6177_v38 = vsel %vm781_vm1, %v14676_v61, -inf }
 0xf01   : > { %v14646_v4 = vpop.eup %12551  ;;  %v6183_v2 = vsel %vm781_vm1, %v14686_v55, -inf }
 0xf02   : > { %12565 = vpow2.f32 %v5677_v49  ;;  %v5684_v53 = vsel %vm781_vm1, %v14646_v4, 0.0  ;;  %v6150_v40 = vpop.f32.mrf.mxu0  ;;  %v14692_v49 = vmul.f32 0.25, %v11814_v34  ;;  %v10174_v34 = vld [vmem:[%s12993_s11 + $0x1b8] sm:$0xff] }
 0xf03   : > { %v14650_v16 = vpop.eup %12553  ;;  %5685 = vadd.xlane.f32.xlu1 %v5684_v53  ;;  %v14694_v53 = vmul.f32 0.25, %v6150_v40  ;;  %11934 = vmatprep.subr.msk.mxu0 %vm619_vm0, %v10174_v34  ;;  %v10173_v40 = vld [vmem:[%s12993_s11 + $0x1b0] sm:$0xff]  ;;  %12567 = vrcp.f32 %v14620_v43 }
 0xf04   : > { %v5681_v32 = vsel %vm781_vm1, %v14650_v16, 0.0  ;;  %v11817_v18 = vpop.f32.mrf.mxu0  ;;  %11935 = vmatpush3.xpose.msk.msra.mxu0 %vm619_vm0, %v10174_v34  ;;  %v10162_v34 = vld [vmem:[%s12999_s20 + $0x198] sm:$0xff]  ;;  %12569 = vrcp.f32 %v14618_v60  ;;  %v9955_v60 = vld [vmem:[%s13075_s29 + $0x120] sm:$0xff] }
 0xf05   : > { %v14654_v5 = vpop.eup %12555  ;;  %5682 = vadd.xlane.f32.xlu0 %v5681_v32  ;;  %v14700_v56 = vmul.f32 0.25, %v11817_v18  ;;  %11936 = vmatprep.subr.msk.mxu0 %vm619_vm0, %v10173_v40  ;;  %v10169_v18 = vld [vmem:[%s12993_s11 + $0x190] sm:$0xff]  ;;  %12571 = vrcp.f32 %v14624_v44 }
 0xf06   : > { %v5690_v33 = vsel %vm781_vm1, %v14654_v5, 0.0  ;;  %v6160_v32 = vpop.f32.mrf.mxu0  ;;  %12573 = vrcp.f32 %v14622_v0 }
 0xf07   : > { %v14658_v3 = vpop.eup %12557  ;;  %5691 = vadd.xlane.f32.xlu1 %v5690_v33  ;;  %v6192_v33 = vsel %vm781_vm1, %v14692_v49, -inf  ;;  %12575 = vrcp.f32 %v14628_v30  ;;  %v9953_v30 = vld [vmem:[%s13075_s29 + $0x110] sm:$0xff] }
 0xf08   : > { %v5687_v23 = vsel %vm781_vm1, %v14658_v3, 0.0  ;;  %11937 = vmatpush3.xpose.msk.msra.mxu0 %vm619_vm0, %v10173_v40  ;;  %v10165_v40 = vld [vmem:[%s12999_s20 + $0x1b0] sm:$0xff]  ;;  %12577 = vrcp.f32 %v14626_v13 }
 0xf09   : > { %v14662_v14 = vpop.eup %12559  ;;  %5688 = vadd.xlane.f32.xlu0 %v5687_v23  ;;  %v14702_v23 = vmul.f32 0.25, %v6160_v32  ;;  %v10159_v32 = vld [vmem:[%s12999_s20 + $0x180] sm:$0xff]  ;;  %12579 = vrcp.f32 %v14632_v37 }
 0xf0a   : > { %v5696_v46 = vsel %vm781_vm1, %v14662_v14, 0.0  ;;  %11950 = vmatprep.mubr.msk.f32.mxu0 %vm619_vm0, %v10159_v32  ;;  %12581 = vrcp.f32 %v14630_v24  ;;  %v9951_v37 = vld [vmem:[%s13075_s29 + $0x100] sm:$0xff] }
 0xf0b   : > { %v14666_v26 = vpop.eup %12561  ;;  %5697 = vadd.xlane.f32.xlu1 %v5696_v46  ;;  %v6189_v46 = vsel %vm781_vm1, %v14694_v53, -inf }
 0xf0c   : > { %v5693_v17 = vsel %vm781_vm1, %v14666_v26, 0.0 }
 0xf0d   : > { %v14672_v31 = vpop.eup %12563  ;;  %5694 = vadd.xlane.f32.xlu0 %v5693_v17  ;;  %v6198_v17 = vsel %vm781_vm1, %v14700_v56, -inf }
 0xf0e   : > { %v5702_v19 = vsel %vm781_vm1, %v14672_v31, 0.0 }
 0xf0f   : > { %v14678_v54 = vpop.eup %12565  ;;  %5703 = vadd.xlane.f32.xlu1 %v5702_v19  ;;  %v6195_v19 = vsel %vm781_vm1, %v14702_v23, -inf }
 0xf10   : > { %v5699_v63 = vsel %vm781_vm1, %v14678_v54, 0.0 }
 0xf11   : > { %5700 = vadd.xlane.f32.xlu0 %v5699_v63  ;;  %v10172_v63 = vld [vmem:[%s12993_s11 + $0x1a8] sm:$0xff] }
 0xf12   : > { %11938 = vmatprep.subr.msk.mxu0 %vm619_vm0, %v10172_v63 }
 0xf13   : > { %6181 = vmax.xlane.f32.xlu1 %v6180_v21  ;;  %11939 = vmatpush3.xpose.msk.msra.mxu0 %vm619_vm0, %v10172_v63  ;;  %v10171_v21 = vld [vmem:[%s12993_s11 + $0x1a0] sm:$0xff]  ;;  %v10166_v63 = vld [vmem:[%s12999_s20 + $0x1b8] sm:$0xff] }
 0xf14   : > { %11940 = vmatprep.subr.msk.mxu0 %vm619_vm0, %v10171_v21 }
 0xf15   : > { %6178 = vmax.xlane.f32.xlu0 %v6177_v38  ;;  %v10170_v38 = vld [vmem:[%s12993_s11 + $0x198] sm:$0xff] }
 0xf17   : > { %6187 = vmax.xlane.f32.xlu1 %v6186_v39  ;;  %11941 = vmatpush3.xpose.msk.msra.mxu0 %vm619_vm0, %v10171_v21  ;;  %v10168_v39 = vld [vmem:[%s12993_s11 + $0x188] sm:$0xff] }
 0xf18   : > { %11942 = vmatprep.subr.msk.mxu0 %vm619_vm0, %v10170_v38 }
 0xf19   : > { %6184 = vmax.xlane.f32.xlu0 %v6183_v2  ;;  %v10167_v2 = vld [vmem:[%s12993_s11 + $0x180] sm:$0xff] }
 0xf1b   : > { %6193 = vmax.xlane.f32.xlu1 %v6192_v33  ;;  %11943 = vmatpush3.xpose.msk.msra.mxu0 %vm619_vm0, %v10170_v38  ;;  %v10160_v33 = vld [vmem:[%s12999_s20 + $0x188] sm:$0xff] }
 0xf1c   : > { %11944 = vmatprep.subr.msk.mxu0 %vm619_vm0, %v10169_v18 }
 0xf1d   : > { %6190 = vmax.xlane.f32.xlu0 %v6189_v46  ;;  %v10161_v46 = vld [vmem:[%s12999_s20 + $0x190] sm:$0xff] }
 0xf1f   : > { %6199 = vmax.xlane.f32.xlu1 %v6198_v17  ;;  %11945 = vmatpush3.xpose.msk.msra.mxu0 %vm619_vm0, %v10169_v18  ;;  %v10163_v17 = vld [vmem:[%s12999_s20 + $0x1a0] sm:$0xff] }
 0xf20   : > { %11946 = vmatprep.subr.msk.mxu0 %vm619_vm0, %v10168_v39 }
 0xf21   : > { %6196 = vmax.xlane.f32.xlu0 %v6195_v19  ;;  %v10164_v19 = vld [vmem:[%s12999_s20 + $0x1a8] sm:$0xff] }
 0xf23   : > { %11947 = vmatpush3.xpose.msk.msra.mxu0 %vm619_vm0, %v10168_v39 }
 0xf24   : > { %11948 = vmatprep.subr.msk.mxu0 %vm619_vm0, %v10167_v2 }
 0xf27   : > { %11949 = vmatpush3.xpose.msk.msra.mxu0 %vm619_vm0, %v10167_v2 }
 0xf2a   : > { %11951 = vmatmul.mubr.msk.f32.vlgmr.msra.gmra.mxu0 %vm619_vm0, %v10160_v33 }
 0xf2b   : > { %11953 = vmatprep.mubr.msk.f32.mxu0 %vm619_vm0, %v10161_v46 }
 0xf2e   : > { %11954 = vmatmul.mubr.msk.f32.gmra.mxu0 %vm619_vm0, %v10162_v34 }
 0xf2f   : > { %11956 = vmatprep.mubr.msk.f32.mxu0 %vm619_vm0, %v10163_v17 }
 0xf32   : > { %11957 = vmatmul.mubr.msk.f32.gmra.mxu0 %vm619_vm0, %v10164_v19 }
 0xf33   : > { %11959 = vmatprep.mubr.msk.f32.mxu0 %vm619_vm0, %v10165_v40 }
 0xf36   : > { %11960 = vmatmul.mubr.msk.f32.gmra.mxu0 %vm619_vm0, %v10166_v63 }
 0xf6b   : > { %v11564_v21 = vpop.f32.mrf.mxu1 }
 0xf6c   : > { %v14751_v38 = vadd.f32 %v11564_v21, %v14315_v50  ;;  %v9954_v21 = vld [vmem:[%s13075_s29 + $0x118] sm:$0xff] }
 0xf6d   : > { %v14753_v18 = vpop.f32.mrf.mxu1 }
 0xf6e   : > { %16179 = vst [vmem:[#allocation26_spill] sm:$0xff] %v14753_v18 }
 0xf6f   : > { %v11567_v39 = vpop.f32.mrf.mxu1 }
 0xf70   : > { %v14756_v2 = vadd.f32 %v11567_v39, %v14327_v58 }
 0xf71   : > { %v14758_v32 = vpop.f32.mrf.mxu1 }
 0xf72   : > { %16180 = vst [vmem:[#allocation27_spill] sm:$0xff] %v14758_v32 }
 0xf73   : > { %v11570_v33 = vpop.f32.mrf.mxu1 }
 0xf74   : > { %v14761_v46 = vadd.f32 %v11570_v33, %v14336_v1  ;;  %v9957_v1 = vld [vmem:[%s13075_s29 + $0x130] sm:$0xff]  ;;  %v9952_v33 = vld [vmem:[%s13075_s29 + $0x108] sm:$0xff] }
 0xf75   : > { %v14763_v34 = vpop.f32.mrf.mxu1 }
 0xf76   : > { %16181 = vst [vmem:[#allocation28_spill] sm:$0xff] %v14763_v34 }
 0xf77   : > { %v11573_v17 = vpop.f32.mrf.mxu1 }
 0xf78   : > { %v14766_v50 = vadd.f32 %v11573_v17, %v14347_v15  ;;  %v9956_v15 = vld [vmem:[%s13075_s29 + $0x128] sm:$0xff] }
 0xf79   : > { %v14768_v19 = vpop.f32.mrf.mxu1 }
 0xf7a   : > { %16182 = vst [vmem:[#allocation29_spill] sm:$0xff] %v14768_v19  ;;  %v10221_v19 = vld [vmem:[%s13126_s30 + $0x1b0] sm:$0xff] }
 0xf7b   : > { %v11620_v40 = vpop.f32.mrf.mxu1 }
 0xf7d   : > { %v4725_v58 = vpop.f32.mrf.mxu1 }
 0xf7e   : > { %11634 = vmatprep.mubr.msk.f32.mxu1 %vm619_vm0, %v4725_v58 }
 0xf7f   : > { %v11623_v63 = vpop.f32.mrf.mxu1  ;;  %11635 = vmatmul.mubr.msk.f32.vlgmr.msra.gmra.mxu1 %vm619_vm0, %v11620_v40 }
 0xf80   : > { %11675 = vmatpush3.msra.mxu1 %v14643_v51  ;;  %v12568_v51 = vpop.eup %12567 }
 0xf81   : > { %11676 = vmatprep.subr.mxu1 %v9957_v1  ;;  %v4735_v43 = vpop.f32.mrf.mxu1  ;;  %v12570_v17 = vpop.eup %12569  ;;  %v5164_v40 = vmul.f32 %v12568_v51, %v14453_v35 }
 0xf82   : > { %11677 = vmatpush3.msra.mxu1 %v9957_v1  ;;  %11637 = vmatprep.mubr.msk.f32.mxu1 %vm619_vm0, %v4735_v43  ;;  %v12572_v58 = vpop.eup %12571  ;;  %v5166_v24 = vmul.f32 %v12570_v17, %v14449_v47 }
 0xf83   : > { %11678 = vmatprep.subr.mxu1 %v9956_v15  ;;  %v11626_v44 = vpop.f32.mrf.mxu1  ;;  %11638 = vmatmul.mubr.msk.f32.gmra.mxu1 %vm619_vm0, %v11623_v63  ;;  %v12574_v63 = vpop.eup %12573  ;;  %v5168_v43 = vmul.f32 %v12572_v58, %v14461_v57 }
 0xf84   : > { %11679 = vmatpush3.msra.mxu1 %v9956_v15 }
 0xf85   : > { %11680 = vmatprep.subr.mxu1 %v9955_v60  ;;  %v4745_v0 = vpop.f32.mrf.mxu1 }
 0xf86   : > { %11681 = vmatpush3.msra.mxu1 %v9955_v60  ;;  %11640 = vmatprep.mubr.msk.f32.mxu1 %vm619_vm0, %v4745_v0  ;;  %v12576_v60 = vpop.eup %12575 }
 0xf87   : > { %11682 = vmatprep.subr.mxu1 %v9954_v21  ;;  %v11629_v39 = vpop.f32.mrf.mxu1  ;;  %11641 = vmatmul.mubr.msk.f32.gmra.mxu1 %vm619_vm0, %v11626_v44  ;;  %v5170_v44 = vmul.f32 %v12574_v63, %v14457_v59  ;;  %v5172_v47 = vmul.f32 %v12576_v60, %v14469_v29 }
 0xf88   : > { %11683 = vmatpush3.msra.mxu1 %v9954_v21  ;;  %v12578_v21 = vpop.eup %12577 }
 0xf89   : > { %11684 = vmatprep.subr.mxu1 %v9953_v30  ;;  %v4755_v13 = vpop.f32.mrf.mxu1  ;;  %v5174_v57 = vmul.f32 %v12578_v21, %v14465_v45 }
 0xf8a   : > { %11685 = vmatpush3.msra.mxu1 %v9953_v30  ;;  %11643 = vmatprep.mubr.msk.f32.mxu1 %vm619_vm0, %v4755_v13  ;;  %v12580_v30 = vpop.eup %12579 }
 0xf8b   : > { %11686 = vmatprep.subr.mxu1 %v9952_v33  ;;  %11644 = vmatmul.mubr.msk.f32.gmra.mxu1 %vm619_vm0, %v11629_v39  ;;  %v12582_v39 = vpop.eup %12581  ;;  %v5176_v13 = vmul.f32 %v12580_v30, %v14483_v27 }
 0xf8c   : > { %11687 = vmatpush3.msra.mxu1 %v9952_v33  ;;  %v14795_v1 = vpop.xlane.xlu1 %5685  ;;  %11690 = vmatprep.mubr.msk.f32.mxu1 %vm781_vm1, %v5164_v40  ;;  %v5178_v29 = vmul.f32 %v12582_v39, %v14475_v62 }
 0xf8d   : > { %11688 = vmatprep.subr.mxu1 %v9951_v37 }
 0xf8e   : > { %11689 = vmatpush3.msra.mxu1 %v9951_v37  ;;  %v14799_v15 = vpop.xlane.xlu0 %5682 }
 0xf8f   : > { %11691 = vmatmul.mubr.msk.f32.vlgmr.msra.gmra.mxu1 %vm781_vm1, %v5166_v24 }
 0xf90   : > { %v14803_v35 = vpop.xlane.xlu1 %5691  ;;  %11693 = vmatprep.mubr.msk.f32.mxu1 %vm781_vm1, %v5168_v43 }
 0xf92   : > { %v14807_v0 = vpop.xlane.xlu0 %5688 }
 0xf93   : > { %11694 = vmatmul.mubr.msk.f32.gmra.mxu1 %vm781_vm1, %v5170_v44 }
 0xf94   : > { %v14811_v51 = vpop.xlane.xlu1 %5697  ;;  %11696 = vmatprep.mubr.msk.f32.mxu1 %vm781_vm1, %v5172_v47 }
 0xf96   : > { %v14815_v33 = vpop.xlane.xlu0 %5694 }
 0xf97   : > { %11697 = vmatmul.mubr.msk.f32.gmra.mxu1 %vm781_vm1, %v5174_v57 }
 0xf98   : > { %v14819_v59 = vpop.xlane.xlu1 %5703  ;;  %11699 = vmatprep.mubr.msk.f32.mxu1 %vm781_vm1, %v5176_v13  ;;  %v11880_v13 = vpop.f32.mrf.mxu0 }
 0xf9a   : > { %v14823_v17 = vpop.xlane.xlu0 %5700 }
 0xf9b   : > { %11700 = vmatmul.mubr.msk.f32.gmra.mxu1 %vm781_vm1, %v5178_v29 }
 0xf9c   : > { %v6182_v37 = vpop.xlane.xlu1 %6181 }
 0xf9d   : > { %v6202_v45 = vsub.f32 %v14670_v10, %v6182_v37 }
 0xf9e   : > { %v6179_v40 = vpop.xlane.xlu0 %6178 }
 0xf9f   : > { %v6211_v58 = vmul.f32 1.442695, %v6202_v45  ;;  %v6201_v24 = vsub.f32 %v14676_v61, %v6179_v40  ;;  %v6672_v40 = vpop.f32.mrf.mxu0 }
 0xfa0   : > { %v6188_v27 = vpop.xlane.xlu1 %6187 }
 0xfa1   : > { %12583 = vpow2.f32 %v6211_v58  ;;  %v6209_v63 = vmul.f32 1.442695, %v6201_v24  ;;  %v6204_v43 = vsub.f32 %v14684_v48, %v6188_v27  ;;  %v11883_v27 = vpop.f32.mrf.mxu0 }
 0xfa2   : > { %v6185_v60 = vpop.xlane.xlu0 %6184 }
 0xfa3   : > { %12585 = vpow2.f32 %v6209_v63  ;;  %v6215_v44 = vmul.f32 1.442695, %v6204_v43  ;;  %v6203_v62 = vsub.f32 %v14686_v55, %v6185_v60  ;;  %v6682_v60 = vpop.f32.mrf.mxu0 }
 0xfa4   : > { %v6194_v21 = vpop.xlane.xlu1 %6193 }
 0xfa5   : > { %12587 = vpow2.f32 %v6215_v44  ;;  %v6213_v47 = vmul.f32 1.442695, %v6203_v62  ;;  %v6206_v30 = vsub.f32 %v14692_v49, %v6194_v21 }
 0xfa6   : > { %v6191_v10 = vpop.xlane.xlu0 %6190 }
 0xfa7   : > { %12589 = vpow2.f32 %v6213_v47  ;;  %v6219_v57 = vmul.f32 1.442695, %v6206_v30  ;;  %v6205_v61 = vsub.f32 %v14694_v53, %v6191_v10  ;;  %v11886_v30 = vpop.f32.mrf.mxu0 }
 0xfa8   : > { %v6200_v39 = vpop.xlane.xlu1 %6199 }
 0xfa9   : > { %12591 = vpow2.f32 %v6219_v57  ;;  %v6217_v29 = vmul.f32 1.442695, %v6205_v61  ;;  %v6208_v48 = vsub.f32 %v14700_v56, %v6200_v39  ;;  %v14858_v57 = vmul.f32 0.25, %v11880_v13 }
 0xfaa   : > { %v6197_v37 = vpop.xlane.xlu0 %6196  ;;  %v14872_v13 = vmul.f32 0.25, %v11883_v27 }
 0xfab   : > { %12593 = vpow2.f32 %v6217_v29  ;;  %v6223_v45 = vmul.f32 1.442695, %v6208_v48  ;;  %v6207_v55 = vsub.f32 %v14702_v23, %v6197_v37  ;;  %v14864_v29 = vmul.f32 0.25, %v6672_v40  ;;  %v6692_v37 = vpop.f32.mrf.mxu0 }
 0xfad   : > { %12595 = vpow2.f32 %v6223_v45  ;;  %v6221_v58 = vmul.f32 1.442695, %v6207_v55  ;;  %v6722_v55 = vsel %vm781_vm1, %v14858_v57, -inf  ;;  %v11889_v40 = vpop.f32.mrf.mxu0 }
 0xfae   : > { %v14834_v49 = vpop.eup %12583 }
 0xfaf   : > { %12597 = vpow2.f32 %v6221_v58  ;;  %v6228_v53 = vsel %vm781_vm1, %v14834_v49, 0.0  ;;  %v14874_v58 = vmul.f32 0.25, %v6682_v60 }
 0xfb0   : > { %v14838_v24 = vpop.eup %12585  ;;  %6229 = vadd.xlane.f32.xlu1 %v6228_v53  ;;  %v6719_v53 = vsel %vm781_vm1, %v14864_v29, -inf  ;;  %12599 = vrcp.f32 %v14795_v1 }
 0xfb1   : > { %v6225_v56 = vsel %vm781_vm1, %v14838_v24, 0.0  ;;  %v6725_v27 = vsel %vm781_vm1, %v14874_v58, -inf }
 0xfb2   : > { %v14842_v63 = vpop.eup %12587  ;;  %6226 = vadd.xlane.f32.xlu0 %v6225_v56  ;;  %v6728_v56 = vsel %vm781_vm1, %v14872_v13, -inf }
 0xfb3   : > { %v6234_v23 = vsel %vm781_vm1, %v14842_v63, 0.0 }
 0xfb4   : > { %v14846_v43 = vpop.eup %12589  ;;  %6235 = vadd.xlane.f32.xlu1 %v6234_v23  ;;  %v14880_v23 = vmul.f32 0.25, %v11886_v30 }
 0xfb5   : > { %v6231_v44 = vsel %vm781_vm1, %v14846_v43, 0.0 }
 0xfb6   : > { %v14850_v62 = vpop.eup %12591  ;;  %6232 = vadd.xlane.f32.xlu0 %v6231_v44  ;;  %v14882_v44 = vmul.f32 0.25, %v6692_v37  ;;  %v6734_v60 = vsel %vm781_vm1, %v14880_v23, -inf  ;;  %v14897_v37 = vld [vmem:[%s16135_s8 + $0x48] sm:$0xff] }
 0xfb7   : > { %v6240_v21 = vsel %vm781_vm1, %v14850_v62, 0.0  ;;  %11702 = vmatprep.subr.mxu1 %v14897_v37 }
 0xfb8   : > { %v14854_v47 = vpop.eup %12593  ;;  %6241 = vadd.xlane.f32.xlu1 %v6240_v21  ;;  %v6702_v21 = vpop.f32.mrf.mxu0  ;;  %v6731_v30 = vsel %vm781_vm1, %v14882_v44, -inf  ;;  %11703 = vmatpush3.msra.mxu1 %v14897_v37 }
 0xfb9   : > { %v6237_v10 = vsel %vm781_vm1, %v14854_v47, 0.0 }
 0xfba   : > { %v14860_v61 = vpop.eup %12595  ;;  %6238 = vadd.xlane.f32.xlu0 %v6237_v10  ;;  %v14888_v10 = vmul.f32 0.25, %v11889_v40  ;;  %v14913_v40 = vld [vmem:[%s13217_s24 + $0x138] sm:$0xff] }
 0xfbb   : > { %v6246_v39 = vsel %vm781_vm1, %v14860_v61, 0.0 }
 0xfbc   : > { %v14866_v48 = vpop.eup %12597  ;;  %6247 = vadd.xlane.f32.xlu1 %v6246_v39  ;;  %v14890_v39 = vmul.f32 0.25, %v6702_v21  ;;  %v10228_v21 = vld [vmem:[%s13099_s19 + $0x1a8] sm:$0xff] }
 0xfbd   : > { %v6243_v45 = vsel %vm781_vm1, %v14866_v48, 0.0 }
 0xfbe   : > { %6244 = vadd.xlane.f32.xlu0 %v6243_v45  ;;  %v6740_v45 = vsel %vm781_vm1, %v14888_v10, -inf }
 0xfc0   : > { %6723 = vmax.xlane.f32.xlu1 %v6722_v55  ;;  %v6737_v55 = vsel %vm781_vm1, %v14890_v39, -inf }
 0xfc2   : > { %6720 = vmax.xlane.f32.xlu0 %v6719_v53  ;;  %v14908_v53 = vld [vmem:[%s16135_s8 + $0x40] sm:$0xff] }
 0xfc3   : > { %11704 = vmatprep.subr.mxu1 %v14908_v53 }
 0xfc4   : > { %6729 = vmax.xlane.f32.xlu1 %v6728_v56  ;;  %11705 = vmatpush3.msra.mxu1 %v14908_v53  ;;  %v10230_v56 = vld [vmem:[%s13099_s19 + $0x1b8] sm:$0xff] }
 0xfc5   : > { %11746 = vmatprep.subr.mxu1 %v14913_v40  ;;  %12006 = vmatprep.subr.msk.mxu0 %vm619_vm0, %v10230_v56 }
 0xfc6   : > { %6726 = vmax.xlane.f32.xlu0 %v6725_v27  ;;  %v10229_v27 = vld [vmem:[%s13099_s19 + $0x1b0] sm:$0xff]  ;;  %12007 = vmatpush3.xpose.msk.msra.mxu0 %vm619_vm0, %v10230_v56  ;;  %v10224_v56 = vld [vmem:[%s13099_s19 + $0x188] sm:$0xff] }
 0xfc7   : > { %12008 = vmatprep.subr.msk.mxu0 %vm619_vm0, %v10229_v27 }
 0xfc8   : > { %6735 = vmax.xlane.f32.xlu1 %v6734_v60  ;;  %v10227_v60 = vld [vmem:[%s13099_s19 + $0x1a0] sm:$0xff] }
 0xfca   : > { %6732 = vmax.xlane.f32.xlu0 %v6731_v30  ;;  %12009 = vmatpush3.xpose.msk.msra.mxu0 %vm619_vm0, %v10229_v27  ;;  %v10226_v30 = vld [vmem:[%s13099_s19 + $0x198] sm:$0xff]  ;;  %v10223_v27 = vld [vmem:[%s13099_s19 + $0x180] sm:$0xff] }
 0xfcb   : > { %12010 = vmatprep.subr.msk.mxu0 %vm619_vm0, %v10228_v21 }
 0xfcc   : > { %6741 = vmax.xlane.f32.xlu1 %v6740_v45  ;;  %v10215_v45 = vld [vmem:[%s13126_s30 + $0x180] sm:$0xff] }
 0xfcd   : > { %12022 = vmatprep.mubr.msk.f32.mxu0 %vm619_vm0, %v10215_v45  ;;  %v10219_v45 = vld [vmem:[%s13126_s30 + $0x1a0] sm:$0xff] }
 0xfce   : > { %6738 = vmax.xlane.f32.xlu0 %v6737_v55  ;;  %12011 = vmatpush3.xpose.msk.msra.mxu0 %vm619_vm0, %v10228_v21  ;;  %v10225_v55 = vld [vmem:[%s13099_s19 + $0x190] sm:$0xff]  ;;  %v10216_v21 = vld [vmem:[%s13126_s30 + $0x188] sm:$0xff] }
 0xfcf   : > { %12012 = vmatprep.subr.msk.mxu0 %vm619_vm0, %v10227_v60 }
 0xfd2   : > { %12013 = vmatpush3.xpose.msk.msra.mxu0 %vm619_vm0, %v10227_v60  ;;  %v10217_v60 = vld [vmem:[%s13126_s30 + $0x190] sm:$0xff] }
 0xfd3   : > { %12014 = vmatprep.subr.msk.mxu0 %vm619_vm0, %v10226_v30 }
 0xfd6   : > { %12015 = vmatpush3.xpose.msk.msra.mxu0 %vm619_vm0, %v10226_v30  ;;  %v10218_v30 = vld [vmem:[%s13126_s30 + $0x198] sm:$0xff] }
 0xfd7   : > { %12016 = vmatprep.subr.msk.mxu0 %vm619_vm0, %v10225_v55 }
 0xfda   : > { %12017 = vmatpush3.xpose.msk.msra.mxu0 %vm619_vm0, %v10225_v55  ;;  %v10220_v55 = vld [vmem:[%s13126_s30 + $0x1a8] sm:$0xff] }
 0xfdb   : > { %12018 = vmatprep.subr.msk.mxu0 %vm619_vm0, %v10224_v56 }
 0xfde   : > { %12019 = vmatpush3.xpose.msk.msra.mxu0 %vm619_vm0, %v10224_v56  ;;  %v10222_v56 = vld [vmem:[%s13126_s30 + $0x1b8] sm:$0xff] }
 0xfdf   : > { %12020 = vmatprep.subr.msk.mxu0 %vm619_vm0, %v10223_v27 }
 0xfe2   : > { %12021 = vmatpush3.xpose.msk.msra.mxu0 %vm619_vm0, %v10223_v27 }
 0xfe5   : > { %12023 = vmatmul.mubr.msk.f32.vlgmr.msra.gmra.mxu0 %vm619_vm0, %v10216_v21 }
 0xfe6   : > { %12025 = vmatprep.mubr.msk.f32.mxu0 %vm619_vm0, %v10217_v60 }
 0xfe9   : > { %12026 = vmatmul.mubr.msk.f32.gmra.mxu0 %vm619_vm0, %v10218_v30 }
 0xfea   : > { %12028 = vmatprep.mubr.msk.f32.mxu0 %vm619_vm0, %v10219_v45 }
 0xfed   : > { %12029 = vmatmul.mubr.msk.f32.gmra.mxu0 %vm619_vm0, %v10220_v55 }
 0xfee   : > { %12031 = vmatprep.mubr.msk.f32.mxu0 %vm619_vm0, %v10221_v19 }
 0xff1   : > { %12032 = vmatmul.mubr.msk.f32.gmra.mxu0 %vm619_vm0, %v10222_v56 }
0x1039   : > { %v14956_v27 = vpop.xlane.xlu1 %6229 }
0x103b   : > { %v14958_v21 = vpop.xlane.xlu0 %6226 }
0x103d   : > { %v14960_v60 = vpop.xlane.xlu1 %6235 }
0x103f   : > { %v11636_v34 = vpop.f32.mrf.mxu1  ;;  %v14962_v32 = vpop.xlane.xlu0 %6232 }
0x1040   : > { %v14965_v30 = vadd.f32 %v11636_v34, %v14552_v25 }
0x1041   : > { %v14967_v45 = vpop.xlane.xlu1 %6241  ;;  %v14969_v55 = vpop.f32.mrf.mxu1 }
0x1042   : > { %16183 = vst [vmem:[#allocation30_spill] sm:$0xff] %v14965_v30  ;;  %16184 = vst [vmem:[#allocation31_spill] sm:$0xff] %v14969_v55 }
0x1043   : > { %v11639_v19 = vpop.f32.mrf.mxu1  ;;  %v14971_v18 = vpop.xlane.xlu0 %6238 }
0x1044   : > { %v14974_v56 = vadd.f32 %v11639_v19, %v14558_v6 }
0x1045   : > { %v14976_v22 = vpop.xlane.xlu1 %6247  ;;  %v14978_v36 = vpop.f32.mrf.mxu1 }
0x1046   : > { %16185 = vst [vmem:[#allocation32_spill] sm:$0xff] %v14974_v56  ;;  %16186 = vst [vmem:[#allocation33_spill] sm:$0xff] %v14978_v36 }
0x1047   : > { %v11642_v28 = vpop.f32.mrf.mxu1  ;;  %v14980_v20 = vpop.xlane.xlu0 %6244 }
0x1048   : > { %v14983_v25 = vadd.f32 %v11642_v28, %v14564_v11 }
0x1049   : > { %v6724_v34 = vpop.xlane.xlu1 %6723  ;;  %v14985_v41 = vpop.f32.mrf.mxu1 }
0x104a   : > { %v6744_v30 = vsub.f32 %v14858_v57, %v6724_v34 }
0x104b   : > { %v11645_v55 = vpop.f32.mrf.mxu1  ;;  %v6721_v52 = vpop.xlane.xlu0 %6720 }
0x104c   : > { %v6753_v42 = vmul.f32 1.442695, %v6744_v30  ;;  %v14989_v6 = vadd.f32 %v11645_v55, %v14570_v7  ;;  %v6743_v19 = vsub.f32 %v14864_v29, %v6721_v52 }
0x104d   : > { %v6730_v56 = vpop.xlane.xlu1 %6729  ;;  %v14993_v36 = vpop.f32.mrf.mxu1 }
0x104e   : > { %12601 = vpow2.f32 %v6753_v42  ;;  %v6751_v11 = vmul.f32 1.442695, %v6743_v19  ;;  %v6746_v28 = vsub.f32 %v14872_v13, %v6730_v56  ;;  %v10013_v13 = vld [vmem:[%s13217_s24 + $0x130] sm:$0xff]  ;;  %v10012_v56 = vld [vmem:[%s13217_s24 + $0x128] sm:$0xff] }
0x104f   : > { %12603 = vrcp.f32 %v14799_v15  ;;  %v11692_v57 = vpop.f32.mrf.mxu1  ;;  %v6727_v34 = vpop.xlane.xlu0 %6726 }
0x1050   : > { %12605 = vpow2.f32 %v6751_v11  ;;  %v6757_v30 = vmul.f32 1.442695, %v6746_v28  ;;  %v6745_v7 = vsub.f32 %v14874_v58, %v6727_v34  ;;  %v10011_v28 = vld [vmem:[%s13217_s24 + $0x120] sm:$0xff] }
0x1051   : > { %12607 = vrcp.f32 %v14807_v0  ;;  %v6736_v52 = vpop.xlane.xlu1 %6735  ;;  %v5269_v1 = vpop.f32.mrf.mxu1 }
0x1052   : > { %12609 = vpow2.f32 %v6757_v30  ;;  %v6755_v29 = vmul.f32 1.442695, %v6745_v7  ;;  %v6748_v42 = vsub.f32 %v14880_v23, %v6736_v52  ;;  %11706 = vmatprep.mubr.msk.f32.mxu1 %vm619_vm0, %v5269_v1  ;;  %v12600_v7 = vpop.eup %12599  ;;  %v10009_v52 = vld [vmem:[%s13217_s24 + $0x110] sm:$0xff] }
0x1053   : > { %12611 = vrcp.f32 %v14803_v35  ;;  %v11695_v15 = vpop.f32.mrf.mxu1  ;;  %11707 = vmatmul.mubr.msk.f32.vlgmr.msra.gmra.mxu1 %vm619_vm0, %v11692_v57  ;;  %v6733_v55 = vpop.xlane.xlu0 %6732 }
0x1054   : > { %12613 = vpow2.f32 %v6755_v29  ;;  %v6761_v58 = vmul.f32 1.442695, %v6748_v42  ;;  %11747 = vmatpush3.msra.mxu1 %v14913_v40  ;;  %v6747_v0 = vsub.f32 %v14882_v44, %v6733_v55  ;;  %v15011_v57 = vpop.f32.mrf.mxu0 }
0x1055   : > { %12615 = vrcp.f32 %v14815_v33  ;;  %11748 = vmatprep.subr.mxu1 %v10013_v13  ;;  %v6742_v23 = vpop.xlane.xlu1 %6741  ;;  %v5279_v19 = vpop.f32.mrf.mxu1 }
0x1056   : > { %12617 = vpow2.f32 %v6761_v58  ;;  %v6759_v35 = vmul.f32 1.442695, %v6747_v0  ;;  %v6750_v11 = vsub.f32 %v14888_v10, %v6742_v23  ;;  %11749 = vmatpush3.msra.mxu1 %v10013_v13  ;;  %11709 = vmatprep.mubr.msk.f32.mxu1 %vm619_vm0, %v5279_v19  ;;  %v10010_v10 = vld [vmem:[%s13217_s24 + $0x118] sm:$0xff]  ;;  %v15020_v1 = vpop.f32.mrf.mxu0  ;;  %v10008_v13 = vld [vmem:[%s13217_s24 + $0x108] sm:$0xff] }
0x1057   : > { %12619 = vrcp.f32 %v14811_v51  ;;  %11750 = vmatprep.subr.mxu1 %v10012_v56  ;;  %v11698_v44 = vpop.f32.mrf.mxu1  ;;  %11710 = vmatmul.mubr.msk.f32.gmra.mxu1 %vm619_vm0, %v11695_v15  ;;  %v6739_v33 = vpop.xlane.xlu0 %6738 }
0x1058   : > { %12621 = vpow2.f32 %v6759_v35  ;;  %v6765_v40 = vmul.f32 1.442695, %v6750_v11  ;;  %11751 = vmatpush3.msra.mxu1 %v10012_v56  ;;  %v6749_v34 = vsub.f32 %v14890_v39, %v6739_v33  ;;  %v10007_v56 = vld [vmem:[%s13217_s24 + $0x100] sm:$0xff]  ;;  %v11955_v23 = vpop.f32.mrf.mxu0 }
0x1059   : > { %12623 = vrcp.f32 %v14823_v17  ;;  %11752 = vmatprep.subr.mxu1 %v10011_v28  ;;  %v5289_v30 = vpop.f32.mrf.mxu1 }
0x105a   : > { %12625 = vpow2.f32 %v6765_v40  ;;  %v6763_v51 = vmul.f32 1.442695, %v6749_v34  ;;  %11753 = vmatpush3.msra.mxu1 %v10011_v28  ;;  %11712 = vmatprep.mubr.msk.f32.mxu1 %vm619_vm0, %v5289_v30  ;;  %v7226_v34 = vpop.f32.mrf.mxu0 }
0x105b   : > { %v15022_v29 = vpop.eup %12601  ;;  %11754 = vmatprep.subr.mxu1 %v10010_v10  ;;  %v11701_v42 = vpop.f32.mrf.mxu1  ;;  %11713 = vmatmul.mubr.msk.f32.gmra.mxu1 %vm619_vm0, %v11698_v44  ;;  %v5708_v44 = vmul.f32 %v12600_v7, %v14646_v4 }
0x105c   : > { %v12604_v17 = vpop.eup %12603  ;;  %12627 = vpow2.f32 %v6763_v51  ;;  %11755 = vmatpush3.msra.mxu1 %v10010_v10  ;;  %v6770_v39 = vsel %vm781_vm1, %v15022_v29, 0.0 }
0x105d   : > { %v15028_v15 = vpop.eup %12605  ;;  %12629 = vrcp.f32 %v14819_v59  ;;  %11756 = vmatprep.subr.mxu1 %v10009_v52  ;;  %6771 = vadd.xlane.f32.xlu1 %v6770_v39  ;;  %v5299_v55 = vpop.f32.mrf.mxu1  ;;  %v5706_v35 = vmul.f32 %v12604_v17, %v14650_v16 }
0x105e   : > { %v12608_v58 = vpop.eup %12607  ;;  %11757 = vmatpush3.msra.mxu1 %v10009_v52  ;;  %11715 = vmatprep.mubr.msk.f32.mxu1 %vm619_vm0, %v5299_v55  ;;  %v6767_v0 = vsel %vm781_vm1, %v15028_v15, 0.0  ;;  %v11958_v17 = vpop.f32.mrf.mxu0  ;;  %v15076_v55 = vmul.f32 0.25, %v15020_v1  ;;  %v15089_v1 = vmul.f32 0.25, %v7226_v34 }
0x105f   : > { %v15035_v19 = vpop.eup %12609  ;;  %11758 = vmatprep.subr.mxu1 %v10008_v13  ;;  %11716 = vmatmul.mubr.msk.f32.gmra.mxu1 %vm619_vm0, %v11701_v42  ;;  %v5710_v16 = vmul.f32 %v12608_v58, %v14658_v3 }
0x1060   : > { %v12612_v59 = vpop.eup %12611  ;;  %11759 = vmatpush3.msra.mxu1 %v10008_v13  ;;  %6768 = vadd.xlane.f32.xlu0 %v6767_v0  ;;  %v6776_v11 = vsel %vm781_vm1, %v15035_v19, 0.0  ;;  %v15067_v13 = vmul.f32 0.25, %v15011_v57 }
0x1061   : > { %v15041_v28 = vpop.eup %12613  ;;  %11760 = vmatprep.subr.mxu1 %v10007_v56  ;;  %11762 = vmatprep.mubr.msk.f32.mxu1 %vm781_vm1, %v5706_v35  ;;  %v5712_v51 = vmul.f32 %v12612_v59, %v14654_v5  ;;  %v15083_v35 = vmul.f32 0.25, %v11955_v23  ;;  %v7263_v59 = vsel %vm781_vm1, %v15076_v55, -inf }
0x1062   : > { %v12616_v33 = vpop.eup %12615  ;;  %6777 = vadd.xlane.f32.xlu1 %v6776_v11  ;;  %11761 = vmatpush3.msra.mxu1 %v10007_v56  ;;  %v6773_v40 = vsel %vm781_vm1, %v15041_v28, 0.0  ;;  %v7236_v56 = vpop.f32.mrf.mxu0  ;;  %v15094_v11 = vmul.f32 0.25, %v11958_v17  ;;  %v10271_v17 = vld [vmem:[%s12999_s20 + $0x1c0] sm:$0xff] }
0x1063   : > { %v15048_v10 = vpop.eup %12617  ;;  %11763 = vmatmul.mubr.msk.f32.vlgmr.msra.gmra.mxu1 %vm781_vm1, %v5708_v44  ;;  %11774 = vmatprep.subr.mxu1 %v14897_v37  ;;  %v5714_v42 = vmul.f32 %v12616_v33, %v14666_v26  ;;  %v7272_v23 = vsel %vm781_vm1, %v15083_v35, -inf  ;;  %v15098_v44 = vmul.f32 0.25, %v7236_v56  ;;  %v10279_v56 = vld [vmem:[%s12993_s11 + $0x1c0] sm:$0xff] }
0x1064   : > { %v12620_v30 = vpop.eup %12619  ;;  %6774 = vadd.xlane.f32.xlu0 %v6773_v40  ;;  %11765 = vmatprep.mubr.msk.f32.mxu1 %vm781_vm1, %v5710_v16  ;;  %v6782_v4 = vsel %vm781_vm1, %v15048_v10, 0.0  ;;  %v7278_v16 = vsel %vm781_vm1, %v15094_v11, -inf }
0x1065   : > { %v15055_v7 = vpop.eup %12621  ;;  %11775 = vmatpush3.msra.mxu1 %v14897_v37  ;;  %v5716_v26 = vmul.f32 %v12620_v30, %v14662_v14  ;;  %v7266_v14 = vsel %vm781_vm1, %v15067_v13, -inf  ;;  %v7275_v30 = vsel %vm781_vm1, %v15098_v44, -inf  ;;  %12094 = vmatprep.mubr.msk.f32.mxu0 %vm619_vm0, %v10271_v17 }
0x1066   : > { %v12624_v3 = vpop.eup %12623  ;;  %6783 = vadd.xlane.f32.xlu1 %v6782_v4  ;;  %v6779_v52 = vsel %vm781_vm1, %v15055_v7, 0.0  ;;  %11776 = vmatprep.subr.mxu1 %v14908_v53 }
0x1067   : > { %v15063_v39 = vpop.eup %12625  ;;  %11766 = vmatmul.mubr.msk.f32.gmra.mxu1 %vm781_vm1, %v5712_v51  ;;  %v5718_v0 = vmul.f32 %v12624_v3, %v14678_v54  ;;  %v11961_v54 = vpop.f32.mrf.mxu0  ;;  %v15115_v3 = vld [vmem:[%s13075_s29 + $0x178] sm:$0xff] }
0x1068   : > { %16187 = vst [vmem:[#allocation34_spill] sm:$0xff] %v15063_v39  ;;  %6780 = vadd.xlane.f32.xlu0 %v6779_v52  ;;  %11768 = vmatprep.mubr.msk.f32.mxu1 %vm781_vm1, %v5714_v42  ;;  %v6788_v5 = vsel %vm781_vm1, %v15063_v39, 0.0  ;;  %v15102_v40 = vmul.f32 0.25, %v11961_v54  ;;  %v10286_v52 = vld [vmem:[%s12993_s11 + $0x1f8] sm:$0xff]  ;;  %v10285_v42 = vld [vmem:[%s12993_s11 + $0x1f0] sm:$0xff] }
0x1069   : > { %v15072_v37 = vpop.eup %12627  ;;  %11777 = vmatpush3.msra.mxu1 %v14908_v53  ;;  %v7246_v33 = vpop.f32.mrf.mxu0  ;;  %12078 = vmatprep.subr.msk.mxu0 %vm619_vm0, %v10286_v52 }
0x106a   : > { %16188 = vst [vmem:[#allocation35_spill] sm:$0xff] %v15072_v37  ;;  %v12630_v58 = vpop.eup %12629  ;;  %6789 = vadd.xlane.f32.xlu1 %v6788_v5  ;;  %v6785_v57 = vsel %vm781_vm1, %v15072_v37, 0.0  ;;  %v15106_v34 = vmul.f32 0.25, %v7246_v33  ;;  %v7284_v4 = vsel %vm781_vm1, %v15102_v40, -inf  ;;  %11818 = vmatprep.subr.mxu1 %v15115_v3  ;;  %v10284_v5 = vld [vmem:[%s12993_s11 + $0x1e8] sm:$0xff] }
0x106b   : > { %11769 = vmatmul.mubr.msk.f32.gmra.mxu1 %vm781_vm1, %v5716_v26  ;;  %v5720_v53 = vmul.f32 %v12630_v58, %v14672_v31  ;;  %v7269_v31 = vsel %vm781_vm1, %v15089_v1, -inf  ;;  %12079 = vmatpush3.xpose.msk.msra.mxu0 %vm619_vm0, %v10286_v52  ;;  %v10283_v26 = vld [vmem:[%s12993_s11 + $0x1e0] sm:$0xff]  ;;  %v10282_v58 = vld [vmem:[%s12993_s11 + $0x1d8] sm:$0xff]  ;;  %v10276_v33 = vld [vmem:[%s12999_s20 + $0x1e8] sm:$0xff] }
0x106c   : > { %6786 = vadd.xlane.f32.xlu0 %v6785_v57  ;;  %11771 = vmatprep.mubr.msk.f32.mxu1 %vm781_vm1, %v5718_v0  ;;  %v7281_v51 = vsel %vm781_vm1, %v15106_v34, -inf  ;;  %v10281_v57 = vld [vmem:[%s12993_s11 + $0x1d0] sm:$0xff]  ;;  %v10280_v0 = vld [vmem:[%s12993_s11 + $0x1c8] sm:$0xff]  ;;  %s12869_s11 = smov [#allocation2]  }
0x106d   : > { %12080 = vmatprep.subr.msk.mxu0 %vm619_vm0, %v10285_v42 }
0x106e   : > { %7267 = vmax.xlane.f32.xlu1 %v7266_v14  ;;  %v10272_v14 = vld [vmem:[%s12999_s20 + $0x1c8] sm:$0xff] }
0x106f   : > { %11772 = vmatmul.mubr.msk.f32.gmra.mxu1 %vm781_vm1, %v5720_v53  ;;  %12081 = vmatpush3.xpose.msk.msra.mxu0 %vm619_vm0, %v10285_v42  ;;  %v10273_v53 = vld [vmem:[%s12999_s20 + $0x1d0] sm:$0xff] }
0x1070   : > { %7264 = vmax.xlane.f32.xlu0 %v7263_v59  ;;  %12082 = vmatprep.subr.msk.mxu0 %vm619_vm0, %v10284_v5  ;;  %v10274_v59 = vld [vmem:[%s12999_s20 + $0x1d8] sm:$0xff] }
0x1072   : > { %7273 = vmax.xlane.f32.xlu1 %v7272_v23  ;;  %v10275_v23 = vld [vmem:[%s12999_s20 + $0x1e0] sm:$0xff] }
0x1073   : > { %12083 = vmatpush3.xpose.msk.msra.mxu0 %vm619_vm0, %v10284_v5 }
0x1074   : > { %7270 = vmax.xlane.f32.xlu0 %v7269_v31  ;;  %12084 = vmatprep.subr.msk.mxu0 %vm619_vm0, %v10283_v26 }
0x1076   : > { %7279 = vmax.xlane.f32.xlu1 %v7278_v16  ;;  %v10277_v16 = vld [vmem:[%s12999_s20 + $0x1f0] sm:$0xff] }
0x1077   : > { %12085 = vmatpush3.xpose.msk.msra.mxu0 %vm619_vm0, %v10283_v26 }
0x1078   : > { %7276 = vmax.xlane.f32.xlu0 %v7275_v30  ;;  %12086 = vmatprep.subr.msk.mxu0 %vm619_vm0, %v10282_v58 }
0x107a   : > { %7285 = vmax.xlane.f32.xlu1 %v7284_v4 }
0x107b   : > { %12087 = vmatpush3.xpose.msk.msra.mxu0 %vm619_vm0, %v10282_v58 }
0x107c   : > { %7282 = vmax.xlane.f32.xlu0 %v7281_v51  ;;  %12088 = vmatprep.subr.msk.mxu0 %vm619_vm0, %v10281_v57  ;;  %v10278_v51 = vld [vmem:[%s12999_s20 + $0x1f8] sm:$0xff] }
0x107f   : > { %12089 = vmatpush3.xpose.msk.msra.mxu0 %vm619_vm0, %v10281_v57 }
0x1080   : > { %12090 = vmatprep.subr.msk.mxu0 %vm619_vm0, %v10280_v0 }
0x1083   : > { %12091 = vmatpush3.xpose.msk.msra.mxu0 %vm619_vm0, %v10280_v0 }
0x1084   : > { %12092 = vmatprep.subr.msk.mxu0 %vm619_vm0, %v10279_v56 }
0x1087   : > { %12093 = vmatpush3.xpose.msk.msra.mxu0 %vm619_vm0, %v10279_v56 }
0x108a   : > { %12095 = vmatmul.mubr.msk.f32.vlgmr.msra.gmra.mxu0 %vm619_vm0, %v10272_v14 }
0x108b   : > { %12097 = vmatprep.mubr.msk.f32.mxu0 %vm619_vm0, %v10273_v53 }
0x108e   : > { %12098 = vmatmul.mubr.msk.f32.gmra.mxu0 %vm619_vm0, %v10274_v59 }
0x108f   : > { %12100 = vmatprep.mubr.msk.f32.mxu0 %vm619_vm0, %v10275_v23 }
0x1092   : > { %12101 = vmatmul.mubr.msk.f32.gmra.mxu0 %vm619_vm0, %v10276_v33 }
0x1093   : > { %12103 = vmatprep.mubr.msk.f32.mxu0 %vm619_vm0, %v10277_v16 }
0x1096   : > { %12104 = vmatmul.mubr.msk.f32.gmra.mxu0 %vm619_vm0, %v10278_v51 }
0x10e6   : > { %v15149_v54 = vpop.xlane.xlu1 %6771 }
0x10e9   : > { %v15153_v31 = vpop.xlane.xlu0 %6768 }
0x10eb   : > { %v15158_v30 = vpop.xlane.xlu1 %6777 }
0x10ed   : > { %v15161_v4 = vpop.xlane.xlu0 %6774 }
0x10ef   : > { %v15165_v52 = vpop.xlane.xlu1 %6783 }
0x10f1   : > { %v15168_v42 = vpop.xlane.xlu0 %6780 }
0x10f3   : > { %v15170_v17 = vpop.xlane.xlu1 %6789 }
0x10f5   : > { %v15172_v5 = vpop.xlane.xlu0 %6786 }
0x10f7   : > { %v7268_v26 = vpop.xlane.xlu1 %7267 }
0x10f8   : > { %v7288_v58 = vsub.f32 %v15067_v13, %v7268_v26 }
0x10f9   : > { %v7265_v57 = vpop.xlane.xlu0 %7264 }
0x10fa   : > { %v7297_v0 = vmul.f32 1.442695, %v7288_v58  ;;  %v7287_v56 = vsub.f32 %v15076_v55, %v7265_v57  ;;  %v12024_v57 = vpop.f32.mrf.mxu0 }
0x10fb   : > { %v7274_v14 = vpop.xlane.xlu1 %7273 }
0x10fc   : > { %12631 = vpow2.f32 %v7297_v0  ;;  %v7295_v53 = vmul.f32 1.442695, %v7287_v56  ;;  %v7290_v59 = vsub.f32 %v15083_v35, %v7274_v14 }
0x10fd   : > { %v7271_v23 = vpop.xlane.xlu0 %7270 }
0x10fe   : > { %12633 = vpow2.f32 %v7295_v53  ;;  %v7301_v33 = vmul.f32 1.442695, %v7290_v59  ;;  %v7289_v16 = vsub.f32 %v15089_v1, %v7271_v23  ;;  %v7758_v53 = vpop.f32.mrf.mxu0 }
0x10ff   : > { %v7280_v51 = vpop.xlane.xlu1 %7279 }
0x1100   : > { %12635 = vpow2.f32 %v7301_v33  ;;  %v7299_v39 = vmul.f32 1.442695, %v7289_v16  ;;  %v7292_v37 = vsub.f32 %v15094_v11, %v7280_v51 }
0x1101   : > { %v7277_v13 = vpop.xlane.xlu0 %7276 }
0x1102   : > { %12637 = vpow2.f32 %v7299_v39  ;;  %v7305_v26 = vmul.f32 1.442695, %v7292_v37  ;;  %v7291_v55 = vsub.f32 %v15098_v44, %v7277_v13  ;;  %v12027_v44 = vpop.f32.mrf.mxu0 }
0x1103   : > { %v7286_v58 = vpop.xlane.xlu1 %7285 }
0x1104   : > { %12639 = vpow2.f32 %v7305_v26  ;;  %v7303_v0 = vmul.f32 1.442695, %v7291_v55  ;;  %v7294_v35 = vsub.f32 %v15102_v40, %v7286_v58  ;;  %v7768_v16 = vpop.f32.mrf.mxu0 }
0x1105   : > { %v7283_v56 = vpop.xlane.xlu0 %7282 }
0x1106   : > { %12641 = vpow2.f32 %v7303_v0  ;;  %v7309_v14 = vmul.f32 1.442695, %v7294_v35  ;;  %v7293_v1 = vsub.f32 %v15106_v34, %v7283_v56  ;;  %v12030_v0 = vpop.f32.mrf.mxu0 }
0x1108   : > { %12643 = vpow2.f32 %v7309_v14  ;;  %v7307_v59 = vmul.f32 1.442695, %v7293_v1  ;;  %v15209_v14 = vmul.f32 0.25, %v12024_v57 }
0x1109   : > { %v15182_v11 = vpop.eup %12631 }
0x110a   : > { %12645 = vpow2.f32 %v7307_v59  ;;  %v7314_v39 = vsel %vm781_vm1, %v15182_v11, 0.0 }
0x110b   : > { %v15186_v37 = vpop.eup %12633  ;;  %7315 = vadd.xlane.f32.xlu1 %v7314_v39  ;;  %12647 = vrcp.f32 %v14958_v21  ;;  %v10069_v21 = vld [vmem:[%s13075_s29 + $0x170] sm:$0xff] }
0x110c   : > { %v7311_v40 = vsel %vm781_vm1, %v15186_v37, 0.0  ;;  %12649 = vrcp.f32 %v14956_v27 }
0x110d   : > { %v15190_v23 = vpop.eup %12635  ;;  %7312 = vadd.xlane.f32.xlu0 %v7311_v40  ;;  %v15217_v40 = vmul.f32 0.25, %v7758_v53  ;;  %v15232_v53 = vmul.f32 0.25, %v7768_v16  ;;  %12651 = vrcp.f32 %v14962_v32  ;;  %v10067_v32 = vld [vmem:[%s13075_s29 + $0x160] sm:$0xff] }
0x110e   : > { %16189 = vst [vmem:[#allocation36_spill] sm:$0xff] %v15190_v23  ;;  %v7320_v34 = vsel %vm781_vm1, %v15190_v23, 0.0  ;;  %12653 = vrcp.f32 %v14960_v60  ;;  %v16214_v23 = vld [vmem:[#allocation17_spill] sm:$0xff] }
0x110f   : > { %v15194_v33 = vpop.eup %12637  ;;  %7321 = vadd.xlane.f32.xlu1 %v7320_v34  ;;  %v7811_v16 = vsel %vm781_vm1, %v15232_v53, -inf  ;;  %12655 = vrcp.f32 %v14971_v18  ;;  %v10065_v18 = vld [vmem:[%s13075_s29 + $0x150] sm:$0xff] }
0x1110   : > { %16190 = vst [vmem:[#allocation37_spill] sm:$0xff] %v15194_v33  ;;  %v7317_v51 = vsel %vm781_vm1, %v15194_v33, 0.0  ;;  %12657 = vrcp.f32 %v14967_v45 }
0x1111   : > { %v15198_v13 = vpop.eup %12639  ;;  %7318 = vadd.xlane.f32.xlu0 %v7317_v51  ;;  %12659 = vrcp.f32 %v14980_v20  ;;  %v10063_v20 = vld [vmem:[%s13075_s29 + $0x140] sm:$0xff] }
0x1112   : > { %16191 = vst [vmem:[#allocation38_spill] sm:$0xff] %v15198_v13  ;;  %v7326_v26 = vsel %vm781_vm1, %v15198_v13, 0.0  ;;  %12661 = vrcp.f32 %v14976_v22 }
0x1113   : > { %v15202_v55 = vpop.eup %12641  ;;  %v11708_v58 = vpop.f32.mrf.mxu1  ;;  %7327 = vadd.xlane.f32.xlu1 %v7326_v26 }
0x1114   : > { %16192 = vst [vmem:[#allocation39_spill] sm:$0xff] %v15202_v55  ;;  %v15205_v35 = vadd.f32 %v11708_v58, %v14751_v38  ;;  %v7323_v56 = vsel %vm781_vm1, %v15202_v55, 0.0  ;;  %v7778_v38 = vpop.f32.mrf.mxu0  ;;  %v15226_v58 = vmul.f32 0.25, %v12027_v44 }
0x1115   : > { %v15211_v1 = vpop.eup %12643  ;;  %v15213_v59 = vpop.f32.mrf.mxu1  ;;  %7324 = vadd.xlane.f32.xlu0 %v7323_v56  ;;  %v7808_v56 = vsel %vm781_vm1, %v15209_v14, -inf }
0x1116   : > { %16193 = vst [vmem:[#allocation40_spill] sm:$0xff] %v15211_v1  ;;  %16194 = vst [vmem:[#allocation41_spill] sm:$0xff] %v15213_v59  ;;  %v7332_v39 = vsel %vm781_vm1, %v15211_v1, 0.0  ;;  %v7814_v44 = vsel %vm781_vm1, %v15226_v58, -inf }
0x1117   : > { %v15219_v34 = vpop.eup %12645  ;;  %v11711_v51 = vpop.f32.mrf.mxu1  ;;  %7333 = vadd.xlane.f32.xlu1 %v7332_v39  ;;  %v7805_v39 = vsel %vm781_vm1, %v15217_v40, -inf }
0x1118   : > { %16195 = vst [vmem:[#allocation42_spill] sm:$0xff] %v15219_v34  ;;  %v15222_v26 = vadd.f32 %v11711_v51, %v14756_v2  ;;  %v7329_v57 = vsel %vm781_vm1, %v15219_v34, 0.0  ;;  %v12033_v2 = vpop.f32.mrf.mxu0  ;;  %v15239_v34 = vmul.f32 0.25, %v12030_v0 }
0x1119   : > { %v15230_v59 = vpop.f32.mrf.mxu1  ;;  %7330 = vadd.xlane.f32.xlu0 %v7329_v57  ;;  %v15245_v57 = vmul.f32 0.25, %v7778_v38 }
0x111a   : > { %16196 = vst [vmem:[#allocation43_spill] sm:$0xff] %v15230_v59  ;;  %v7820_v0 = vsel %vm781_vm1, %v15239_v34, -inf }
0x111b   : > { %v11714_v1 = vpop.f32.mrf.mxu1  ;;  %7809 = vmax.xlane.f32.xlu1 %v7808_v56  ;;  %v7788_v56 = vpop.f32.mrf.mxu0 }
0x111c   : > { %v15237_v51 = vadd.f32 %v11714_v1, %v14761_v46  ;;  %v15252_v46 = vmul.f32 0.25, %v12033_v2  ;;  %v15259_v38 = vmul.f32 0.25, %v7788_v56  ;;  %v10068_v56 = vld [vmem:[%s13075_s29 + $0x168] sm:$0xff] }
0x111d   : > { %v15243_v13 = vpop.f32.mrf.mxu1  ;;  %7806 = vmax.xlane.f32.xlu0 %v7805_v39  ;;  %v7817_v39 = vsel %vm781_vm1, %v15245_v57, -inf }
0x111e   : > { %16197 = vst [vmem:[#allocation44_spill] sm:$0xff] %v15243_v13  ;;  %v7823_v2 = vsel %vm781_vm1, %v15259_v38, -inf }
0x111f   : > { %v11717_v59 = vpop.f32.mrf.mxu1  ;;  %7815 = vmax.xlane.f32.xlu1 %v7814_v44 }
0x1120   : > { %v15250_v55 = vadd.f32 %v11717_v59, %v14766_v50  ;;  %v7826_v50 = vsel %vm781_vm1, %v15252_v46, -inf }
0x1121   : > { %v15256_v1 = vpop.f32.mrf.mxu1  ;;  %7812 = vmax.xlane.f32.xlu0 %v7811_v16 }
0x1122   : > { %16198 = vst [vmem:[#allocation45_spill] sm:$0xff] %v15256_v1 }
0x1123   : > { %v11764_v44 = vpop.f32.mrf.mxu1  ;;  %7821 = vmax.xlane.f32.xlu1 %v7820_v0 }
0x1125   : > { %v5811_v59 = vpop.f32.mrf.mxu1  ;;  %7818 = vmax.xlane.f32.xlu0 %v7817_v39  ;;  %v12648_v39 = vpop.eup %12647 }
0x1126   : > { %11778 = vmatprep.mubr.msk.f32.mxu1 %vm619_vm0, %v5811_v59  ;;  %v12650_v59 = vpop.eup %12649 }
0x1127   : > { %v11767_v16 = vpop.f32.mrf.mxu1  ;;  %11779 = vmatmul.mubr.msk.f32.vlgmr.msra.gmra.mxu1 %vm619_vm0, %v11764_v44  ;;  %7827 = vmax.xlane.f32.xlu1 %v7826_v50  ;;  %v10064_v50 = vld [vmem:[%s13075_s29 + $0x148] sm:$0xff] }
0x1128   : > { %11819 = vmatpush3.msra.mxu1 %v15115_v3  ;;  %v10066_v3 = vld [vmem:[%s13075_s29 + $0x158] sm:$0xff] }
0x1129   : > { %11820 = vmatprep.subr.mxu1 %v10069_v21  ;;  %v5821_v27 = vpop.f32.mrf.mxu1  ;;  %7824 = vmax.xlane.f32.xlu0 %v7823_v2  ;;  %v12652_v2 = vpop.eup %12651 }
0x112a   : > { %11821 = vmatpush3.msra.mxu1 %v10069_v21  ;;  %11781 = vmatprep.mubr.msk.f32.mxu1 %vm619_vm0, %v5821_v27  ;;  %v6250_v21 = vmul.f32 %v12648_v39, %v14838_v24  ;;  %v12654_v22 = vpop.eup %12653  ;;  %v10342_v39 = vld [vmem:[%s13099_s19 + $0x1f8] sm:$0xff] }
0x112b   : > { %11822 = vmatprep.subr.mxu1 %v10068_v56  ;;  %v11770_v0 = vpop.f32.mrf.mxu1  ;;  %11782 = vmatmul.mubr.msk.f32.gmra.mxu1 %vm619_vm0, %v11767_v16  ;;  %v6252_v16 = vmul.f32 %v12650_v59, %v14834_v49  ;;  %v12656_v27 = vpop.eup %12655  ;;  %v6256_v24 = vmul.f32 %v12654_v22, %v14842_v63 }
0x112c   : > { %11823 = vmatpush3.msra.mxu1 %v10068_v56  ;;  %v6254_v56 = vmul.f32 %v12652_v2, %v14846_v43  ;;  %12150 = vmatprep.subr.msk.mxu0 %vm619_vm0, %v10342_v39 }
0x112d   : > { %11824 = vmatprep.subr.mxu1 %v10067_v32  ;;  %v5831_v60 = vpop.f32.mrf.mxu1  ;;  %12151 = vmatpush3.xpose.msk.msra.mxu0 %vm619_vm0, %v10342_v39 }
0x112e   : > { %11825 = vmatpush3.msra.mxu1 %v10067_v32  ;;  %11784 = vmatprep.mubr.msk.f32.mxu1 %vm619_vm0, %v5831_v60  ;;  %v12658_v32 = vpop.eup %12657 }
0x112f   : > { %11826 = vmatprep.subr.mxu1 %v10066_v3  ;;  %v11773_v44 = vpop.f32.mrf.mxu1  ;;  %11785 = vmatmul.mubr.msk.f32.gmra.mxu1 %vm619_vm0, %v11770_v0  ;;  %v6258_v0 = vmul.f32 %v12656_v27, %v14854_v47  ;;  %v6260_v49 = vmul.f32 %v12658_v32, %v14850_v62  ;;  %v15309_v47 = vld [vmem:[%s16135_s8 + $0x58] sm:$0xff]  ;;  %v15316_v62 = vld [vmem:[%s16135_s8 + $0x50] sm:$0xff] }
0x1130   : > { %11827 = vmatpush3.msra.mxu1 %v10066_v3  ;;  %v12660_v3 = vpop.eup %12659  ;;  %v10338_v27 = vld [vmem:[%s13099_s19 + $0x1d8] sm:$0xff] }
0x1131   : > { %11828 = vmatprep.subr.mxu1 %v10065_v18  ;;  %v5841_v45 = vpop.f32.mrf.mxu1  ;;  %v12662_v60 = vpop.eup %12661  ;;  %v6262_v43 = vmul.f32 %v12660_v3, %v14866_v48 }
0x1132   : > { %11829 = vmatpush3.msra.mxu1 %v10065_v18  ;;  %11787 = vmatprep.mubr.msk.f32.mxu1 %vm619_vm0, %v5841_v45  ;;  %v6264_v63 = vmul.f32 %v12662_v60, %v14860_v61  ;;  %v15321_v61 = vld [vmem:[%s13217_s24 + $0x178] sm:$0xff]  ;;  %v10327_v45 = vld [vmem:[%s13126_s30 + $0x1c0] sm:$0xff]  ;;  %v10337_v60 = vld [vmem:[%s13099_s19 + $0x1d0] sm:$0xff] }
0x1133   : > { %11830 = vmatprep.subr.mxu1 %v10064_v50  ;;  %11788 = vmatmul.mubr.msk.f32.gmra.mxu1 %vm619_vm0, %v11773_v44  ;;  %v10341_v44 = vld [vmem:[%s13099_s19 + $0x1f0] sm:$0xff] }
0x1134   : > { %11831 = vmatpush3.msra.mxu1 %v10064_v50  ;;  %11834 = vmatprep.mubr.msk.f32.mxu1 %vm781_vm1, %v6250_v21 }
0x1135   : > { %11832 = vmatprep.subr.mxu1 %v10063_v20  ;;  %12152 = vmatprep.subr.msk.mxu0 %vm619_vm0, %v10341_v44 }
0x1136   : > { %11833 = vmatpush3.msra.mxu1 %v10063_v20  ;;  %12166 = vmatprep.mubr.msk.f32.mxu0 %vm619_vm0, %v10327_v45  ;;  %v10340_v20 = vld [vmem:[%s13099_s19 + $0x1e8] sm:$0xff] }
0x1137   : > { %11835 = vmatmul.mubr.msk.f32.vlgmr.msra.gmra.mxu1 %vm781_vm1, %v6252_v16  ;;  %11846 = vmatprep.subr.mxu1 %v15309_v47  ;;  %v10339_v16 = vld [vmem:[%s13099_s19 + $0x1e0] sm:$0xff] }
0x1138   : > { %11837 = vmatprep.mubr.msk.f32.mxu1 %vm781_vm1, %v6254_v56  ;;  %11847 = vmatpush3.msra.mxu1 %v15309_v47 }
0x1139   : > { %11848 = vmatprep.subr.mxu1 %v15316_v62  ;;  %12153 = vmatpush3.xpose.msk.msra.mxu0 %vm619_vm0, %v10341_v44 }
0x113a   : > { %11849 = vmatpush3.msra.mxu1 %v15316_v62  ;;  %12154 = vmatprep.subr.msk.mxu0 %vm619_vm0, %v10340_v20 }
0x113b   : > { %11838 = vmatmul.mubr.msk.f32.gmra.mxu1 %vm781_vm1, %v6256_v24  ;;  %11890 = vmatprep.subr.mxu1 %v15321_v61 }
0x113c   : > { %11840 = vmatprep.mubr.msk.f32.mxu1 %vm781_vm1, %v6258_v0 }
0x113d   : > { %12155 = vmatpush3.xpose.msk.msra.mxu0 %vm619_vm0, %v10340_v20  ;;  %v10336_v20 = vld [vmem:[%s13099_s19 + $0x1c8] sm:$0xff] }
0x113e   : > { %12156 = vmatprep.subr.msk.mxu0 %vm619_vm0, %v10339_v16 }
0x113f   : > { %11841 = vmatmul.mubr.msk.f32.gmra.mxu1 %vm781_vm1, %v6260_v49 }
0x1140   : > { %11843 = vmatprep.mubr.msk.f32.mxu1 %vm781_vm1, %v6262_v43 }
0x1141   : > { %12157 = vmatpush3.xpose.msk.msra.mxu0 %vm619_vm0, %v10339_v16 }
0x1142   : > { %12158 = vmatprep.subr.msk.mxu0 %vm619_vm0, %v10338_v27 }
0x1143   : > { %11844 = vmatmul.mubr.msk.f32.gmra.mxu1 %vm781_vm1, %v6264_v63 }
0x1145   : > { %12159 = vmatpush3.xpose.msk.msra.mxu0 %vm619_vm0, %v10338_v27 }
0x1146   : > { %12160 = vmatprep.subr.msk.mxu0 %vm619_vm0, %v10337_v60 }
0x1149   : > { %12161 = vmatpush3.xpose.msk.msra.mxu0 %vm619_vm0, %v10337_v60 }
0x114a   : > { %12162 = vmatprep.subr.msk.mxu0 %vm619_vm0, %v10336_v20 }
0x114d   : > { %12163 = vmatpush3.xpose.msk.msra.mxu0 %vm619_vm0, %v10336_v20 }
0x1194   : > { %v15324_v48 = vpop.xlane.xlu1 %7315 }
0x1196   : > { %v15326_v18 = vpop.xlane.xlu0 %7312 }
0x1198   : > { %v15330_v50 = vpop.xlane.xlu1 %7321 }
0x119a   : > { %v15335_v59 = vpop.xlane.xlu0 %7318 }
0x119c   : > { %v15340_v21 = vpop.xlane.xlu1 %7327 }
0x119e   : > { %v15343_v2 = vpop.xlane.xlu0 %7324 }
0x11a0   : > { %v15347_v22 = vpop.xlane.xlu1 %7333 }
0x11a2   : > { %v15350_v56 = vpop.xlane.xlu0 %7330 }
0x11a4   : > { %v7810_v24 = vpop.xlane.xlu1 %7809 }
0x11a5   : > { %v7830_v32 = vsub.f32 %v15209_v14, %v7810_v24 }
0x11a6   : > { %v7807_v0 = vpop.xlane.xlu0 %7806 }
0x11a7   : > { %v7839_v3 = vmul.f32 1.442695, %v7830_v32  ;;  %v7829_v49 = vsub.f32 %v15217_v40, %v7807_v0  ;;  %v10335_v0 = vld [vmem:[%s13099_s19 + $0x1c0] sm:$0xff]  ;;  %s10395_s19 = sshll.u32 %s12984_s27, 6  ;;  %s513_s27 = sand.u32 1, %s12851_s14  }
0x11a8   : > { %v7816_v43 = vpop.xlane.xlu1 %7815  ;;  %12164 = vmatprep.subr.msk.mxu0 %vm619_vm0, %v10335_v0  ;;  %s16010_s22 = scalar_lea.vmem %s16133_s6, %s10395_s19  ;;  %s16016_s20 = scalar_lea.vmem %s16134_s7, %s10395_s19 }
0x11a9   : > { %12663 = vpow2.f32 %v7839_v3  ;;  %v7837_v63 = vmul.f32 1.442695, %v7829_v49  ;;  %v7832_v39 = vsub.f32 %v15226_v58, %v7816_v43  ;;  %v12096_v49 = vpop.f32.mrf.mxu0  ;;  %12165 = vmatpush3.xpose.msk.msra.mxu0 %vm619_vm0, %v10335_v0  ;;  %s9518_s0 = sshll.u32 %s513_s27, 6  ;;  %s16082_s16 = scalar_lea.sflag [#allocation3], %s513_s27 }
0x11aa   : > { %v7813_v44 = vpop.xlane.xlu0 %7812 }
0x11ab   : > { %12665 = vpow2.f32 %v7837_v63  ;;  %v7843_v14 = vmul.f32 1.442695, %v7832_v39  ;;  %v7831_v45 = vsub.f32 %v15232_v53, %v7813_v44  ;;  %v10328_v44 = vld [vmem:[%s13126_s30 + $0x1c8] sm:$0xff] }
0x11ac   : > { %v7822_v16 = vpop.xlane.xlu1 %7821  ;;  %12167 = vmatmul.mubr.msk.f32.vlgmr.msra.gmra.mxu0 %vm619_vm0, %v10328_v44 }
0x11ad   : > { %12667 = vpow2.f32 %v7843_v14  ;;  %v7841_v40 = vmul.f32 1.442695, %v7831_v45  ;;  %v7834_v24 = vsub.f32 %v15239_v34, %v7822_v16 }
0x11ae   : > { %v7819_v32 = vpop.xlane.xlu0 %7818 }
0x11af   : > { %12669 = vpow2.f32 %v7841_v40  ;;  %v7847_v58 = vmul.f32 1.442695, %v7834_v24  ;;  %v7833_v27 = vsub.f32 %v15245_v57, %v7819_v32  ;;  %v8302_v57 = vpop.f32.mrf.mxu0  ;;  %v10330_v40 = vld [vmem:[%s13126_s30 + $0x1d8] sm:$0xff]  ;;  %v10331_v32 = vld [vmem:[%s13126_s30 + $0x1e0] sm:$0xff] }
0x11b0   : > { %v7828_v3 = vpop.xlane.xlu1 %7827 }
0x11b1   : > { %12671 = vpow2.f32 %v7847_v58  ;;  %v7845_v53 = vmul.f32 1.442695, %v7833_v27  ;;  %v7836_v43 = vsub.f32 %v15252_v46, %v7828_v3  ;;  %v10329_v46 = vld [vmem:[%s13126_s30 + $0x1d0] sm:$0xff] }
0x11b2   : > { %v7825_v34 = vpop.xlane.xlu0 %7824  ;;  %12169 = vmatprep.mubr.msk.f32.mxu0 %vm619_vm0, %v10329_v46  ;;  %v15409_v46 = vmul.f32 0.25, %v12096_v49 }
0x11b3   : > { %12673 = vpow2.f32 %v7845_v53  ;;  %v7851_v60 = vmul.f32 1.442695, %v7836_v43  ;;  %v7835_v63 = vsub.f32 %v15259_v38, %v7825_v34  ;;  %v12099_v38 = vpop.f32.mrf.mxu0  ;;  %12170 = vmatmul.mubr.msk.f32.gmra.mxu0 %vm619_vm0, %v10330_v40  ;;  %v10332_v53 = vld [vmem:[%s13126_s30 + $0x1e8] sm:$0xff]  ;;  %v10333_v34 = vld [vmem:[%s13126_s30 + $0x1f0] sm:$0xff] }
0x11b4   : > { %12172 = vmatprep.mubr.msk.f32.mxu0 %vm619_vm0, %v10331_v32  ;;  %v15417_v32 = vmul.f32 0.25, %v8302_v57 }
0x11b5   : > { %12675 = vpow2.f32 %v7851_v60  ;;  %v7849_v39 = vmul.f32 1.442695, %v7835_v63  ;;  %v8312_v0 = vpop.f32.mrf.mxu0 }
0x11b6   : > { %v15375_v14 = vpop.eup %12663  ;;  %v8349_v57 = vsel %vm781_vm1, %v15417_v32, -inf }
0x11b7   : > { %16199 = vst [vmem:[#allocation46_spill] sm:$0xff] %v15375_v14  ;;  %12677 = vpow2.f32 %v7849_v39  ;;  %v7856_v45 = vsel %vm781_vm1, %v15375_v14, 0.0  ;;  %v12102_v39 = vpop.f32.mrf.mxu0  ;;  %12173 = vmatmul.mubr.msk.f32.gmra.mxu0 %vm619_vm0, %v10332_v53  ;;  %v15424_v53 = vmul.f32 0.25, %v12099_v38 }
0x11b8   : > { %v15380_v20 = vpop.eup %12665  ;;  %7857 = vadd.xlane.f32.xlu1 %v7856_v45  ;;  %12175 = vmatprep.mubr.msk.f32.mxu0 %vm619_vm0, %v10333_v34  ;;  %v10334_v45 = vld [vmem:[%s13126_s30 + $0x1f8] sm:$0xff]  ;;  %v8352_v34 = vsel %vm781_vm1, %v15409_v46, -inf  ;;  %12679 = vrcp.f32 %v15153_v31 }
0x11b9   : > { %16200 = vst [vmem:[#allocation47_spill] sm:$0xff] %v15380_v20  ;;  %v7853_v16 = vsel %vm781_vm1, %v15380_v20, 0.0  ;;  %12681 = vrcp.f32 %v15149_v54  ;;  %v10123_v54 = vld [vmem:[%s13217_s24 + $0x160] sm:$0xff] }
0x11ba   : > { %v15387_v24 = vpop.eup %12667  ;;  %7854 = vadd.xlane.f32.xlu0 %v7853_v16  ;;  %12683 = vrcp.f32 %v15161_v4 }
0x11bb   : > { %16201 = vst [vmem:[#allocation48_spill] sm:$0xff] %v15387_v24  ;;  %v7862_v58 = vsel %vm781_vm1, %v15387_v24, 0.0  ;;  %12176 = vmatmul.mubr.msk.f32.gmra.mxu0 %vm619_vm0, %v10334_v45  ;;  %v8358_v45 = vsel %vm781_vm1, %v15424_v53, -inf  ;;  %12685 = vrcp.f32 %v15158_v30 }
0x11bc   : > { %v15392_v27 = vpop.eup %12669  ;;  %7863 = vadd.xlane.f32.xlu1 %v7862_v58  ;;  %12687 = vrcp.f32 %v15168_v42  ;;  %v10121_v42 = vld [vmem:[%s13217_s24 + $0x150] sm:$0xff] }
0x11bd   : > { %16202 = vst [vmem:[#allocation49_spill] sm:$0xff] %v15392_v27  ;;  %v7859_v3 = vsel %vm781_vm1, %v15392_v27, 0.0  ;;  %v16212_v27 = vld [vmem:[#allocation23_spill] sm:$0xff]  ;;  %12689 = vrcp.f32 %v15165_v52 }
0x11be   : > { %v15399_v43 = vpop.eup %12671  ;;  %7860 = vadd.xlane.f32.xlu0 %v7859_v3  ;;  %v8322_v3 = vpop.f32.mrf.mxu0  ;;  %12691 = vrcp.f32 %v15172_v5  ;;  %v10119_v5 = vld [vmem:[%s13217_s24 + $0x140] sm:$0xff] }
0x11bf   : > { %16203 = vst [vmem:[#allocation50_spill] sm:$0xff] %v15399_v43  ;;  %v7868_v60 = vsel %vm781_vm1, %v15399_v43, 0.0  ;;  %v15436_v1 = vmul.f32 0.25, %v8322_v3  ;;  %v16209_v43 = vld [vmem:[#allocation31_spill] sm:$0xff]  ;;  %12693 = vrcp.f32 %v15170_v17 }
0x11c0   : > { %v15404_v63 = vpop.eup %12673  ;;  %7869 = vadd.xlane.f32.xlu1 %v7868_v60  ;;  %v15428_v60 = vmul.f32 0.25, %v8312_v0 }
0x11c1   : > { %16204 = vst [vmem:[#allocation51_spill] sm:$0xff] %v15404_v63  ;;  %v7865_v44 = vsel %vm781_vm1, %v15404_v63, 0.0  ;;  %v16210_v63 = vld [vmem:[#allocation30_spill] sm:$0xff] }
0x11c2   : > { %v15413_v16 = vpop.eup %12675  ;;  %7866 = vadd.xlane.f32.xlu0 %v7865_v44  ;;  %v12105_v44 = vpop.f32.mrf.mxu0  ;;  %v8355_v38 = vsel %vm781_vm1, %v15428_v60, -inf }
0x11c3   : > { %16205 = vst [vmem:[#allocation52_spill] sm:$0xff] %v15413_v16  ;;  %v7874_v40 = vsel %vm781_vm1, %v15413_v16, 0.0  ;;  %v15440_v0 = vmul.f32 0.25, %v12105_v44  ;;  %v2691_v44 = vadd.f32 %v14036_v8, %v13686_v9  ;;  %v16208_v16 = vld [vmem:[#allocation16_spill] sm:$0xff]  ;;  %v16215_v8 = vld [vmem:[#allocation33_spill] sm:$0xff] }
0x11c4   : > { %v15419_v58 = vpop.eup %12677  ;;  %7875 = vadd.xlane.f32.xlu1 %v7874_v40  ;;  %v15432_v40 = vmul.f32 0.25, %v12102_v39  ;;  %v8361_v39 = vsel %vm781_vm1, %v15436_v1, -inf }
0x11c5   : > { %16206 = vst [vmem:[#allocation53_spill] sm:$0xff] %v15419_v58  ;;  %v7871_v49 = vsel %vm781_vm1, %v15419_v58, 0.0  ;;  %v8370_v3 = vsel %vm781_vm1, %v15440_v0, -inf }
0x11c6   : > { %7872 = vadd.xlane.f32.xlu0 %v7871_v49  ;;  %v8332_v49 = vpop.f32.mrf.mxu0  ;;  %v8364_v13 = vsel %vm781_vm1, %v15432_v40, -inf }
0x11c8   : > { %8353 = vmax.xlane.f32.xlu1 %v8352_v34  ;;  %v15444_v34 = vmul.f32 0.25, %v8332_v49  ;;  %v16207_v49 = vld [vmem:[#allocation13_spill] sm:$0xff] }
0x11c9   : > { %v2701_v58 = vadd.f32 %v16208_v16, %v16207_v49  ;;  %v16217_v49 = vld [vmem:[#allocation24_spill] sm:$0xff] }
0x11ca   : > { %8350 = vmax.xlane.f32.xlu0 %v8349_v57  ;;  %v8367_v57 = vsel %vm781_vm1, %v15444_v34, -inf }
0x11cb   : > { %v3809_v14 = vadd.f32 %v16212_v27, %v2701_v58 }
0x11cc   : > { %8359 = vmax.xlane.f32.xlu1 %v8358_v45  ;;  %v3807_v45 = vadd.f32 %v14554_v12, %v2691_v44  ;;  %v16216_v44 = vld [vmem:[#allocation32_spill] sm:$0xff] }
0x11cd   : > { %v4895_v12 = vadd.f32 %v16215_v8, %v3809_v14  ;;  %v16220_v14 = vld [vmem:[#allocation25_spill] sm:$0xff] }
0x11ce   : > { %8356 = vmax.xlane.f32.xlu0 %v8355_v38 }
0x11d0   : > { %8365 = vmax.xlane.f32.xlu1 %v8364_v13  ;;  %v4893_v13 = vadd.f32 %v16209_v43, %v3807_v45 }
0x11d2   : > { %8362 = vmax.xlane.f32.xlu0 %v8361_v39 }
0x11d4   : > { %8371 = vmax.xlane.f32.xlu1 %v8370_v3 }
0x11d6   : > { %8368 = vmax.xlane.f32.xlu0 %v8367_v57  ;;  %v16213_v57 = vld [vmem:[#allocation14_spill] sm:$0xff] }
0x11d7   : > { %v2711_v9 = vadd.f32 %v16214_v23, %v16213_v57 }
0x11d9   : > { %v3811_v43 = vadd.f32 %v16217_v49, %v2711_v9 }
0x11db   : > { %v4897_v58 = vadd.f32 %v14985_v41, %v3811_v43  ;;  %v10120_v43 = vld [vmem:[%s13217_s24 + $0x148] sm:$0xff] }
0x11e7   : > { %v11780_v38 = vpop.f32.mrf.mxu1 }
0x11e8   : > { %v15459_v24 = vadd.f32 %v11780_v38, %v16210_v63  ;;  %v16218_v38 = vld [vmem:[#allocation15_spill] sm:$0xff] }
0x11e9   : > { %v5940_v39 = vpop.f32.mrf.mxu1 }
0x11ea   : > { %16211 = vst [vmem:[#allocation13_spill] sm:$0xff] %v15459_v24  ;;  %v15462_v20 = vadd.f32 %v5940_v39, %v4893_v13  ;;  %v16219_v24 = vld [vmem:[#allocation18_spill] sm:$0xff] }
0x11eb   : > { %v11783_v3 = vpop.f32.mrf.mxu1  ;;  %v2721_v27 = vadd.f32 %v16219_v24, %v16218_v38 }
0x11ec   : > { %v15468_v33 = vadd.f32 %v11783_v3, %v16216_v44  ;;  %v10125_v44 = vld [vmem:[%s13217_s24 + $0x170] sm:$0xff] }
0x11ed   : > { %v5950_v16 = vpop.f32.mrf.mxu1  ;;  %v3813_v39 = vadd.f32 %v16220_v14, %v2721_v27 }
0x11ee   : > { %v15471_v45 = vadd.f32 %v5950_v16, %v4895_v12  ;;  %v10122_v16 = vld [vmem:[%s13217_s24 + $0x158] sm:$0xff] }
0x11ef   : > { %v11786_v63 = vpop.f32.mrf.mxu1  ;;  %v4899_v9 = vadd.f32 %v14993_v36, %v3813_v39 }
0x11f0   : > { %v15477_v13 = vadd.f32 %v11786_v63, %v14983_v25 }
0x11f1   : > { %v5960_v23 = vpop.f32.mrf.mxu1 }
0x11f2   : > { %v15480_v3 = vadd.f32 %v5960_v23, %v4897_v58 }
0x11f3   : > { %v11789_v57 = vpop.f32.mrf.mxu1 }
0x11f4   : > { %v15484_v8 = vadd.f32 %v11789_v57, %v14989_v6  ;;  %v10124_v6 = vld [vmem:[%s13217_s24 + $0x168] sm:$0xff] }
0x11f5   : > { %v5970_v12 = vpop.f32.mrf.mxu1 }
0x11f6   : > { %v15487_v41 = vadd.f32 %v5970_v12, %v4899_v9  ;;  %v16221_v12 = vld [vmem:[#allocation35_spill] sm:$0xff] }
0x11f7   : > { %v11836_v24 = vpop.f32.mrf.mxu1 }
0x11f9   : > { %v6355_v25 = vpop.f32.mrf.mxu1 }
0x11fa   : > { %11850 = vmatprep.mubr.msk.f32.mxu1 %vm619_vm0, %v6355_v25 }
0x11fb   : > { %v11839_v36 = vpop.f32.mrf.mxu1  ;;  %11851 = vmatmul.mubr.msk.f32.vlgmr.msra.gmra.mxu1 %vm619_vm0, %v11836_v24 }
0x11fc   : > { %11891 = vmatpush3.msra.mxu1 %v15321_v61  ;;  %v12680_v61 = vpop.eup %12679 }
0x11fd   : > { %11892 = vmatprep.subr.mxu1 %v10125_v44  ;;  %v6365_v31 = vpop.f32.mrf.mxu1  ;;  %v12682_v63 = vpop.eup %12681  ;;  %v6792_v38 = vmul.f32 %v12680_v61, %v15028_v15 }
0x11fe   : > { %11893 = vmatpush3.msra.mxu1 %v10125_v44  ;;  %11853 = vmatprep.mubr.msk.f32.mxu1 %vm619_vm0, %v6365_v31  ;;  %v12684_v27 = vpop.eup %12683  ;;  %v6794_v58 = vmul.f32 %v12682_v63, %v15022_v29  ;;  %v15547_v31 = vld [vmem:[%s13075_s29 + $0x1b8] sm:$0xff] }
0x11ff   : > { %11894 = vmatprep.subr.mxu1 %v10124_v6  ;;  %v11842_v4 = vpop.f32.mrf.mxu1  ;;  %11854 = vmatmul.mubr.msk.f32.gmra.mxu1 %vm619_vm0, %v11839_v36  ;;  %v12686_v17 = vpop.eup %12685  ;;  %v6796_v23 = vmul.f32 %v12684_v27, %v15041_v28 }
0x1200   : > { %11895 = vmatpush3.msra.mxu1 %v10124_v6  ;;  %v12688_v14 = vpop.eup %12687  ;;  %v6798_v15 = vmul.f32 %v12686_v17, %v15035_v19  ;;  %v16222_v19 = vld [vmem:[#allocation34_spill] sm:$0xff] }
0x1201   : > { %11896 = vmatprep.subr.mxu1 %v10123_v54  ;;  %v6375_v30 = vpop.f32.mrf.mxu1  ;;  %v12690_v39 = vpop.eup %12689  ;;  %v6800_v29 = vmul.f32 %v12688_v14, %v15055_v7 }
0x1202   : > { %11897 = vmatpush3.msra.mxu1 %v10123_v54  ;;  %11856 = vmatprep.mubr.msk.f32.mxu1 %vm619_vm0, %v6375_v30  ;;  %v12692_v57 = vpop.eup %12691  ;;  %v6802_v28 = vmul.f32 %v12690_v39, %v15048_v10 }
0x1203   : > { %11898 = vmatprep.subr.mxu1 %v10122_v16  ;;  %v11845_v49 = vpop.f32.mrf.mxu1  ;;  %11857 = vmatmul.mubr.msk.f32.gmra.mxu1 %vm619_vm0, %v11842_v4  ;;  %v12694_v9 = vpop.eup %12693 }
0x1204   : > { %11899 = vmatpush3.msra.mxu1 %v10122_v16  ;;  %v6806_v24 = vmul.f32 %v12694_v9, %v16222_v19 }
0x1205   : > { %11900 = vmatprep.subr.mxu1 %v10121_v42  ;;  %v6385_v52 = vpop.f32.mrf.mxu1 }
0x1206   : > { %11901 = vmatpush3.msra.mxu1 %v10121_v42  ;;  %11859 = vmatprep.mubr.msk.f32.mxu1 %vm619_vm0, %v6385_v52 }
0x1207   : > { %11902 = vmatprep.subr.mxu1 %v10120_v43  ;;  %11860 = vmatmul.mubr.msk.f32.gmra.mxu1 %vm619_vm0, %v11845_v49 }
0x1208   : > { %11903 = vmatpush3.msra.mxu1 %v10120_v43  ;;  %11906 = vmatprep.mubr.msk.f32.mxu1 %vm781_vm1, %v6792_v38 }
0x1209   : > { %11904 = vmatprep.subr.mxu1 %v10119_v5 }
0x120a   : > { %11905 = vmatpush3.msra.mxu1 %v10119_v5 }
0x120b   : > { %11907 = vmatmul.mubr.msk.f32.vlgmr.msra.gmra.mxu1 %vm781_vm1, %v6794_v58  ;;  %11918 = vmatprep.subr.mxu1 %v15309_v47 }
0x120c   : > { %11909 = vmatprep.mubr.msk.f32.mxu1 %vm781_vm1, %v6796_v23  ;;  %11919 = vmatpush3.msra.mxu1 %v15309_v47  ;;  %v6804_v47 = vmul.f32 %v12692_v57, %v16221_v12 }
0x120d   : > { %11920 = vmatprep.subr.mxu1 %v15316_v62 }
0x120e   : > { %11921 = vmatpush3.msra.mxu1 %v15316_v62 }
0x120f   : > { %11910 = vmatmul.mubr.msk.f32.gmra.mxu1 %vm781_vm1, %v6798_v15  ;;  %11962 = vmatprep.subr.mxu1 %v15547_v31 }
0x1210   : > { %11912 = vmatprep.mubr.msk.f32.mxu1 %vm781_vm1, %v6800_v29 }
0x1213   : > { %11913 = vmatmul.mubr.msk.f32.gmra.mxu1 %vm781_vm1, %v6802_v28 }
0x1214   : > { %11915 = vmatprep.mubr.msk.f32.mxu1 %vm781_vm1, %v6804_v47 }
0x1217   : > { %11916 = vmatmul.mubr.msk.f32.gmra.mxu1 %vm781_vm1, %v6806_v24 }
0x1241   : > { %v15532_v7 = vpop.xlane.xlu1 %7857 }
0x1243   : > { %v15534_v62 = vpop.xlane.xlu0 %7854 }
0x1245   : > { %v15536_v25 = vpop.xlane.xlu1 %7863 }
0x1247   : > { %v15538_v44 = vpop.xlane.xlu0 %7860 }
0x1249   : > { %v15540_v10 = vpop.xlane.xlu1 %7869 }
0x124b   : > { %v15542_v36 = vpop.xlane.xlu0 %7866 }
0x124d   : > { %v15544_v6 = vpop.xlane.xlu1 %7875 }
0x124f   : > { %v15549_v54 = vpop.xlane.xlu0 %7872 }
0x1251   : > { %v8354_v4 = vpop.xlane.xlu1 %8353 }
0x1252   : > { %v8374_v16 = vsub.f32 %v15409_v46, %v8354_v4 }
0x1253   : > { %v8351_v30 = vpop.xlane.xlu0 %8350 }
0x1254   : > { %v8383_v42 = vmul.f32 1.442695, %v8374_v16  ;;  %v8373_v61 = vsub.f32 %v15417_v32, %v8351_v30 }
0x1255   : > { %v8360_v49 = vpop.xlane.xlu1 %8359 }
0x1256   : > { %12695 = vpow2.f32 %v8383_v42  ;;  %v8381_v43 = vmul.f32 1.442695, %v8373_v61  ;;  %v8376_v52 = vsub.f32 %v15424_v53, %v8360_v49 }
0x1257   : > { %v8357_v63 = vpop.xlane.xlu0 %8356 }
0x1258   : > { %12697 = vpow2.f32 %v8381_v43  ;;  %v8387_v5 = vmul.f32 1.442695, %v8376_v52  ;;  %v8375_v38 = vsub.f32 %v15428_v60, %v8357_v63 }
0x1259   : > { %v8366_v27 = vpop.xlane.xlu1 %8365 }
0x125a   : > { %12699 = vpow2.f32 %v8387_v5  ;;  %v8385_v58 = vmul.f32 1.442695, %v8375_v38  ;;  %v8378_v17 = vsub.f32 %v15432_v40, %v8366_v27 }
0x125b   : > { %v8363_v46 = vpop.xlane.xlu0 %8362 }
0x125c   : > { %12701 = vpow2.f32 %v8385_v58  ;;  %v8391_v23 = vmul.f32 1.442695, %v8378_v17  ;;  %v8377_v32 = vsub.f32 %v15436_v1, %v8363_v46 }
0x125d   : > { %v8372_v14 = vpop.xlane.xlu1 %8371 }
0x125e   : > { %12703 = vpow2.f32 %v8391_v23  ;;  %v8389_v15 = vmul.f32 1.442695, %v8377_v32  ;;  %v8380_v53 = vsub.f32 %v15440_v0, %v8372_v14 }
0x125f   : > { %v8369_v39 = vpop.xlane.xlu0 %8368 }
0x1260   : > { %12705 = vpow2.f32 %v8389_v15  ;;  %v8395_v29 = vmul.f32 1.442695, %v8380_v53  ;;  %v8379_v60 = vsub.f32 %v15444_v34, %v8369_v39 }
0x1262   : > { %12707 = vpow2.f32 %v8395_v29  ;;  %v8393_v57 = vmul.f32 1.442695, %v8379_v60 }
0x1263   : > { %v15560_v28 = vpop.eup %12695 }
0x1264   : > { %12709 = vpow2.f32 %v8393_v57  ;;  %v8400_v40 = vsel %vm781_vm1, %v15560_v28, 0.0 }
0x1265   : > { %v15564_v9 = vpop.eup %12697  ;;  %8401 = vadd.xlane.f32.xlu1 %v8400_v40  ;;  %12711 = vrcp.f32 %v15326_v18 }
0x1266   : > { %v8397_v1 = vsel %vm781_vm1, %v15564_v9, 0.0  ;;  %12713 = vrcp.f32 %v15324_v48  ;;  %v10179_v48 = vld [vmem:[%s13075_s29 + $0x1a0] sm:$0xff] }
0x1267   : > { %v15568_v0 = vpop.eup %12699  ;;  %8398 = vadd.xlane.f32.xlu0 %v8397_v1  ;;  %12715 = vrcp.f32 %v15335_v59 }
0x1268   : > { %v8406_v34 = vsel %vm781_vm1, %v15568_v0, 0.0  ;;  %12717 = vrcp.f32 %v15330_v50 }
0x1269   : > { %v15572_v12 = vpop.eup %12701  ;;  %8407 = vadd.xlane.f32.xlu1 %v8406_v34  ;;  %12719 = vrcp.f32 %v15343_v2  ;;  %v10177_v2 = vld [vmem:[%s13075_s29 + $0x190] sm:$0xff] }
0x126a   : > { %v8403_v47 = vsel %vm781_vm1, %v15572_v12, 0.0  ;;  %12721 = vrcp.f32 %v15340_v21 }
0x126b   : > { %v15576_v19 = vpop.eup %12703  ;;  %8404 = vadd.xlane.f32.xlu0 %v8403_v47  ;;  %12723 = vrcp.f32 %v15350_v56  ;;  %v10175_v56 = vld [vmem:[%s13075_s29 + $0x180] sm:$0xff] }
0x126c   : > { %v8412_v24 = vsel %vm781_vm1, %v15576_v19, 0.0  ;;  %v12168_v43 = vpop.f32.mrf.mxu0  ;;  %12725 = vrcp.f32 %v15347_v22 }
0x126d   : > { %v15580_v4 = vpop.eup %12705  ;;  %8413 = vadd.xlane.f32.xlu1 %v8412_v24  ;;  %v15592_v52 = vmul.f32 0.25, %v12168_v43 }
0x126e   : > { %v8409_v16 = vsel %vm781_vm1, %v15580_v4, 0.0  ;;  %v8844_v63 = vpop.f32.mrf.mxu0 }
0x126f   : > { %v15584_v30 = vpop.eup %12707  ;;  %8410 = vadd.xlane.f32.xlu0 %v8409_v16  ;;  %v15594_v5 = vmul.f32 0.25, %v8844_v63  ;;  %v8894_v38 = vsel %vm781_vm1, %v15592_v52, -inf }
0x1270   : > { %v8418_v42 = vsel %vm781_vm1, %v15584_v30, 0.0 }
0x1271   : > { %v15588_v61 = vpop.eup %12709  ;;  %8419 = vadd.xlane.f32.xlu1 %v8418_v42  ;;  %v8891_v17 = vsel %vm781_vm1, %v15594_v5, -inf }
0x1272   : > { %v8415_v49 = vsel %vm781_vm1, %v15588_v61, 0.0 }
0x1273   : > { %8416 = vadd.xlane.f32.xlu0 %v8415_v49  ;;  %v12171_v27 = vpop.f32.mrf.mxu0 }
0x1274   : > { %v15598_v58 = vmul.f32 0.25, %v12171_v27 }
0x1275   : > { %8895 = vmax.xlane.f32.xlu1 %v8894_v38  ;;  %v8854_v46 = vpop.f32.mrf.mxu0 }
0x1276   : > { %v15602_v23 = vmul.f32 0.25, %v8854_v46  ;;  %v8900_v32 = vsel %vm781_vm1, %v15598_v58, -inf }
0x1277   : > { %8892 = vmax.xlane.f32.xlu0 %v8891_v17  ;;  %v12174_v14 = vpop.f32.mrf.mxu0 }
0x1278   : > { %v15606_v15 = vmul.f32 0.25, %v12174_v14  ;;  %v8897_v53 = vsel %vm781_vm1, %v15602_v23, -inf }
0x1279   : > { %8901 = vmax.xlane.f32.xlu1 %v8900_v32  ;;  %v8864_v39 = vpop.f32.mrf.mxu0 }
0x127a   : > { %v15610_v29 = vmul.f32 0.25, %v8864_v39  ;;  %v8906_v60 = vsel %vm781_vm1, %v15606_v15, -inf }
0x127b   : > { %8898 = vmax.xlane.f32.xlu0 %v8897_v53  ;;  %v12177_v57 = vpop.f32.mrf.mxu0 }
0x127c   : > { %v15614_v40 = vmul.f32 0.25, %v12177_v57  ;;  %v8903_v1 = vsel %vm781_vm1, %v15610_v29, -inf  ;;  %v10178_v57 = vld [vmem:[%s13075_s29 + $0x198] sm:$0xff] }
0x127d   : > { %8907 = vmax.xlane.f32.xlu1 %v8906_v60  ;;  %v8874_v34 = vpop.f32.mrf.mxu0 }
0x127e   : > { %v15618_v47 = vmul.f32 0.25, %v8874_v34  ;;  %v8912_v24 = vsel %vm781_vm1, %v15614_v40, -inf  ;;  %v10176_v34 = vld [vmem:[%s13075_s29 + $0x188] sm:$0xff] }
0x127f   : > { %8904 = vmax.xlane.f32.xlu0 %v8903_v1 }
0x1280   : > { %v8909_v16 = vsel %vm781_vm1, %v15618_v47, -inf }
0x1281   : > { %8913 = vmax.xlane.f32.xlu1 %v8912_v24 }
0x1283   : > { %8910 = vmax.xlane.f32.xlu0 %v8909_v16 }
0x12bb   : > { %v11852_v42 = vpop.f32.mrf.mxu1 }
0x12bc   : > { %v15625_v49 = vadd.f32 %v11852_v42, %v15205_v35 }
0x12bd   : > { %v15627_v43 = vpop.f32.mrf.mxu1 }
0x12bf   : > { %v11855_v63 = vpop.f32.mrf.mxu1 }
0x12c0   : > { %v15630_v38 = vadd.f32 %v11855_v63, %v15222_v26 }
0x12c1   : > { %v15632_v27 = vpop.f32.mrf.mxu1 }
0x12c3   : > { %v11858_v17 = vpop.f32.mrf.mxu1 }
0x12c4   : > { %v15635_v46 = vadd.f32 %v11858_v17, %v15237_v51  ;;  %v10181_v51 = vld [vmem:[%s13075_s29 + $0x1b0] sm:$0xff]  ;;  %v16223_v17 = vld [vmem:[#allocation37_spill] sm:$0xff] }
0x12c5   : > { %v15637_v32 = vpop.f32.mrf.mxu1 }
0x12c7   : > { %v11861_v14 = vpop.f32.mrf.mxu1 }
0x12c8   : > { %v15640_v35 = vadd.f32 %v11861_v14, %v15250_v55  ;;  %v10180_v55 = vld [vmem:[%s13075_s29 + $0x1a8] sm:$0xff] }
0x12c9   : > { %v15642_v53 = vpop.f32.mrf.mxu1 }
0x12cb   : > { %v11908_v39 = vpop.f32.mrf.mxu1 }
0x12cd   : > { %v6897_v26 = vpop.f32.mrf.mxu1 }
0x12ce   : > { %11922 = vmatprep.mubr.msk.f32.mxu1 %vm619_vm0, %v6897_v26 }
0x12cf   : > { %v11911_v60 = vpop.f32.mrf.mxu1  ;;  %11923 = vmatmul.mubr.msk.f32.vlgmr.msra.gmra.mxu1 %vm619_vm0, %v11908_v39 }
0x12d0   : > { %11963 = vmatpush3.msra.mxu1 %v15547_v31  ;;  %v12712_v31 = vpop.eup %12711 }
0x12d1   : > { %11964 = vmatprep.subr.mxu1 %v10181_v51  ;;  %v6907_v18 = vpop.f32.mrf.mxu1  ;;  %v12714_v24 = vpop.eup %12713  ;;  %v7336_v16 = vmul.f32 %v12712_v31, %v15186_v37  ;;  %v16224_v37 = vld [vmem:[#allocation36_spill] sm:$0xff] }
0x12d2   : > { %11965 = vmatpush3.msra.mxu1 %v10181_v51  ;;  %11925 = vmatprep.mubr.msk.f32.mxu1 %vm619_vm0, %v6907_v18  ;;  %v12716_v42 = vpop.eup %12715  ;;  %v7338_v63 = vmul.f32 %v12714_v24, %v15182_v11  ;;  %v16226_v11 = vld [vmem:[#allocation38_spill] sm:$0xff] }
0x12d3   : > { %11966 = vmatprep.subr.mxu1 %v10180_v55  ;;  %v11914_v59 = vpop.f32.mrf.mxu1  ;;  %11926 = vmatmul.mubr.msk.f32.gmra.mxu1 %vm619_vm0, %v11911_v60  ;;  %v12718_v22 = vpop.eup %12717  ;;  %v7340_v14 = vmul.f32 %v12716_v42, %v16223_v17  ;;  %v16225_v60 = vld [vmem:[#allocation39_spill] sm:$0xff] }
0x12d4   : > { %11967 = vmatpush3.msra.mxu1 %v10180_v55  ;;  %v12720_v39 = vpop.eup %12719  ;;  %v7342_v26 = vmul.f32 %v12718_v22, %v16224_v37 }
0x12d5   : > { %11968 = vmatprep.subr.mxu1 %v10179_v48  ;;  %v6917_v50 = vpop.f32.mrf.mxu1  ;;  %v12722_v51 = vpop.eup %12721  ;;  %v7344_v55 = vmul.f32 %v12720_v39, %v16225_v60 }
0x12d6   : > { %11969 = vmatpush3.msra.mxu1 %v10179_v48  ;;  %11928 = vmatprep.mubr.msk.f32.mxu1 %vm619_vm0, %v6917_v50  ;;  %v12724_v18 = vpop.eup %12723  ;;  %v7346_v48 = vmul.f32 %v12722_v51, %v16226_v11 }
0x12d7   : > { %11970 = vmatprep.subr.mxu1 %v10178_v57  ;;  %v11917_v1 = vpop.f32.mrf.mxu1  ;;  %11929 = vmatmul.mubr.msk.f32.gmra.mxu1 %vm619_vm0, %v11914_v59  ;;  %v12726_v59 = vpop.eup %12725 }
0x12d8   : > { %11971 = vmatpush3.msra.mxu1 %v10178_v57  ;;  %v16227_v57 = vld [vmem:[#allocation42_spill] sm:$0xff] }
0x12d9   : > { %11972 = vmatprep.subr.mxu1 %v10177_v2  ;;  %v6927_v21 = vpop.f32.mrf.mxu1  ;;  %v7348_v50 = vmul.f32 %v12724_v18, %v16227_v57 }
0x12da   : > { %11973 = vmatpush3.msra.mxu1 %v10177_v2  ;;  %11931 = vmatprep.mubr.msk.f32.mxu1 %vm619_vm0, %v6927_v21  ;;  %v16228_v2 = vld [vmem:[#allocation40_spill] sm:$0xff] }
0x12db   : > { %11974 = vmatprep.subr.mxu1 %v10176_v34  ;;  %11932 = vmatmul.mubr.msk.f32.gmra.mxu1 %vm619_vm0, %v11917_v1  ;;  %v7350_v31 = vmul.f32 %v12726_v59, %v16228_v2 }
0x12dc   : > { %11975 = vmatpush3.msra.mxu1 %v10176_v34  ;;  %11978 = vmatprep.mubr.msk.f32.mxu1 %vm781_vm1, %v7336_v16 }
0x12dd   : > { %11976 = vmatprep.subr.mxu1 %v10175_v56 }
0x12de   : > { %11977 = vmatpush3.msra.mxu1 %v10175_v56 }
0x12df   : > { %11979 = vmatmul.mubr.msk.f32.vlgmr.msra.gmra.mxu1 %vm781_vm1, %v7338_v63 }
0x12e0   : > { %11981 = vmatprep.mubr.msk.f32.mxu1 %vm781_vm1, %v7340_v14 }
0x12e3   : > { %11982 = vmatmul.mubr.msk.f32.gmra.mxu1 %vm781_vm1, %v7342_v26 }
0x12e4   : > { %11984 = vmatprep.mubr.msk.f32.mxu1 %vm781_vm1, %v7344_v55 }
0x12e7   : > { %11985 = vmatmul.mubr.msk.f32.gmra.mxu1 %vm781_vm1, %v7346_v48 }
0x12e8   : > { %11987 = vmatprep.mubr.msk.f32.mxu1 %vm781_vm1, %v7348_v50 }
0x12eb   : > { %11988 = vmatmul.mubr.msk.f32.gmra.mxu1 %vm781_vm1, %v7350_v31 }
0x12ee   : > { %v15684_v1 = vpop.xlane.xlu1 %8401 }
0x12f0   : > { %v15686_v34 = vpop.xlane.xlu0 %8398 }
0x12f2   : > { %v15688_v21 = vpop.xlane.xlu1 %8407 }
0x12f4   : > { %v15690_v24 = vpop.xlane.xlu0 %8404 }
0x12f6   : > { %v15692_v56 = vpop.xlane.xlu1 %8413 }
0x12f8   : > { %v15694_v16 = vpop.xlane.xlu0 %8410 }
0x12fa   : > { %v15696_v42 = vpop.xlane.xlu1 %8419 }
0x12fc   : > { %v15698_v63 = vpop.xlane.xlu0 %8416 }
0x12fe   : > { %v8896_v22 = vpop.xlane.xlu1 %8895 }
0x12ff   : > { %v8916_v17 = vsub.f32 %v15592_v52, %v8896_v22 }
0x1300   : > { %v8893_v14 = vpop.xlane.xlu0 %8892 }
0x1301   : > { %v8925_v39 = vmul.f32 1.442695, %v8916_v17  ;;  %v8915_v37 = vsub.f32 %v15594_v5, %v8893_v14 }
0x1302   : > { %v8902_v26 = vpop.xlane.xlu1 %8901 }
0x1303   : > { %12727 = vpow2.f32 %v8925_v39  ;;  %v8923_v51 = vmul.f32 1.442695, %v8915_v37  ;;  %v8918_v60 = vsub.f32 %v15598_v58, %v8902_v26  ;;  %v15709_v58 = vld [vmem:[%s16135_s8 + $0x68] sm:$0xff] }
0x1304   : > { %v8899_v55 = vpop.xlane.xlu0 %8898  ;;  %11990 = vmatprep.subr.mxu1 %v15709_v58 }
0x1305   : > { %12729 = vpow2.f32 %v8923_v51  ;;  %v8929_v18 = vmul.f32 1.442695, %v8918_v60  ;;  %v8917_v11 = vsub.f32 %v15602_v23, %v8899_v55  ;;  %11991 = vmatpush3.msra.mxu1 %v15709_v58 }
0x1306   : > { %v8908_v48 = vpop.xlane.xlu1 %8907 }
0x1307   : > { %12731 = vpow2.f32 %v8929_v18  ;;  %v8927_v59 = vmul.f32 1.442695, %v8917_v11  ;;  %v8920_v57 = vsub.f32 %v15606_v15, %v8908_v48 }
0x1308   : > { %v8905_v52 = vpop.xlane.xlu0 %8904 }
0x1309   : > { %12733 = vpow2.f32 %v8927_v59  ;;  %v8933_v50 = vmul.f32 1.442695, %v8920_v57  ;;  %v8919_v5 = vsub.f32 %v15610_v29, %v8905_v52  ;;  %v10238_v59 = vld [vmem:[%s13217_s24 + $0x1b8] sm:$0xff] }
0x130a   : > { %v8914_v31 = vpop.xlane.xlu1 %8913 }
0x130b   : > { %12735 = vpow2.f32 %v8933_v50  ;;  %v8931_v2 = vmul.f32 1.442695, %v8919_v5  ;;  %v8922_v23 = vsub.f32 %v15614_v40, %v8914_v31  ;;  %v15724_v40 = vld [vmem:[%s16135_s8 + $0x60] sm:$0xff] }
0x130c   : > { %v8911_v22 = vpop.xlane.xlu0 %8910  ;;  %11992 = vmatprep.subr.mxu1 %v15724_v40 }
0x130d   : > { %12737 = vpow2.f32 %v8931_v2  ;;  %v8921_v15 = vsub.f32 %v15618_v47, %v8911_v22  ;;  %v8937_v17 = vmul.f32 1.442695, %v8922_v23  ;;  %11993 = vmatpush3.msra.mxu1 %v15724_v40  ;;  %v16229_v23 = vld [vmem:[#allocation13_spill] sm:$0xff] }
0x130e   : > { %12034 = vmatprep.subr.mxu1 %v10238_v59 }
0x130f   : > { %v8935_v29 = vmul.f32 1.442695, %v8921_v15  ;;  %12739 = vpow2.f32 %v8937_v17 }
0x1310   : > { %v15715_v14 = vpop.eup %12727 }
0x1311   : > { %12741 = vpow2.f32 %v8935_v29  ;;  %v8942_v37 = vsel %vm781_vm1, %v15715_v14, 0.0 }
0x1312   : > { %v15717_v39 = vpop.eup %12729  ;;  %8943 = vadd.xlane.f32.xlu1 %v8942_v37  ;;  %12743 = vrcp.f32 %v15534_v62 }
0x1313   : > { %v8939_v47 = vsel %vm781_vm1, %v15717_v39, 0.0  ;;  %12745 = vrcp.f32 %v15532_v7  ;;  %v10235_v7 = vld [vmem:[%s13217_s24 + $0x1a0] sm:$0xff] }
0x1314   : > { %v15728_v26 = vpop.eup %12731  ;;  %8940 = vadd.xlane.f32.xlu0 %v8939_v47  ;;  %12747 = vrcp.f32 %v15538_v44  ;;  %v10234_v44 = vld [vmem:[%s13217_s24 + $0x198] sm:$0xff] }
0x1315   : > { %v8948_v60 = vsel %vm781_vm1, %v15728_v26, 0.0  ;;  %12749 = vrcp.f32 %v15536_v25 }
0x1316   : > { %v15732_v51 = vpop.eup %12733  ;;  %8949 = vadd.xlane.f32.xlu1 %v8948_v60  ;;  %12751 = vrcp.f32 %v15542_v36  ;;  %v10233_v36 = vld [vmem:[%s13217_s24 + $0x190] sm:$0xff] }
0x1317   : > { %v8945_v55 = vsel %vm781_vm1, %v15732_v51, 0.0  ;;  %12753 = vrcp.f32 %v15540_v10 }
0x1318   : > { %v15738_v18 = vpop.eup %12735  ;;  %8946 = vadd.xlane.f32.xlu0 %v8945_v55  ;;  %12755 = vrcp.f32 %v15549_v54  ;;  %v10231_v54 = vld [vmem:[%s13217_s24 + $0x180] sm:$0xff] }
0x1319   : > { %v8954_v48 = vsel %vm781_vm1, %v15738_v18, 0.0  ;;  %12757 = vrcp.f32 %v15544_v6 }
0x131a   : > { %v15740_v11 = vpop.eup %12737  ;;  %8955 = vadd.xlane.f32.xlu1 %v8954_v48  ;;  %12759 = vrcp.f32 %v15686_v34 }
0x131b   : > { %v8951_v57 = vsel %vm781_vm1, %v15740_v11, 0.0  ;;  %12761 = vrcp.f32 %v15684_v1  ;;  %v10291_v1 = vld [vmem:[%s13075_s29 + $0x1e0] sm:$0xff] }
0x131c   : > { %v15747_v52 = vpop.eup %12739  ;;  %8952 = vadd.xlane.f32.xlu0 %v8951_v57  ;;  %12763 = vrcp.f32 %v15690_v24 }
0x131d   : > { %v8960_v5 = vsel %vm781_vm1, %v15747_v52, 0.0  ;;  %12765 = vrcp.f32 %v15688_v21 }
0x131e   : > { %v15749_v50 = vpop.eup %12741  ;;  %8961 = vadd.xlane.f32.xlu1 %v8960_v5  ;;  %12767 = vrcp.f32 %v15694_v16  ;;  %v10289_v16 = vld [vmem:[%s13075_s29 + $0x1d0] sm:$0xff] }
0x131f   : > { %v8957_v2 = vsel %vm781_vm1, %v15749_v50, 0.0  ;;  %12769 = vrcp.f32 %v15692_v56 }
0x1320   : > { %8958 = vadd.xlane.f32.xlu0 %v8957_v2  ;;  %12771 = vrcp.f32 %v15698_v63  ;;  %v10287_v63 = vld [vmem:[%s13075_s29 + $0x1c0] sm:$0xff] }
0x1321   : > { %12773 = vrcp.f32 %v15696_v42 }
0x138f   : > { %v11924_v31 = vpop.f32.mrf.mxu1 }
0x1390   : > { %v15756_v22 = vadd.f32 %v11924_v31, %v16229_v23 }
0x1391   : > { %v7026_v15 = vpop.f32.mrf.mxu1 }
0x1392   : > { %v15759_v17 = vadd.f32 %v7026_v15, %v15462_v20 }
0x1393   : > { %v11927_v29 = vpop.f32.mrf.mxu1 }
0x1394   : > { %v15762_v37 = vadd.f32 %v11927_v29, %v15468_v33  ;;  %v10232_v29 = vld [vmem:[%s13217_s24 + $0x188] sm:$0xff] }
0x1395   : > { %v7036_v47 = vpop.f32.mrf.mxu1 }
0x1396   : > { %v15765_v60 = vadd.f32 %v7036_v47, %v15471_v45 }
0x1397   : > { %v11930_v55 = vpop.f32.mrf.mxu1 }
0x1398   : > { %v15768_v48 = vadd.f32 %v11930_v55, %v15477_v13  ;;  %v16230_v55 = vld [vmem:[#allocation47_spill] sm:$0xff] }
0x1399   : > { %v7046_v57 = vpop.f32.mrf.mxu1 }
0x139a   : > { %v15771_v5 = vadd.f32 %v7046_v57, %v15480_v3  ;;  %v10237_v3 = vld [vmem:[%s13217_s24 + $0x1b0] sm:$0xff] }
0x139b   : > { %v11933_v20 = vpop.f32.mrf.mxu1 }
0x139c   : > { %v15774_v2 = vadd.f32 %v11933_v20, %v15484_v8  ;;  %v10236_v8 = vld [vmem:[%s13217_s24 + $0x1a8] sm:$0xff] }
0x139d   : > { %v7056_v33 = vpop.f32.mrf.mxu1 }
0x139e   : > { %v15778_v31 = vadd.f32 %v7056_v33, %v15487_v41  ;;  %v16231_v33 = vld [vmem:[#allocation46_spill] sm:$0xff] }
0x139f   : > { %v11980_v45 = vpop.f32.mrf.mxu1 }
0x13a1   : > { %v7441_v13 = vpop.f32.mrf.mxu1 }
0x13a2   : > { %11994 = vmatprep.mubr.msk.f32.mxu1 %vm619_vm0, %v7441_v13  ;;  %v16232_v13 = vld [vmem:[#allocation49_spill] sm:$0xff] }
0x13a3   : > { %v11983_v23 = vpop.f32.mrf.mxu1  ;;  %11995 = vmatmul.mubr.msk.f32.vlgmr.msra.gmra.mxu1 %vm619_vm0, %v11980_v45 }
0x13a4   : > { %12035 = vmatpush3.msra.mxu1 %v10238_v59  ;;  %v12744_v59 = vpop.eup %12743 }
0x13a5   : > { %12036 = vmatprep.subr.mxu1 %v10237_v3  ;;  %v7451_v41 = vpop.f32.mrf.mxu1  ;;  %v12746_v47 = vpop.eup %12745  ;;  %v7878_v57 = vmul.f32 %v12744_v59, %v16230_v55  ;;  %v16239_v55 = vld [vmem:[#allocation9_spill] sm:$0xff] }
0x13a6   : > { %12037 = vmatpush3.msra.mxu1 %v10237_v3  ;;  %11997 = vmatprep.mubr.msk.f32.mxu1 %vm619_vm0, %v7451_v41  ;;  %v12748_v20 = vpop.eup %12747  ;;  %v7880_v45 = vmul.f32 %v12746_v47, %v16231_v33 }
0x13a7   : > { %12038 = vmatprep.subr.mxu1 %v10236_v8  ;;  %v11986_v62 = vpop.f32.mrf.mxu1  ;;  %11998 = vmatmul.mubr.msk.f32.gmra.mxu1 %vm619_vm0, %v11983_v23  ;;  %v12750_v6 = vpop.eup %12749  ;;  %v7882_v3 = vmul.f32 %v12748_v20, %v16232_v13  ;;  %v16240_v20 = vld [vmem:[#allocation19_spill] sm:$0xff] }
0x13a8   : > { %12039 = vmatpush3.msra.mxu1 %v10236_v8  ;;  %v12752_v23 = vpop.eup %12751  ;;  %v16233_v8 = vld [vmem:[#allocation48_spill] sm:$0xff] }
0x13a9   : > { %12040 = vmatprep.subr.mxu1 %v10235_v7  ;;  %v7461_v25 = vpop.f32.mrf.mxu1  ;;  %v7884_v41 = vmul.f32 %v12750_v6, %v16233_v8  ;;  %v16242_v6 = vld [vmem:[#allocation10_spill] sm:$0xff]  ;;  %v16244_v8 = vld [vmem:[#allocation20_spill] sm:$0xff] }
0x13aa   : > { %12041 = vmatpush3.msra.mxu1 %v10235_v7  ;;  %12000 = vmatprep.mubr.msk.f32.mxu1 %vm619_vm0, %v7461_v25  ;;  %v12754_v7 = vpop.eup %12753 }
0x13ab   : > { %12042 = vmatprep.subr.mxu1 %v10234_v44  ;;  %v11989_v15 = vpop.f32.mrf.mxu1  ;;  %12001 = vmatmul.mubr.msk.f32.gmra.mxu1 %vm619_vm0, %v11986_v62  ;;  %v16234_v62 = vld [vmem:[#allocation51_spill] sm:$0xff]  ;;  %v12756_v25 = vpop.eup %12755 }
0x13ac   : > { %12043 = vmatpush3.msra.mxu1 %v10234_v44  ;;  %v7886_v44 = vmul.f32 %v12752_v23, %v16234_v62 }
0x13ad   : > { %12044 = vmatprep.subr.mxu1 %v10233_v36  ;;  %v7471_v10 = vpop.f32.mrf.mxu1 }
0x13ae   : > { %12045 = vmatpush3.msra.mxu1 %v10233_v36  ;;  %12003 = vmatprep.mubr.msk.f32.mxu1 %vm619_vm0, %v7471_v10  ;;  %v16235_v36 = vld [vmem:[#allocation50_spill] sm:$0xff]  ;;  %v16237_v10 = vld [vmem:[#allocation52_spill] sm:$0xff] }
0x13af   : > { %12046 = vmatprep.subr.mxu1 %v10232_v29  ;;  %12004 = vmatmul.mubr.msk.f32.gmra.mxu1 %vm619_vm0, %v11989_v15  ;;  %v7888_v59 = vmul.f32 %v12754_v7, %v16235_v36  ;;  %v12758_v15 = vpop.eup %12757  ;;  %v16245_v7 = vld [vmem:[#allocation41_spill] sm:$0xff]  ;;  %v16247_v36 = vld [vmem:[#allocation11_spill] sm:$0xff] }
0x13b0   : > { %12047 = vmatpush3.msra.mxu1 %v10232_v29  ;;  %12050 = vmatprep.mubr.msk.f32.mxu1 %vm781_vm1, %v7878_v57  ;;  %v16236_v29 = vld [vmem:[#allocation53_spill] sm:$0xff]  ;;  %v7892_v47 = vmul.f32 %v12758_v15, %v16237_v10  ;;  %v16248_v15 = vld [vmem:[#allocation27_spill] sm:$0xff] }
0x13b1   : > { %12048 = vmatprep.subr.mxu1 %v10231_v54 }
0x13b2   : > { %12049 = vmatpush3.msra.mxu1 %v10231_v54  ;;  %v10294_v54 = vld [vmem:[%s13075_s29 + $0x1f8] sm:$0xff] }
0x13b3   : > { %12051 = vmatmul.mubr.msk.f32.vlgmr.msra.gmra.mxu1 %vm781_vm1, %v7880_v45  ;;  %12062 = vmatprep.subr.mxu1 %v15709_v58  ;;  %v16241_v45 = vld [vmem:[#allocation6_spill] sm:$0xff] }
0x13b4   : > { %12053 = vmatprep.mubr.msk.f32.mxu1 %vm781_vm1, %v7882_v3  ;;  %12063 = vmatpush3.msra.mxu1 %v15709_v58  ;;  %v7890_v58 = vmul.f32 %v12756_v25, %v16236_v29  ;;  %v2038_v13 = vadd.f32 %v16242_v6, %v16241_v45  ;;  %v16243_v3 = vld [vmem:[#allocation26_spill] sm:$0xff]  ;;  %v16246_v25 = vld [vmem:[#allocation7_spill] sm:$0xff]  ;;  %v16251_v6 = vld [vmem:[#allocation8_spill] sm:$0xff] }
0x13b5   : > { %12064 = vmatprep.subr.mxu1 %v15724_v40 }
0x13b6   : > { %12065 = vmatpush3.msra.mxu1 %v15724_v40  ;;  %v16238_v40 = vld [vmem:[#allocation5_spill] sm:$0xff] }
0x13b7   : > { %12054 = vmatmul.mubr.msk.f32.gmra.mxu1 %vm781_vm1, %v7884_v41  ;;  %12106 = vmatprep.subr.mxu1 %v10294_v54  ;;  %v2028_v57 = vadd.f32 %v16239_v55, %v16238_v40  ;;  %v3267_v41 = vadd.f32 %v16244_v8, %v2038_v13  ;;  %v16249_v40 = vld [vmem:[#allocation21_spill] sm:$0xff]  ;;  %v16252_v13 = vld [vmem:[#allocation12_spill] sm:$0xff] }
0x13b8   : > { %12056 = vmatprep.mubr.msk.f32.mxu1 %vm781_vm1, %v7886_v44 }
0x13b9   : > { %v3265_v33 = vadd.f32 %v16240_v20, %v2028_v57  ;;  %v4353_v29 = vadd.f32 %v16248_v15, %v3267_v41  ;;  %v16250_v57 = vld [vmem:[#allocation43_spill] sm:$0xff]  ;;  %v16256_v15 = vld [vmem:[#allocation29_spill] sm:$0xff] }
0x13bb   : > { %12057 = vmatmul.mubr.msk.f32.gmra.mxu1 %vm781_vm1, %v7888_v59  ;;  %v4351_v23 = vadd.f32 %v16243_v3, %v3265_v33  ;;  %v2048_v59 = vadd.f32 %v16247_v36, %v16246_v25  ;;  %v5439_v20 = vadd.f32 %v16250_v57, %v4353_v29  ;;  %v2058_v3 = vadd.f32 %v16252_v13, %v16251_v6 }
0x13bc   : > { %12059 = vmatprep.mubr.msk.f32.mxu1 %vm781_vm1, %v7890_v58 }
0x13bd   : > { %v5437_v62 = vadd.f32 %v16245_v7, %v4351_v23  ;;  %v3269_v55 = vadd.f32 %v16249_v40, %v2048_v59  ;;  %v16253_v23 = vld [vmem:[#allocation28_spill] sm:$0xff]  ;;  %v6525_v41 = vadd.f32 %v15632_v27, %v5439_v20  ;;  %v16254_v7 = vld [vmem:[#allocation22_spill] sm:$0xff]  ;;  %v16257_v40 = vld [vmem:[#allocation45_spill] sm:$0xff] }
0x13bf   : > { %12060 = vmatmul.mubr.msk.f32.gmra.mxu1 %vm781_vm1, %v7892_v47  ;;  %v6523_v58 = vadd.f32 %v15627_v43, %v5437_v62  ;;  %v4355_v8 = vadd.f32 %v16253_v23, %v3269_v55  ;;  %v3271_v62 = vadd.f32 %v16254_v7, %v2058_v3  ;;  %v10293_v3 = vld [vmem:[%s13075_s29 + $0x1f0] sm:$0xff]  ;;  %v10290_v23 = vld [vmem:[%s13075_s29 + $0x1d8] sm:$0xff] }
0x13c1   : > { %v4357_v29 = vadd.f32 %v16256_v15, %v3271_v62 }
0x1463   : > { %v11996_v44 = vpop.f32.mrf.mxu1 }
0x1464   : > { %v15836_v10 = vadd.f32 %v11996_v44, %v15625_v49  ;;  %v16255_v44 = vld [vmem:[#allocation44_spill] sm:$0xff] }
0x1465   : > { %v7570_v47 = vpop.f32.mrf.mxu1  ;;  %v5441_v25 = vadd.f32 %v16255_v44, %v4355_v8 }
0x1466   : > { %v15840_v33 = vadd.f32 %v7570_v47, %v6523_v58 }
0x1467   : > { %v11999_v45 = vpop.f32.mrf.mxu1  ;;  %v6527_v58 = vadd.f32 %v15637_v32, %v5441_v25 }
0x1468   : > { %v15847_v43 = vadd.f32 %v11999_v45, %v15630_v38  ;;  %v5443_v38 = vadd.f32 %v16257_v40, %v4357_v29 }
0x1469   : > { %v7580_v49 = vpop.f32.mrf.mxu1 }
0x146a   : > { %v15851_v36 = vadd.f32 %v7580_v49, %v6525_v41  ;;  %v6529_v20 = vadd.f32 %v15642_v53, %v5443_v38  ;;  %v10288_v41 = vld [vmem:[%s13075_s29 + $0x1c8] sm:$0xff] }
0x146b   : > { %v12002_v59 = vpop.f32.mrf.mxu1 }
0x146c   : > { %v15856_v47 = vadd.f32 %v12002_v59, %v15635_v46 }
0x146d   : > { %v7590_v27 = vpop.f32.mrf.mxu1 }
0x146e   : > { %v15859_v55 = vadd.f32 %v7590_v27, %v6527_v58 }
0x146f   : > { %v12005_v57 = vpop.f32.mrf.mxu1 }
0x1470   : > { %v15863_v45 = vadd.f32 %v12005_v57, %v15640_v35  ;;  %v10292_v35 = vld [vmem:[%s13075_s29 + $0x1e8] sm:$0xff] }
0x1471   : > { %v7600_v6 = vpop.f32.mrf.mxu1 }
0x1472   : > { %v15866_v32 = vadd.f32 %v7600_v6, %v6529_v20 }
0x1473   : > { %v12052_v13 = vpop.f32.mrf.mxu1 }
0x1475   : > { %v7983_v46 = vpop.f32.mrf.mxu1 }
0x1476   : > { %12066 = vmatprep.mubr.msk.f32.mxu1 %vm619_vm0, %v7983_v46 }
0x1477   : > { %v12055_v53 = vpop.f32.mrf.mxu1  ;;  %12067 = vmatmul.mubr.msk.f32.vlgmr.msra.gmra.mxu1 %vm619_vm0, %v12052_v13  ;;  %v8941_v13 = vpop.xlane.xlu0 %8940 }
0x1478   : > { %12107 = vmatpush3.msra.mxu1 %v10294_v54  ;;  %v12760_v54 = vpop.eup %12759  ;;  %12775 = vrcp.f32 %v8941_v13 }
0x1479   : > { %12108 = vmatprep.subr.mxu1 %v10293_v3  ;;  %v7993_v34 = vpop.f32.mrf.mxu1  ;;  %v12762_v49 = vpop.eup %12761  ;;  %v8422_v7 = vmul.f32 %v12760_v54, %v15564_v9 }
0x147a   : > { %12109 = vmatpush3.msra.mxu1 %v10293_v3  ;;  %12069 = vmatprep.mubr.msk.f32.mxu1 %vm619_vm0, %v7993_v34  ;;  %v12764_v62 = vpop.eup %12763  ;;  %v8424_v44 = vmul.f32 %v12762_v49, %v15560_v28 }
0x147b   : > { %12110 = vmatprep.subr.mxu1 %v10292_v35  ;;  %v12058_v24 = vpop.f32.mrf.mxu1  ;;  %12070 = vmatmul.mubr.msk.f32.gmra.mxu1 %vm619_vm0, %v12055_v53  ;;  %v12766_v42 = vpop.eup %12765  ;;  %v8426_v25 = vmul.f32 %v12764_v62, %v15572_v12 }
0x147c   : > { %12111 = vmatpush3.msra.mxu1 %v10292_v35  ;;  %v12768_v59 = vpop.eup %12767  ;;  %v8428_v9 = vmul.f32 %v12766_v42, %v15568_v0  ;;  %v8944_v35 = vpop.xlane.xlu1 %8943  ;;  %v10345_v42 = vld [vmem:[%s13217_s24 + $0x1d0] sm:$0xff] }
0x147d   : > { %12112 = vmatprep.subr.mxu1 %v10291_v1  ;;  %v8003_v21 = vpop.f32.mrf.mxu1  ;;  %v12770_v15 = vpop.eup %12769  ;;  %v8430_v29 = vmul.f32 %v12768_v59, %v15580_v4  ;;  %v15909_v4 = vld [vmem:[%s16135_s8 + $0x78] sm:$0xff]  ;;  %12777 = vrcp.f32 %v8944_v35 }
0x147e   : > { %12113 = vmatpush3.msra.mxu1 %v10291_v1  ;;  %12072 = vmatprep.mubr.msk.f32.mxu1 %vm619_vm0, %v8003_v21  ;;  %v12772_v58 = vpop.eup %12771  ;;  %v8432_v28 = vmul.f32 %v12770_v15, %v15576_v19  ;;  %v15916_v19 = vld [vmem:[%s16135_s8 + $0x70] sm:$0xff] }
0x147f   : > { %12114 = vmatprep.subr.mxu1 %v10290_v23  ;;  %v12061_v8 = vpop.f32.mrf.mxu1  ;;  %12073 = vmatmul.mubr.msk.f32.gmra.mxu1 %vm619_vm0, %v12058_v24  ;;  %v12774_v27 = vpop.eup %12773  ;;  %v8434_v12 = vmul.f32 %v12772_v58, %v15588_v61  ;;  %v10343_v58 = vld [vmem:[%s13217_s24 + $0x1c0] sm:$0xff] }
0x1480   : > { %12115 = vmatpush3.msra.mxu1 %v10290_v23  ;;  %v8436_v0 = vmul.f32 %v12774_v27, %v15584_v30  ;;  %v10350_v30 = vld [vmem:[%s13217_s24 + $0x1f8] sm:$0xff] }
0x1481   : > { %12116 = vmatprep.subr.mxu1 %v10289_v16  ;;  %v8013_v56 = vpop.f32.mrf.mxu1 }
0x1482   : > { %12117 = vmatpush3.msra.mxu1 %v10289_v16  ;;  %12075 = vmatprep.mubr.msk.f32.mxu1 %vm619_vm0, %v8013_v56  ;;  %v10347_v56 = vld [vmem:[%s13217_s24 + $0x1e0] sm:$0xff] }
0x1483   : > { %12118 = vmatprep.subr.mxu1 %v10288_v41  ;;  %12076 = vmatmul.mubr.msk.f32.gmra.mxu1 %vm619_vm0, %v12061_v8 }
0x1484   : > { %12119 = vmatpush3.msra.mxu1 %v10288_v41  ;;  %12122 = vmatprep.mubr.msk.f32.mxu1 %vm781_vm1, %v8422_v7  ;;  %v10348_v41 = vld [vmem:[%s13217_s24 + $0x1e8] sm:$0xff]  ;;  %v10346_v7 = vld [vmem:[%s13217_s24 + $0x1d8] sm:$0xff] }
0x1485   : > { %12120 = vmatprep.subr.mxu1 %v10287_v63 }
0x1486   : > { %12121 = vmatpush3.msra.mxu1 %v10287_v63 }
0x1487   : > { %12123 = vmatmul.mubr.msk.f32.vlgmr.msra.gmra.mxu1 %vm781_vm1, %v8424_v44  ;;  %12134 = vmatprep.subr.mxu1 %v15909_v4 }
0x1488   : > { %12125 = vmatprep.mubr.msk.f32.mxu1 %vm781_vm1, %v8426_v25  ;;  %12135 = vmatpush3.msra.mxu1 %v15909_v4  ;;  %v12776_v25 = vpop.eup %12775 }
0x1489   : > { %12136 = vmatprep.subr.mxu1 %v15916_v19 }
0x148a   : > { %12137 = vmatpush3.msra.mxu1 %v15916_v19 }
0x148b   : > { %12126 = vmatmul.mubr.msk.f32.gmra.mxu1 %vm781_vm1, %v8428_v9  ;;  %12178 = vmatprep.subr.mxu1 %v10350_v30  ;;  %v10344_v9 = vld [vmem:[%s13217_s24 + $0x1c8] sm:$0xff] }
0x148c   : > { %12128 = vmatprep.mubr.msk.f32.mxu1 %vm781_vm1, %v8430_v29  ;;  %v12778_v29 = vpop.eup %12777 }
0x148f   : > { %12129 = vmatmul.mubr.msk.f32.gmra.mxu1 %vm781_vm1, %v8432_v28  ;;  %v8964_v28 = vmul.f32 %v12776_v25, %v15717_v39 }
0x1490   : > { %12131 = vmatprep.mubr.msk.f32.mxu1 %vm781_vm1, %v8434_v12  ;;  %v8966_v12 = vmul.f32 %v12778_v29, %v15715_v14 }
0x1493   : > { %12132 = vmatmul.mubr.msk.f32.gmra.mxu1 %vm781_vm1, %v8436_v0 }
0x1537   : > { %v12068_v61 = vpop.f32.mrf.mxu1 }
0x1538   : > { %v15922_v40 = vadd.f32 %v12068_v61, %v15756_v22 }
0x1539   : > { %v8112_v38 = vpop.f32.mrf.mxu1 }
0x153a   : > { %v15925_v57 = vadd.f32 %v8112_v38, %v15759_v17  ;;  %v8947_v17 = vpop.xlane.xlu0 %8946 }
0x153b   : > { %v12071_v20 = vpop.f32.mrf.mxu1  ;;  %12779 = vrcp.f32 %v8947_v17 }
0x153c   : > { %v15928_v6 = vadd.f32 %v12071_v20, %v15762_v37 }
0x153d   : > { %v8122_v46 = vpop.f32.mrf.mxu1 }
0x153e   : > { %v15931_v3 = vadd.f32 %v8122_v46, %v15765_v60  ;;  %v8950_v60 = vpop.xlane.xlu1 %8949 }
0x153f   : > { %v12074_v53 = vpop.f32.mrf.mxu1  ;;  %12781 = vrcp.f32 %v8950_v60 }
0x1540   : > { %v15934_v34 = vadd.f32 %v12074_v53, %v15768_v48  ;;  %v8953_v48 = vpop.xlane.xlu0 %8952 }
0x1541   : > { %v8132_v22 = vpop.f32.mrf.mxu1  ;;  %12783 = vrcp.f32 %v8953_v48 }
0x1542   : > { %v15937_v1 = vadd.f32 %v8132_v22, %v15771_v5  ;;  %v10349_v5 = vld [vmem:[%s13217_s24 + $0x1f0] sm:$0xff]  ;;  %s16044_s24 = scalar_lea.vmem [#allocation2], %s9518_s0 }
0x1543   : > { %v12077_v24 = vpop.f32.mrf.mxu1  ;;  %s9332_s19 = sshll.u32 %s16044_s24, 4  ;;  %s16076_s19 = int_to_ptr.vmem [resolvable:$true] %s9332_s19 }
0x1544   : > { %v15940_v37 = vadd.f32 %v12077_v24, %v15774_v2  ;;  %v8956_v2 = vpop.xlane.xlu1 %8955  ;;  %v8959_v49 = vpop.xlane.xlu0 %8958  ;;  %s12791_s29 = scalar_lea.vmem %s16076_s19, 1024 }
0x1545   : > { %v8142_v23 = vpop.f32.mrf.mxu1  ;;  %12785 = vrcp.f32 %v8956_v2  ;;  %p12792_p12 = scmp.ne.s32.totalorder %s16076_s19, %s12791_s29 }
0x1546   : > { %v15943_v21 = vadd.f32 %v8142_v23, %v15778_v31  ;;  %12787 = vrcp.f32 %v8959_v49 }
0x1547   : > { %v12124_v16 = vpop.f32.mrf.mxu1  ;;  %p12793_p13 = pnand %p12792_p12, %p12967_p4 }
0x1548   : > { %v8962_v44 = vpop.xlane.xlu1 %8961  ;;  %v12780_v27 = vpop.eup %12779 }
0x1549   : > { %v8527_v54 = vpop.f32.mrf.mxu1  ;;  %12789 = vrcp.f32 %v8962_v44  ;;  %p12794_p0 = pneg %p12793_p13 }
0x154a   : > { %12138 = vmatprep.mubr.msk.f32.mxu1 %vm619_vm0, %v8527_v54 }
0x154b   : > { %v12127_v8 = vpop.f32.mrf.mxu1  ;;  %12139 = vmatmul.mubr.msk.f32.vlgmr.msra.gmra.mxu1 %vm619_vm0, %v12124_v16 }
0x154c   : > { %12179 = vmatpush3.msra.mxu1 %v10350_v30  ;;  %v12782_v0 = vpop.eup %12781  ;;  %v8968_v30 = vmul.f32 %v12780_v27, %v15732_v51 }
0x154d   : > { %12180 = vmatprep.subr.mxu1 %v10349_v5  ;;  %v8537_v31 = vpop.f32.mrf.mxu1  ;;  %v8970_v39 = vmul.f32 %v12782_v0, %v15728_v26  ;;  %v585_v0 = vld [vmem:[%s16016_s20] sm:$0xff] }
0x154e   : > { %12181 = vmatpush3.msra.mxu1 %v10349_v5  ;;  %12141 = vmatprep.mubr.msk.f32.mxu1 %vm619_vm0, %v8537_v31  ;;  %v12784_v61 = vpop.eup %12783  ;;  %v16003_v5 = vld [vmem:[%s16136_s9] ss:$0 sm:$0xff] }
0x154f   : > { %12182 = vmatprep.subr.mxu1 %v10348_v41  ;;  %v12130_v63 = vpop.f32.mrf.mxu1  ;;  %12142 = vmatmul.mubr.msk.f32.gmra.mxu1 %vm619_vm0, %v12127_v8  ;;  %v8972_v14 = vmul.f32 %v12784_v61, %v15740_v11  ;;  %v580_v61 = vld [vmem:[%s16010_s22 + $0x18] sm:$0xff] }
0x1550   : > { %12183 = vmatpush3.msra.mxu1 %v10348_v41 }
0x1551   : > { %12184 = vmatprep.subr.mxu1 %v10347_v56  ;;  %v8547_v62 = vpop.f32.mrf.mxu1 }
0x1552   : > { %12185 = vmatpush3.msra.mxu1 %v10347_v56  ;;  %12144 = vmatprep.mubr.msk.f32.mxu1 %vm619_vm0, %v8547_v62  ;;  %v12786_v38 = vpop.eup %12785  ;;  %v578_v62 = vld [vmem:[%s16010_s22 + $0x8] sm:$0xff] }
0x1553   : > { %12186 = vmatprep.subr.mxu1 %v10346_v7  ;;  %v12133_v59 = vpop.f32.mrf.mxu1  ;;  %12145 = vmatmul.mubr.msk.f32.gmra.mxu1 %vm619_vm0, %v12130_v63  ;;  %v12788_v20 = vpop.eup %12787  ;;  %v8974_v51 = vmul.f32 %v12786_v38, %v15738_v18 }
0x1554   : > { %12187 = vmatpush3.msra.mxu1 %v10346_v7  ;;  %v8976_v46 = vmul.f32 %v12788_v20, %v15749_v50 }
0x1555   : > { %12188 = vmatprep.subr.mxu1 %v10345_v42  ;;  %v8557_v15 = vpop.f32.mrf.mxu1 }
0x1556   : > { %12189 = vmatpush3.msra.mxu1 %v10345_v42  ;;  %12147 = vmatprep.mubr.msk.f32.mxu1 %vm619_vm0, %v8557_v15  ;;  %v12790_v13 = vpop.eup %12789  ;;  %v577_v15 = vld [vmem:[%s16010_s22] sm:$0xff] }
0x1557   : > { %12190 = vmatprep.subr.mxu1 %v10344_v9  ;;  %12148 = vmatmul.mubr.msk.f32.gmra.mxu1 %vm619_vm0, %v12133_v59  ;;  %v8978_v26 = vmul.f32 %v12790_v13, %v15747_v52  ;;  %v586_v59 = vld [vmem:[%s16016_s20 + $0x8] sm:$0xff] }
0x1558   : > { %12191 = vmatpush3.msra.mxu1 %v10344_v9  ;;  %12194 = vmatprep.mubr.msk.f32.mxu1 %vm781_vm1, %v8964_v28 }
0x1559   : > { %12192 = vmatprep.subr.mxu1 %v10343_v58 }
0x155a   : > { %12193 = vmatpush3.msra.mxu1 %v10343_v58 }
0x155b   : > { %12195 = vmatmul.mubr.msk.f32.vlgmr.msra.gmra.mxu1 %vm781_vm1, %v8966_v12  ;;  %12206 = vmatprep.subr.mxu1 %v15909_v4 }
0x155c   : > { %12197 = vmatprep.mubr.msk.f32.mxu1 %vm781_vm1, %v8968_v30  ;;  %12207 = vmatpush3.msra.mxu1 %v15909_v4 }
0x155d   : > { %12208 = vmatprep.subr.mxu1 %v15916_v19 }
0x155e   : > { %12209 = vmatpush3.msra.mxu1 %v15916_v19 }
0x155f   : > { %12198 = vmatmul.mubr.msk.f32.gmra.mxu1 %vm781_vm1, %v8970_v39  ;;  %v579_v39 = vld [vmem:[%s16010_s22 + $0x10] sm:$0xff] }
0x1560   : > { %12200 = vmatprep.mubr.msk.f32.mxu1 %vm781_vm1, %v8972_v14 }
0x1563   : > { %12201 = vmatmul.mubr.msk.f32.gmra.mxu1 %vm781_vm1, %v8974_v51 }
0x1564   : > { %12203 = vmatprep.mubr.msk.f32.mxu1 %vm781_vm1, %v8976_v46 }
0x1567   : > { %12204 = vmatmul.mubr.msk.f32.gmra.mxu1 %vm781_vm1, %v8978_v26 }
0x160b   : > { %v12140_v11 = vpop.f32.mrf.mxu1 }
0x160c   : > { %v8696_v4 = vadd.f32 %v12140_v11, %v15836_v10 }
0x160d   : > { %v8656_v19 = vpop.f32.mrf.mxu1 }
0x160e   : > { %v8695_v53 = vadd.f32 %v8656_v19, %v15840_v33  ;;  %v9253_v8 = vadd.f32 %v16003_v5, %v8696_v4 }
0x160f   : > { %v12143_v35 = vpop.f32.mrf.mxu1 }
0x1610   : > { %v8698_v18 = vadd.f32 %v12143_v35, %v15847_v43  ;;  %v9252_v2 = vadd.f32 %v16003_v5, %v8695_v53  ;;  %v9269_v56 = vadd.f32 1.0, %v9253_v8 }
0x1611   : > { %v8666_v22 = vpop.f32.mrf.mxu1 }
0x1612   : > { %v8697_v50 = vadd.f32 %v8666_v22, %v15851_v36  ;;  %v9255_v49 = vadd.f32 %v16003_v5, %v8698_v18  ;;  %v9268_v25 = vadd.f32 1.0, %v9252_v2  ;;  %v9277_v28 = vmul.f32 %v9269_v56, %v578_v62 }
0x1613   : > { %v12146_v17 = vpop.f32.mrf.mxu1 }
0x1614   : > { %v8700_v24 = vadd.f32 %v12146_v17, %v15856_v47  ;;  %v9254_v63 = vadd.f32 %v16003_v5, %v8697_v50  ;;  %v9271_v27 = vadd.f32 1.0, %v9255_v49  ;;  %v9276_v51 = vmul.f32 %v9268_v25, %v577_v15 }
0x1615   : > { %v8676_v23 = vpop.f32.mrf.mxu1 }
0x1616   : > { %v8699_v52 = vadd.f32 %v8676_v23, %v15859_v55  ;;  %v9270_v12 = vadd.f32 1.0, %v9254_v63  ;;  %v9257_v13 = vadd.f32 %v16003_v5, %v8700_v24  ;;  %v9279_v35 = vmul.f32 %v9271_v27, %v580_v61 }
0x1617   : > { %v12149_v60 = vpop.f32.mrf.mxu1 }
0x1618   : > { %v15987_v16 = vadd.f32 %v12149_v60, %v15863_v45  ;;  %v9256_v46 = vadd.f32 %v16003_v5, %v8699_v52  ;;  %v9278_v18 = vmul.f32 %v9270_v12, %v579_v39 }
0x1619   : > { %v8686_v10 = vpop.f32.mrf.mxu1 }
0x161a   : > { %v15990_v48 = vadd.f32 %v8686_v10, %v15866_v32  ;;  %v9259_v22 = vadd.f32 %v16003_v5, %v15987_v16  ;;  %v9273_v10 = vadd.f32 1.0, %v9257_v13 }
0x161b   : > { %v12196_v33 = vpop.f32.mrf.mxu1 }
0x161c   : > { %v9258_v16 = vadd.f32 %v16003_v5, %v15990_v48  ;;  %v9275_v8 = vadd.f32 1.0, %v9259_v22 }
0x161d   : > { %v9069_v54 = vpop.f32.mrf.mxu1 }
0x161e   : > { %12210 = vmatprep.mubr.msk.f32.mxu1 %vm619_vm0, %v9069_v54  ;;  %v9274_v25 = vadd.f32 1.0, %v9258_v16 }
0x161f   : > { %v12199_v43 = vpop.f32.mrf.mxu1  ;;  %12211 = vmatmul.mubr.msk.f32.vlgmr.msra.gmra.mxu1 %vm619_vm0, %v12196_v33  ;;  %v9272_v33 = vadd.f32 1.0, %v9256_v46 }
0x1621   : > { %v9079_v36 = vpop.f32.mrf.mxu1 }
0x1622   : > { %12213 = vmatprep.mubr.msk.f32.mxu1 %vm619_vm0, %v9079_v36  ;;  %v581_v36 = vld [vmem:[%s16010_s22 + $0x20] sm:$0xff] }
0x1623   : > { %v12202_v47 = vpop.f32.mrf.mxu1  ;;  %12214 = vmatmul.mubr.msk.f32.gmra.mxu1 %vm619_vm0, %v12199_v43  ;;  %v582_v43 = vld [vmem:[%s16010_s22 + $0x28] sm:$0xff]  ;;  %v9280_v62 = vmul.f32 %v9272_v33, %v581_v36 }
0x1625   : > { %v9089_v55 = vpop.f32.mrf.mxu1 }
0x1626   : > { %12216 = vmatprep.mubr.msk.f32.mxu1 %vm619_vm0, %v9089_v55 }
0x1627   : > { %v12205_v45 = vpop.f32.mrf.mxu1  ;;  %12217 = vmatmul.mubr.msk.f32.gmra.mxu1 %vm619_vm0, %v12202_v47 }
0x1629   : > { %v9099_v32 = vpop.f32.mrf.mxu1 }
0x162a   : > { %12219 = vmatprep.mubr.msk.f32.mxu1 %vm619_vm0, %v9099_v32 }
0x162b   : > { %12220 = vmatmul.mubr.msk.f32.gmra.mxu1 %vm619_vm0, %v12205_v45  ;;  %v590_v45 = vld [vmem:[%s16016_s20 + $0x28] sm:$0xff] }
0x16df   : > { %v12212_v41 = vpop.f32.mrf.mxu1 }
0x16e0   : > { %v9238_v31 = vadd.f32 %v12212_v41, %v15922_v40  ;;  %v589_v41 = vld [vmem:[%s16016_s20 + $0x20] sm:$0xff] }
0x16e1   : > { %v9198_v7 = vpop.f32.mrf.mxu1 }
0x16e2   : > { %v9261_v44 = vadd.f32 %v16003_v5, %v9238_v31  ;;  %v9237_v42 = vadd.f32 %v9198_v7, %v15925_v57  ;;  %v9281_v7 = vmul.f32 %v9273_v10, %v582_v43 }
0x16e3   : > { %v12215_v9 = vpop.f32.mrf.mxu1 }
0x16e4   : > { %v9285_v40 = vadd.f32 1.0, %v9261_v44  ;;  %v9260_v29 = vadd.f32 %v16003_v5, %v9237_v42  ;;  %v9240_v58 = vadd.f32 %v12215_v9, %v15928_v6  ;;  %v588_v6 = vld [vmem:[%s16016_s20 + $0x18] sm:$0xff] }
0x16e5   : > { %v9208_v30 = vpop.f32.mrf.mxu1  ;;  %v584_v44 = vld [vmem:[%s16010_s22 + $0x38] sm:$0xff] }
0x16e6   : > { %v9293_v57 = vmul.f32 %v9285_v40, %v586_v59  ;;  %v9284_v38 = vadd.f32 1.0, %v9260_v29  ;;  %v9263_v14 = vadd.f32 %v16003_v5, %v9240_v58  ;;  %v9239_v20 = vadd.f32 %v9208_v30, %v15931_v3  ;;  %v587_v3 = vld [vmem:[%s16016_s20 + $0x10] sm:$0xff]  ;;  %v592_v42 = vld [vmem:[%s16016_s20 + $0x38] sm:$0xff] }
0x16e7   : > { %v12218_v26 = vpop.f32.mrf.mxu1  ;;  %v583_v40 = vld [vmem:[%s16010_s22 + $0x30] sm:$0xff]  ;;  %s16074_s22 = scalar_lea.hbm %s16137_s10, %s10397_s28 }
0x16e8   : > { %v9301_v11 = vadd.f32 %v9293_v57, %v9277_v28  ;;  %v9292_v4 = vmul.f32 %v9284_v38, %v585_v0  ;;  %v9287_v19 = vadd.f32 1.0, %v9263_v14  ;;  %v9262_v53 = vadd.f32 %v16003_v5, %v9239_v20  ;;  %v591_v58 = vld [vmem:[%s16016_s20 + $0x30] sm:$0xff]  ;;  %s12795_s20 = sshll.u32 %s12869_s11, 4  ;;  %s12796_s20 = int_to_ptr.vmem [resolvable:$false] %s12795_s20 }
0x16e9   : > { %v9242_v50 = vadd.f32 %v12218_v26, %v15934_v34  ;;  %v9218_v17 = vpop.f32.mrf.mxu1  ;;  %v9282_v0 = vmul.f32 %v9274_v25, %v583_v40  ;;  %s12797_s0 = scalar_lea.vmem %s12796_s20, 2048  ;;  %p12798_p1 = scmp.lt.s32.totalorder %s16076_s19, %s12796_s20 }
0x16ea   : > { %9309 = vst [vmem:[%s16044_s24 + $0x8] sm:$0xff] %v9301_v11  ;;  %v9300_v24 = vadd.f32 %v9292_v4, %v9276_v51  ;;  %v9295_v23 = vmul.f32 %v9287_v19, %v588_v6  ;;  %v9286_v52 = vadd.f32 1.0, %v9262_v53  ;;  %v9241_v60 = vadd.f32 %v9218_v17, %v15937_v1  ;;  %p12799_p2 = scmp.lt.s32.totalorder %s12797_s0, %s12791_s29 }
0x16eb   : > { %v9265_v34 = vadd.f32 %v16003_v5, %v9242_v50  ;;  %v12221_v54 = vpop.f32.mrf.mxu1 }
0x16ec   : > { %9308 = vst [vmem:[%s16044_s24] sm:$0xff] %v9300_v24  ;;  %v9303_v47 = vadd.f32 %v9295_v23, %v9279_v35  ;;  %v9294_v55 = vmul.f32 %v9286_v52, %v587_v3  ;;  %v9264_v1 = vadd.f32 %v16003_v5, %v9241_v60  ;;  %v9244_v32 = vadd.f32 %v12221_v54, %v15940_v37  ;;  %p12800_p3 = por %p12799_p2, %p12798_p1 }
0x16ed   : > { %v9289_v2 = vadd.f32 1.0, %v9265_v34  ;;  %v9228_v48 = vpop.f32.mrf.mxu1 }
0x16ee   : > { %9311 = vst [vmem:[%s16044_s24 + $0x18] sm:$0xff] %v9303_v47  ;;  %v9302_v31 = vadd.f32 %v9294_v55, %v9278_v18  ;;  %v9288_v56 = vadd.f32 1.0, %v9264_v1  ;;  %v9267_v49 = vadd.f32 %v16003_v5, %v9244_v32  ;;  %v9243_v63 = vadd.f32 %v9228_v48, %v15943_v21  ;;  %p12801_p5 = pnand %p12800_p3, %p12794_p0 }
0x16ef   : > { %v9297_v37 = vmul.f32 %v9289_v2, %v590_v45  ;;  %v9283_v21 = vmul.f32 %v9275_v8, %v584_v44 }
0x16f0   : > { %9310 = vst [vmem:[%s16044_s24 + $0x10] sm:$0xff] %v9302_v31  ;;  %v9296_v59 = vmul.f32 %v9288_v56, %v589_v41  ;;  %v9291_v9 = vadd.f32 1.0, %v9267_v49  ;;  %v9266_v15 = vadd.f32 %v16003_v5, %v9243_v63 }
0x16f1   : > { %v9305_v29 = vadd.f32 %v9297_v37, %v9281_v7 }
0x16f2   : > { %v9304_v28 = vadd.f32 %v9296_v59, %v9280_v62  ;;  %v9299_v27 = vmul.f32 %v9291_v9, %v592_v42  ;;  %v9290_v12 = vadd.f32 1.0, %v9266_v15 }
0x16f3   : > { %9313 = vst [vmem:[%s16044_s24 + $0x28] sm:$0xff] %v9305_v29 }
0x16f4   : > { %9312 = vst [vmem:[%s16044_s24 + $0x20] sm:$0xff] %v9304_v28  ;;  %v9307_v30 = vadd.f32 %v9299_v27, %v9283_v21  ;;  %v9298_v61 = vmul.f32 %v9290_v12, %v591_v58 }
0x16f6   : > { %9315 = vst [vmem:[%s16044_s24 + $0x38] sm:$0xff] %v9307_v30  ;;  %v9306_v5 = vadd.f32 %v9298_v61, %v9282_v0 }
0x16f8   : > { %9314 = vst [vmem:[%s16044_s24 + $0x30] sm:$0xff] %v9306_v5 }
0x16f9   : > { %12804 = shalt.err (!%p12801_p5)
}
0x16fa   : > { %s12805_s27 = scalar_lea.hbm %s16074_s22, 1024  ;;  %s12809_s30 = scalar_lea.hbm %s16137_s10, 2048 }
0x16fb   : > { %p12806_p6 = scmp.ne.s32.totalorder %s16074_s22, %s12805_s27  ;;  %p12810_p10 = scmp.lt.s32.totalorder %s16074_s22, %s16137_s10 }
0x16fc   : > { %p12811_p11 = scmp.lt.s32.totalorder %s12809_s30, %s12805_s27 }
0x16fd   : > { %p12807_p7 = pnand %p12806_p6, %p12967_p4 }
0x16fe   : > { %p12812_p12 = por %p12811_p11, %p12810_p10 }
0x16ff   : > { %p12808_p9 = pneg %p12807_p7 }
0x1701   : > { %p12813_p13 = pnand %p12812_p12, %p12808_p9 }
0x1703   : > { %12816 = shalt.err (!%p12813_p13)
}
0x1704   : > { %s12870_s29 = smov 128   ;;  %s12871_s20 = smov 8  }
0x1705   : > { %12222 = dma.vmem_to_hbm [thread:$0]  (%p12967_p4), %s16076_s19, 1024, %s16074_s22, %s16082_s16, %s12870_s29, %s12870_s29, %s12871_s20  }
0x1706 PF: > { %p12228_p0 = scmp.ge.s32.totalorder %s12867_s18, 2  ;;  %s9347_s0 = sand.u32 1, %s12847_s13  }
0x1707   : > { %s9348_s27 = scalar_lea.sflag [#allocation3], %s9347_s0 }
0x1708   : > { %p12225_p1 = pnand %p12228_p0, %p12974_p8 }
0x170a   : > { %p12226_p2 = pneg %p12225_p1 }
0x170c   : > { %12842 = dma.done.wait (%p12226_p2), %s9348_s27, 1024  }
0x170d   : > { %12844 = vsyncadd (%p12226_p2), %s9348_s27, 4294966272  ;;  %s23_s18 = sadd.s32 1, %s12867_s18   ;;  %s16258_s13 = smov %s12851_s14 }
0x170e   : > { %p20_p3 = scmp.ge.s32.totalorder %s23_s18, 4   ;;  %s16259_s14 = smov %s12855_s15 }
0x170f   : > { %s16260_s15 = smov %s12980_s26  ;;  %s16261_s16 = smov %s12863_s17 }
0x1710   : > { %s16262_s17 = smov %s16264_s21  ;;  %22 = sbr.rel (!%p20_p3) target bundleno = 6 (0x6), region = 158 }
0x1715   :  { %9353 = vsyncpa [#allocation3], 1 }
0x1716   :  { %9355 = vsyncpa [#allocation3 + $0x1], 1 }

</bundles_post_ra>
